<compile_context>
chip_gen: v6e
topology: v6e:2x2x1
jax: 0.10.0
libtpu: 0.0.40
codegen_flags: <defaults>
</compile_context>

<pallas_src>
import functools
import numpy as np
import jax
import jax.numpy as jnp
from jax import lax
from jax.experimental import pallas as pl
from jax.experimental.pallas import tpu as pltpu

LANE = 128


def _round_up(n, m):
    return (n + m - 1) // m * m


# ----------------------------------------------------------------------------
# Kernel A: ConvTranspose2d(k=4, s=2, p=1) + bias.
#   out[2i+py, 2j+px] = sum_{a,b} x_pad[i+py+a, j+px+b] @ w_sub[py, px, a, b]
# The 4 (a,b) taps are stacked along K (K = 4*Cin_p, single matmul per parity).
# Output block layout (1, H, 2, W, 2*Cout_p):
#   o[0, i, py, j, px*Cout_p + c] == up[2i+py, 2j+px, c]
# so a row-major reshape outside the kernel interleaves the parities for free.
# ----------------------------------------------------------------------------
def _upsample_kernel(x_ref, w_ref, b_ref, o_ref, xpad, *, rc):
    H, W, Cin_p = x_ref.shape[1], x_ref.shape[2], x_ref.shape[3]
    Cout_p = b_ref.shape[1]

    # zero-padded input lives only in VMEM scratch (no wrapper-side jnp.pad)
    xpad[...] = jnp.zeros_like(xpad)
    xpad[1:H + 1, 1:W + 1, :] = x_ref[0]
    bias = b_ref[...]                                       # (1, Cout_p) f32

    def chunk(ci, carry):
        r0 = ci * rc
        for py in range(2):
            for px in range(2):
                taps = [
                    xpad[pl.ds(r0 + py + a, rc), px + b:px + b + W, :]
                    for a in range(2) for b in range(2)
                ]
                xs = jnp.concatenate(taps, axis=-1)         # (rc, W, 4*Cin_p) bf16
                y = jnp.dot(xs.reshape(rc * W, 4 * Cin_p), w_ref[py, px],
                            preferred_element_type=jnp.float32)
                y = y + bias
                o_ref[0, pl.ds(r0, rc), py, :,
                      px * Cout_p:(px + 1) * Cout_p] = (
                    y.reshape(rc, W, Cout_p).astype(o_ref.dtype))
        return carry

    lax.fori_loop(0, H // rc, chunk, 0)


# ----------------------------------------------------------------------------
# Kernel B: implicit channel-concat + 3x3 conv (pad=1, no bias) + folded BN + ReLU.
# The concatenated [up ; shortcut] tensor is assembled once in a zero-padded VMEM
# scratch, then the 9 taps are K = 2*Cout_p matmuls accumulated in f32.
# ----------------------------------------------------------------------------
def _conv_bn_relu_kernel(up_ref, sc_ref, w_ref, scale_ref, shift_ref, o_ref,
                         catpad, *, rc):
    H2, W2, Cout_p = o_ref.shape[1], o_ref.shape[2], o_ref.shape[3]
    C2 = catpad.shape[2]                                    # 2 * Cout_p

    catpad[...] = jnp.zeros_like(catpad)
    catpad[1:H2 + 1, 1:W2 + 1, 0:Cout_p] = up_ref[0]
    catpad[1:H2 + 1, 1:W2 + 1, Cout_p:C2] = sc_ref[0]
    scale = scale_ref[...]                                  # (1, Cout_p) f32
    shift = shift_ref[...]                                  # (1, Cout_p) f32

    def chunk(ci, carry):
        r0 = ci * rc
        acc = jnp.zeros((rc * W2, Cout_p), jnp.float32)
        for dy in range(3):
            for dx in range(3):
                win = catpad[pl.ds(r0 + dy, rc), dx:dx + W2, :]
                acc = acc + jnp.dot(win.reshape(rc * W2, C2), w_ref[dy, dx],
                                    preferred_element_type=jnp.float32)
        y = jnp.maximum(acc * scale + shift, 0.0)
        o_ref[0, pl.ds(r0, rc), :, :] = y.reshape(rc, W2, Cout_p).astype(o_ref.dtype)
        return carry

    lax.fori_loop(0, H2 // rc, chunk, 0)


# ----------------------------------------------------------------------------
# Wrapper (NCHW in / NCHW out, PyTorch convention)
# ----------------------------------------------------------------------------
def decoder_block_forward(x_nchw, shortcut_nchw, params):
    wt, bt, wc, gamma, beta, rmean, rvar, eps = params
    B, Cin, H, W = x_nchw.shape
    Cout = wt.shape[1]
    H2, W2 = 2 * H, 2 * W
    Cin_p = _round_up(Cin, LANE)
    Cout_p = _round_up(Cout, LANE)

    # NCHW -> NHWC, lane-pad channels to a multiple of 128, bf16 MXU operands.
    x = jnp.transpose(x_nchw, (0, 2, 3, 1))
    x = jnp.pad(x, ((0, 0), (0, 0), (0, 0), (0, Cin_p - Cin))).astype(jnp.bfloat16)
    sc = jnp.transpose(shortcut_nchw, (0, 2, 3, 1))
    sc = jnp.pad(sc, ((0, 0), (0, 0), (0, 0), (0, Cout_p - Cout))).astype(jnp.bfloat16)

    # transposed-conv weights: parity decomposition + K-fold over the 4 taps
    wt_t = jnp.transpose(wt, (2, 3, 0, 1))                  # (4, 4, Cin, Cout)
    kidx = np.array([[3, 1], [2, 0]])                       # [parity, shift] -> kernel tap
    w_sub = wt_t[kidx[:, None, :, None], kidx[None, :, None, :]]   # (2,2,2,2,Cin,Cout)
    w_sub = jnp.pad(w_sub, ((0, 0),) * 4 + ((0, Cin_p - Cin), (0, Cout_p - Cout)))
    w_up = w_sub.reshape(2, 2, 4 * Cin_p, Cout_p).astype(jnp.bfloat16)
    b_up = jnp.pad(bt, (0, Cout_p - Cout)).reshape(1, Cout_p).astype(jnp.float32)

    # 3x3 conv weights split into [up ; shortcut] input halves, each lane-padded,
    # restacked to match the in-kernel VMEM concat layout (K = 2*Cout_p).
    w3 = jnp.transpose(wc, (2, 3, 1, 0))                    # (3, 3, 2*Cout, Cout)
    pad_io = ((0, 0), (0, 0), (0, Cout_p - Cout), (0, Cout_p - Cout))
    w3 = jnp.concatenate(
        [jnp.pad(w3[:, :, :Cout, :], pad_io), jnp.pad(w3[:, :, Cout:, :], pad_io)],
        axis=2).astype(jnp.bfloat16)                        # (3, 3, 2*Cout_p, Cout_p)

    # folded BatchNorm (eval mode); padded lanes stay exactly zero.
    inv = gamma / jnp.sqrt(rvar + eps)
    scale = jnp.pad(inv, (0, Cout_p - Cout)).reshape(1, Cout_p).astype(jnp.float32)
    shift = jnp.pad(beta - rmean * inv,
                    (0, Cout_p - Cout)).reshape(1, Cout_p).astype(jnp.float32)

    rc_a = 8 if H % 8 == 0 else H
    rc_b = 8 if H2 % 8 == 0 else H2
    cparams = pltpu.CompilerParams(dimension_semantics=("parallel",),
                                   vmem_limit_bytes=64 * 1024 * 1024)

    # ---- stage 1: transposed conv -> parity-factored layout -------------------
    up_folded = pl.pallas_call(
        functools.partial(_upsample_kernel, rc=rc_a),
        out_shape=jax.ShapeDtypeStruct((B, H, 2, W, 2 * Cout_p), jnp.bfloat16),
        grid=(B,),
        in_specs=[
            pl.BlockSpec((1, H, W, Cin_p), lambda b: (b, 0, 0, 0)),
            pl.BlockSpec((2, 2, 4 * Cin_p, Cout_p), lambda b: (0, 0, 0, 0)),
            pl.BlockSpec((1, Cout_p), lambda b: (0, 0)),
        ],
        out_specs=pl.BlockSpec((1, H, 2, W, 2 * Cout_p), lambda b: (b, 0, 0, 0, 0)),
        scratch_shapes=[pltpu.VMEM((H + 2, W + 2, Cin_p), jnp.bfloat16)],
        compiler_params=cparams,
    )(x, w_up, b_up)
    # row-major bitcast: interleaves the 2x2 output parities with no data movement
    up = up_folded.reshape(B, H2, W2, Cout_p)

    # ---- stage 2: (implicit concat) 3x3 conv + folded BN + ReLU ----------------
    out_p = pl.pallas_call(
        functools.partial(_conv_bn_relu_kernel, rc=rc_b),
        out_shape=jax.ShapeDtypeStruct((B, H2, W2, Cout_p), jnp.float32),
        grid=(B,),
        in_specs=[
            pl.BlockSpec((1, H2, W2, Cout_p), lambda b: (b, 0, 0, 0)),
            pl.BlockSpec((1, H2, W2, Cout_p), lambda b: (b, 0, 0, 0)),
            pl.BlockSpec((3, 3, 2 * Cout_p, Cout_p), lambda b: (0, 0, 0, 0)),
            pl.BlockSpec((1, Cout_p), lambda b: (0, 0)),
            pl.BlockSpec((1, Cout_p), lambda b: (0, 0)),
        ],
        out_specs=pl.BlockSpec((1, H2, W2, Cout_p), lambda b: (b, 0, 0, 0)),
        scratch_shapes=[pltpu.VMEM((H2 + 2, W2 + 2, 2 * Cout_p), jnp.bfloat16)],
        compiler_params=cparams,
    )(up, sc, w3, scale, shift)

    out = out_p[:, :, :, :Cout]
    return jnp.transpose(out, (0, 3, 1, 2))                 # back to NCHW


# ----------------------------------------------------------------------------
# Pure-JAX f32 reference (for correctness check)
# ----------------------------------------------------------------------------
def ref_forward(x_nchw, shortcut_nchw, params):
    wt, bt, wc, gamma, beta, rmean, rvar, eps = params
    x = jnp.transpose(x_nchw, (0, 2, 3, 1))
    sc = jnp.transpose(shortcut_nchw, (0, 2, 3, 1))
    # ConvTranspose2d(k=4,s=2,p=1) == lhs-dilated conv with flipped kernel, pad 2
    w_hwio = jnp.transpose(wt, (2, 3, 0, 1))[::-1, ::-1]
    y = lax.conv_general_dilated(
        x, w_hwio, window_strides=(1, 1), padding=[(2, 2), (2, 2)],
        lhs_dilation=(2, 2), dimension_numbers=("NHWC", "HWIO", "NHWC")) + bt
    cat = jnp.concatenate([y, sc], axis=-1)
    w3 = jnp.transpose(wc, (2, 3, 1, 0))
    z = lax.conv_general_dilated(
        cat, w3, window_strides=(1, 1), padding=[(1, 1), (1, 1)],
        dimension_numbers=("NHWC", "HWIO", "NHWC"))
    z = (z - rmean) / jnp.sqrt(rvar + eps) * gamma + beta
    z = jnp.maximum(z, 0.0)
    return jnp.transpose(z, (0, 3, 1, 2))


if __name__ == "__main__":
    key = jax.random.PRNGKey(0)
    B, Cin, Cout, H, W = 2, 4, 8, 8, 8
    ks = jax.random.split(key, 9)

    x = jax.random.normal(ks[0], (B, Cin, H, W), jnp.float32)
    shortcut = jax.random.normal(ks[1], (B, Cout, 2 * H, 2 * W), jnp.float32)

    # ConvTranspose2d weight/bias : (Cin, Cout, 4, 4), (Cout,)
    wt = jax.random.normal(ks[2], (Cin, Cout, 4, 4), jnp.float32) * 0.1
    bt = jax.random.normal(ks[3], (Cout,), jnp.float32) * 0.1
    # bottleneck conv weight : (Cout, 2*Cout, 3, 3)
    wc = jax.random.normal(ks[4], (Cout, 2 * Cout, 3, 3), jnp.float32) * 0.1
    # BatchNorm2d (eval mode) with non-trivial statistics
    gamma = 1.0 + 0.1 * jax.random.normal(ks[5], (Cout,), jnp.float32)
    beta = 0.1 * jax.random.normal(ks[6], (Cout,), jnp.float32)
    rmean = 0.1 * jax.random.normal(ks[7], (Cout,), jnp.float32)
    rvar = 1.0 + 0.5 * jnp.abs(jax.random.normal(ks[8], (Cout,), jnp.float32))
    eps = 1e-5

    params = (wt, bt, wc, gamma, beta, rmean, rvar, eps)

    out = jax.block_until_ready(jax.jit(decoder_block_forward)(x, shortcut, params))
    ref = jax.block_until_ready(ref_forward(x, shortcut, params))

    assert out.shape == (B, Cout, 2 * H, 2 * W), out.shape
    # bf16 MXU operands -> loose tolerance vs the pure-f32 reference
    np.testing.assert_allclose(np.asarray(out), np.asarray(ref), rtol=5e-2, atol=5e-2)
    print("KERNEL_OK")
</pallas_src>

<mosaic_0001>
module attributes {stable_mosaic.version = 11 : i64} {
  func.func @_upsample_kernel(%arg0: i32, %arg1: memref<1x8x8x128xbf16, #tpu.memory_space<vmem>>, %arg2: memref<2x2x512x128xbf16, #tpu.memory_space<vmem>>, %arg3: memref<1x128xf32, #tpu.memory_space<vmem>>, %arg4: memref<1x8x2x8x256xbf16, #tpu.memory_space<vmem>>, %arg5: memref<10x10x128xbf16, #tpu.memory_space<vmem>>) attributes {dimension_semantics = [#tpu.dimension_semantics<parallel>], iteration_bounds = array<i64: 2>, scalar_prefetch = 0 : i64, scratch_operands = 1 : i64, tpu.core_type = #tpu.core_type<tc>, window_params = [{transform_indices = @transform_0, window_bounds = array<i64: 1, 8, 8, 128>}, {pipeline_mode = #tpu.pipeline_mode<synchronous>, transform_indices = @transform_1, window_bounds = array<i64: 2, 2, 512, 128>}, {pipeline_mode = #tpu.pipeline_mode<synchronous>, transform_indices = @transform_2, window_bounds = array<i64: 1, 128>}, {transform_indices = @transform_3, window_bounds = array<i64: 1, 8, 2, 8, 256>}]} {
    %cst = arith.constant 0.000000e+00 : bf16
    %0 = vector.broadcast %cst : bf16 to vector<10x10x128xbf16>
    %c0 = arith.constant 0 : index
    %c0_0 = arith.constant 0 : index
    %c0_1 = arith.constant 0 : index
    %1 = vector.load %arg5[%c0, %c0_0, %c0_1] : memref<10x10x128xbf16, #tpu.memory_space<vmem>>, vector<10x10x128xbf16>
    tpu.vector_store %arg5[%c0, %c0_0, %c0_1], %0 {strides = array<i32>} : memref<10x10x128xbf16, #tpu.memory_space<vmem>>, vector<10x10x128xbf16>,
    %c0_2 = arith.constant 0 : index
    %c0_3 = arith.constant 0 : index
    %c0_4 = arith.constant 0 : index
    %c0_5 = arith.constant 0 : index
    %2 = vector.load %arg1[%c0_2, %c0_3, %c0_4, %c0_5] : memref<1x8x8x128xbf16, #tpu.memory_space<vmem>>, vector<1x8x8x128xbf16>
    %3 = vector.shape_cast %2 : vector<1x8x8x128xbf16> to vector<8x8x128xbf16>
    %c1 = arith.constant 1 : index
    %c1_6 = arith.constant 1 : index
    %c0_7 = arith.constant 0 : index
    %4 = vector.load %arg5[%c1, %c1_6, %c0_7] : memref<10x10x128xbf16, #tpu.memory_space<vmem>>, vector<8x8x128xbf16>
    tpu.vector_store %arg5[%c1, %c1_6, %c0_7], %3 {strides = array<i32>} : memref<10x10x128xbf16, #tpu.memory_space<vmem>>, vector<8x8x128xbf16>,
    %c0_8 = arith.constant 0 : index
    %c0_9 = arith.constant 0 : index
    %5 = vector.load %arg3[%c0_8, %c0_9] : memref<1x128xf32, #tpu.memory_space<vmem>>, vector<1x128xf32>
    %c0_i32 = arith.constant 0 : i32
    %c8_i32 = arith.constant 8 : i32
    %6 = arith.muli %c0_i32, %c8_i32 : i32
    %c0_i32_10 = arith.constant 0 : i32
    %7 = arith.addi %6, %c0_i32_10 : i32
    %c0_i32_11 = arith.constant 0 : i32
    %8 = arith.addi %7, %c0_i32_11 : i32
    %9 = arith.index_cast %8 : i32 to index
    %c0_12 = arith.constant 0 : index
    %c0_13 = arith.constant 0 : index
    %10 = vector.load %arg5[%9, %c0_12, %c0_13] : memref<10x10x128xbf16, #tpu.memory_space<vmem>>, vector<8x8x128xbf16>
    %c0_i32_14 = arith.constant 0 : i32
    %11 = arith.addi %6, %c0_i32_14 : i32
    %c0_i32_15 = arith.constant 0 : i32
    %12 = arith.addi %11, %c0_i32_15 : i32
    %13 = arith.index_cast %12 : i32 to index
    %c1_16 = arith.constant 1 : index
    %c0_17 = arith.constant 0 : index
    %14 = vector.load %arg5[%13, %c1_16, %c0_17] : memref<10x10x128xbf16, #tpu.memory_space<vmem>>, vector<8x8x128xbf16>
    %c0_i32_18 = arith.constant 0 : i32
    %15 = arith.addi %6, %c0_i32_18 : i32
    %c1_i32 = arith.constant 1 : i32
    %16 = arith.addi %15, %c1_i32 : i32
    %17 = arith.index_cast %16 : i32 to index
    %c0_19 = arith.constant 0 : index
    %c0_20 = arith.constant 0 : index
    %18 = vector.load %arg5[%17, %c0_19, %c0_20] : memref<10x10x128xbf16, #tpu.memory_space<vmem>>, vector<8x8x128xbf16>
    %c0_i32_21 = arith.constant 0 : i32
    %19 = arith.addi %6, %c0_i32_21 : i32
    %c1_i32_22 = arith.constant 1 : i32
    %20 = arith.addi %19, %c1_i32_22 : i32
    %21 = arith.index_cast %20 : i32 to index
    %c1_23 = arith.constant 1 : index
    %c0_24 = arith.constant 0 : index
    %22 = vector.load %arg5[%21, %c1_23, %c0_24] : memref<10x10x128xbf16, #tpu.memory_space<vmem>>, vector<8x8x128xbf16>
    %23 = tpu.concatenate %10, %14, %18, %22 in 2 : vector<8x8x128xbf16>, vector<8x8x128xbf16>, vector<8x8x128xbf16>, vector<8x8x128xbf16> -> vector<8x8x512xbf16>
    %24 = vector.shape_cast %23 : vector<8x8x512xbf16> to vector<64x512xbf16>
    %c0_25 = arith.constant 0 : index
    %c0_26 = arith.constant 0 : index
    %c0_27 = arith.constant 0 : index
    %c0_28 = arith.constant 0 : index
    %25 = vector.load %arg2[%c0_25, %c0_26, %c0_27, %c0_28] : memref<2x2x512x128xbf16, #tpu.memory_space<vmem>>, vector<1x1x512x128xbf16>
    %26 = vector.shape_cast %25 : vector<1x1x512x128xbf16> to vector<512x128xbf16>
    %cst_29 = arith.constant dense<0.000000e+00> : vector<64x128xf32>
    %27 = tpu.matmul %24, %26, %cst_29 {dimension_numbers = #tpu.dot_dimension_numbers<[1], [0], [0], [1], [0, 0, 1, 1], [], []>} : vector<64x512xbf16>, vector<512x128xbf16>, vector<64x128xf32> -> vector<64x128xf32>
    %28 = vector.broadcast %5 : vector<1x128xf32> to vector<64x128xf32>
    %29 = arith.addf %27, %28 : vector<64x128xf32>
    %30 = vector.shape_cast %29 : vector<64x128xf32> to vector<8x8x128xf32>
    %31 = arith.truncf %30 : vector<8x8x128xf32> to vector<8x8x128xbf16>
    %c0_30 = arith.constant 0 : index
    %32 = arith.index_cast %6 : i32 to index
    %c0_31 = arith.constant 0 : index
    %c0_32 = arith.constant 0 : index
    %c0_33 = arith.constant 0 : index
    %33 = vector.load %arg4[%c0_30, %32, %c0_31, %c0_32, %c0_33] : memref<1x8x2x8x256xbf16, #tpu.memory_space<vmem>>, vector<1x8x1x8x128xbf16>
    %34 = vector.shape_cast %33 : vector<1x8x1x8x128xbf16> to vector<8x8x128xbf16>
    %35 = vector.shape_cast %31 : vector<8x8x128xbf16> to vector<1x8x1x8x128xbf16>
    tpu.vector_store %arg4[%c0_30, %32, %c0_31, %c0_32, %c0_33], %35 {strides = array<i32>} : memref<1x8x2x8x256xbf16, #tpu.memory_space<vmem>>, vector<1x8x1x8x128xbf16>,
    %c0_i32_34 = arith.constant 0 : i32
    %36 = arith.addi %6, %c0_i32_34 : i32
    %c0_i32_35 = arith.constant 0 : i32
    %37 = arith.addi %36, %c0_i32_35 : i32
    %38 = arith.index_cast %37 : i32 to index
    %c1_36 = arith.constant 1 : index
    %c0_37 = arith.constant 0 : index
    %39 = vector.load %arg5[%38, %c1_36, %c0_37] : memref<10x10x128xbf16, #tpu.memory_space<vmem>>, vector<8x8x128xbf16>
    %c0_i32_38 = arith.constant 0 : i32
    %40 = arith.addi %6, %c0_i32_38 : i32
    %c0_i32_39 = arith.constant 0 : i32
    %41 = arith.addi %40, %c0_i32_39 : i32
    %42 = arith.index_cast %41 : i32 to index
    %c2 = arith.constant 2 : index
    %c0_40 = arith.constant 0 : index
    %43 = vector.load %arg5[%42, %c2, %c0_40] : memref<10x10x128xbf16, #tpu.memory_space<vmem>>, vector<8x8x128xbf16>
    %c0_i32_41 = arith.constant 0 : i32
    %44 = arith.addi %6, %c0_i32_41 : i32
    %c1_i32_42 = arith.constant 1 : i32
    %45 = arith.addi %44, %c1_i32_42 : i32
    %46 = arith.index_cast %45 : i32 to index
    %c1_43 = arith.constant 1 : index
    %c0_44 = arith.constant 0 : index
    %47 = vector.load %arg5[%46, %c1_43, %c0_44] : memref<10x10x128xbf16, #tpu.memory_space<vmem>>, vector<8x8x128xbf16>
    %c0_i32_45 = arith.constant 0 : i32
    %48 = arith.addi %6, %c0_i32_45 : i32
    %c1_i32_46 = arith.constant 1 : i32
    %49 = arith.addi %48, %c1_i32_46 : i32
    %50 = arith.index_cast %49 : i32 to index
    %c2_47 = arith.constant 2 : index
    %c0_48 = arith.constant 0 : index
    %51 = vector.load %arg5[%50, %c2_47, %c0_48] : memref<10x10x128xbf16, #tpu.memory_space<vmem>>, vector<8x8x128xbf16>
    %52 = tpu.concatenate %39, %43, %47, %51 in 2 : vector<8x8x128xbf16>, vector<8x8x128xbf16>, vector<8x8x128xbf16>, vector<8x8x128xbf16> -> vector<8x8x512xbf16>
    %53 = vector.shape_cast %52 : vector<8x8x512xbf16> to vector<64x512xbf16>
    %c0_49 = arith.constant 0 : index
    %c1_50 = arith.constant 1 : index
    %c0_51 = arith.constant 0 : index
    %c0_52 = arith.constant 0 : index
    %54 = vector.load %arg2[%c0_49, %c1_50, %c0_51, %c0_52] : memref<2x2x512x128xbf16, #tpu.memory_space<vmem>>, vector<1x1x512x128xbf16>
    %55 = vector.shape_cast %54 : vector<1x1x512x128xbf16> to vector<512x128xbf16>
    %cst_53 = arith.constant dense<0.000000e+00> : vector<64x128xf32>
    %56 = tpu.matmul %53, %55, %cst_53 {dimension_numbers = #tpu.dot_dimension_numbers<[1], [0], [0], [1], [0, 0, 1, 1], [], []>} : vector<64x512xbf16>, vector<512x128xbf16>, vector<64x128xf32> -> vector<64x128xf32>
    %57 = vector.broadcast %5 : vector<1x128xf32> to vector<64x128xf32>
    %58 = arith.addf %56, %57 : vector<64x128xf32>
    %59 = vector.shape_cast %58 : vector<64x128xf32> to vector<8x8x128xf32>
    %60 = arith.truncf %59 : vector<8x8x128xf32> to vector<8x8x128xbf16>
    %c0_54 = arith.constant 0 : index
    %61 = arith.index_cast %6 : i32 to index
    %c0_55 = arith.constant 0 : index
    %c0_56 = arith.constant 0 : index
    %c128 = arith.constant 128 : index
    %62 = vector.load %arg4[%c0_54, %61, %c0_55, %c0_56, %c128] : memref<1x8x2x8x256xbf16, #tpu.memory_space<vmem>>, vector<1x8x1x8x128xbf16>
    %63 = vector.shape_cast %62 : vector<1x8x1x8x128xbf16> to vector<8x8x128xbf16>
    %64 = vector.shape_cast %60 : vector<8x8x128xbf16> to vector<1x8x1x8x128xbf16>
    tpu.vector_store %arg4[%c0_54, %61, %c0_55, %c0_56, %c128], %64 {strides = array<i32>} : memref<1x8x2x8x256xbf16, #tpu.memory_space<vmem>>, vector<1x8x1x8x128xbf16>,
    %c1_i32_57 = arith.constant 1 : i32
    %65 = arith.addi %6, %c1_i32_57 : i32
    %c0_i32_58 = arith.constant 0 : i32
    %66 = arith.addi %65, %c0_i32_58 : i32
    %67 = arith.index_cast %66 : i32 to index
    %c0_59 = arith.constant 0 : index
    %c0_60 = arith.constant 0 : index
    %68 = vector.load %arg5[%67, %c0_59, %c0_60] : memref<10x10x128xbf16, #tpu.memory_space<vmem>>, vector<8x8x128xbf16>
    %c1_i32_61 = arith.constant 1 : i32
    %69 = arith.addi %6, %c1_i32_61 : i32
    %c0_i32_62 = arith.constant 0 : i32
    %70 = arith.addi %69, %c0_i32_62 : i32
    %71 = arith.index_cast %70 : i32 to index
    %c1_63 = arith.constant 1 : index
    %c0_64 = arith.constant 0 : index
    %72 = vector.load %arg5[%71, %c1_63, %c0_64] : memref<10x10x128xbf16, #tpu.memory_space<vmem>>, vector<8x8x128xbf16>
    %c1_i32_65 = arith.constant 1 : i32
    %73 = arith.addi %6, %c1_i32_65 : i32
    %c1_i32_66 = arith.constant 1 : i32
    %74 = arith.addi %73, %c1_i32_66 : i32
    %75 = arith.index_cast %74 : i32 to index
    %c0_67 = arith.constant 0 : index
    %c0_68 = arith.constant 0 : index
    %76 = vector.load %arg5[%75, %c0_67, %c0_68] : memref<10x10x128xbf16, #tpu.memory_space<vmem>>, vector<8x8x128xbf16>
    %c1_i32_69 = arith.constant 1 : i32
    %77 = arith.addi %6, %c1_i32_69 : i32
    %c1_i32_70 = arith.constant 1 : i32
    %78 = arith.addi %77, %c1_i32_70 : i32
    %79 = arith.index_cast %78 : i32 to index
    %c1_71 = arith.constant 1 : index
    %c0_72 = arith.constant 0 : index
    %80 = vector.load %arg5[%79, %c1_71, %c0_72] : memref<10x10x128xbf16, #tpu.memory_space<vmem>>, vector<8x8x128xbf16>
    %81 = tpu.concatenate %68, %72, %76, %80 in 2 : vector<8x8x128xbf16>, vector<8x8x128xbf16>, vector<8x8x128xbf16>, vector<8x8x128xbf16> -> vector<8x8x512xbf16>
    %82 = vector.shape_cast %81 : vector<8x8x512xbf16> to vector<64x512xbf16>
    %c1_73 = arith.constant 1 : index
    %c0_74 = arith.constant 0 : index
    %c0_75 = arith.constant 0 : index
    %c0_76 = arith.constant 0 : index
    %83 = vector.load %arg2[%c1_73, %c0_74, %c0_75, %c0_76] : memref<2x2x512x128xbf16, #tpu.memory_space<vmem>>, vector<1x1x512x128xbf16>
    %84 = vector.shape_cast %83 : vector<1x1x512x128xbf16> to vector<512x128xbf16>
    %cst_77 = arith.constant dense<0.000000e+00> : vector<64x128xf32>
    %85 = tpu.matmul %82, %84, %cst_77 {dimension_numbers = #tpu.dot_dimension_numbers<[1], [0], [0], [1], [0, 0, 1, 1], [], []>} : vector<64x512xbf16>, vector<512x128xbf16>, vector<64x128xf32> -> vector<64x128xf32>
    %86 = vector.broadcast %5 : vector<1x128xf32> to vector<64x128xf32>
    %87 = arith.addf %85, %86 : vector<64x128xf32>
    %88 = vector.shape_cast %87 : vector<64x128xf32> to vector<8x8x128xf32>
    %89 = arith.truncf %88 : vector<8x8x128xf32> to vector<8x8x128xbf16>
    %c0_78 = arith.constant 0 : index
    %90 = arith.index_cast %6 : i32 to index
    %c1_79 = arith.constant 1 : index
    %c0_80 = arith.constant 0 : index
    %c0_81 = arith.constant 0 : index
    %91 = vector.load %arg4[%c0_78, %90, %c1_79, %c0_80, %c0_81] : memref<1x8x2x8x256xbf16, #tpu.memory_space<vmem>>, vector<1x8x1x8x128xbf16>
    %92 = vector.shape_cast %91 : vector<1x8x1x8x128xbf16> to vector<8x8x128xbf16>
    %93 = vector.shape_cast %89 : vector<8x8x128xbf16> to vector<1x8x1x8x128xbf16>
    tpu.vector_store %arg4[%c0_78, %90, %c1_79, %c0_80, %c0_81], %93 {strides = array<i32>} : memref<1x8x2x8x256xbf16, #tpu.memory_space<vmem>>, vector<1x8x1x8x128xbf16>,
    %c1_i32_82 = arith.constant 1 : i32
    %94 = arith.addi %6, %c1_i32_82 : i32
    %c0_i32_83 = arith.constant 0 : i32
    %95 = arith.addi %94, %c0_i32_83 : i32
    %96 = arith.index_cast %95 : i32 to index
    %c1_84 = arith.constant 1 : index
    %c0_85 = arith.constant 0 : index
    %97 = vector.load %arg5[%96, %c1_84, %c0_85] : memref<10x10x128xbf16, #tpu.memory_space<vmem>>, vector<8x8x128xbf16>
    %c1_i32_86 = arith.constant 1 : i32
    %98 = arith.addi %6, %c1_i32_86 : i32
    %c0_i32_87 = arith.constant 0 : i32
    %99 = arith.addi %98, %c0_i32_87 : i32
    %100 = arith.index_cast %99 : i32 to index
    %c2_88 = arith.constant 2 : index
    %c0_89 = arith.constant 0 : index
    %101 = vector.load %arg5[%100, %c2_88, %c0_89] : memref<10x10x128xbf16, #tpu.memory_space<vmem>>, vector<8x8x128xbf16>
    %c1_i32_90 = arith.constant 1 : i32
    %102 = arith.addi %6, %c1_i32_90 : i32
    %c1_i32_91 = arith.constant 1 : i32
    %103 = arith.addi %102, %c1_i32_91 : i32
    %104 = arith.index_cast %103 : i32 to index
    %c1_92 = arith.constant 1 : index
    %c0_93 = arith.constant 0 : index
    %105 = vector.load %arg5[%104, %c1_92, %c0_93] : memref<10x10x128xbf16, #tpu.memory_space<vmem>>, vector<8x8x128xbf16>
    %c1_i32_94 = arith.constant 1 : i32
    %106 = arith.addi %6, %c1_i32_94 : i32
    %c1_i32_95 = arith.constant 1 : i32
    %107 = arith.addi %106, %c1_i32_95 : i32
    %108 = arith.index_cast %107 : i32 to index
    %c2_96 = arith.constant 2 : index
    %c0_97 = arith.constant 0 : index
    %109 = vector.load %arg5[%108, %c2_96, %c0_97] : memref<10x10x128xbf16, #tpu.memory_space<vmem>>, vector<8x8x128xbf16>
    %110 = tpu.concatenate %97, %101, %105, %109 in 2 : vector<8x8x128xbf16>, vector<8x8x128xbf16>, vector<8x8x128xbf16>, vector<8x8x128xbf16> -> vector<8x8x512xbf16>
    %111 = vector.shape_cast %110 : vector<8x8x512xbf16> to vector<64x512xbf16>
    %c1_98 = arith.constant 1 : index
    %c1_99 = arith.constant 1 : index
    %c0_100 = arith.constant 0 : index
    %c0_101 = arith.constant 0 : index
    %112 = vector.load %arg2[%c1_98, %c1_99, %c0_100, %c0_101] : memref<2x2x512x128xbf16, #tpu.memory_space<vmem>>, vector<1x1x512x128xbf16>
    %113 = vector.shape_cast %112 : vector<1x1x512x128xbf16> to vector<512x128xbf16>
    %cst_102 = arith.constant dense<0.000000e+00> : vector<64x128xf32>
    %114 = tpu.matmul %111, %113, %cst_102 {dimension_numbers = #tpu.dot_dimension_numbers<[1], [0], [0], [1], [0, 0, 1, 1], [], []>} : vector<64x512xbf16>, vector<512x128xbf16>, vector<64x128xf32> -> vector<64x128xf32>
    %115 = vector.broadcast %5 : vector<1x128xf32> to vector<64x128xf32>
    %116 = arith.addf %114, %115 : vector<64x128xf32>
    %117 = vector.shape_cast %116 : vector<64x128xf32> to vector<8x8x128xf32>
    %118 = arith.truncf %117 : vector<8x8x128xf32> to vector<8x8x128xbf16>
    %c0_103 = arith.constant 0 : index
    %119 = arith.index_cast %6 : i32 to index
    %c1_104 = arith.constant 1 : index
    %c0_105 = arith.constant 0 : index
    %c128_106 = arith.constant 128 : index
    %120 = vector.load %arg4[%c0_103, %119, %c1_104, %c0_105, %c128_106] : memref<1x8x2x8x256xbf16, #tpu.memory_space<vmem>>, vector<1x8x1x8x128xbf16>
    %121 = vector.shape_cast %120 : vector<1x8x1x8x128xbf16> to vector<8x8x128xbf16>
    %122 = vector.shape_cast %118 : vector<8x8x128xbf16> to vector<1x8x1x8x128xbf16>
    tpu.vector_store %arg4[%c0_103, %119, %c1_104, %c0_105, %c128_106], %122 {strides = array<i32>} : memref<1x8x2x8x256xbf16, #tpu.memory_space<vmem>>, vector<1x8x1x8x128xbf16>,
    %c1_i32_107 = arith.constant 1 : i32
    return
  }
  func.func @transform_0(%arg0: i32) -> (i32, i32, i32, i32) {
    %c0_i32 = arith.constant 0 : i32
    %c0_i32_0 = arith.constant 0 : i32
    %c0_i32_1 = arith.constant 0 : i32
    %c0_i32_2 = arith.constant 0 : i32
    return %arg0, %c0_i32, %c0_i32_0, %c0_i32_1 : i32, i32, i32, i32
  }
  func.func @transform_1(%arg0: i32) -> (i32, i32, i32, i32) {
    %c0_i32 = arith.constant 0 : i32
    %c0_i32_0 = arith.constant 0 : i32
    %c0_i32_1 = arith.constant 0 : i32
    %c0_i32_2 = arith.constant 0 : i32
    %c0_i32_3 = arith.constant 0 : i32
    return %c0_i32, %c0_i32_0, %c0_i32_1, %c0_i32_2 : i32, i32, i32, i32
  }
  func.func @transform_2(%arg0: i32) -> (i32, i32) {
    %c0_i32 = arith.constant 0 : i32
    %c0_i32_0 = arith.constant 0 : i32
    %c0_i32_1 = arith.constant 0 : i32
    return %c0_i32, %c0_i32_0 : i32, i32
  }
  func.func @transform_3(%arg0: i32) -> (i32, i32, i32, i32, i32) {
    %c0_i32 = arith.constant 0 : i32
    %c0_i32_0 = arith.constant 0 : i32
    %c0_i32_1 = arith.constant 0 : i32
    %c0_i32_2 = arith.constant 0 : i32
    %c0_i32_3 = arith.constant 0 : i32
    return %arg0, %c0_i32, %c0_i32_0, %c0_i32_1, %c0_i32_2 : i32, i32, i32, i32, i32
  }
}

module attributes {stable_mosaic.version = 11 : i64} {
  func.func @_conv_bn_relu_kernel(%arg0: i32, %arg1: memref<1x16x16x128xbf16, #tpu.memory_space<vmem>>, %arg2: memref<1x16x16x128xbf16, #tpu.memory_space<vmem>>, %arg3: memref<3x3x256x128xbf16, #tpu.memory_space<vmem>>, %arg4: memref<1x128xf32, #tpu.memory_space<vmem>>, %arg5: memref<1x128xf32, #tpu.memory_space<vmem>>, %arg6: memref<1x16x16x128xf32, #tpu.memory_space<vmem>>, %arg7: memref<18x18x256xbf16, #tpu.memory_space<vmem>>) attributes {dimension_semantics = [#tpu.dimension_semantics<parallel>], iteration_bounds = array<i64: 2>, scalar_prefetch = 0 : i64, scratch_operands = 1 : i64, tpu.core_type = #tpu.core_type<tc>, window_params = [{transform_indices = @transform_0, window_bounds = array<i64: 1, 16, 16, 128>}, {transform_indices = @transform_1, window_bounds = array<i64: 1, 16, 16, 128>}, {pipeline_mode = #tpu.pipeline_mode<synchronous>, transform_indices = @transform_2, window_bounds = array<i64: 3, 3, 256, 128>}, {pipeline_mode = #tpu.pipeline_mode<synchronous>, transform_indices = @transform_3, window_bounds = array<i64: 1, 128>}, {pipeline_mode = #tpu.pipeline_mode<synchronous>, transform_indices = @transform_4, window_bounds = array<i64: 1, 128>}, {transform_indices = @transform_5, window_bounds = array<i64: 1, 16, 16, 128>}]} {
    %cst = arith.constant 0.000000e+00 : bf16
    %0 = vector.broadcast %cst : bf16 to vector<18x18x256xbf16>
    %c0 = arith.constant 0 : index
    %c0_0 = arith.constant 0 : index
    %c0_1 = arith.constant 0 : index
    %1 = vector.load %arg7[%c0, %c0_0, %c0_1] : memref<18x18x256xbf16, #tpu.memory_space<vmem>>, vector<18x18x256xbf16>
    tpu.vector_store %arg7[%c0, %c0_0, %c0_1], %0 {strides = array<i32>} : memref<18x18x256xbf16, #tpu.memory_space<vmem>>, vector<18x18x256xbf16>,
    %c0_2 = arith.constant 0 : index
    %c0_3 = arith.constant 0 : index
    %c0_4 = arith.constant 0 : index
    %c0_5 = arith.constant 0 : index
    %2 = vector.load %arg1[%c0_2, %c0_3, %c0_4, %c0_5] : memref<1x16x16x128xbf16, #tpu.memory_space<vmem>>, vector<1x16x16x128xbf16>
    %3 = vector.shape_cast %2 : vector<1x16x16x128xbf16> to vector<16x16x128xbf16>
    %c1 = arith.constant 1 : index
    %c1_6 = arith.constant 1 : index
    %c0_7 = arith.constant 0 : index
    %4 = vector.load %arg7[%c1, %c1_6, %c0_7] : memref<18x18x256xbf16, #tpu.memory_space<vmem>>, vector<16x16x128xbf16>
    tpu.vector_store %arg7[%c1, %c1_6, %c0_7], %3 {strides = array<i32>} : memref<18x18x256xbf16, #tpu.memory_space<vmem>>, vector<16x16x128xbf16>,
    %c0_8 = arith.constant 0 : index
    %c0_9 = arith.constant 0 : index
    %c0_10 = arith.constant 0 : index
    %c0_11 = arith.constant 0 : index
    %5 = vector.load %arg2[%c0_8, %c0_9, %c0_10, %c0_11] : memref<1x16x16x128xbf16, #tpu.memory_space<vmem>>, vector<1x16x16x128xbf16>
    %6 = vector.shape_cast %5 : vector<1x16x16x128xbf16> to vector<16x16x128xbf16>
    %c1_12 = arith.constant 1 : index
    %c1_13 = arith.constant 1 : index
    %c128 = arith.constant 128 : index
    %7 = vector.load %arg7[%c1_12, %c1_13, %c128] : memref<18x18x256xbf16, #tpu.memory_space<vmem>>, vector<16x16x128xbf16>
    tpu.vector_store %arg7[%c1_12, %c1_13, %c128], %6 {strides = array<i32>} : memref<18x18x256xbf16, #tpu.memory_space<vmem>>, vector<16x16x128xbf16>,
    %c0_14 = arith.constant 0 : index
    %c0_15 = arith.constant 0 : index
    %8 = vector.load %arg4[%c0_14, %c0_15] : memref<1x128xf32, #tpu.memory_space<vmem>>, vector<1x128xf32>
    %c0_16 = arith.constant 0 : index
    %c0_17 = arith.constant 0 : index
    %9 = vector.load %arg5[%c0_16, %c0_17] : memref<1x128xf32, #tpu.memory_space<vmem>>, vector<1x128xf32>
    %c0_i32 = arith.constant 0 : i32
    %c2_i32 = arith.constant 2 : i32
    %10 = arith.addi %c0_i32, %c2_i32 : i32
    %c1_i32 = arith.constant 1 : i32
    scf.for %arg8 = %c0_i32 to %10 step %c1_i32  : i32 {
      %c8_i32 = arith.constant 8 : i32
      %11 = arith.muli %arg8, %c8_i32 : i32
      %cst_19 = arith.constant 0.000000e+00 : f32
      %12 = vector.broadcast %cst_19 : f32 to vector<128x128xf32>
      %c0_i32_20 = arith.constant 0 : i32
      %13 = arith.addi %11, %c0_i32_20 : i32
      %14 = arith.index_cast %13 : i32 to index
      %c0_21 = arith.constant 0 : index
      %c0_22 = arith.constant 0 : index
      %15 = vector.load %arg7[%14, %c0_21, %c0_22] : memref<18x18x256xbf16, #tpu.memory_space<vmem>>, vector<8x16x256xbf16>
      %16 = vector.shape_cast %15 : vector<8x16x256xbf16> to vector<128x256xbf16>
      %c0_23 = arith.constant 0 : index
      %c0_24 = arith.constant 0 : index
      %c0_25 = arith.constant 0 : index
      %c0_26 = arith.constant 0 : index
      %17 = vector.load %arg3[%c0_23, %c0_24, %c0_25, %c0_26] : memref<3x3x256x128xbf16, #tpu.memory_space<vmem>>, vector<1x1x256x128xbf16>
      %18 = vector.shape_cast %17 : vector<1x1x256x128xbf16> to vector<256x128xbf16>
      %cst_27 = arith.constant dense<0.000000e+00> : vector<128x128xf32>
      %19 = tpu.matmul %16, %18, %cst_27 {dimension_numbers = #tpu.dot_dimension_numbers<[1], [0], [0], [1], [0, 0, 1, 1], [], []>} : vector<128x256xbf16>, vector<256x128xbf16>, vector<128x128xf32> -> vector<128x128xf32>
      %20 = arith.addf %12, %19 : vector<128x128xf32>
      %c0_i32_28 = arith.constant 0 : i32
      %21 = arith.addi %11, %c0_i32_28 : i32
      %22 = arith.index_cast %21 : i32 to index
      %c1_29 = arith.constant 1 : index
      %c0_30 = arith.constant 0 : index
      %23 = vector.load %arg7[%22, %c1_29, %c0_30] : memref<18x18x256xbf16, #tpu.memory_space<vmem>>, vector<8x16x256xbf16>
      %24 = vector.shape_cast %23 : vector<8x16x256xbf16> to vector<128x256xbf16>
      %c0_31 = arith.constant 0 : index
      %c1_32 = arith.constant 1 : index
      %c0_33 = arith.constant 0 : index
      %c0_34 = arith.constant 0 : index
      %25 = vector.load %arg3[%c0_31, %c1_32, %c0_33, %c0_34] : memref<3x3x256x128xbf16, #tpu.memory_space<vmem>>, vector<1x1x256x128xbf16>
      %26 = vector.shape_cast %25 : vector<1x1x256x128xbf16> to vector<256x128xbf16>
      %cst_35 = arith.constant dense<0.000000e+00> : vector<128x128xf32>
      %27 = tpu.matmul %24, %26, %cst_35 {dimension_numbers = #tpu.dot_dimension_numbers<[1], [0], [0], [1], [0, 0, 1, 1], [], []>} : vector<128x256xbf16>, vector<256x128xbf16>, vector<128x128xf32> -> vector<128x128xf32>
      %28 = arith.addf %20, %27 : vector<128x128xf32>
      %c0_i32_36 = arith.constant 0 : i32
      %29 = arith.addi %11, %c0_i32_36 : i32
      %30 = arith.index_cast %29 : i32 to index
      %c2 = arith.constant 2 : index
      %c0_37 = arith.constant 0 : index
      %31 = vector.load %arg7[%30, %c2, %c0_37] : memref<18x18x256xbf16, #tpu.memory_space<vmem>>, vector<8x16x256xbf16>
      %32 = vector.shape_cast %31 : vector<8x16x256xbf16> to vector<128x256xbf16>
      %c0_38 = arith.constant 0 : index
      %c2_39 = arith.constant 2 : index
      %c0_40 = arith.constant 0 : index
      %c0_41 = arith.constant 0 : index
      %33 = vector.load %arg3[%c0_38, %c2_39, %c0_40, %c0_41] : memref<3x3x256x128xbf16, #tpu.memory_space<vmem>>, vector<1x1x256x128xbf16>
      %34 = vector.shape_cast %33 : vector<1x1x256x128xbf16> to vector<256x128xbf16>
      %cst_42 = arith.constant dense<0.000000e+00> : vector<128x128xf32>
      %35 = tpu.matmul %32, %34, %cst_42 {dimension_numbers = #tpu.dot_dimension_numbers<[1], [0], [0], [1], [0, 0, 1, 1], [], []>} : vector<128x256xbf16>, vector<256x128xbf16>, vector<128x128xf32> -> vector<128x128xf32>
      %36 = arith.addf %28, %35 : vector<128x128xf32>
      %c1_i32_43 = arith.constant 1 : i32
      %37 = arith.addi %11, %c1_i32_43 : i32
      %38 = arith.index_cast %37 : i32 to index
      %c0_44 = arith.constant 0 : index
      %c0_45 = arith.constant 0 : index
      %39 = vector.load %arg7[%38, %c0_44, %c0_45] : memref<18x18x256xbf16, #tpu.memory_space<vmem>>, vector<8x16x256xbf16>
      %40 = vector.shape_cast %39 : vector<8x16x256xbf16> to vector<128x256xbf16>
      %c1_46 = arith.constant 1 : index
      %c0_47 = arith.constant 0 : index
      %c0_48 = arith.constant 0 : index
      %c0_49 = arith.constant 0 : index
      %41 = vector.load %arg3[%c1_46, %c0_47, %c0_48, %c0_49] : memref<3x3x256x128xbf16, #tpu.memory_space<vmem>>, vector<1x1x256x128xbf16>
      %42 = vector.shape_cast %41 : vector<1x1x256x128xbf16> to vector<256x128xbf16>
      %cst_50 = arith.constant dense<0.000000e+00> : vector<128x128xf32>
      %43 = tpu.matmul %40, %42, %cst_50 {dimension_numbers = #tpu.dot_dimension_numbers<[1], [0], [0], [1], [0, 0, 1, 1], [], []>} : vector<128x256xbf16>, vector<256x128xbf16>, vector<128x128xf32> -> vector<128x128xf32>
      %44 = arith.addf %36, %43 : vector<128x128xf32>
      %c1_i32_51 = arith.constant 1 : i32
      %45 = arith.addi %11, %c1_i32_51 : i32
      %46 = arith.index_cast %45 : i32 to index
      %c1_52 = arith.constant 1 : index
      %c0_53 = arith.constant 0 : index
      %47 = vector.load %arg7[%46, %c1_52, %c0_53] : memref<18x18x256xbf16, #tpu.memory_space<vmem>>, vector<8x16x256xbf16>
      %48 = vector.shape_cast %47 : vector<8x16x256xbf16> to vector<128x256xbf16>
      %c1_54 = arith.constant 1 : index
      %c1_55 = arith.constant 1 : index
      %c0_56 = arith.constant 0 : index
      %c0_57 = arith.constant 0 : index
      %49 = vector.load %arg3[%c1_54, %c1_55, %c0_56, %c0_57] : memref<3x3x256x128xbf16, #tpu.memory_space<vmem>>, vector<1x1x256x128xbf16>
      %50 = vector.shape_cast %49 : vector<1x1x256x128xbf16> to vector<256x128xbf16>
      %cst_58 = arith.constant dense<0.000000e+00> : vector<128x128xf32>
      %51 = tpu.matmul %48, %50, %cst_58 {dimension_numbers = #tpu.dot_dimension_numbers<[1], [0], [0], [1], [0, 0, 1, 1], [], []>} : vector<128x256xbf16>, vector<256x128xbf16>, vector<128x128xf32> -> vector<128x128xf32>
      %52 = arith.addf %44, %51 : vector<128x128xf32>
      %c1_i32_59 = arith.constant 1 : i32
      %53 = arith.addi %11, %c1_i32_59 : i32
      %54 = arith.index_cast %53 : i32 to index
      %c2_60 = arith.constant 2 : index
      %c0_61 = arith.constant 0 : index
      %55 = vector.load %arg7[%54, %c2_60, %c0_61] : memref<18x18x256xbf16, #tpu.memory_space<vmem>>, vector<8x16x256xbf16>
      %56 = vector.shape_cast %55 : vector<8x16x256xbf16> to vector<128x256xbf16>
      %c1_62 = arith.constant 1 : index
      %c2_63 = arith.constant 2 : index
      %c0_64 = arith.constant 0 : index
      %c0_65 = arith.constant 0 : index
      %57 = vector.load %arg3[%c1_62, %c2_63, %c0_64, %c0_65] : memref<3x3x256x128xbf16, #tpu.memory_space<vmem>>, vector<1x1x256x128xbf16>
      %58 = vector.shape_cast %57 : vector<1x1x256x128xbf16> to vector<256x128xbf16>
      %cst_66 = arith.constant dense<0.000000e+00> : vector<128x128xf32>
      %59 = tpu.matmul %56, %58, %cst_66 {dimension_numbers = #tpu.dot_dimension_numbers<[1], [0], [0], [1], [0, 0, 1, 1], [], []>} : vector<128x256xbf16>, vector<256x128xbf16>, vector<128x128xf32> -> vector<128x128xf32>
      %60 = arith.addf %52, %59 : vector<128x128xf32>
      %c2_i32_67 = arith.constant 2 : i32
      %61 = arith.addi %11, %c2_i32_67 : i32
      %62 = arith.index_cast %61 : i32 to index
      %c0_68 = arith.constant 0 : index
      %c0_69 = arith.constant 0 : index
      %63 = vector.load %arg7[%62, %c0_68, %c0_69] : memref<18x18x256xbf16, #tpu.memory_space<vmem>>, vector<8x16x256xbf16>
      %64 = vector.shape_cast %63 : vector<8x16x256xbf16> to vector<128x256xbf16>
      %c2_70 = arith.constant 2 : index
      %c0_71 = arith.constant 0 : index
      %c0_72 = arith.constant 0 : index
      %c0_73 = arith.constant 0 : index
      %65 = vector.load %arg3[%c2_70, %c0_71, %c0_72, %c0_73] : memref<3x3x256x128xbf16, #tpu.memory_space<vmem>>, vector<1x1x256x128xbf16>
      %66 = vector.shape_cast %65 : vector<1x1x256x128xbf16> to vector<256x128xbf16>
      %cst_74 = arith.constant dense<0.000000e+00> : vector<128x128xf32>
      %67 = tpu.matmul %64, %66, %cst_74 {dimension_numbers = #tpu.dot_dimension_numbers<[1], [0], [0], [1], [0, 0, 1, 1], [], []>} : vector<128x256xbf16>, vector<256x128xbf16>, vector<128x128xf32> -> vector<128x128xf32>
      %68 = arith.addf %60, %67 : vector<128x128xf32>
      %c2_i32_75 = arith.constant 2 : i32
      %69 = arith.addi %11, %c2_i32_75 : i32
      %70 = arith.index_cast %69 : i32 to index
      %c1_76 = arith.constant 1 : index
      %c0_77 = arith.constant 0 : index
      %71 = vector.load %arg7[%70, %c1_76, %c0_77] : memref<18x18x256xbf16, #tpu.memory_space<vmem>>, vector<8x16x256xbf16>
      %72 = vector.shape_cast %71 : vector<8x16x256xbf16> to vector<128x256xbf16>
      %c2_78 = arith.constant 2 : index
      %c1_79 = arith.constant 1 : index
      %c0_80 = arith.constant 0 : index
      %c0_81 = arith.constant 0 : index
      %73 = vector.load %arg3[%c2_78, %c1_79, %c0_80, %c0_81] : memref<3x3x256x128xbf16, #tpu.memory_space<vmem>>, vector<1x1x256x128xbf16>
      %74 = vector.shape_cast %73 : vector<1x1x256x128xbf16> to vector<256x128xbf16>
      %cst_82 = arith.constant dense<0.000000e+00> : vector<128x128xf32>
      %75 = tpu.matmul %72, %74, %cst_82 {dimension_numbers = #tpu.dot_dimension_numbers<[1], [0], [0], [1], [0, 0, 1, 1], [], []>} : vector<128x256xbf16>, vector<256x128xbf16>, vector<128x128xf32> -> vector<128x128xf32>
      %76 = arith.addf %68, %75 : vector<128x128xf32>
      %c2_i32_83 = arith.constant 2 : i32
      %77 = arith.addi %11, %c2_i32_83 : i32
      %78 = arith.index_cast %77 : i32 to index
      %c2_84 = arith.constant 2 : index
      %c0_85 = arith.constant 0 : index
      %79 = vector.load %arg7[%78, %c2_84, %c0_85] : memref<18x18x256xbf16, #tpu.memory_space<vmem>>, vector<8x16x256xbf16>
      %80 = vector.shape_cast %79 : vector<8x16x256xbf16> to vector<128x256xbf16>
      %c2_86 = arith.constant 2 : index
      %c2_87 = arith.constant 2 : index
      %c0_88 = arith.constant 0 : index
      %c0_89 = arith.constant 0 : index
      %81 = vector.load %arg3[%c2_86, %c2_87, %c0_88, %c0_89] : memref<3x3x256x128xbf16, #tpu.memory_space<vmem>>, vector<1x1x256x128xbf16>
      %82 = vector.shape_cast %81 : vector<1x1x256x128xbf16> to vector<256x128xbf16>
      %cst_90 = arith.constant dense<0.000000e+00> : vector<128x128xf32>
      %83 = tpu.matmul %80, %82, %cst_90 {dimension_numbers = #tpu.dot_dimension_numbers<[1], [0], [0], [1], [0, 0, 1, 1], [], []>} : vector<128x256xbf16>, vector<256x128xbf16>, vector<128x128xf32> -> vector<128x128xf32>
      %84 = arith.addf %76, %83 : vector<128x128xf32>
      %85 = vector.broadcast %8 : vector<1x128xf32> to vector<128x128xf32>
      %86 = arith.mulf %84, %85 : vector<128x128xf32>
      %87 = vector.broadcast %9 : vector<1x128xf32> to vector<128x128xf32>
      %88 = arith.addf %86, %87 : vector<128x128xf32>
      %cst_91 = arith.constant 0.000000e+00 : f32
      %89 = vector.broadcast %cst_91 : f32 to vector<128x128xf32>
      %90 = arith.maximumf %88, %89 : vector<128x128xf32>
      %91 = vector.shape_cast %90 : vector<128x128xf32> to vector<8x16x128xf32>
      %c0_92 = arith.constant 0 : index
      %92 = arith.index_cast %11 : i32 to index
      %c0_93 = arith.constant 0 : index
      %c0_94 = arith.constant 0 : index
      %93 = vector.load %arg6[%c0_92, %92, %c0_93, %c0_94] : memref<1x16x16x128xf32, #tpu.memory_space<vmem>>, vector<1x8x16x128xf32>
      %94 = vector.shape_cast %93 : vector<1x8x16x128xf32> to vector<8x16x128xf32>
      %95 = vector.shape_cast %91 : vector<8x16x128xf32> to vector<1x8x16x128xf32>
      tpu.vector_store %arg6[%c0_92, %92, %c0_93, %c0_94], %95 {strides = array<i32>} : memref<1x16x16x128xf32, #tpu.memory_space<vmem>>, vector<1x8x16x128xf32>,
    }
    %c2_i32_18 = arith.constant 2 : i32
    return
  }
  func.func @transform_0(%arg0: i32) -> (i32, i32, i32, i32) {
    %c0_i32 = arith.constant 0 : i32
    %c0_i32_0 = arith.constant 0 : i32
    %c0_i32_1 = arith.constant 0 : i32
    %c0_i32_2 = arith.constant 0 : i32
    return %arg0, %c0_i32, %c0_i32_0, %c0_i32_1 : i32, i32, i32, i32
  }
  func.func @transform_1(%arg0: i32) -> (i32, i32, i32, i32) {
    %c0_i32 = arith.constant 0 : i32
    %c0_i32_0 = arith.constant 0 : i32
    %c0_i32_1 = arith.constant 0 : i32
    %c0_i32_2 = arith.constant 0 : i32
    return %arg0, %c0_i32, %c0_i32_0, %c0_i32_1 : i32, i32, i32, i32
  }
  func.func @transform_2(%arg0: i32) -> (i32, i32, i32, i32) {
    %c0_i32 = arith.constant 0 : i32
    %c0_i32_0 = arith.constant 0 : i32
    %c0_i32_1 = arith.constant 0 : i32
    %c0_i32_2 = arith.constant 0 : i32
    %c0_i32_3 = arith.constant 0 : i32
    return %c0_i32, %c0_i32_0, %c0_i32_1, %c0_i32_2 : i32, i32, i32, i32
  }
  func.func @transform_3(%arg0: i32) -> (i32, i32) {
    %c0_i32 = arith.constant 0 : i32
    %c0_i32_0 = arith.constant 0 : i32
    %c0_i32_1 = arith.constant 0 : i32
    return %c0_i32, %c0_i32_0 : i32, i32
  }
  func.func @transform_4(%arg0: i32) -> (i32, i32) {
    %c0_i32 = arith.constant 0 : i32
    %c0_i32_0 = arith.constant 0 : i32
    %c0_i32_1 = arith.constant 0 : i32
    return %c0_i32, %c0_i32_0 : i32, i32
  }
  func.func @transform_5(%arg0: i32) -> (i32, i32, i32, i32) {
    %c0_i32 = arith.constant 0 : i32
    %c0_i32_0 = arith.constant 0 : i32
    %c0_i32_1 = arith.constant 0 : i32
    %c0_i32_2 = arith.constant 0 : i32
    return %arg0, %c0_i32, %c0_i32_0, %c0_i32_1 : i32, i32, i32, i32
  }
}

</mosaic_0001>

<bundles_post_ra>
// kernel: decoder_block_forward.2
= control target key start
LH: loop header
LB: loop body
LE: loop exit
PB: predicated region body
PF: predicated region fallthrough
CT: control target
= control target key end

     0   :  { %s4945_s12 = smov 0   ;;  %s5835_s0 = inlined_call_operand.vmem [shape: bf16[2,8,8,128], index: 0, kind: input, shape index: {}]   ;;  %s5836_s1 = inlined_call_operand.vmem [shape: bf16[2,2,512,128], index: 1, kind: input, shape index: {}]   ;;  %s5837_s2 = inlined_call_operand.vmem [shape: f32[1,128], index: 2, kind: input, shape index: {}]   ;;  %s5838_s3 = inlined_call_operand.vmem [shape: bf16[2,8,2,8,256], index: 3, kind: output, shape index: {}]  }
   0x1 LB: > { %s3805_s13 = sadd.s32 4294967295, %s4922_s12   ;;  %p3809_p0 = scmp.ge.s32.totalorder %s4922_s12, 1  ;;  %s4922_s12 = sphi %s4945_s12, %s13_s12  }
   0x2   : > { %p137_p1 = scmp.lt.s32.totalorder %s4922_s12, 3 }
   0x4   : > { %p138_p2 = pnand %p3809_p0, %p137_p1 }
   0x5   : > { %p161_p3 = scmp.lt.s32.totalorder (!%p138_p2), %s3805_s13, 1 }
   0x6   : > { %141 = sbr.rel (%p138_p2) target bundleno = 473 (0x1d9), region = 32 }
   0xb   : > { %v4708_v0 = vld [vmem:[%s5836_s1 + $0x78] sm:$0xff]   ;;  %v4924_v3 = vmov 0   ;;  %v4712_v5 = vld [vmem:[%s5836_s1 + $0x70] sm:$0xff]   ;;  %v4716_v9 = vld [vmem:[%s5836_s1 + $0x68] sm:$0xff]   ;;  %s5846_s13 = smov (!%p161_p3, %s3805_s13), 1  ;;  %vm281_vm0 = vcmask 1043456  }
   0xc   : > { %v4709_v1 = vld [vmem:[%s5836_s1 + $0xf8] sm:$0xff]   ;;  %4379 = vmatprep.subr.bf16.mxu0 %v4708_v0  ;;  %172 = vst [vmem:[#allocation2] sm:$0xf] %v4924_v3  ;;  %173 = vst [vmem:[#allocation2 + $0x4] sm:$0x1] %v4924_v3  ;;  %v4713_v6 = vld [vmem:[%s5836_s1 + $0xf0] sm:$0xff]  }
   0xd   : > { %v4710_v2 = vld [vmem:[%s5836_s1 + $0x38] sm:$0xff]   ;;  %174 = vst [vmem:[#allocation2 + $0x8] sm:$0xf] %v4924_v3  ;;  %175 = vst [vmem:[#allocation2 + $0xc] sm:$0x1] %v4924_v3  ;;  %4419 = vmatprep.subr.bf16.mxu1 %v4709_v1  ;;  %v4714_v7 = vld [vmem:[%s5836_s1 + $0x30] sm:$0xff]  }
   0xe   : > { %176 = vst [vmem:[#allocation2 + $0x10] sm:$0xf] %v4924_v3  ;;  %177 = vst [vmem:[#allocation2 + $0x14] sm:$0x1] %v4924_v3  ;;  %v4711_v4 = vld [vmem:[%s5836_s1 + $0xb8] sm:$0xff]   ;;  %4380 = vmatpush3.bf16.msra.mxu0 %v4710_v2  ;;  %v4715_v8 = vld [vmem:[%s5836_s1 + $0xb0] sm:$0xff]  }
   0xf   : > { %178 = vst [vmem:[#allocation2 + $0x18] sm:$0xf] %v4924_v3  ;;  %179 = vst [vmem:[#allocation2 + $0x1c] sm:$0x1] %v4924_v3  ;;  %4420 = vmatpush3.bf16.msra.mxu1 %v4711_v4  ;;  %4381 = vmatprep.subr.bf16.mxu0 %v4712_v5  ;;  %v4717_v10 = vld [vmem:[%s5836_s1 + $0xe8] sm:$0xff]   ;;  %v4720_v13 = vld [vmem:[%s5836_s1 + $0x60] sm:$0xff]  }
  0x10   : > { %180 = vst [vmem:[#allocation2 + $0x20] sm:$0xf] %v4924_v3  ;;  %181 = vst [vmem:[#allocation2 + $0x24] sm:$0x1] %v4924_v3  ;;  %4421 = vmatprep.subr.bf16.mxu1 %v4713_v6  ;;  %v4718_v11 = vld [vmem:[%s5836_s1 + $0x28] sm:$0xff]   ;;  %v4721_v14 = vld [vmem:[%s5836_s1 + $0xe0] sm:$0xff]  }
  0x11   : > { %182 = vst [vmem:[#allocation2 + $0x28] sm:$0xf] %v4924_v3  ;;  %183 = vst [vmem:[#allocation2 + $0x2c] sm:$0x1] %v4924_v3  ;;  %v4719_v12 = vld [vmem:[%s5836_s1 + $0xa8] sm:$0xff]   ;;  %v4722_v15 = vld [vmem:[%s5836_s1 + $0x20] sm:$0xff]  }
  0x12   : > { %184 = vst [vmem:[#allocation2 + $0x30] sm:$0xf] %v4924_v3  ;;  %185 = vst [vmem:[#allocation2 + $0x34] sm:$0x1] %v4924_v3  ;;  %4382 = vmatpush3.bf16.msra.mxu0 %v4714_v7  ;;  %v4723_v16 = vld [vmem:[%s5836_s1 + $0xa0] sm:$0xff]   ;;  %v4724_v17 = vld [vmem:[%s5836_s1 + $0x58] sm:$0xff]  }
  0x13   : > { %186 = vst [vmem:[#allocation2 + $0x38] sm:$0xf] %v4924_v3  ;;  %187 = vst [vmem:[#allocation2 + $0x3c] sm:$0x1] %v4924_v3  ;;  %4422 = vmatpush3.bf16.msra.mxu1 %v4715_v8  ;;  %4383 = vmatprep.subr.bf16.mxu0 %v4716_v9  ;;  %v4725_v18 = vld [vmem:[%s5836_s1 + $0xd8] sm:$0xff]   ;;  %v4728_v21 = vld [vmem:[%s5836_s1 + $0x50] sm:$0xff]  }
  0x14   : > { %188 = vst [vmem:[#allocation2 + $0x40] sm:$0xf] %v4924_v3  ;;  %189 = vst [vmem:[#allocation2 + $0x44] sm:$0x1] %v4924_v3  ;;  %4423 = vmatprep.subr.bf16.mxu1 %v4717_v10  ;;  %v4726_v19 = vld [vmem:[%s5836_s1 + $0x18] sm:$0xff]   ;;  %v4729_v22 = vld [vmem:[%s5836_s1 + $0xd0] sm:$0xff]  }
  0x15   : > { %190 = vst [vmem:[#allocation2 + $0x48] sm:$0xf] %v4924_v3  ;;  %191 = vst [vmem:[#allocation2 + $0x4c] sm:$0x1] %v4924_v3  ;;  %v4727_v20 = vld [vmem:[%s5836_s1 + $0x98] sm:$0xff]   ;;  %v4730_v23 = vld [vmem:[%s5836_s1 + $0x10] sm:$0xff]  }
  0x16   : > { %4384 = vmatpush3.bf16.msra.mxu0 %v4718_v11  ;;  %v4731_v24 = vld [vmem:[%s5836_s1 + $0x90] sm:$0xff]   ;;  %v4732_v25 = vld [vmem:[%s5836_s1 + $0x48] sm:$0xff]   ;;  %s4377_s18 = sshll.u32 %s5846_s13, 5  ;;  %v4736_v29 = vld [vmem:[%s5836_s1 + $0x40] sm:$0xff]   ;;  %vm282_vm1 = vsmask.f32 7938 }
  0x17   : > { %4424 = vmatpush3.bf16.msra.mxu1 %v4719_v12  ;;  %4385 = vmatprep.subr.bf16.mxu0 %v4720_v13  ;;  %v4733_v26 = vld [vmem:[%s5836_s1 + $0xc8] sm:$0xff]   ;;  %v4737_v30 = vld [vmem:[%s5836_s1 + $0xc0] sm:$0xff]   ;;  %s5053_s27 = scalar_lea.vmem %s5835_s0, %s4377_s18  ;;  %vm287_vm2 = vcmask 1040384   ;;  %vm288_vm3 = vsmask.f32 256  ;;  %vm5063_vm4 = vmand %vm281_vm0, %vm282_vm1  ;;  %s4378_s28 = sshll.u32 %s5846_s13, 7 }
  0x18   : > { %4425 = vmatprep.subr.bf16.mxu1 %v4721_v14  ;;  %v4734_v27 = vld [vmem:[%s5836_s1 + $0x8] sm:$0xff]   ;;  %v4738_v31 = vld [vmem:[%s5836_s1] sm:$0xff]   ;;  %v4746_v42 = vld [vmem:[%s5836_s1 + $0x178] sm:$0xff]   ;;  %vm1352_vm6 = vsmask.f32 3328  ;;  %s5762_s13 = scalar_lea.vmem %s5838_s3, %s4378_s28 }
  0x19   : > { %v4735_v28 = vld [vmem:[%s5836_s1 + $0x88] sm:$0xff]   ;;  %v4739_v32 = vld [vmem:[%s5836_s1 + $0x80] sm:$0xff]   ;;  %vm5073_vm5 = vmand %vm287_vm2, %vm288_vm3  ;;  %vm1353_vm7 = vsmask.f32 7440 }
  0x1a   : > { %4386 = vmatpush3.bf16.msra.mxu0 %v4722_v15  ;;  %v192_v33 = vld [vmem:[%s5053_s27] sm:$0xf]  ;;  %v284_v37 = vld [vmem:[#allocation2 + $0x8] sm:$0xf]  ;;  %v344_v40 = vld [vmem:[#allocation2 + $0x4] sm:$0x1] }
  0x1b   : > { %4426 = vmatpush3.bf16.msra.mxu1 %v4723_v16  ;;  %4387 = vmatprep.subr.bf16.mxu0 %v4724_v17  ;;  %v201_v34 = vshrl.u32 %v192_v33, 16  ;;  %v204_v35 = vshll.u32 %v192_v33, 16  ;;  %v5067_v38 = vld [vmem:[#allocation2] sm:$0xf]  ;;  %v193_v41 = vld [vmem:[%s5053_s27 + $0x4] sm:$0xf]  ;;  %vm5292_vm8 = vmor %vm1352_vm6, %vm1353_vm7 }
  0x1c   : > { %4427 = vmatprep.subr.bf16.mxu1 %v4725_v18  ;;  %v290_v44 = vld [vmem:[#allocation2 + $0xc] sm:$0x1]  ;;  %v209_v45 = vshrl.u32 %v193_v41, 16  ;;  %v212_v46 = vshll.u32 %v193_v41, 16  ;;  %v293_v49 = vld [vmem:[#allocation2 + $0x10] sm:$0xf]  ;;  %v3814_v51 = vcombine.low %v5067_v38, %v344_v40 }
  0x1d   : > { %v203_v39 = vrot.slane %v201_v34, 7  ;;  %v4747_v50 = vld [vmem:[%s5836_s1 + $0x1f8] sm:$0xff]   ;;  %v296_v55 = vld [vmem:[#allocation2 + $0x14] sm:$0x1]  ;;  %v194_v61 = vld [vmem:[%s5053_s27 + $0x8] sm:$0xf] }
  0x1e   : > { %4388 = vmatpush3.bf16.msra.mxu0 %v4726_v19  ;;  %v211_v52 = vrot.slane %v209_v45, 7  ;;  %v411_v58 = vshll.u32 %v3814_v51, 16  ;;  %v217_v62 = vshrl.u32 %v194_v61, 16  ;;  %v409_v63 = vshrl.u32 %v3814_v51, 16  ;;  %v195_v2 = vld [vmem:[%s5053_s27 + $0xc] sm:$0xf] }
  0x1f   : > { %4428 = vmatpush3.bf16.msra.mxu1 %v4727_v20  ;;  %4389 = vmatprep.subr.bf16.mxu0 %v4728_v21  ;;  %v206_v47 = vor.u32 %v204_v35, %v203_v39  ;;  %v207_v48 = vrot.slane %v203_v39, 4  ;;  %v220_v1 = vshll.u32 %v194_v61, 16  ;;  %v299_v6 = vld [vmem:[#allocation2 + $0x18] sm:$0xf]  ;;  %v302_v11 = vld [vmem:[#allocation2 + $0x1c] sm:$0x1] }
  0x20   : > { %4429 = vmatprep.subr.bf16.mxu1 %v4729_v22  ;;  %v214_v56 = vor.u32 %v212_v46, %v211_v52  ;;  %v215_v57 = vrot.slane %v211_v52, 4  ;;  %v413_v0 = vrot.slane %v411_v58, 1  ;;  %v219_v9 = vrot.slane %v217_v62, 7  ;;  %v308_v39 = vld [vmem:[#allocation2 + $0x24] sm:$0x1]  ;;  %v4753_v61 = vld [vmem:[%s5836_s1 + $0x1b0] sm:$0xff]  }
  0x21   : > { %v285_v53 = vsel %vm5063_vm4, %v206_v47, %v284_v37  ;;  %v291_v54 = vsel %vm5073_vm5, %v207_v48, %v290_v44  ;;  %v225_v12 = vshrl.u32 %v195_v2, 16  ;;  %v228_v13 = vshll.u32 %v195_v2, 16  ;;  %v4750_v47 = vld [vmem:[%s5836_s1 + $0x170] sm:$0xff]   ;;  %v4794_v43 = vld [vmem:[%s5836_s1 + $0x100] sm:$0xff]  }
  0x22   : > { %4390 = vmatpush3.bf16.msra.mxu0 %v4730_v23  ;;  %286 = vst [vmem:[#allocation2 + $0x8] sm:$0xf] %v285_v53  ;;  %292 = vst [vmem:[#allocation2 + $0xc] sm:$0x1] %v291_v54  ;;  %v294_v59 = vsel %vm5063_vm4, %v214_v56, %v293_v49  ;;  %v297_v60 = vsel %vm5073_vm5, %v215_v57, %v296_v55  ;;  %v222_v18 = vor.u32 %v220_v1, %v219_v9  ;;  %v4749_v49 = vld [vmem:[%s5836_s1 + $0x1b8] sm:$0xff]   ;;  %v4751_v53 = vld [vmem:[%s5836_s1 + $0x1f0] sm:$0xff]  }
  0x23   : > { %4430 = vmatpush3.bf16.msra.mxu1 %v4731_v24  ;;  %4391 = vmatprep.subr.bf16.mxu0 %v4732_v25  ;;  %295 = vst [vmem:[#allocation2 + $0x10] sm:$0xf] %v294_v59  ;;  %298 = vst [vmem:[#allocation2 + $0x14] sm:$0x1] %v297_v60  ;;  %v414_v19 = vor.u32 %v413_v0, %v409_v63  ;;  %v227_v33 = vrot.slane %v225_v12, 7  ;;  %v4752_v55 = vld [vmem:[%s5836_s1 + $0x130] sm:$0xff]  }
  0x24   : > { %4431 = vmatprep.subr.bf16.mxu1 %v4733_v26  ;;  %v223_v26 = vrot.slane %v219_v9, 4  ;;  %v196_v56 = vld [vmem:[%s5053_s27 + $0x10] sm:$0xf]  ;;  %v4760_v0 = vld [vmem:[%s5836_s1 + $0x168] sm:$0xff]   ;;  %v197_v1 = vld [vmem:[%s5053_s27 + $0x14] sm:$0xf] }
  0x25   : > { %v230_v44 = vor.u32 %v228_v13, %v227_v33  ;;  %v231_v45 = vrot.slane %v227_v33, 4  ;;  %v233_v59 = vshrl.u32 %v196_v56, 16  ;;  %v236_v60 = vshll.u32 %v196_v56, 16  ;;  %v314_v12 = vld [vmem:[#allocation2 + $0x2c] sm:$0x1] }
  0x26   : > { %4392 = vmatpush3.bf16.msra.mxu0 %v4734_v27  ;;  %v300_v27 = vsel %vm5063_vm4, %v222_v18, %v299_v6  ;;  %v303_v37 = vsel %vm5073_vm5, %v223_v26, %v302_v11  ;;  %v311_v11 = vld [vmem:[#allocation2 + $0x28] sm:$0xf]  ;;  %v244_v13 = vshll.u32 %v197_v1, 16 }
  0x27   : > { %4432 = vmatpush3.bf16.msra.mxu1 %v4735_v28  ;;  %4393 = vmatprep.subr.bf16.mxu0 %v4736_v29  ;;  %v305_v29 = vld [vmem:[#allocation2 + $0x20] sm:$0xf]  ;;  %301 = vst [vmem:[#allocation2 + $0x18] sm:$0xf] %v300_v27  ;;  %304 = vst [vmem:[#allocation2 + $0x1c] sm:$0x1] %v303_v37  ;;  %v309_v51 = vsel %vm5073_vm5, %v231_v45, %v308_v39 }
  0x28   : > { %4433 = vmatprep.subr.bf16.mxu1 %v4737_v30  ;;  %310 = vst [vmem:[#allocation2 + $0x24] sm:$0x1] %v309_v51  ;;  %v235_v6 = vrot.slane %v233_v59, 7  ;;  %v4777_v59 = vld [vmem:[%s5836_s1 + $0x198] sm:$0xff]  }
  0x29   : > { %v337_v3 = vld [vmem:[#allocation2 + $0x8] sm:$0xf]  ;;  %v345_v4 = vld [vmem:[#allocation2 + $0xc] sm:$0x1] }
  0x2a   : > { %4394 = vmatpush3.bf16.msra.mxu0 %v4738_v31  ;;  %v5091_v5 = vld [vmem:[#allocation2 + $0x8] sm:$0xf]  ;;  %v3815_v7 = vcombine.low %v337_v3, %v345_v4  ;;  %v360_v8 = vld [vmem:[#allocation2 + $0xc] sm:$0x1]  ;;  %v353_v16 = vld [vmem:[#allocation2 + $0x10] sm:$0xf]  ;;  %v3831_v35 = vcombine.low %v5067_v38, %v337_v3 }
  0x2b   : > { %4434 = vmatpush3.bf16.msra.mxu1 %v4739_v32  ;;  %4459 = vmatprep.subr.bf16.mxu0 %v4746_v42  ;;  %v3822_v10 = vcombine.low %v5091_v5, %v360_v8  ;;  %v361_v17 = vld [vmem:[#allocation2 + $0x14] sm:$0x1]  ;;  %v5094_v23 = vld [vmem:[#allocation2 + $0x10] sm:$0xf]  ;;  %v4748_v42 = vld [vmem:[%s5836_s1 + $0x138] sm:$0xff]   ;;  %v3833_v52 = vcombine.low %v5091_v5, %v353_v16 }
  0x2c   : > { %4499 = vmatprep.subr.bf16.mxu1 %v4747_v50  ;;  %v416_v14 = vshrl.u32 %v3815_v7, 16  ;;  %v418_v15 = vshll.u32 %v3815_v7, 16  ;;  %v3823_v20 = vcombine.low %v353_v16, %v361_v17  ;;  %v346_v24 = vld [vmem:[#allocation2 + $0x14] sm:$0x1]  ;;  %v306_v50 = vsel %vm5063_vm4, %v230_v44, %v305_v29  ;;  %v4761_v4 = vld [vmem:[%s5836_s1 + $0x1e8] sm:$0xff]  }
  0x2d   : > { %v505_v21 = vshrl.u32 %v3822_v10, 16  ;;  %v507_v22 = vshll.u32 %v3822_v10, 16  ;;  %v5099_v28 = vcombine.low %v5094_v23, %v346_v24  ;;  %307 = vst [vmem:[#allocation2 + $0x20] sm:$0xf] %v306_v50  ;;  %v4762_v5 = vld [vmem:[%s5836_s1 + $0x128] sm:$0xff]   ;;  %v241_v7 = vshrl.u32 %v197_v1, 16 }
  0x2e   : > { %v420_v25 = vrot.slane %v418_v15, 1  ;;  %v512_v31 = vshrl.u32 %v3823_v20, 16  ;;  %v514_v32 = vshll.u32 %v3823_v20, 16  ;;  %v5126_v57 = vld [vmem:[#allocation2 + $0x18] sm:$0xf]  ;;  %v4764_v10 = vld [vmem:[%s5836_s1 + $0x160] sm:$0xff]  }
  0x2f   : > { %v509_v30 = vrot.slane %v507_v22, 1  ;;  %v425_v38 = vshll.u32 %v5099_v28, 16  ;;  %v5128_v58 = vld [vmem:[#allocation2 + $0x18] sm:$0xf]  ;;  %v423_v62 = vshrl.u32 %v5099_v28, 16  ;;  %v239_v15 = vrot.slane %v235_v6, 4 }
  0x30   : > { %v421_v34 = vor.u32 %v420_v25, %v416_v14  ;;  %v516_v41 = vrot.slane %v514_v32, 1  ;;  %v347_v2 = vld [vmem:[#allocation2 + $0x1c] sm:$0x1]  ;;  %v238_v14 = vor.u32 %v236_v60, %v235_v6  ;;  %v243_v16 = vrot.slane %v241_v7, 7  ;;  %v363_v20 = vld [vmem:[#allocation2 + $0x24] sm:$0x1] }
  0x31   : > { %v510_v40 = vor.u32 %v509_v30, %v505_v21  ;;  %v427_v63 = vrot.slane %v425_v38, 1  ;;  %v362_v3 = vld [vmem:[#allocation2 + $0x1c] sm:$0x1]  ;;  %v3817_v8 = vcombine.low %v5126_v57, %v347_v2  ;;  %v4763_v21 = vld [vmem:[%s5836_s1 + $0x1a8] sm:$0xff]   ;;  %v317_v22 = vld [vmem:[#allocation2 + $0x30] sm:$0xf]  ;;  %v3835_v45 = vcombine.low %v5094_v23, %v5126_v57 }
  0x32   : > { %v3832_v46 = vcombine.low %v414_v19, %v421_v34  ;;  %v517_v48 = vor.u32 %v516_v41, %v512_v31  ;;  %v3824_v9 = vcombine.low %v5128_v58, %v362_v3  ;;  %v348_v29 = vld [vmem:[#allocation2 + $0x24] sm:$0x1]  ;;  %v320_v30 = vld [vmem:[#allocation2 + $0x34] sm:$0x1]  ;;  %v312_v33 = vsel %vm5063_vm4, %v238_v14, %v311_v11  ;;  %v4774_v38 = vld [vmem:[%s5836_s1 + $0x158] sm:$0xff]  }
  0x33   : > { %v430_v17 = vshrl.u32 %v3817_v8, 16  ;;  %v432_v18 = vshll.u32 %v3817_v8, 16  ;;  %v428_v24 = vor.u32 %v427_v63, %v423_v62  ;;  %v4765_v32 = vld [vmem:[%s5836_s1 + $0x1e0] sm:$0xff]   ;;  %v315_v34 = vsel %vm5073_vm5, %v239_v15, %v314_v12  ;;  %313 = vst [vmem:[#allocation2 + $0x28] sm:$0xf] %v312_v33  ;;  %v4775_v23 = vld [vmem:[%s5836_s1 + $0x1d8] sm:$0xff]  }
  0x34   : > { %902 = vmatprep.mubr.bf16.mxu0 %v3832_v46  ;;  %v3834_v54 = vcombine.low %v510_v40, %v517_v48  ;;  %v5149_v19 = vld [vmem:[#allocation2 + $0x20] sm:$0xf]  ;;  %v519_v26 = vshrl.u32 %v3824_v9, 16  ;;  %v521_v27 = vshll.u32 %v3824_v9, 16  ;;  %316 = vst [vmem:[#allocation2 + $0x2c] sm:$0x1] %v315_v34 }
  0x35   : > { %903 = vmatmul.mubr.bf16.vlgmr.msra.gmra.mxu0 %v3831_v35  ;;  %v3825_v25 = vcombine.low %v5149_v19, %v363_v20  ;;  %v5155_v28 = vld [vmem:[#allocation2 + $0x20] sm:$0xf]  ;;  %v434_v31 = vrot.slane %v432_v18, 1  ;;  %v3837_v56 = vcombine.low %v5128_v58, %v5149_v19  ;;  %v4778_v62 = vld [vmem:[%s5836_s1 + $0x150] sm:$0xff]   ;;  %v198_v63 = vld [vmem:[%s5053_s27 + $0x18] sm:$0xf] }
  0x36   : > { %4460 = vmatpush3.bf16.msra.mxu0 %v4748_v42  ;;  %967 = vmatprep.mubr.bf16.mxu1 %v3834_v54  ;;  %v5165_v35 = vcombine.low %v5155_v28, %v348_v29  ;;  %v523_v37 = vrot.slane %v521_v27, 1  ;;  %v4766_v41 = vld [vmem:[%s5836_s1 + $0x120] sm:$0xff]   ;;  %v246_v42 = vor.u32 %v244_v13, %v243_v16  ;;  %v4776_v54 = vld [vmem:[%s5836_s1 + $0x118] sm:$0xff]   ;;  %v249_v6 = vshrl.u32 %v198_v63, 16  ;;  %v4781_v9 = vld [vmem:[%s5836_s1 + $0x190] sm:$0xff]  }
  0x37   : > { %4461 = vmatprep.subr.bf16.mxu0 %v4750_v47  ;;  %968 = vmatmul.mubr.bf16.vlgmr.msra.gmra.mxu1 %v3833_v52  ;;  %v526_v39 = vshrl.u32 %v3825_v25, 16  ;;  %v528_v40 = vshll.u32 %v3825_v25, 16  ;;  %v435_v44 = vor.u32 %v434_v31, %v430_v17  ;;  %v4767_v46 = vld [vmem:[%s5836_s1 + $0x1a0] sm:$0xff]   ;;  %v247_v47 = vrot.slane %v243_v16, 4  ;;  %v199_v11 = vld [vmem:[%s5053_s27 + $0x1c] sm:$0xf] }
  0x38   : > { %4500 = vmatpush3.bf16.msra.mxu1 %v4749_v49  ;;  %v524_v48 = vor.u32 %v523_v37, %v519_v26  ;;  %v439_v50 = vshll.u32 %v5165_v35, 16  ;;  %v318_v51 = vsel %vm5063_vm4, %v246_v42, %v317_v22  ;;  %v437_v57 = vshrl.u32 %v5165_v35, 16  ;;  %v326_v27 = vld [vmem:[#allocation2 + $0x3c] sm:$0x1]  ;;  %v329_v34 = vld [vmem:[#allocation2 + $0x40] sm:$0xf] }
  0x39   : > { %4501 = vmatprep.subr.bf16.mxu1 %v4751_v53  ;;  %v530_v49 = vrot.slane %v528_v40, 1  ;;  %v3836_v52 = vcombine.low %v428_v24, %v435_v44  ;;  %319 = vst [vmem:[#allocation2 + $0x30] sm:$0xf] %v318_v51  ;;  %v321_v53 = vsel %vm5073_vm5, %v247_v47, %v320_v30  ;;  %v252_v7 = vshll.u32 %v198_v63, 16  ;;  %v332_v35 = vld [vmem:[#allocation2 + $0x44] sm:$0x1] }
  0x3a   : > { %4462 = vmatpush3.bf16.msra.mxu0 %v4752_v55  ;;  %322 = vst [vmem:[#allocation2 + $0x34] sm:$0x1] %v321_v53  ;;  %v5201_v1 = vld [vmem:[#allocation2 + $0x28] sm:$0xf]  ;;  %v251_v15 = vrot.slane %v249_v6, 7  ;;  %v257_v16 = vshrl.u32 %v199_v11, 16 }
  0x3b   : > { %4463 = vmatprep.subr.bf16.mxu0 %v4760_v0  ;;  %v531_v55 = vor.u32 %v530_v49, %v526_v39  ;;  %910 = vmatprep.mubr.bf16.mxu0 %v3836_v52  ;;  %v5199_v0 = vld [vmem:[#allocation2 + $0x28] sm:$0xf]  ;;  %v349_v58 = vld [vmem:[#allocation2 + $0x2c] sm:$0x1]  ;;  %v260_v33 = vshll.u32 %v199_v11, 16 }
  0x3c   : > { %4502 = vmatpush3.bf16.msra.mxu1 %v4753_v61  ;;  %v441_v61 = vrot.slane %v439_v50, 1  ;;  %v3819_v2 = vcombine.low %v5199_v0, %v349_v58  ;;  %v364_v3 = vld [vmem:[#allocation2 + $0x2c] sm:$0x1]  ;;  %v254_v25 = vor.u32 %v252_v7, %v251_v15  ;;  %v255_v26 = vrot.slane %v251_v15, 4  ;;  %v1033_v6 = vld [vmem:[#allocation2 + $0x8] sm:$0xe] }
  0x3d   : > { %4503 = vmatprep.subr.bf16.mxu1 %v4761_v4  ;;  %v3838_v60 = vcombine.low %v524_v48, %v531_v55  ;;  %911 = vmatmul.mubr.bf16.gmra.mxu0 %v3835_v45  ;;  %v4779_v4 = vld [vmem:[%s5836_s1 + $0x1d0] sm:$0xff]   ;;  %v3826_v8 = vcombine.low %v5201_v1, %v364_v3  ;;  %v4788_v37 = vld [vmem:[%s5836_s1 + $0x148] sm:$0xff]   ;;  %v3839_v45 = vcombine.low %v5155_v28, %v5199_v0  ;;  %v4792_v55 = vld [vmem:[%s5836_s1 + $0x140] sm:$0xff]  }
  0x3e   : > { %4464 = vmatpush3.bf16.msra.mxu0 %v4762_v5  ;;  %v4780_v5 = vld [vmem:[%s5836_s1 + $0x110] sm:$0xff]   ;;  %v444_v12 = vshrl.u32 %v3819_v2, 16  ;;  %v446_v13 = vshll.u32 %v3819_v2, 16  ;;  %v442_v17 = vor.u32 %v441_v61, %v437_v57  ;;  %v4789_v47 = vld [vmem:[%s5836_s1 + $0x1c8] sm:$0xff]   ;;  %v4793_v57 = vld [vmem:[%s5836_s1 + $0x1c0] sm:$0xff]  }
  0x3f   : > { %4465 = vmatprep.subr.bf16.mxu0 %v4764_v10  ;;  %975 = vmatprep.mubr.bf16.mxu1 %v3838_v60  ;;  %v323_v10 = vld [vmem:[#allocation2 + $0x38] sm:$0xf]  ;;  %v533_v19 = vshrl.u32 %v3826_v8, 16  ;;  %v535_v20 = vshll.u32 %v3826_v8, 16  ;;  %v4791_v28 = vld [vmem:[%s5836_s1 + $0x188] sm:$0xff]  }
  0x40   : > { %4504 = vmatpush3.bf16.msra.mxu1 %v4763_v21  ;;  %v5215_v14 = vld [vmem:[#allocation2 + $0x30] sm:$0xf]  ;;  %v448_v22 = vrot.slane %v446_v13, 1  ;;  %v324_v42 = vsel %vm5063_vm4, %v254_v25, %v323_v10 }
  0x41   : > { %4505 = vmatprep.subr.bf16.mxu1 %v4765_v32  ;;  %976 = vmatmul.mubr.bf16.gmra.mxu1 %v3837_v56  ;;  %v365_v18 = vld [vmem:[#allocation2 + $0x34] sm:$0x1]  ;;  %v5217_v21 = vld [vmem:[#allocation2 + $0x30] sm:$0xf]  ;;  %v537_v30 = vrot.slane %v535_v20, 1  ;;  %v259_v32 = vrot.slane %v257_v16, 7  ;;  %v3841_v56 = vcombine.low %v5201_v1, %v5215_v14 }
  0x42   : > { %4466 = vmatpush3.bf16.msra.mxu0 %v4766_v41  ;;  %v3827_v24 = vcombine.low %v5215_v14, %v365_v18  ;;  %v350_v29 = vld [vmem:[#allocation2 + $0x34] sm:$0x1]  ;;  %v449_v39 = vor.u32 %v448_v22, %v444_v12  ;;  %325 = vst [vmem:[#allocation2 + $0x38] sm:$0xf] %v324_v42  ;;  %v1017_v1 = vld [vmem:[#allocation2 + $0x4] sm:$0x1] }
  0x43   : > { %4467 = vmatprep.subr.bf16.mxu0 %v4774_v38  ;;  %v5221_v31 = vcombine.low %v5217_v21, %v350_v29  ;;  %v538_v44 = vor.u32 %v537_v30, %v533_v19  ;;  %v4790_v38 = vld [vmem:[%s5836_s1 + $0x108] sm:$0xff]   ;;  %v262_v50 = vor.u32 %v260_v33, %v259_v32  ;;  %v263_v51 = vrot.slane %v259_v32, 4  ;;  %v1016_v29 = vld [vmem:[#allocation2] sm:$0xf] }
  0x44   : > { %4506 = vmatpush3.bf16.msra.mxu1 %v4767_v46  ;;  %v540_v40 = vshrl.u32 %v3827_v24, 16  ;;  %v542_v41 = vshll.u32 %v3827_v24, 16  ;;  %v327_v46 = vsel %vm5073_vm5, %v255_v26, %v326_v27  ;;  %v3840_v48 = vcombine.low %v442_v17, %v449_v39  ;;  %v5270_v17 = vld [vmem:[#allocation2 + $0xc] sm:$0x1]  ;;  %v5272_v24 = vld [vmem:[#allocation2 + $0x14] sm:$0x1] }
  0x45   : > { %4507 = vmatprep.subr.bf16.mxu1 %v4775_v23  ;;  %328 = vst [vmem:[#allocation2 + $0x3c] sm:$0x1] %v327_v46  ;;  %v453_v52 = vshll.u32 %v5221_v31, 16  ;;  %v330_v53 = vsel %vm5063_vm4, %v262_v50, %v329_v34  ;;  %v451_v61 = vshrl.u32 %v5221_v31, 16  ;;  %v1056_v31 = vld [vmem:[#allocation2 + $0x8] sm:$0xe] }
  0x46   : > { %4468 = vmatpush3.bf16.msra.mxu0 %v4776_v54  ;;  %v544_v49 = vrot.slane %v542_v41, 1  ;;  %918 = vmatprep.mubr.bf16.mxu0 %v3840_v48  ;;  %v333_v54 = vsel %vm5073_vm5, %v263_v51, %v332_v35  ;;  %331 = vst [vmem:[#allocation2 + $0x40] sm:$0xf] %v330_v53  ;;  %v1018_v34 = vld [vmem:[#allocation2 + $0x8] sm:$0xf]  ;;  %v3887_v39 = vcombine.low %v1056_v31, %v5270_v17  ;;  %v4801_v48 = vld [vmem:[%s5836_s1 + $0x2f8] sm:$0xff]  }
  0x47   : > { %4469 = vmatprep.subr.bf16.mxu0 %v4778_v62  ;;  %919 = vmatmul.mubr.bf16.gmra.mxu0 %v3839_v45  ;;  %334 = vst [vmem:[#allocation2 + $0x44] sm:$0x1] %v333_v54  ;;  %v455_v62 = vrot.slane %v453_v52, 1 }
  0x48   : > { %4508 = vmatpush3.bf16.msra.mxu1 %v4777_v59  ;;  %v545_v23 = vor.u32 %v544_v49, %v540_v40  ;;  %v4795_v59 = vld [vmem:[%s5836_s1 + $0x180] sm:$0xff]   ;;  %v4800_v40 = vld [vmem:[%s5836_s1 + $0x278] sm:$0xff]  }
  0x49   : > { %4509 = vmatprep.subr.bf16.mxu1 %v4779_v4  ;;  %v5260_v60 = vld [vmem:[#allocation2 + $0x38] sm:$0xf]  ;;  %v1019_v4 = vld [vmem:[#allocation2 + $0xc] sm:$0x1]  ;;  %v456_v13 = vor.u32 %v455_v62, %v451_v61  ;;  %v1042_v61 = vld [vmem:[#allocation2 + $0x10] sm:$0xf] }
  0x4a   : > { %4470 = vmatpush3.bf16.msra.mxu0 %v4780_v5  ;;  %v3842_v36 = vcombine.low %v538_v44, %v545_v23  ;;  %v5263_v63 = vld [vmem:[#allocation2 + $0x38] sm:$0xf]  ;;  %v1032_v5 = vld [vmem:[#allocation2] sm:$0xe]  ;;  %v3880_v12 = vcombine.low %v1033_v6, %v1019_v4  ;;  %v3843_v33 = vcombine.low %v5217_v21, %v5260_v60  ;;  %v1235_v21 = vshll.u32 %v3887_v39, 16 }
  0x4b   : > { %4471 = vmatprep.subr.bf16.mxu0 %v4788_v37  ;;  %v3879_v7 = vcombine.low %v1032_v5, %v1017_v1  ;;  %v1057_v37 = vld [vmem:[#allocation2 + $0x10] sm:$0xe] }
  0x4c   : > { %4510 = vmatpush3.bf16.msra.mxu1 %v4781_v9  ;;  %983 = vmatprep.mubr.bf16.mxu1 %v3842_v36  ;;  %v351_v0 = vld [vmem:[#allocation2 + $0x3c] sm:$0x1]  ;;  %v1128_v22 = vshrl.u32 %v3880_v12, 16  ;;  %v1130_v30 = vshll.u32 %v3880_v12, 16  ;;  %v3888_v45 = vcombine.low %v1057_v37, %v5272_v24  ;;  %v1237_v54 = vrot.slane %v1235_v21, 1  ;;  %v4804_v21 = vld [vmem:[%s5836_s1 + $0x270] sm:$0xff]  }
  0x4d   : > { %4511 = vmatprep.subr.bf16.mxu1 %v4789_v47  ;;  %984 = vmatmul.mubr.bf16.gmra.mxu1 %v3841_v56  ;;  %v366_v58 = vld [vmem:[#allocation2 + $0x3c] sm:$0x1]  ;;  %v3821_v2 = vcombine.low %v5260_v60, %v351_v0  ;;  %v5267_v10 = vld [vmem:[#allocation2 + $0x40] sm:$0xf]  ;;  %v1121_v19 = vshrl.u32 %v3879_v7, 16  ;;  %v1123_v20 = vshll.u32 %v3879_v7, 16 }
  0x4e   : > { %4472 = vmatpush3.bf16.msra.mxu0 %v4790_v38  ;;  %v3828_v3 = vcombine.low %v5263_v63, %v366_v58  ;;  %v367_v11 = vld [vmem:[#allocation2 + $0x44] sm:$0x1]  ;;  %v1132_v44 = vrot.slane %v1130_v30, 1  ;;  %v1233_v38 = vshrl.u32 %v3887_v39, 16  ;;  %v3845_v50 = vcombine.low %v5263_v63, %v5267_v10  ;;  %v1035_v37 = vld [vmem:[#allocation2 + $0x18] sm:$0xe] }
  0x4f   : > { %4473 = vmatprep.subr.bf16.mxu0 %v4792_v55  ;;  %v458_v8 = vshrl.u32 %v3821_v2, 16  ;;  %v460_v9 = vshll.u32 %v3821_v2, 16  ;;  %v3829_v14 = vcombine.low %v5267_v10, %v367_v11  ;;  %v1125_v35 = vrot.slane %v1123_v20, 1  ;;  %v5298_v20 = vld [vmem:[#allocation2 + $0x14] sm:$0x1] }
  0x50   : > { %4512 = vmatpush3.bf16.msra.mxu1 %v4791_v28  ;;  %v547_v15 = vshrl.u32 %v3828_v3, 16  ;;  %v549_v16 = vshll.u32 %v3828_v3, 16  ;;  %v1133_v51 = vor.u32 %v1132_v44, %v1128_v22  ;;  %v1040_v28 = vld [vmem:[#allocation2 + $0x8] sm:$0xf]  ;;  %v1242_v23 = vshll.u32 %v3888_v45, 16 }
  0x51   : > { %4513 = vmatprep.subr.bf16.mxu1 %v4793_v57  ;;  %v462_v18 = vrot.slane %v460_v9, 1  ;;  %v554_v26 = vshrl.u32 %v3829_v14, 16  ;;  %v556_v27 = vshll.u32 %v3829_v14, 16  ;;  %v1126_v47 = vor.u32 %v1125_v35, %v1121_v19  ;;  %v5305_v39 = vld [vmem:[#allocation2 + $0x1c] sm:$0x1] }
  0x52   : > { %4474 = vmatpush3.bf16.msra.mxu0 %v4794_v43  ;;  %v551_v25 = vrot.slane %v549_v16, 1  ;;  %v1240_v55 = vshrl.u32 %v3888_v45, 16  ;;  %v3901_v57 = vcombine.low %v1018_v34, %v1133_v51  ;;  %v3904_v36 = vsel %vm281_vm0, %v1019_v4, %v1133_v51  ;;  %v4802_v45 = vld [vmem:[%s5836_s1 + $0x238] sm:$0xff]  }
  0x53   : > { %v463_v32 = vor.u32 %v462_v18, %v458_v8  ;;  %v558_v42 = vrot.slane %v556_v27, 1  ;;  %4539 = vmatprep.subr.bf16.mxu0 %v4800_v40  ;;  %v3895_v52 = vcombine.low %v1016_v29, %v1126_v47  ;;  %v3898_v53 = vsel %vm281_vm0, %v1017_v1, %v1126_v47 }
  0x54   : > { %4514 = vmatpush3.bf16.msra.mxu1 %v4795_v59  ;;  %v552_v41 = vor.u32 %v551_v25, %v547_v15  ;;  %v1365_v43 = vshll.u32 %v3898_v53, 16  ;;  %v1238_v62 = vor.u32 %v1237_v54, %v1233_v38  ;;  %v1384_v63 = vshrl.u32 %v3901_v57, 16 }
  0x55   : > { %v3844_v46 = vcombine.low %v456_v13, %v463_v32  ;;  %v559_v49 = vor.u32 %v558_v42, %v554_v26  ;;  %4579 = vmatprep.subr.bf16.mxu1 %v4801_v48  ;;  %v1356_v59 = vshrl.u32 %v3895_v52, 16  ;;  %v1359_v60 = vshll.u32 %v3895_v52, 16  ;;  %v5300_v26 = vld [vmem:[#allocation2 + $0x1c] sm:$0x1]  ;;  %v1034_v32 = vld [vmem:[#allocation2 + $0x10] sm:$0xe] }
  0x56   : > { %v1387_v0 = vshll.u32 %v3901_v57, 16  ;;  %v1393_v58 = vshll.u32 %v3904_v36, 16  ;;  %v1244_v2 = vrot.slane %v1242_v23, 1  ;;  %v1367_v5 = vrot.slane %v1365_v43, 5  ;;  %v1059_v52 = vld [vmem:[#allocation2 + $0x20] sm:$0xe] }
  0x57   : > { %926 = vmatprep.mubr.bf16.mxu0 %v3844_v46  ;;  %v3846_v56 = vcombine.low %v552_v41, %v559_v49  ;;  %v1358_v1 = vrot.slane %v1356_v59, 4  ;;  %v1361_v3 = vrot.slane %v1359_v60, 5  ;;  %v3896_v6 = vcombine.low %v1040_v28, %v1238_v62  ;;  %v5316_v49 = vld [vmem:[#allocation2 + $0x24] sm:$0x1]  ;;  %v1022_v59 = vld [vmem:[#allocation2 + $0x18] sm:$0xf] }
  0x58   : > { %927 = vmatmul.mubr.bf16.gmra.mxu0 %v3843_v33  ;;  %v1386_v7 = vrot.slane %v1384_v63, 4  ;;  %v1389_v8 = vrot.slane %v1387_v0, 5  ;;  %v1245_v9 = vor.u32 %v1244_v2, %v1240_v55  ;;  %v3900_v4 = vsel %vm281_vm0, %v5270_v17, %v1238_v62  ;;  %v1020_v55 = vld [vmem:[#allocation2 + $0x10] sm:$0xf]  ;;  %v4803_v63 = vld [vmem:[%s5836_s1 + $0x2b8] sm:$0xff]  }
  0x59   : > { %991 = vmatprep.mubr.bf16.mxu1 %v3846_v56  ;;  %v1362_v10 = vor.u32 %v1361_v3, %v1358_v1  ;;  %v1370_v11 = vshrl.u32 %v3896_v6, 16  ;;  %v1373_v12 = vshll.u32 %v3896_v6, 16  ;;  %v1379_v13 = vshll.u32 %v3900_v4, 16  ;;  %v4806_v0 = vld [vmem:[%s5836_s1 + $0x230] sm:$0xff]   ;;  %v1044_v2 = vld [vmem:[#allocation2 + $0x18] sm:$0xf] }
  0x5a   : > { %992 = vmatmul.mubr.bf16.gmra.mxu1 %v3845_v50  ;;  %v1390_v15 = vor.u32 %v1389_v8, %v1386_v7  ;;  %v1395_v16 = vrot.slane %v1393_v58, 5  ;;  %v3902_v18 = vcombine.low %v1042_v61, %v1245_v9  ;;  %v3906_v19 = vsel %vm281_vm0, %v5272_v24, %v1245_v9  ;;  %v1058_v50 = vld [vmem:[#allocation2 + $0x18] sm:$0xe]  ;;  %v4812_v8 = vld [vmem:[%s5836_s1 + $0x268] sm:$0xff]  }
  0x5b   : > { %v1363_v22 = vrot.slane %v1362_v10, 4  ;;  %v1372_v17 = vrot.slane %v1370_v11, 4  ;;  %v1375_v25 = vrot.slane %v1373_v12, 5  ;;  %v1407_v31 = vshll.u32 %v3906_v19, 16  ;;  %v4805_v10 = vld [vmem:[%s5836_s1 + $0x2f0] sm:$0xff]  }
  0x5c   : > { %v1391_v27 = vrot.slane %v1390_v15, 4  ;;  %v1398_v29 = vshrl.u32 %v3902_v18, 16  ;;  %v1401_v30 = vshll.u32 %v3902_v18, 16  ;;  %v1381_v35 = vrot.slane %v1379_v13, 5  ;;  %v1046_v12 = vld [vmem:[#allocation2 + $0x20] sm:$0xf] }
  0x5d   : > { %v1368_v33 = vsel %vm5292_vm8, %v1363_v22, %v1367_v5  ;;  %v1376_v34 = vor.u32 %v1375_v25, %v1372_v17  ;;  %v3881_v24 = vcombine.low %v1034_v32, %v5298_v20  ;;  %v1409_v44 = vrot.slane %v1407_v31, 5 }
  0x5e   : > { %v1396_v40 = vsel %vm5292_vm8, %v1391_v27, %v1395_v16  ;;  %v1400_v41 = vrot.slane %v1398_v29, 4  ;;  %v1403_v42 = vrot.slane %v1401_v30, 5  ;;  %v3882_v48 = vcombine.low %v1035_v37, %v5300_v26  ;;  %v4814_v27 = vld [vmem:[%s5836_s1 + $0x228] sm:$0xff]  }
  0x5f   : > { %v4007_v46 = vcombine.low %v1368_v33, %v1396_v40  ;;  %v4008_v47 = vcombine.high %v1368_v33, %v1396_v40  ;;  %v1377_v38 = vrot.slane %v1376_v34, 4  ;;  %v1135_v28 = vshrl.u32 %v3881_v24, 16 }
  0x60   : > { %v1404_v51 = vor.u32 %v1403_v42, %v1400_v41  ;;  %v1137_v23 = vshll.u32 %v3881_v24, 16  ;;  %v3889_v53 = vcombine.low %v1058_v50, %v5305_v39  ;;  %v1142_v56 = vshrl.u32 %v3882_v48, 16 }
  0x61   : > { %1932 = vmatprep.mubr.bf16.mxu0 %v4008_v47  ;;  %v1382_v54 = vsel %vm5292_vm8, %v1377_v38, %v1381_v35  ;;  %v1144_v57 = vshll.u32 %v3882_v48, 16  ;;  %v3890_v36 = vcombine.low %v1059_v52, %v5316_v49 }
  0x62   : > { %v1405_v43 = vrot.slane %v1404_v51, 4  ;;  %1933 = vmatmul.mubr.bf16.vlgmr.msra.gmra.mxu0 %v4007_v46  ;;  %v1139_v60 = vrot.slane %v1137_v23, 1  ;;  %v1247_v61 = vshrl.u32 %v3889_v53, 16  ;;  %v1249_v62 = vshll.u32 %v3889_v53, 16  ;;  %v4824_v23 = vld [vmem:[%s5836_s1 + $0x258] sm:$0xff]  }
  0x63   : > { %4540 = vmatpush3.bf16.msra.mxu0 %v4802_v45  ;;  %v1146_v58 = vrot.slane %v1144_v57, 1  ;;  %v1254_v1 = vshrl.u32 %v3890_v36, 16  ;;  %v1256_v3 = vshll.u32 %v3890_v36, 16 }
  0x64   : > { %v1410_v5 = vsel %vm5292_vm8, %v1405_v43, %v1409_v44  ;;  %4541 = vmatprep.subr.bf16.mxu0 %v4804_v21  ;;  %v1140_v6 = vor.u32 %v1139_v60, %v1135_v28  ;;  %v1251_v7 = vrot.slane %v1249_v62, 1  ;;  %v4813_v44 = vld [vmem:[%s5836_s1 + $0x2e8] sm:$0xff]   ;;  %v5359_v28 = vld [vmem:[#allocation2 + $0x24] sm:$0x1]  ;;  %v1036_v60 = vld [vmem:[#allocation2 + $0x20] sm:$0xe] }
  0x65   : > { %v4009_v9 = vcombine.low %v1382_v54, %v1410_v5  ;;  %v4010_v4 = vcombine.high %v1382_v54, %v1410_v5  ;;  %v1147_v11 = vor.u32 %v1146_v58, %v1142_v56  ;;  %v1258_v13 = vrot.slane %v1256_v3, 1  ;;  %v5367_v56 = vld [vmem:[#allocation2 + $0x2c] sm:$0x1]  ;;  %v1037_v58 = vld [vmem:[#allocation2 + $0x28] sm:$0xe] }
  0x66   : > { %v3907_v15 = vcombine.low %v1020_v55, %v1140_v6  ;;  %v3910_v16 = vsel %vm281_vm0, %v5298_v20, %v1140_v6  ;;  %v1252_v18 = vor.u32 %v1251_v7, %v1247_v61  ;;  %v4816_v20 = vld [vmem:[%s5836_s1 + $0x260] sm:$0xff]   ;;  %v4815_v55 = vld [vmem:[%s5836_s1 + $0x2a8] sm:$0xff]   ;;  %v3884_v7 = vcombine.low %v1037_v58, %v5367_v56 }
  0x67   : > { %1997 = vmatprep.mubr.bf16.mxu1 %v4010_v4  ;;  %4542 = vmatpush3.bf16.msra.mxu0 %v4806_v0  ;;  %v3913_v19 = vcombine.low %v1022_v59, %v1147_v11  ;;  %v3916_v22 = vsel %vm281_vm0, %v5300_v26, %v1147_v11  ;;  %v1421_v17 = vshll.u32 %v3910_v16, 16  ;;  %v1259_v25 = vor.u32 %v1258_v13, %v1254_v1  ;;  %v4807_v26 = vld [vmem:[%s5836_s1 + $0x2b0] sm:$0xff]   ;;  %v4817_v59 = vld [vmem:[%s5836_s1 + $0x2e0] sm:$0xff]   ;;  %v4826_v1 = vld [vmem:[%s5836_s1 + $0x218] sm:$0xff]  }
  0x68   : > { %1998 = vmatmul.mubr.bf16.vlgmr.msra.gmra.mxu1 %v4009_v9  ;;  %v1412_v29 = vshrl.u32 %v3907_v15, 16  ;;  %v1415_v30 = vshll.u32 %v3907_v15, 16  ;;  %v1449_v31 = vshll.u32 %v3916_v22, 16  ;;  %v3908_v32 = vcombine.low %v1044_v2, %v1252_v18  ;;  %4543 = vmatprep.subr.bf16.mxu0 %v4812_v8  ;;  %v4819_v0 = vld [vmem:[%s5836_s1 + $0x2a0] sm:$0xff]   ;;  %v5382_v8 = vld [vmem:[#allocation2 + $0x2c] sm:$0x1] }
  0x69   : > { %4580 = vmatpush3.bf16.msra.mxu1 %v4803_v63  ;;  %v1423_v33 = vrot.slane %v1421_v17, 5  ;;  %v1440_v34 = vshrl.u32 %v3913_v19, 16  ;;  %v1443_v35 = vshll.u32 %v3913_v19, 16  ;;  %v3912_v37 = vsel %vm281_vm0, %v5305_v39, %v1252_v18  ;;  %v4818_v39 = vld [vmem:[%s5836_s1 + $0x220] sm:$0xff]   ;;  %v4825_v9 = vld [vmem:[%s5836_s1 + $0x2d8] sm:$0xff]   ;;  %v4828_v4 = vld [vmem:[%s5836_s1 + $0x250] sm:$0xff]  }
  0x6a   : > { %4581 = vmatprep.subr.bf16.mxu1 %v4805_v10  ;;  %v1414_v24 = vrot.slane %v1412_v29, 4  ;;  %v1417_v40 = vrot.slane %v1415_v30, 5  ;;  %v1451_v41 = vrot.slane %v1449_v31, 5  ;;  %v3914_v42 = vcombine.low %v1046_v12, %v1259_v25  ;;  %v5392_v15 = vld [vmem:[#allocation2 + $0x34] sm:$0x1] }
  0x6b   : > { %v1442_v45 = vrot.slane %v1440_v34, 4  ;;  %v1445_v46 = vrot.slane %v1443_v35, 5  ;;  %v3918_v47 = vsel %vm281_vm0, %v5316_v49, %v1259_v25  ;;  %v1426_v38 = vshrl.u32 %v3908_v32, 16  ;;  %4544 = vmatpush3.bf16.msra.mxu0 %v4814_v27  ;;  %v1060_v16 = vld [vmem:[#allocation2 + $0x28] sm:$0xe]  ;;  %v4827_v34 = vld [vmem:[%s5836_s1 + $0x298] sm:$0xff]  }
  0x6c   : > { %v1418_v21 = vor.u32 %v1417_v40, %v1414_v24  ;;  %v1429_v48 = vshll.u32 %v3908_v32, 16  ;;  %v1435_v50 = vshll.u32 %v3912_v37, 16  ;;  %v1454_v51 = vshrl.u32 %v3914_v42, 16  ;;  %4545 = vmatprep.subr.bf16.mxu0 %v4816_v20  ;;  %v1024_v17 = vld [vmem:[#allocation2 + $0x20] sm:$0xf] }
  0x6d   : > { %4582 = vmatpush3.bf16.msra.mxu1 %v4807_v26  ;;  %v1446_v52 = vor.u32 %v1445_v46, %v1442_v45  ;;  %v1428_v49 = vrot.slane %v1426_v38, 4  ;;  %v1457_v53 = vshll.u32 %v3914_v42, 16  ;;  %v1463_v54 = vshll.u32 %v3918_v47, 16  ;;  %v1061_v27 = vld [vmem:[#allocation2 + $0x30] sm:$0xe] }
  0x6e   : > { %v1419_v57 = vrot.slane %v1418_v21, 4  ;;  %v1431_v36 = vrot.slane %v1429_v48, 5  ;;  %v1456_v43 = vrot.slane %v1454_v51, 4  ;;  %4583 = vmatprep.subr.bf16.mxu1 %v4813_v44  ;;  %v1437_v62 = vrot.slane %v1435_v50, 5  ;;  %v1026_v26 = vld [vmem:[#allocation2 + $0x28] sm:$0xf] }
  0x6f   : > { %v1447_v61 = vrot.slane %v1446_v52, 4  ;;  %v1459_v63 = vrot.slane %v1457_v53, 5  ;;  %4546 = vmatpush3.bf16.msra.mxu0 %v4818_v39  ;;  %v3883_v2 = vcombine.low %v1036_v60, %v5359_v28  ;;  %v1465_v6 = vrot.slane %v1463_v54, 5  ;;  %v1048_v21 = vld [vmem:[#allocation2 + $0x28] sm:$0xf]  ;;  %v4830_v50 = vld [vmem:[%s5836_s1 + $0x210] sm:$0xff]  }
  0x70   : > { %v1424_v3 = vsel %vm5292_vm8, %v1419_v57, %v1423_v33  ;;  %v1432_v5 = vor.u32 %v1431_v36, %v1428_v49  ;;  %4547 = vmatprep.subr.bf16.mxu0 %v4824_v23  ;;  %v1156_v25 = vshrl.u32 %v3884_v7, 16  ;;  %v1158_v31 = vshll.u32 %v3884_v7, 16 }
  0x71   : > { %v1452_v10 = vsel %vm5292_vm8, %v1447_v61, %v1451_v41  ;;  %v1460_v11 = vor.u32 %v1459_v63, %v1456_v43  ;;  %4584 = vmatpush3.bf16.msra.mxu1 %v4815_v55  ;;  %v1149_v12 = vshrl.u32 %v3883_v2, 16  ;;  %v1151_v13 = vshll.u32 %v3883_v2, 16  ;;  %v4829_v41 = vld [vmem:[%s5836_s1 + $0x2d0] sm:$0xff]  }
  0x72   : > { %v4012_v18 = vcombine.high %v1424_v3, %v1452_v10  ;;  %v1433_v19 = vrot.slane %v1432_v5, 4  ;;  %v4011_v22 = vcombine.low %v1424_v3, %v1452_v10  ;;  %4585 = vmatprep.subr.bf16.mxu1 %v4817_v59  ;;  %v3891_v32 = vcombine.low %v1060_v16, %v5382_v8  ;;  %v4831_v43 = vld [vmem:[%s5836_s1 + $0x290] sm:$0xff]  }
  0x73   : > { %v1461_v29 = vrot.slane %v1460_v11, 4  ;;  %v1153_v30 = vrot.slane %v1151_v13, 1  ;;  %4548 = vmatpush3.bf16.msra.mxu0 %v4826_v1  ;;  %v3892_v33 = vcombine.low %v1061_v27, %v5392_v15  ;;  %v1160_v24 = vrot.slane %v1158_v31, 1  ;;  %v1050_v63 = vld [vmem:[#allocation2 + $0x30] sm:$0xf]  ;;  %v4836_v1 = vld [vmem:[%s5836_s1 + $0x248] sm:$0xff]  }
  0x74   : > { %1940 = vmatprep.mubr.bf16.mxu0 %v4012_v18  ;;  %v1438_v20 = vsel %vm5292_vm8, %v1433_v19, %v1437_v62  ;;  %4549 = vmatprep.subr.bf16.mxu0 %v4828_v4  ;;  %v1261_v40 = vshrl.u32 %v3891_v32, 16  ;;  %v1263_v45 = vshll.u32 %v3891_v32, 16  ;;  %v4837_v4 = vld [vmem:[%s5836_s1 + $0x2c8] sm:$0xff]   ;;  %v5428_v13 = vld [vmem:[#allocation2 + $0x3c] sm:$0x1] }
  0x75   : > { %v1466_v35 = vsel %vm5292_vm8, %v1461_v29, %v1465_v6  ;;  %1941 = vmatmul.mubr.bf16.gmra.mxu0 %v4011_v22  ;;  %4586 = vmatpush3.bf16.msra.mxu1 %v4819_v0  ;;  %v1154_v37 = vor.u32 %v1153_v30, %v1149_v12  ;;  %v1268_v46 = vshrl.u32 %v3892_v33, 16  ;;  %v1161_v47 = vor.u32 %v1160_v24, %v1156_v25  ;;  %v1038_v16 = vld [vmem:[#allocation2 + $0x30] sm:$0xe]  ;;  %v1039_v25 = vld [vmem:[#allocation2 + $0x38] sm:$0xe]  ;;  %v4838_v27 = vld [vmem:[%s5836_s1 + $0x208] sm:$0xff]  }
  0x76   : > { %v4014_v42 = vcombine.high %v1438_v20, %v1466_v35  ;;  %v4013_v44 = vcombine.low %v1438_v20, %v1466_v35  ;;  %4587 = vmatprep.subr.bf16.mxu1 %v4825_v9  ;;  %v1270_v48 = vshll.u32 %v3892_v33, 16  ;;  %v1265_v23 = vrot.slane %v1263_v45, 1  ;;  %v5421_v9 = vld [vmem:[#allocation2 + $0x34] sm:$0x1]  ;;  %v5433_v32 = vld [vmem:[#allocation2 + $0x3c] sm:$0x1] }
  0x77   : > { %v3919_v38 = vcombine.low %v1024_v17, %v1154_v37  ;;  %v3922_v39 = vsel %vm281_vm0, %v5359_v28, %v1154_v37  ;;  %v3925_v52 = vcombine.low %v1026_v26, %v1161_v47  ;;  %v3928_v49 = vsel %vm281_vm0, %v5367_v56, %v1161_v47  ;;  %4550 = vmatpush3.bf16.msra.mxu0 %v4830_v50  ;;  %v5438_v35 = vld [vmem:[#allocation2 + $0x44] sm:$0x1] }
  0x78   : > { %2005 = vmatprep.mubr.bf16.mxu1 %v4014_v42  ;;  %v1477_v51 = vshll.u32 %v3922_v39, 16  ;;  %v1505_v57 = vshll.u32 %v3928_v49, 16  ;;  %v1266_v28 = vor.u32 %v1265_v23, %v1261_v40  ;;  %v1272_v36 = vrot.slane %v1270_v48, 1  ;;  %4551 = vmatprep.subr.bf16.mxu0 %v4836_v1  ;;  %v1062_v42 = vld [vmem:[#allocation2 + $0x38] sm:$0xe]  ;;  %v4839_v23 = vld [vmem:[%s5836_s1 + $0x288] sm:$0xff]  }
  0x79   : > { %2006 = vmatmul.mubr.bf16.gmra.mxu1 %v4013_v44  ;;  %v1468_v53 = vshrl.u32 %v3919_v38, 16  ;;  %v1471_v54 = vshll.u32 %v3919_v38, 16  ;;  %v1496_v61 = vshrl.u32 %v3925_v52, 16  ;;  %v1499_v62 = vshll.u32 %v3925_v52, 16  ;;  %v1063_v44 = vld [vmem:[#allocation2 + $0x40] sm:$0xe] }
  0x7a   : > { %v1479_v55 = vrot.slane %v1477_v51, 5  ;;  %4588 = vmatpush3.bf16.msra.mxu1 %v4827_v34  ;;  %v1507_v0 = vrot.slane %v1505_v57, 5  ;;  %v1273_v56 = vor.u32 %v1272_v36, %v1268_v46  ;;  %v3920_v58 = vcombine.low %v1048_v21, %v1266_v28  ;;  %v1028_v51 = vld [vmem:[#allocation2 + $0x30] sm:$0xf]  ;;  %v1030_v36 = vld [vmem:[#allocation2 + $0x38] sm:$0xf] }
  0x7b   : > { %v1470_v59 = vrot.slane %v1468_v53, 4  ;;  %v1473_v60 = vrot.slane %v1471_v54, 5  ;;  %4589 = vmatprep.subr.bf16.mxu1 %v4829_v41  ;;  %v3924_v2 = vsel %vm281_vm0, %v5382_v8, %v1266_v28  ;;  %v1498_v5 = vrot.slane %v1496_v61, 4  ;;  %4552 = vmatpush3.bf16.msra.mxu0 %v4838_v27 }
  0x7c   : > { %v1501_v6 = vrot.slane %v1499_v62, 5  ;;  %v1491_v7 = vshll.u32 %v3924_v2, 16  ;;  %v3926_v10 = vcombine.low %v1050_v63, %v1273_v56  ;;  %v3930_v11 = vsel %vm281_vm0, %v5392_v15, %v1273_v56  ;;  %v1052_v63 = vld [vmem:[#allocation2 + $0x38] sm:$0xf] }
  0x7d   : > { %v1474_v3 = vor.u32 %v1473_v60, %v1470_v59  ;;  %v1482_v12 = vshrl.u32 %v3920_v58, 16  ;;  %v1485_v8 = vshll.u32 %v3920_v58, 16  ;;  %v1519_v17 = vshll.u32 %v3930_v11, 16  ;;  %v4841_v60 = vld [vmem:[%s5836_s1 + $0x2c0] sm:$0xff]  }
  0x7e   : > { %4590 = vmatpush3.bf16.msra.mxu1 %v4831_v43  ;;  %v1502_v19 = vor.u32 %v1501_v6, %v1498_v5  ;;  %v1493_v22 = vrot.slane %v1491_v7, 5  ;;  %v1510_v15 = vshrl.u32 %v3926_v10, 16  ;;  %v1513_v31 = vshll.u32 %v3926_v10, 16  ;;  %v4842_v58 = vld [vmem:[%s5836_s1 + $0x200] sm:$0xff]  }
  0x7f   : > { %v1475_v18 = vrot.slane %v1474_v3, 4  ;;  %4591 = vmatprep.subr.bf16.mxu1 %v4837_v4  ;;  %v1484_v29 = vrot.slane %v1482_v12, 4  ;;  %v1487_v30 = vrot.slane %v1485_v8, 5  ;;  %v1521_v33 = vrot.slane %v1519_v17, 5  ;;  %v4843_v3 = vld [vmem:[%s5836_s1 + $0x280] sm:$0xff]  }
  0x80   : > { %v1503_v26 = vrot.slane %v1502_v19, 4  ;;  %v3885_v34 = vcombine.low %v1038_v16, %v5421_v9  ;;  %v1512_v24 = vrot.slane %v1510_v15, 4  ;;  %v1515_v40 = vrot.slane %v1513_v31, 5  ;;  %v1054_v10 = vld [vmem:[#allocation2 + $0x40] sm:$0xf]  ;;  %v4850_v16 = vld [vmem:[%s5836_s1 + $0x378] sm:$0xff]  }
  0x81   : > { %v1480_v20 = vsel %vm5292_vm8, %v1475_v18, %v1479_v55  ;;  %v1488_v37 = vor.u32 %v1487_v30, %v1484_v29  ;;  %v3886_v41 = vcombine.low %v1039_v25, %v5428_v13  ;;  %v3893_v38 = vcombine.low %v1062_v42, %v5433_v32  ;;  %v4840_v55 = vld [vmem:[%s5836_s1 + $0x240] sm:$0xff]   ;;  %v5475_v42 = vld [vmem:[#allocation2 + $0x8] sm:$0xf] }
  0x82   : > { %v1508_v45 = vsel %vm5292_vm8, %v1503_v26, %v1507_v0  ;;  %v1163_v46 = vshrl.u32 %v3885_v34, 16  ;;  %v1165_v47 = vshll.u32 %v3885_v34, 16  ;;  %v1516_v48 = vor.u32 %v1515_v40, %v1512_v24  ;;  %4592 = vmatpush3.bf16.msra.mxu1 %v4839_v23  ;;  %4553 = vmatprep.subr.bf16.mxu0 %v4840_v55 }
  0x83   : > { %v4016_v39 = vcombine.high %v1480_v20, %v1508_v45  ;;  %v1489_v21 = vrot.slane %v1488_v37, 4  ;;  %v4015_v50 = vcombine.low %v1480_v20, %v1508_v45  ;;  %v1170_v49 = vshrl.u32 %v3886_v41, 16  ;;  %4593 = vmatprep.subr.bf16.mxu1 %v4841_v60  ;;  %4554 = vmatpush3.bf16.msra.mxu0 %v4842_v58  ;;  %v2054_v45 = vld [vmem:[#allocation2 + $0xc] sm:$0x1] }
  0x84   : > { %v1167_v52 = vrot.slane %v1165_v47, 1  ;;  %v1172_v53 = vshll.u32 %v3886_v41, 16  ;;  %v3894_v54 = vcombine.low %v1063_v44, %v5438_v35  ;;  %v1517_v28 = vrot.slane %v1516_v48, 4  ;;  %4619 = vmatprep.subr.bf16.mxu0 %v4850_v16  ;;  %v5477_v44 = vld [vmem:[#allocation2 + $0x10] sm:$0xf] }
  0x85   : > { %1948 = vmatprep.mubr.bf16.mxu0 %v4016_v39  ;;  %v1494_v57 = vsel %vm5292_vm8, %v1489_v21, %v1493_v22  ;;  %v1275_v43 = vshrl.u32 %v3893_v38, 16  ;;  %v1277_v59 = vshll.u32 %v3893_v38, 16  ;;  %v5479_v47 = vld [vmem:[#allocation2 + $0x10] sm:$0xf]  ;;  %v2071_v38 = vld [vmem:[#allocation2 + $0x14] sm:$0x1] }
  0x86   : > { %1949 = vmatmul.mubr.bf16.gmra.mxu0 %v4015_v50  ;;  %v1168_v61 = vor.u32 %v1167_v52, %v1163_v46  ;;  %v1174_v62 = vrot.slane %v1172_v53, 1  ;;  %v1282_v0 = vshrl.u32 %v3894_v54, 16  ;;  %v1284_v56 = vshll.u32 %v3894_v54, 16  ;;  %4594 = vmatpush3.bf16.msra.mxu1 %v4843_v3  ;;  %v2055_v46 = vld [vmem:[#allocation2 + $0x14] sm:$0x1]  ;;  %v4851_v53 = vld [vmem:[%s5836_s1 + $0x3f8] sm:$0xff]  }
  0x87   : > { %v1522_v2 = vsel %vm5292_vm8, %v1517_v28, %v1521_v33  ;;  %v1279_v1 = vrot.slane %v1277_v59, 1  ;;  %v5481_v50 = vld [vmem:[#allocation2 + $0x18] sm:$0xf]  ;;  %4659 = vmatprep.subr.bf16.mxu1 %v4851_v53 }
  0x88   : > { %v4018_v5 = vcombine.high %v1494_v57, %v1522_v2  ;;  %v4017_v6 = vcombine.low %v1494_v57, %v1522_v2  ;;  %v1175_v7 = vor.u32 %v1174_v62, %v1170_v49  ;;  %v3931_v4 = vcombine.low %v1028_v51, %v1168_v61  ;;  %v2072_v51 = vld [vmem:[#allocation2 + $0x1c] sm:$0x1] }
  0x89   : > { %v3934_v11 = vsel %vm281_vm0, %v5421_v9, %v1168_v61  ;;  %v1280_v12 = vor.u32 %v1279_v1, %v1275_v43  ;;  %v1286_v8 = vrot.slane %v1284_v56, 1  ;;  %v4055_v61 = vcombine.low %v5475_v42, %v2054_v45  ;;  %v2057_v45 = vld [vmem:[#allocation2 + $0x24] sm:$0x1] }
  0x8a   : > { %2013 = vmatprep.mubr.bf16.mxu1 %v4018_v5  ;;  %v3937_v18 = vcombine.low %v1030_v36, %v1175_v7  ;;  %v3940_v19 = vsel %vm281_vm0, %v5428_v13, %v1175_v7  ;;  %v1524_v22 = vshrl.u32 %v3931_v4, 16  ;;  %v1527_v17 = vshll.u32 %v3931_v4, 16 }
  0x8b   : > { %2014 = vmatmul.mubr.bf16.gmra.mxu1 %v4017_v6  ;;  %v1533_v25 = vshll.u32 %v3934_v11, 16  ;;  %v1561_v27 = vshll.u32 %v3940_v19, 16  ;;  %v1287_v29 = vor.u32 %v1286_v8, %v1282_v0  ;;  %v3932_v30 = vcombine.low %v1052_v63, %v1280_v12 }
  0x8c   : > { %v1526_v9 = vrot.slane %v1524_v22, 4  ;;  %v1529_v15 = vrot.slane %v1527_v17, 5  ;;  %v1552_v31 = vshrl.u32 %v3937_v18, 16  ;;  %v1555_v20 = vshll.u32 %v3937_v18, 16 }
  0x8d   : > { %v1535_v26 = vrot.slane %v1533_v25, 5  ;;  %v1563_v33 = vrot.slane %v1561_v27, 5  ;;  %v3936_v34 = vsel %vm281_vm0, %v5433_v32, %v1280_v12  ;;  %v3938_v37 = vcombine.low %v1054_v10, %v1287_v29 }
  0x8e   : > { %v1530_v24 = vor.u32 %v1529_v15, %v1526_v9  ;;  %v1554_v13 = vrot.slane %v1552_v31, 4  ;;  %v1557_v40 = vrot.slane %v1555_v20, 5  ;;  %v3942_v41 = vsel %vm281_vm0, %v5438_v35, %v1287_v29 }
  0x8f   : > { %v1538_v39 = vshrl.u32 %v3932_v30, 16  ;;  %v1541_v21 = vshll.u32 %v3932_v30, 16  ;;  %v1547_v48 = vshll.u32 %v3936_v34, 16  ;;  %v1566_v32 = vshrl.u32 %v3938_v37, 16  ;;  %v2049_v34 = vld [vmem:[#allocation2 + $0x20] sm:$0xf] }
  0x90   : > { %v1531_v23 = vrot.slane %v1530_v24, 4  ;;  %v1558_v52 = vor.u32 %v1557_v40, %v1554_v13  ;;  %v1569_v49 = vshll.u32 %v3938_v37, 16  ;;  %v1575_v35 = vshll.u32 %v3942_v41, 16  ;;  %v2056_v37 = vld [vmem:[#allocation2 + $0x1c] sm:$0x1]  ;;  %v4854_v41 = vld [vmem:[%s5836_s1 + $0x370] sm:$0xff]  }
  0x91   : > { %v1540_v54 = vrot.slane %v1538_v39, 4  ;;  %v1543_v55 = vrot.slane %v1541_v21, 5  ;;  %v1568_v57 = vrot.slane %v1566_v32, 4  ;;  %v1549_v43 = vrot.slane %v1547_v48, 5  ;;  %v5511_v39 = vld [vmem:[#allocation2 + $0x28] sm:$0xf] }
  0x92   : > { %v1536_v28 = vsel %vm5292_vm8, %v1531_v23, %v1535_v26  ;;  %v1559_v36 = vrot.slane %v1558_v52, 4  ;;  %v1571_v59 = vrot.slane %v1569_v49, 5  ;;  %v4056_v62 = vcombine.low %v5477_v44, %v2055_v46  ;;  %v4852_v26 = vld [vmem:[%s5836_s1 + $0x338] sm:$0xff]   ;;  %v2073_v48 = vld [vmem:[#allocation2 + $0x24] sm:$0x1] }
  0x93   : > { %v1544_v60 = vor.u32 %v1543_v55, %v1540_v54  ;;  %v4063_v63 = vcombine.low %v5479_v47, %v2071_v38  ;;  %v1577_v58 = vrot.slane %v1575_v35, 5  ;;  %v4064_v2 = vcombine.low %v5481_v50, %v2072_v51  ;;  %v5509_v38 = vld [vmem:[#allocation2 + $0x20] sm:$0xf]  ;;  %v2074_v32 = vld [vmem:[#allocation2 + $0x2c] sm:$0x1]  ;;  %v4855_v55 = vld [vmem:[%s5836_s1 + $0x3f0] sm:$0xff]  }
  0x94   : > { %v1564_v0 = vsel %vm5292_vm8, %v1559_v36, %v1563_v33  ;;  %v1572_v56 = vor.u32 %v1571_v59, %v1568_v57  ;;  %v2120_v6 = vshrl.u32 %v4055_v61, 16  ;;  %v2122_v4 = vshll.u32 %v4055_v61, 16  ;;  %v5501_v33 = vld [vmem:[#allocation2 + $0x18] sm:$0xf] }
  0x95   : > { %v4020_v1 = vcombine.high %v1536_v28, %v1564_v0  ;;  %v1545_v3 = vrot.slane %v1544_v60, 4  ;;  %v4019_v5 = vcombine.low %v1536_v28, %v1564_v0  ;;  %v2127_v10 = vshrl.u32 %v4056_v62, 16 }
  0x96   : > { %v1573_v7 = vrot.slane %v1572_v56, 4  ;;  %v2129_v11 = vshll.u32 %v4056_v62, 16  ;;  %v2216_v8 = vshrl.u32 %v4063_v63, 16  ;;  %v2218_v16 = vshll.u32 %v4063_v63, 16 }
  0x97   : > { %1956 = vmatprep.mubr.bf16.mxu0 %v4020_v1  ;;  %v1550_v12 = vsel %vm5292_vm8, %v1545_v3, %v1549_v43  ;;  %v2223_v18 = vshrl.u32 %v4064_v2, 16  ;;  %v2124_v22 = vrot.slane %v2122_v4, 1  ;;  %v2225_v25 = vshll.u32 %v4064_v2, 16  ;;  %v4856_v43 = vld [vmem:[%s5836_s1 + $0x330] sm:$0xff]   ;;  %v4865_v1 = vld [vmem:[%s5836_s1 + $0x3e8] sm:$0xff]  }
  0x98   : > { %v1578_v19 = vsel %vm5292_vm8, %v1573_v7, %v1577_v58  ;;  %1957 = vmatmul.mubr.bf16.gmra.mxu0 %v4019_v5  ;;  %v2131_v17 = vrot.slane %v2129_v11, 1  ;;  %v2220_v30 = vrot.slane %v2218_v16, 1  ;;  %v4135_v40 = vcombine.low %v5475_v42, %v5477_v44  ;;  %v4853_v44 = vld [vmem:[%s5836_s1 + $0x3b8] sm:$0xff]   ;;  %v4868_v7 = vld [vmem:[%s5836_s1 + $0x360] sm:$0xff]   ;;  %v2050_v4 = vld [vmem:[#allocation2 + $0x28] sm:$0xf] }
  0x99   : > { %v4022_v27 = vcombine.high %v1550_v12, %v1578_v19  ;;  %v4021_v29 = vcombine.low %v1550_v12, %v1578_v19  ;;  %v2125_v9 = vor.u32 %v2124_v22, %v2120_v6  ;;  %v2227_v31 = vrot.slane %v2225_v25, 1  ;;  %v4866_v6 = vld [vmem:[%s5836_s1 + $0x328] sm:$0xff]   ;;  %v2059_v16 = vld [vmem:[#allocation2 + $0x34] sm:$0x1]  ;;  %v4869_v22 = vld [vmem:[%s5836_s1 + $0x3e0] sm:$0xff]  }
  0x9a   : > { %v2132_v15 = vor.u32 %v2131_v17, %v2127_v10  ;;  %v2221_v20 = vor.u32 %v2220_v30, %v2216_v8  ;;  %v4057_v46 = vcombine.low %v5501_v33, %v2056_v37  ;;  %v4058_v21 = vcombine.low %v2049_v34, %v2057_v45  ;;  %v2051_v10 = vld [vmem:[#allocation2 + $0x30] sm:$0xf]  ;;  %v4867_v12 = vld [vmem:[%s5836_s1 + $0x3a8] sm:$0xff]   ;;  %v4870_v17 = vld [vmem:[%s5836_s1 + $0x320] sm:$0xff]  }
  0x9b   : > { %2021 = vmatprep.mubr.bf16.mxu1 %v4022_v27  ;;  %v2228_v13 = vor.u32 %v2227_v31, %v2223_v18  ;;  %v4065_v42 = vcombine.low %v5509_v38, %v2073_v48  ;;  %v4066_v53 = vcombine.low %v5511_v39, %v2074_v32  ;;  %v4137_v54 = vcombine.low %v5479_v47, %v5481_v50  ;;  %v4864_v47 = vld [vmem:[%s5836_s1 + $0x368] sm:$0xff]   ;;  %v4857_v50 = vld [vmem:[%s5836_s1 + $0x3b0] sm:$0xff]   ;;  %v4871_v45 = vld [vmem:[%s5836_s1 + $0x3a0] sm:$0xff]  }
  0x9c   : > { %2022 = vmatmul.mubr.bf16.gmra.mxu1 %v4021_v29  ;;  %v4136_v24 = vcombine.low %v2125_v9, %v2132_v15  ;;  %v2134_v23 = vshrl.u32 %v4057_v46, 16  ;;  %v2136_v52 = vshll.u32 %v4057_v46, 16  ;;  %v2141_v49 = vshrl.u32 %v4058_v21, 16  ;;  %v2058_v8 = vld [vmem:[#allocation2 + $0x2c] sm:$0x1] }
  0x9d   : > { %v4138_v51 = vcombine.low %v2221_v20, %v2228_v13  ;;  %v2143_v35 = vshll.u32 %v4058_v21, 16  ;;  %v2230_v28 = vshrl.u32 %v4065_v42, 16  ;;  %v2232_v36 = vshll.u32 %v4065_v42, 16  ;;  %v2067_v18 = vld [vmem:[#allocation2 + $0x30] sm:$0xf]  ;;  %v4878_v20 = vld [vmem:[%s5836_s1 + $0x358] sm:$0xff]  }
  0x9e   : > { %2608 = vmatprep.mubr.bf16.mxu0 %v4136_v24  ;;  %v2138_v57 = vrot.slane %v2136_v52, 1  ;;  %v2237_v60 = vshrl.u32 %v4066_v53, 16  ;;  %v2239_v61 = vshll.u32 %v4066_v53, 16  ;;  %v4139_v2 = vcombine.low %v5501_v33, %v2049_v34  ;;  %v2068_v29 = vld [vmem:[#allocation2 + $0x38] sm:$0xf] }
  0x9f   : > { %2673 = vmatprep.mubr.bf16.mxu1 %v4138_v51  ;;  %v2145_v59 = vrot.slane %v2143_v35, 1  ;;  %v2234_v63 = vrot.slane %v2232_v36, 1  ;;  %v4141_v19 = vcombine.low %v5509_v38, %v5511_v39  ;;  %v4059_v25 = vcombine.low %v2050_v4, %v2058_v8  ;;  %v2075_v30 = vld [vmem:[#allocation2 + $0x34] sm:$0x1]  ;;  %v2076_v9 = vld [vmem:[#allocation2 + $0x3c] sm:$0x1] }
  0xa0   : > { %2609 = vmatmul.mubr.bf16.vlgmr.msra.gmra.mxu0 %v4135_v40  ;;  %v2139_v62 = vor.u32 %v2138_v57, %v2134_v23  ;;  %v2241_v56 = vrot.slane %v2239_v61, 1  ;;  %v4060_v27 = vcombine.low %v2051_v10, %v2059_v16  ;;  %v4067_v15 = vcombine.low %v2067_v18, %v2075_v30  ;;  %v4879_v39 = vld [vmem:[%s5836_s1 + $0x3d8] sm:$0xff]   ;;  %v4883_v57 = vld [vmem:[%s5836_s1 + $0x3d0] sm:$0xff]   ;;  %v2061_v61 = vld [vmem:[#allocation2 + $0x44] sm:$0x1] }
  0xa1   : > { %4620 = vmatpush3.bf16.msra.mxu0 %v4852_v26  ;;  %v2146_v0 = vor.u32 %v2145_v59, %v2141_v49  ;;  %v2235_v58 = vor.u32 %v2234_v63, %v2230_v28  ;;  %v4068_v31 = vcombine.low %v2068_v29, %v2076_v9  ;;  %v2148_v26 = vshrl.u32 %v4059_v25, 16  ;;  %v4880_v23 = vld [vmem:[%s5836_s1 + $0x318] sm:$0xff]   ;;  %v4884_v28 = vld [vmem:[%s5836_s1 + $0x310] sm:$0xff]   ;;  %v2053_v59 = vld [vmem:[#allocation2 + $0x40] sm:$0xf] }
  0xa2   : > { %4621 = vmatprep.subr.bf16.mxu0 %v4854_v41  ;;  %v2242_v5 = vor.u32 %v2241_v56, %v2237_v60  ;;  %v2150_v33 = vshll.u32 %v4059_v25, 16  ;;  %v2155_v34 = vshrl.u32 %v4060_v27, 16  ;;  %v2157_v37 = vshll.u32 %v4060_v27, 16  ;;  %v4881_v49 = vld [vmem:[%s5836_s1 + $0x398] sm:$0xff]   ;;  %v2078_v56 = vld [vmem:[#allocation2 + $0x4c] sm:$0x1] }
  0xa3   : > { %v4140_v3 = vcombine.low %v2139_v62, %v2146_v0  ;;  %v2244_v24 = vshrl.u32 %v4067_v15, 16  ;;  %v2246_v13 = vshll.u32 %v4067_v15, 16  ;;  %v2251_v40 = vshrl.u32 %v4068_v31, 16  ;;  %v2052_v36 = vld [vmem:[#allocation2 + $0x38] sm:$0xf]  ;;  %v4895_v27 = vld [vmem:[%s5836_s1 + $0x388] sm:$0xff]  }
  0xa4   : > { %2674 = vmatmul.mubr.bf16.vlgmr.msra.gmra.mxu1 %v4137_v54  ;;  %v4142_v11 = vcombine.low %v2235_v58, %v2242_v5  ;;  %v2253_v41 = vshll.u32 %v4068_v31, 16  ;;  %v2152_v46 = vrot.slane %v2150_v33, 1  ;;  %v2159_v38 = vrot.slane %v2157_v37, 1  ;;  %v4882_v54 = vld [vmem:[%s5836_s1 + $0x350] sm:$0xff]   ;;  %v2060_v60 = vld [vmem:[#allocation2 + $0x3c] sm:$0x1] }
  0xa5   : > { %4660 = vmatpush3.bf16.msra.mxu1 %v4853_v44  ;;  %4622 = vmatpush3.bf16.msra.mxu0 %v4856_v43  ;;  %v2248_v21 = vrot.slane %v2246_v13, 1  ;;  %v4143_v44 = vcombine.low %v2050_v4, %v2051_v10  ;;  %v4145_v53 = vcombine.low %v2067_v18, %v2068_v29  ;;  %v4885_v43 = vld [vmem:[%s5836_s1 + $0x390] sm:$0xff]   ;;  %v4061_v62 = vcombine.low %v2052_v36, %v2060_v60  ;;  %v2077_v0 = vld [vmem:[#allocation2 + $0x44] sm:$0x1]  ;;  %v2724_v13 = vld [vmem:[#allocation2 + $0xc] sm:$0x1] }
  0xa6   : > { %4661 = vmatprep.subr.bf16.mxu1 %v4855_v55  ;;  %4623 = vmatprep.subr.bf16.mxu0 %v4864_v47  ;;  %v2255_v48 = vrot.slane %v2253_v41, 1  ;;  %v2153_v32 = vor.u32 %v2152_v46, %v2148_v26  ;;  %v2160_v51 = vor.u32 %v2159_v38, %v2155_v34  ;;  %v4062_v63 = vcombine.low %v2053_v59, %v2061_v61  ;;  %v2069_v47 = vld [vmem:[#allocation2 + $0x40] sm:$0xf]  ;;  %v2739_v41 = vld [vmem:[#allocation2 + $0x8] sm:$0xe] }
  0xa7   : > { %2616 = vmatprep.mubr.bf16.mxu0 %v4140_v3  ;;  %2681 = vmatprep.mubr.bf16.mxu1 %v4142_v11  ;;  %v2249_v52 = vor.u32 %v2248_v21, %v2244_v24  ;;  %v4069_v58 = vcombine.low %v2069_v47, %v2077_v0  ;;  %v4147_v9 = vcombine.low %v2052_v36, %v2053_v59  ;;  %v4896_v15 = vld [vmem:[%s5836_s1 + $0x340] sm:$0xff]   ;;  %v2750_v21 = vld [vmem:[#allocation2 + $0x1c] sm:$0x1]  ;;  %v2725_v59 = vld [vmem:[#allocation2 + $0x10] sm:$0xf] }
  0xa8   : > { %2617 = vmatmul.mubr.bf16.gmra.mxu0 %v4139_v2  ;;  %v2256_v42 = vor.u32 %v2255_v48, %v2251_v40  ;;  %v4144_v35 = vcombine.low %v2153_v32, %v2160_v51  ;;  %v2162_v2 = vshrl.u32 %v4061_v62, 16  ;;  %v2169_v3 = vshrl.u32 %v4062_v63, 16  ;;  %v4898_v33 = vld [vmem:[%s5836_s1 + $0x300] sm:$0xff]   ;;  %v2726_v40 = vld [vmem:[#allocation2 + $0x14] sm:$0x1] }
  0xa9   : > { %4662 = vmatpush3.bf16.msra.mxu1 %v4857_v50  ;;  %4624 = vmatpush3.bf16.msra.mxu0 %v4866_v6  ;;  %v2070_v50 = vld [vmem:[#allocation2 + $0x48] sm:$0xf]  ;;  %v2171_v5 = vshll.u32 %v4062_v63, 16  ;;  %v2258_v10 = vshrl.u32 %v4069_v58, 16  ;;  %v2260_v11 = vshll.u32 %v4069_v58, 16  ;;  %v4899_v37 = vld [vmem:[%s5836_s1 + $0x380] sm:$0xff]   ;;  %v4191_v46 = vcombine.low %v2739_v41, %v2724_v13 }
  0xaa   : > { %4663 = vmatprep.subr.bf16.mxu1 %v4865_v1  ;;  %4625 = vmatprep.subr.bf16.mxu0 %v4868_v7  ;;  %v4146_v55 = vcombine.low %v2249_v52, %v2256_v42  ;;  %v2164_v1 = vshll.u32 %v4061_v62, 16  ;;  %v4892_v6 = vld [vmem:[%s5836_s1 + $0x348] sm:$0xff]   ;;  %v4070_v4 = vcombine.low %v2070_v50, %v2078_v56  ;;  %v4149_v34 = vcombine.low %v2069_v47, %v2070_v50  ;;  %v2763_v48 = vld [vmem:[#allocation2 + $0x10] sm:$0xe]  ;;  %v2764_v32 = vld [vmem:[#allocation2 + $0x18] sm:$0xe] }
  0xab   : > { %2624 = vmatprep.mubr.bf16.mxu0 %v4144_v35  ;;  %v4893_v7 = vld [vmem:[%s5836_s1 + $0x3c8] sm:$0xff]   ;;  %v2173_v8 = vrot.slane %v2171_v5, 1  ;;  %v2262_v16 = vrot.slane %v2260_v11, 1  ;;  %v2828_v51 = vshrl.u32 %v4191_v46, 16  ;;  %v4200_v35 = vcombine.low %v2764_v32, %v2750_v21  ;;  %v2742_v36 = vld [vmem:[#allocation2 + $0x20] sm:$0xe] }
  0xac   : > { %2682 = vmatmul.mubr.bf16.gmra.mxu1 %v4141_v19  ;;  %v2265_v18 = vshrl.u32 %v4070_v4, 16  ;;  %v2267_v19 = vshll.u32 %v4070_v4, 16  ;;  %v2747_v4 = vld [vmem:[#allocation2 + $0x10] sm:$0xf]  ;;  %v5620_v32 = vld [vmem:[#allocation2 + $0x24] sm:$0x1] }
  0xad   : > { %4664 = vmatpush3.bf16.msra.mxu1 %v4867_v12  ;;  %4626 = vmatpush3.bf16.msra.mxu0 %v4870_v17  ;;  %v2166_v12 = vrot.slane %v2164_v1, 1  ;;  %v2174_v25 = vor.u32 %v2173_v8, %v2169_v3  ;;  %v2263_v29 = vor.u32 %v2262_v16, %v2258_v10  ;;  %v2947_v62 = vshrl.u32 %v4200_v35, 16 }
  0xae   : > { %4665 = vmatprep.subr.bf16.mxu1 %v4869_v22  ;;  %4627 = vmatprep.subr.bf16.mxu0 %v4878_v20  ;;  %v4894_v22 = vld [vmem:[%s5836_s1 + $0x308] sm:$0xff]   ;;  %v2269_v30 = vrot.slane %v2267_v19, 1  ;;  %v4897_v20 = vld [vmem:[%s5836_s1 + $0x3c0] sm:$0xff]   ;;  %v2949_v63 = vshll.u32 %v4200_v35, 16 }
  0xaf   : > { %2689 = vmatprep.mubr.bf16.mxu1 %v4146_v55  ;;  %v2167_v17 = vor.u32 %v2166_v12, %v2162_v2  ;;  %v2723_v55 = vld [vmem:[#allocation2 + $0x8] sm:$0xf]  ;;  %v5624_v35 = vld [vmem:[#allocation2 + $0x2c] sm:$0x1] }
  0xb0   : > { %2625 = vmatmul.mubr.bf16.gmra.mxu0 %v4143_v44  ;;  %v2270_v26 = vor.u32 %v2269_v30, %v2265_v18  ;;  %v5604_v44 = vld [vmem:[#allocation2 + $0x1c] sm:$0x1]  ;;  %v2951_v58 = vrot.slane %v2949_v63, 1  ;;  %v2744_v63 = vld [vmem:[#allocation2 + $0x30] sm:$0xe] }
  0xb1   : > { %4666 = vmatpush3.bf16.msra.mxu1 %v4871_v45  ;;  %4628 = vmatpush3.bf16.msra.mxu0 %v4880_v23  ;;  %v4148_v31 = vcombine.low %v2167_v17, %v2174_v25  ;;  %v2740_v45 = vld [vmem:[#allocation2 + $0x10] sm:$0xe]  ;;  %v2830_v23 = vshll.u32 %v4191_v46, 16  ;;  %v2749_v17 = vld [vmem:[#allocation2 + $0x18] sm:$0xf] }
  0xb2   : > { %4667 = vmatprep.subr.bf16.mxu1 %v4879_v39  ;;  %4629 = vmatprep.subr.bf16.mxu0 %v4882_v54  ;;  %v4150_v24 = vcombine.low %v2263_v29, %v2270_v26  ;;  %v4192_v38 = vcombine.low %v2740_v45, %v2726_v40  ;;  %v2748_v39 = vld [vmem:[#allocation2 + $0x14] sm:$0x1]  ;;  %v2741_v54 = vld [vmem:[#allocation2 + $0x18] sm:$0xe]  ;;  %v2952_v8 = vor.u32 %v2951_v58, %v2947_v62  ;;  %v2743_v62 = vld [vmem:[#allocation2 + $0x28] sm:$0xe] }
  0xb3   : > { %2632 = vmatprep.mubr.bf16.mxu0 %v4148_v31 }
  0xb4   : > { %2690 = vmatmul.mubr.bf16.gmra.mxu1 %v4145_v53  ;;  %v2835_v52 = vshrl.u32 %v4192_v38, 16  ;;  %v2837_v42 = vshll.u32 %v4192_v38, 16  ;;  %v5606_v53 = vld [vmem:[#allocation2 + $0x24] sm:$0x1]  ;;  %v4214_v26 = vcombine.low %v2749_v17, %v2952_v8 }
  0xb5   : > { %4668 = vmatpush3.bf16.msra.mxu1 %v4881_v49  ;;  %4630 = vmatpush3.bf16.msra.mxu0 %v4884_v28  ;;  %v4199_v49 = vcombine.low %v2763_v48, %v2748_v39  ;;  %v5612_v0 = vcombine.low %v2742_v36, %v5606_v53  ;;  %v5626_v36 = vld [vmem:[#allocation2 + $0x34] sm:$0x1] }
  0xb6   : > { %4669 = vmatprep.subr.bf16.mxu1 %v4883_v57  ;;  %4631 = vmatprep.subr.bf16.mxu0 %v4892_v6  ;;  %v2832_v57 = vrot.slane %v2830_v23, 1  ;;  %v2839_v28 = vrot.slane %v2837_v42, 1  ;;  %v3102_v38 = vshrl.u32 %v4214_v26, 16  ;;  %v3105_v48 = vshll.u32 %v4214_v26, 16  ;;  %v2766_v23 = vld [vmem:[#allocation2 + $0x28] sm:$0xe] }
  0xb7   : > { %2697 = vmatprep.mubr.bf16.mxu1 %v4150_v24  ;;  %v2940_v60 = vshrl.u32 %v4199_v49, 16  ;;  %v2942_v61 = vshll.u32 %v4199_v49, 16 }
  0xb8   : > { %2633 = vmatmul.mubr.bf16.gmra.mxu0 %v4147_v9  ;;  %v2833_v47 = vor.u32 %v2832_v57, %v2828_v51  ;;  %v2840_v50 = vor.u32 %v2839_v28, %v2835_v52  ;;  %v2765_v51 = vld [vmem:[#allocation2 + $0x20] sm:$0xe]  ;;  %v3107_v57 = vrot.slane %v3105_v48, 5 }
  0xb9   : > { %4670 = vmatpush3.bf16.msra.mxu1 %v4885_v43  ;;  %4632 = vmatpush3.bf16.msra.mxu0 %v4894_v22  ;;  %v5609_v43 = vcombine.low %v2741_v54, %v5604_v44  ;;  %v2944_v56 = vrot.slane %v2942_v61, 1  ;;  %v2851_v61 = vshll.u32 %v5612_v0, 16 }
  0xba   : > { %4671 = vmatprep.subr.bf16.mxu1 %v4893_v7  ;;  %4633 = vmatprep.subr.bf16.mxu0 %v4896_v15  ;;  %v4207_v3 = vcombine.low %v2723_v55, %v2833_v47  ;;  %v4210_v5 = vsel %vm281_vm0, %v2724_v13, %v2833_v47  ;;  %v4213_v6 = vcombine.low %v2725_v59, %v2840_v50  ;;  %v3104_v55 = vrot.slane %v3102_v38, 4 }
  0xbb   : > { %v2842_v2 = vshrl.u32 %v5609_v43, 16  ;;  %v2844_v1 = vshll.u32 %v5609_v43, 16  ;;  %v4216_v7 = vsel %vm281_vm0, %v2726_v40, %v2840_v50  ;;  %v3069_v10 = vshll.u32 %v4210_v5, 16 }
  0xbc   : > { %2698 = vmatmul.mubr.bf16.gmra.mxu1 %v4149_v34  ;;  %v3097_v11 = vshll.u32 %v4216_v7, 16  ;;  %v2945_v12 = vor.u32 %v2944_v56, %v2940_v60  ;;  %v3060_v16 = vshrl.u32 %v4207_v3, 16  ;;  %v3063_v18 = vshll.u32 %v4207_v3, 16  ;;  %v2727_v3 = vld [vmem:[#allocation2 + $0x18] sm:$0xf] }
  0xbd   : > { %4672 = vmatpush3.bf16.msra.mxu1 %v4895_v27  ;;  %4634 = vmatpush3.bf16.msra.mxu0 %v4898_v33  ;;  %v3088_v19 = vshrl.u32 %v4213_v6, 16  ;;  %v3091_v22 = vshll.u32 %v4213_v6, 16  ;;  %v3071_v25 = vrot.slane %v3069_v10, 5  ;;  %v4218_v33 = vsel %vm281_vm0, %v2750_v21, %v2952_v8 }
  0xbe   : > { %4673 = vmatprep.subr.bf16.mxu1 %v4897_v20  ;;  %v3099_v27 = vrot.slane %v3097_v11, 5  ;;  %v4208_v29 = vcombine.low %v2747_v4, %v2945_v12  ;;  %v4212_v30 = vsel %vm281_vm0, %v2748_v39, %v2945_v12  ;;  %v3062_v9 = vrot.slane %v3060_v16, 4  ;;  %v5622_v39 = vld [vmem:[#allocation2 + $0x2c] sm:$0x1]  ;;  %v2729_v11 = vld [vmem:[#allocation2 + $0x20] sm:$0xf] }
  0xbf   : > { %v3065_v15 = vrot.slane %v3063_v18, 5  ;;  %v3090_v31 = vrot.slane %v3088_v19, 4  ;;  %v3093_v20 = vrot.slane %v3091_v22, 5  ;;  %v3083_v40 = vshll.u32 %v4212_v30, 16 }
  0xc0   : > { %v3074_v34 = vshrl.u32 %v4208_v29, 16  ;;  %v3111_v41 = vshll.u32 %v4218_v33, 16  ;;  %v2846_v28 = vrot.slane %v2844_v1, 1  ;;  %v2849_v60 = vshrl.u32 %v5612_v0, 16 }
  0xc1   : > { %4674 = vmatpush3.bf16.msra.mxu1 %v4899_v37  ;;  %v3077_v37 = vshll.u32 %v4208_v29, 16  ;;  %v3066_v24 = vor.u32 %v3065_v15, %v3062_v9  ;;  %v3094_v13 = vor.u32 %v3093_v20, %v3090_v31  ;;  %v3085_v49 = vrot.slane %v3083_v40, 5 }
  0xc2   : > { %v3076_v45 = vrot.slane %v3074_v34, 4  ;;  %v3113_v21 = vrot.slane %v3111_v41, 5  ;;  %v3108_v58 = vor.u32 %v3107_v57, %v3104_v55  ;;  %v2847_v1 = vor.u32 %v2846_v28, %v2842_v2  ;;  %v2751_v41 = vld [vmem:[#allocation2 + $0x20] sm:$0xf] }
  0xc3   : > { %v3079_v46 = vrot.slane %v3077_v37, 5  ;;  %v3067_v52 = vrot.slane %v3066_v24, 4  ;;  %v3095_v42 = vrot.slane %v3094_v13, 4  ;;  %v2853_v5 = vrot.slane %v2851_v61, 1 }
  0xc4   : > { %v4201_v6 = vcombine.low %v2765_v51, %v5620_v32  ;;  %v4202_v7 = vcombine.low %v2766_v23, %v5622_v39  ;;  %v3109_v10 = vrot.slane %v3108_v58, 4  ;;  %v5639_v0 = vcombine.low %v2743_v62, %v5624_v35  ;;  %v2753_v23 = vld [vmem:[#allocation2 + $0x28] sm:$0xf]  ;;  %v2767_v58 = vld [vmem:[#allocation2 + $0x30] sm:$0xe] }
  0xc5   : > { %v3080_v54 = vor.u32 %v3079_v46, %v3076_v45  ;;  %v3072_v43 = vsel %vm5292_vm8, %v3067_v52, %v3071_v25  ;;  %v3100_v59 = vsel %vm5292_vm8, %v3095_v42, %v3099_v27  ;;  %v5642_v12 = vcombine.low %v2744_v63, %v5626_v36 }
  0xc6   : > { %v4319_v47 = vcombine.low %v3072_v43, %v3100_v59  ;;  %v4320_v50 = vcombine.high %v3072_v43, %v3100_v59  ;;  %v2854_v8 = vor.u32 %v2853_v5, %v2849_v60  ;;  %v4219_v2 = vcombine.low %v2727_v3, %v2847_v1  ;;  %v2768_v3 = vld [vmem:[#allocation2 + $0x38] sm:$0xe] }
  0xc7   : > { %v3081_v56 = vrot.slane %v3080_v54, 4  ;;  %v4222_v16 = vsel %vm281_vm0, %v5604_v44, %v2847_v1  ;;  %v2954_v18 = vshrl.u32 %v4201_v6, 16  ;;  %v3114_v19 = vsel %vm5292_vm8, %v3109_v10, %v3113_v21 }
  0xc8   : > { %3636 = vmatprep.mubr.bf16.mxu0 %v4320_v50  ;;  %v3125_v22 = vshll.u32 %v4222_v16, 16  ;;  %v2956_v17 = vshll.u32 %v4201_v6, 16  ;;  %v2961_v25 = vshrl.u32 %v4202_v7, 16  ;;  %v4225_v30 = vcombine.low %v2729_v11, %v2854_v8  ;;  %v5658_v50 = vld [vmem:[#allocation2 + $0x34] sm:$0x1] }
  0xc9   : > { %v3086_v4 = vsel %vm5292_vm8, %v3081_v56, %v3085_v49  ;;  %3637 = vmatmul.mubr.bf16.vlgmr.msra.gmra.mxu0 %v4319_v47  ;;  %v4228_v9 = vsel %vm281_vm0, %v5606_v53, %v2854_v8  ;;  %v3116_v15 = vshrl.u32 %v4219_v2, 16  ;;  %v3119_v31 = vshll.u32 %v4219_v2, 16  ;;  %v5660_v56 = vld [vmem:[#allocation2 + $0x3c] sm:$0x1] }
  0xca   : > { %v4321_v27 = vcombine.low %v3086_v4, %v3114_v19  ;;  %v4322_v29 = vcombine.high %v3086_v4, %v3114_v19  ;;  %v3127_v20 = vrot.slane %v3125_v22, 5  ;;  %v3153_v26 = vshll.u32 %v4228_v9, 16  ;;  %v2733_v19 = vld [vmem:[#allocation2 + $0x30] sm:$0xf] }
  0xcb   : > { %v3144_v33 = vshrl.u32 %v4225_v30, 16  ;;  %v3147_v44 = vshll.u32 %v4225_v30, 16  ;;  %v2958_v34 = vrot.slane %v2956_v17, 1  ;;  %v2963_v37 = vshll.u32 %v4202_v7, 16  ;;  %v5664_v7 = vld [vmem:[#allocation2 + $0x3c] sm:$0x1] }
  0xcc   : > { %3701 = vmatprep.mubr.bf16.mxu1 %v4322_v29  ;;  %v3118_v24 = vrot.slane %v3116_v15, 4  ;;  %v3121_v13 = vrot.slane %v3119_v31, 5  ;;  %v3155_v40 = vrot.slane %v3153_v26, 5  ;;  %v2856_v45 = vshrl.u32 %v5639_v0, 16 }
  0xcd   : > { %3702 = vmatmul.mubr.bf16.vlgmr.msra.gmra.mxu1 %v4321_v27  ;;  %v3146_v46 = vrot.slane %v3144_v33, 4  ;;  %v3149_v38 = vrot.slane %v3147_v44, 5  ;;  %v2959_v48 = vor.u32 %v2958_v34, %v2954_v18  ;;  %v2965_v53 = vrot.slane %v2963_v37, 1  ;;  %v2731_v18 = vld [vmem:[#allocation2 + $0x28] sm:$0xf] }
  0xce   : > { %v3122_v51 = vor.u32 %v3121_v13, %v3118_v24  ;;  %v2858_v52 = vshll.u32 %v5639_v0, 16  ;;  %v2863_v42 = vshrl.u32 %v5642_v12, 16  ;;  %v2865_v49 = vshll.u32 %v5642_v12, 16  ;;  %v2745_v0 = vld [vmem:[#allocation2 + $0x38] sm:$0xe] }
  0xcf   : > { %v3150_v21 = vor.u32 %v3149_v38, %v3146_v46  ;;  %v2966_v54 = vor.u32 %v2965_v53, %v2961_v25  ;;  %v4220_v55 = vcombine.low %v2751_v41, %v2959_v48  ;;  %v4224_v57 = vsel %vm281_vm0, %v5620_v32, %v2959_v48 }
  0xd0   : > { %v3123_v28 = vrot.slane %v3122_v51, 4  ;;  %v3139_v43 = vshll.u32 %v4224_v57, 16  ;;  %v2860_v59 = vrot.slane %v2858_v52, 1  ;;  %v2867_v60 = vrot.slane %v2865_v49, 1 }
  0xd1   : > { %v3151_v61 = vrot.slane %v3150_v21, 4  ;;  %v4226_v62 = vcombine.low %v2753_v23, %v2966_v54  ;;  %v4230_v63 = vsel %vm281_vm0, %v5622_v39, %v2966_v54  ;;  %v3130_v47 = vshrl.u32 %v4220_v55, 16  ;;  %v2746_v54 = vld [vmem:[#allocation2 + $0x40] sm:$0xe] }
  0xd2   : > { %v3128_v1 = vsel %vm5292_vm8, %v3123_v28, %v3127_v20  ;;  %v3133_v32 = vshll.u32 %v4220_v55, 16  ;;  %v3141_v5 = vrot.slane %v3139_v43, 5  ;;  %v3167_v6 = vshll.u32 %v4230_v63, 16 }
  0xd3   : > { %v3156_v4 = vsel %vm5292_vm8, %v3151_v61, %v3155_v40  ;;  %v3132_v10 = vrot.slane %v3130_v47, 4  ;;  %v3158_v39 = vshrl.u32 %v4226_v62, 16  ;;  %v3161_v11 = vshll.u32 %v4226_v62, 16 }
  0xd4   : > { %v4324_v12 = vcombine.high %v3128_v1, %v3156_v4  ;;  %v3135_v8 = vrot.slane %v3133_v32, 5  ;;  %v3169_v2 = vrot.slane %v3167_v6, 5  ;;  %v4323_v16 = vcombine.low %v3128_v1, %v3156_v4  ;;  %v5696_v6 = vld [vmem:[#allocation2 + $0x4c] sm:$0x1]  ;;  %v2770_v4 = vld [vmem:[#allocation2 + $0x48] sm:$0xe] }
  0xd5   : > { %v3160_v22 = vrot.slane %v3158_v39, 4  ;;  %v3163_v17 = vrot.slane %v3161_v11, 5  ;;  %v2861_v25 = vor.u32 %v2860_v59, %v2856_v45  ;;  %v2868_v27 = vor.u32 %v2867_v60, %v2863_v42  ;;  %v5689_v59 = vld [vmem:[#allocation2 + $0x44] sm:$0x1]  ;;  %v2769_v60 = vld [vmem:[#allocation2 + $0x40] sm:$0xe] }
  0xd6   : > { %3644 = vmatprep.mubr.bf16.mxu0 %v4324_v12  ;;  %v3136_v29 = vor.u32 %v3135_v8, %v3132_v10  ;;  %v4203_v30 = vcombine.low %v2767_v58, %v5658_v50  ;;  %v4204_v9 = vcombine.low %v2768_v3, %v5660_v56  ;;  %v5671_v15 = vcombine.low %v2745_v0, %v5664_v7  ;;  %v2755_v11 = vld [vmem:[#allocation2 + $0x30] sm:$0xf] }
  0xd7   : > { %v3164_v31 = vor.u32 %v3163_v17, %v3160_v22  ;;  %3645 = vmatmul.mubr.bf16.gmra.mxu0 %v4323_v16  ;;  %v4231_v20 = vcombine.low %v2731_v18, %v2861_v25  ;;  %v4234_v26 = vsel %vm281_vm0, %v5624_v35, %v2861_v25  ;;  %v4237_v33 = vcombine.low %v2733_v19, %v2868_v27  ;;  %v5681_v35 = vld [vmem:[#allocation2 + $0x44] sm:$0x1]  ;;  %v2757_v16 = vld [vmem:[#allocation2 + $0x38] sm:$0xf] }
  0xd8   : > { %v3137_v34 = vrot.slane %v3136_v29, 4  ;;  %v4240_v37 = vsel %vm281_vm0, %v5626_v36, %v2868_v27  ;;  %v3181_v24 = vshll.u32 %v4234_v26, 16  ;;  %v2968_v13 = vshrl.u32 %v4203_v30, 16 }
  0xd9   : > { %v3165_v40 = vrot.slane %v3164_v31, 4  ;;  %v3172_v41 = vshrl.u32 %v4231_v20, 16  ;;  %v3175_v45 = vshll.u32 %v4231_v20, 16  ;;  %v3200_v46 = vshrl.u32 %v4237_v33, 16 }
  0xda   : > { %v3142_v38 = vsel %vm5292_vm8, %v3137_v34, %v3141_v5  ;;  %v3183_v48 = vrot.slane %v3181_v24, 5  ;;  %v3203_v53 = vshll.u32 %v4237_v33, 16  ;;  %v3209_v51 = vshll.u32 %v4240_v37, 16 }
  0xdb   : > { %v3170_v36 = vsel %vm5292_vm8, %v3165_v40, %v3169_v2  ;;  %v3174_v42 = vrot.slane %v3172_v41, 4  ;;  %v3177_v49 = vrot.slane %v3175_v45, 5  ;;  %v3202_v21 = vrot.slane %v3200_v46, 4 }
  0xdc   : > { %v4326_v55 = vcombine.high %v3142_v38, %v3170_v36  ;;  %v4325_v57 = vcombine.low %v3142_v38, %v3170_v36  ;;  %v3205_v28 = vrot.slane %v3203_v53, 5  ;;  %v3211_v43 = vrot.slane %v3209_v51, 5  ;;  %v2737_v36 = vld [vmem:[#allocation2 + $0x40] sm:$0xf] }
  0xdd   : > { %v3178_v61 = vor.u32 %v3177_v49, %v3174_v42  ;;  %v2970_v62 = vshll.u32 %v4203_v30, 16  ;;  %v2975_v63 = vshrl.u32 %v4204_v9, 16  ;;  %v2977_v47 = vshll.u32 %v4204_v9, 16 }
  0xde   : > { %3709 = vmatprep.mubr.bf16.mxu1 %v4326_v55  ;;  %v3206_v3 = vor.u32 %v3205_v28, %v3202_v21  ;;  %v4198_v1 = vcombine.low %v2746_v54, %v5681_v35  ;;  %v2870_v32 = vshrl.u32 %v5671_v15, 16  ;;  %v2872_v5 = vshll.u32 %v5671_v15, 16 }
  0xdf   : > { %3710 = vmatmul.mubr.bf16.gmra.mxu1 %v4325_v57  ;;  %v3179_v39 = vrot.slane %v3178_v61, 4  ;;  %v2972_v0 = vrot.slane %v2970_v62, 1  ;;  %v2979_v12 = vrot.slane %v2977_v47, 1  ;;  %v5701_v8 = vcombine.low %v2769_v60, %v5689_v59 }
  0xe0   : > { %v3207_v2 = vrot.slane %v3206_v3, 4  ;;  %v2874_v18 = vrot.slane %v2872_v5, 1  ;;  %v2877_v19 = vshrl.u32 %v4198_v1, 16  ;;  %v2879_v22 = vshll.u32 %v4198_v1, 16 }
  0xe1   : > { %v3184_v17 = vsel %vm5292_vm8, %v3179_v39, %v3183_v48  ;;  %v2973_v25 = vor.u32 %v2972_v0, %v2968_v13  ;;  %v2980_v27 = vor.u32 %v2979_v12, %v2975_v63  ;;  %v5706_v29 = vcombine.low %v2770_v4, %v5696_v6  ;;  %v2735_v13 = vld [vmem:[#allocation2 + $0x38] sm:$0xf] }
  0xe2   : > { %v3212_v9 = vsel %vm5292_vm8, %v3207_v2, %v3211_v43  ;;  %v2875_v15 = vor.u32 %v2874_v18, %v2870_v32  ;;  %v2881_v31 = vrot.slane %v2879_v22, 1  ;;  %v2982_v20 = vshrl.u32 %v5701_v8, 16 }
  0xe3   : > { %v4328_v33 = vcombine.high %v3184_v17, %v3212_v9  ;;  %v4232_v34 = vcombine.low %v2755_v11, %v2973_v25  ;;  %v4236_v37 = vsel %vm281_vm0, %v5658_v50, %v2973_v25  ;;  %v4238_v24 = vcombine.low %v2757_v16, %v2980_v27 }
  0xe4   : > { %v4242_v40 = vsel %vm281_vm0, %v5660_v56, %v2980_v27  ;;  %v3195_v41 = vshll.u32 %v4236_v37, 16  ;;  %v4327_v45 = vcombine.low %v3184_v17, %v3212_v9  ;;  %v2882_v46 = vor.u32 %v2881_v31, %v2877_v19 }
  0xe5   : > { %3652 = vmatprep.mubr.bf16.mxu0 %v4328_v33  ;;  %v3186_v38 = vshrl.u32 %v4232_v34, 16  ;;  %v3189_v48 = vshll.u32 %v4232_v34, 16  ;;  %v3214_v53 = vshrl.u32 %v4238_v24, 16  ;;  %v3217_v51 = vshll.u32 %v4238_v24, 16 }
  0xe6   : > { %v3197_v49 = vrot.slane %v3195_v41, 5  ;;  %v3223_v21 = vshll.u32 %v4242_v40, 16  ;;  %3653 = vmatmul.mubr.bf16.gmra.mxu0 %v4327_v45  ;;  %v4243_v54 = vcombine.low %v2735_v13, %v2875_v15  ;;  %v4246_v50 = vsel %vm281_vm0, %v5664_v7, %v2875_v15  ;;  %v5736_v40 = vld [vmem:[%s5837_s2] ss:$0 sm:$0xff] }
  0xe7   : > { %v3188_v57 = vrot.slane %v3186_v38, 4  ;;  %v3191_v56 = vrot.slane %v3189_v48, 5  ;;  %v3216_v28 = vrot.slane %v3214_v53, 4  ;;  %v3219_v43 = vrot.slane %v3217_v51, 5  ;;  %v2759_v45 = vld [vmem:[#allocation2 + $0x40] sm:$0xf] }
  0xe8   : > { %v3225_v60 = vrot.slane %v3223_v21, 5  ;;  %v4249_v61 = vcombine.low %v2737_v36, %v2882_v46  ;;  %v4252_v62 = vsel %vm281_vm0, %v5681_v35, %v2882_v46  ;;  %v3228_v63 = vshrl.u32 %v4243_v54, 16 }
  0xe9   : > { %v3192_v3 = vor.u32 %v3191_v56, %v3188_v57  ;;  %v3220_v1 = vor.u32 %v3219_v43, %v3216_v28  ;;  %v3231_v32 = vshll.u32 %v4243_v54, 16  ;;  %v3237_v5 = vshll.u32 %v4246_v50, 16  ;;  %v2761_v50 = vld [vmem:[#allocation2 + $0x48] sm:$0xf] }
  0xea   : > { %v3230_v39 = vrot.slane %v3228_v63, 4  ;;  %v3256_v7 = vshrl.u32 %v4249_v61, 16  ;;  %v3259_v11 = vshll.u32 %v4249_v61, 16  ;;  %v3265_v0 = vshll.u32 %v4252_v62, 16 }
  0xeb   : > { %v3193_v12 = vrot.slane %v3192_v3, 4  ;;  %v3221_v2 = vrot.slane %v3220_v1, 4  ;;  %v3233_v16 = vrot.slane %v3231_v32, 5  ;;  %v3239_v18 = vrot.slane %v3237_v5, 5 }
  0xec   : > { %v3258_v35 = vrot.slane %v3256_v7, 4  ;;  %v3261_v17 = vrot.slane %v3259_v11, 5  ;;  %v3267_v25 = vrot.slane %v3265_v0, 5  ;;  %v2984_v27 = vshll.u32 %v5701_v8, 16 }
  0xed   : > { %v3198_v9 = vsel %vm5292_vm8, %v3193_v12, %v3197_v49  ;;  %v3226_v15 = vsel %vm5292_vm8, %v3221_v2, %v3225_v60  ;;  %v3234_v31 = vor.u32 %v3233_v16, %v3230_v39  ;;  %v2989_v33 = vshrl.u32 %v5706_v29, 16 }
  0xee   : > { %v4330_v34 = vcombine.high %v3198_v9, %v3226_v15  ;;  %v4329_v37 = vcombine.low %v3198_v9, %v3226_v15  ;;  %v3262_v24 = vor.u32 %v3261_v17, %v3258_v35  ;;  %v2986_v13 = vrot.slane %v2984_v27, 1 }
  0xef   : > { %v3235_v41 = vrot.slane %v3234_v31, 4  ;;  %v2991_v46 = vshll.u32 %v5706_v29, 16 }
  0xf0   : > { %3717 = vmatprep.mubr.bf16.mxu1 %v4330_v34  ;;  %v3263_v36 = vrot.slane %v3262_v24, 4  ;;  %v2987_v49 = vor.u32 %v2986_v13, %v2982_v20 }
  0xf1   : > { %3718 = vmatmul.mubr.bf16.gmra.mxu1 %v4329_v37 }
  0xf2   : > { %v3268_v29 = vsel %vm5292_vm8, %v3263_v36, %v3267_v25  ;;  %v4244_v57 = vcombine.low %v2759_v45, %v2987_v49  ;;  %v4248_v8 = vsel %vm281_vm0, %v5689_v59, %v2987_v49 }
  0xf4   : > { %v3242_v43 = vshrl.u32 %v4244_v57, 16  ;;  %v3245_v60 = vshll.u32 %v4244_v57, 16 }
  0xf5   : > { %v5675_v44 = vpop.f32.mrf.mxu0 }
  0xf6   : > { %v3244_v3 = vrot.slane %v3242_v43, 4  ;;  %v3247_v1 = vrot.slane %v3245_v60, 5 }
  0xf7   : > { %v5683_v23 = vpop.f32.mrf.mxu1  ;;  %v5685_v52 = vpop.f32.mrf.mxu0 }
  0xf8   : > { %v4397_v38 = vadd.f32 %v5685_v52, %v5675_v44  ;;  %v3240_v44 = vsel %vm5292_vm8, %v3235_v41, %v3239_v18  ;;  %v2993_v52 = vrot.slane %v2991_v46, 1  ;;  %v3248_v2 = vor.u32 %v3247_v1, %v3244_v3 }
  0xf9   : > { %v5691_v58 = vpop.f32.mrf.mxu1  ;;  %v5698_v10 = vpop.f32.mrf.mxu0 }
  0xfa   : > { %v4437_v48 = vadd.f32 %v5691_v58, %v5683_v23  ;;  %v905_v23 = vadd.f32 %v4397_v38, %v5736_v40  ;;  %v2994_v20 = vor.u32 %v2993_v52, %v2989_v33  ;;  %v3249_v33 = vrot.slane %v3248_v2, 4 }
  0xfb   : > { %v5708_v30 = vpop.f32.mrf.mxu1  ;;  %v5713_v26 = vpop.f32.mrf.mxu0 }
  0xfc   : > { %v4400_v21 = vadd.f32 %v5713_v26, %v5698_v10  ;;  %v3251_v26 = vshll.u32 %v4248_v8, 16  ;;  %v4250_v62 = vcombine.low %v2761_v50, %v2994_v20  ;;  %v4254_v63 = vsel %vm281_vm0, %v5696_v6, %v2994_v20 }
  0xfd   : > { %v4439_v42 = vpop.f32.mrf.mxu1  ;;  %v4401_v55 = vpop.f32.mrf.mxu0  ;;  %v3279_v32 = vshll.u32 %v4254_v63, 16 }
  0xfe   : > { %v4440_v54 = vadd.f32 %v4439_v42, %v5708_v30  ;;  %v908_v10 = vadd.f32 %v4400_v21, %v5736_v40  ;;  %v4332_v30 = vcombine.high %v3240_v44, %v3268_v29  ;;  %v4331_v42 = vcombine.low %v3240_v44, %v3268_v29 }
  0xff   : > { %v4402_v47 = vpop.f32.mrf.mxu0  ;;  %v3270_v39 = vshrl.u32 %v4250_v62, 16  ;;  %v3273_v7 = vshll.u32 %v4250_v62, 16  ;;  %v3253_v16 = vrot.slane %v3251_v26, 5  ;;  %v3281_v18 = vrot.slane %v3279_v32, 5 }
 0x100   : > { %v4403_v58 = vadd.f32 %v4402_v47, %v4401_v55  ;;  %v970_v55 = vadd.f32 %v4437_v48, %v905_v23  ;;  %v973_v61 = vadd.f32 %v4440_v54, %v908_v10  ;;  %3660 = vmatprep.mubr.bf16.mxu0 %v4332_v30 }
 0x101   : > { %v5723_v4 = vpop.f32.mrf.mxu1  ;;  %v5725_v22 = vpop.f32.mrf.mxu0  ;;  %3661 = vmatmul.mubr.bf16.gmra.mxu0 %v4331_v42  ;;  %v3272_v17 = vrot.slane %v3270_v39, 4  ;;  %v3275_v25 = vrot.slane %v3273_v7, 5  ;;  %v3254_v38 = vsel %vm5292_vm8, %v3249_v33, %v3253_v16 }
 0x102   : > { %v913_v59 = vadd.f32 %v4403_v58, %v5736_v40  ;;  %v1000_v5 = vpack.c.bf16 %v970_v55, %v970_v55  ;;  %v1001_v11 = vpack.c.bf16 %v973_v61, %v973_v61 }
 0x103   : > { %v4442_v19 = vpop.f32.mrf.mxu1  ;;  %v4405_v51 = vpop.f32.mrf.mxu0  ;;  %v3276_v37 = vor.u32 %v3275_v25, %v3272_v17 }
 0x104   : > { %v4443_v6 = vadd.f32 %v4442_v19, %v5723_v4  ;;  %1008 = vst [vmem:[%s5762_s13] sm:$0xf] %v1000_v5  ;;  %v4406_v35 = vadd.f32 %v4405_v51, %v5725_v22  ;;  %1009 = vst [vmem:[%s5762_s13 + $0x10] sm:$0xf] %v1001_v11 }
 0x105   : > { %v4444_v53 = vpop.f32.mrf.mxu1  ;;  %v3277_v48 = vrot.slane %v3276_v37, 4 }
 0x106   : > { %v978_v27 = vadd.f32 %v4443_v6, %v913_v59  ;;  %v916_v34 = vadd.f32 %v4406_v35, %v5736_v40 }
 0x107   : > { %v4445_v56 = vpop.f32.mrf.mxu1  ;;  %v4407_v28 = vpop.f32.mrf.mxu0  ;;  %v3282_v21 = vsel %vm5292_vm8, %v3277_v48, %v3281_v18 }
 0x108   : > { %v4446_v4 = vadd.f32 %v4445_v56, %v4444_v53  ;;  %v1002_v24 = vpack.c.bf16 %v978_v27, %v978_v27  ;;  %v4334_v44 = vcombine.high %v3254_v38, %v3282_v21  ;;  %v4333_v52 = vcombine.low %v3254_v38, %v3282_v21 }
 0x109   : > { %v4408_v47 = vpop.f32.mrf.mxu0 }
 0x10a   : > { %v4409_v9 = vadd.f32 %v4408_v47, %v4407_v28  ;;  %v981_v45 = vadd.f32 %v4446_v4, %v916_v34  ;;  %1010 = vst [vmem:[%s5762_s13 + $0x20] sm:$0xf] %v1002_v24  ;;  %3725 = vmatprep.mubr.bf16.mxu1 %v4334_v44 }
 0x10b   : > { %v4410_v12 = vpop.f32.mrf.mxu0  ;;  %3726 = vmatmul.mubr.bf16.gmra.mxu1 %v4333_v52 }
 0x10c   : > { %v921_v13 = vadd.f32 %v4409_v9, %v5736_v40  ;;  %v1003_v36 = vpack.c.bf16 %v981_v45, %v981_v45 }
 0x10d   : > { %v4447_v0 = vpop.f32.mrf.mxu1  ;;  %v4411_v31 = vpop.f32.mrf.mxu0 }
 0x10e   : > { %v4412_v19 = vadd.f32 %v4411_v31, %v4410_v12  ;;  %1011 = vst [vmem:[%s5762_s13 + $0x30] sm:$0xf] %v1003_v36 }
 0x10f   : > { %v4448_v15 = vpop.f32.mrf.mxu1 }
 0x110   : > { %v4449_v41 = vadd.f32 %v4448_v15, %v4447_v0  ;;  %v924_v46 = vadd.f32 %v4412_v19, %v5736_v40 }
 0x111   : > { %v4450_v22 = vpop.f32.mrf.mxu1 }
 0x112   : > { %v986_v51 = vadd.f32 %v4449_v41, %v921_v13 }
 0x113   : > { %v4451_v53 = vpop.f32.mrf.mxu1 }
 0x114   : > { %v4452_v49 = vadd.f32 %v4451_v53, %v4450_v22  ;;  %v1004_v54 = vpack.c.bf16 %v986_v51, %v986_v51 }
 0x116   : > { %v989_v23 = vadd.f32 %v4452_v49, %v924_v46  ;;  %1012 = vst [vmem:[%s5762_s13 + $0x40] sm:$0xf] %v1004_v54 }
 0x118   : > { %v1005_v58 = vpack.c.bf16 %v989_v23, %v989_v23  ;;  %v4413_v29 = vpop.f32.mrf.mxu0 }
 0x11a   : > { %1013 = vst [vmem:[%s5762_s13 + $0x50] sm:$0xf] %v1005_v58  ;;  %v4414_v50 = vpop.f32.mrf.mxu0  ;;  %v4453_v57 = vpop.f32.mrf.mxu1 }
 0x11b   : > { %v4415_v8 = vadd.f32 %v4414_v50, %v4413_v29 }
 0x11c   : > { %v4416_v10 = vpop.f32.mrf.mxu0  ;;  %v4454_v30 = vpop.f32.mrf.mxu1 }
 0x11d   : > { %v929_v14 = vadd.f32 %v4415_v8, %v5736_v40  ;;  %v4455_v20 = vadd.f32 %v4454_v30, %v4453_v57 }
 0x11e   : > { %v4417_v26 = vpop.f32.mrf.mxu0  ;;  %v4456_v42 = vpop.f32.mrf.mxu1 }
 0x11f   : > { %v4418_v56 = vadd.f32 %v4417_v26, %v4416_v10  ;;  %v994_v28 = vadd.f32 %v4455_v20, %v929_v14 }
 0x120   : > { %v4457_v60 = vpop.f32.mrf.mxu1 }
 0x121   : > { %v932_v43 = vadd.f32 %v4418_v56, %v5736_v40  ;;  %v1006_v55 = vpack.c.bf16 %v994_v28, %v994_v28  ;;  %v4458_v61 = vadd.f32 %v4457_v60, %v4456_v42 }
 0x122   : > { %v4475_v59 = vpop.f32.mrf.mxu0 }
 0x123   : > { %1014 = vst [vmem:[%s5762_s13 + $0x60] sm:$0xf] %v1006_v55  ;;  %v997_v62 = vadd.f32 %v4458_v61, %v932_v43 }
 0x124   : > { %v4476_v47 = vpop.f32.mrf.mxu0 }
 0x125   : > { %v1007_v63 = vpack.c.bf16 %v997_v62, %v997_v62  ;;  %v4477_v3 = vadd.f32 %v4476_v47, %v4475_v59 }
 0x126   : > { %v4478_v1 = vpop.f32.mrf.mxu0 }
 0x127   : > { %1015 = vst [vmem:[%s5762_s13 + $0x70] sm:$0xf] %v1007_v63  ;;  %v1935_v39 = vadd.f32 %v4477_v3, %v5736_v40 }
 0x128   : > { %v4515_v32 = vpop.f32.mrf.mxu1  ;;  %v4479_v5 = vpop.f32.mrf.mxu0 }
 0x129   : > { %v4480_v7 = vadd.f32 %v4479_v5, %v4478_v1 }
 0x12a   : > { %v4516_v11 = vpop.f32.mrf.mxu1 }
 0x12b   : > { %v4517_v6 = vadd.f32 %v4516_v11, %v4515_v32  ;;  %v1938_v2 = vadd.f32 %v4480_v7, %v5736_v40 }
 0x12c   : > { %v4518_v0 = vpop.f32.mrf.mxu1 }
 0x12d   : > { %v2000_v12 = vadd.f32 %v4517_v6, %v1935_v39 }
 0x12e   : > { %v4519_v16 = vpop.f32.mrf.mxu1 }
 0x12f   : > { %v2030_v18 = vpack.c.bf16 %v2000_v12, %v2000_v12  ;;  %v4520_v35 = vadd.f32 %v4519_v16, %v4518_v0 }
 0x131   : > { %2038 = vst [vmem:[%s5762_s13 + $0x4] sm:$0xf] %v2030_v18  ;;  %v2003_v17 = vadd.f32 %v4520_v35, %v1938_v2 }
 0x133   : > { %v2031_v25 = vpack.c.bf16 %v2003_v17, %v2003_v17 }
 0x135   : > { %2039 = vst [vmem:[%s5762_s13 + $0x14] sm:$0xf] %v2031_v25  ;;  %v4481_v27 = vpop.f32.mrf.mxu0 }
 0x137   : > { %v4482_v9 = vpop.f32.mrf.mxu0 }
 0x138   : > { %v4483_v15 = vadd.f32 %v4482_v9, %v4481_v27 }
 0x139   : > { %v4521_v31 = vpop.f32.mrf.mxu1  ;;  %v4484_v33 = vpop.f32.mrf.mxu0 }
 0x13a   : > { %v1943_v34 = vadd.f32 %v4483_v15, %v5736_v40 }
 0x13b   : > { %v4522_v4 = vpop.f32.mrf.mxu1  ;;  %v4485_v19 = vpop.f32.mrf.mxu0 }
 0x13c   : > { %v4523_v37 = vadd.f32 %v4522_v4, %v4521_v31  ;;  %v4486_v24 = vadd.f32 %v4485_v19, %v4484_v33 }
 0x13d   : > { %v4524_v13 = vpop.f32.mrf.mxu1 }
 0x13e   : > { %v2008_v41 = vadd.f32 %v4523_v37, %v1943_v34  ;;  %v1946_v22 = vadd.f32 %v4486_v24, %v5736_v40 }
 0x13f   : > { %v4525_v45 = vpop.f32.mrf.mxu1 }
 0x140   : > { %v2032_v46 = vpack.c.bf16 %v2008_v41, %v2008_v41  ;;  %v4526_v38 = vadd.f32 %v4525_v45, %v4524_v13 }
 0x142   : > { %2040 = vst [vmem:[%s5762_s13 + $0x24] sm:$0xf] %v2032_v46  ;;  %v2011_v48 = vadd.f32 %v4526_v38, %v1946_v22 }
 0x144   : > { %v2033_v51 = vpack.c.bf16 %v2011_v48, %v2011_v48 }
 0x146   : > { %2041 = vst [vmem:[%s5762_s13 + $0x34] sm:$0xf] %v2033_v51  ;;  %v4487_v53 = vpop.f32.mrf.mxu0 }
 0x148   : > { %v4488_v36 = vpop.f32.mrf.mxu0 }
 0x149   : > { %v4489_v49 = vadd.f32 %v4488_v36, %v4487_v53 }
 0x14a   : > { %v4490_v21 = vpop.f32.mrf.mxu0 }
 0x14b   : > { %v4527_v54 = vpop.f32.mrf.mxu1  ;;  %v1951_v44 = vadd.f32 %v4489_v49, %v5736_v40 }
 0x14c   : > { %v4491_v52 = vpop.f32.mrf.mxu0 }
 0x14d   : > { %v4528_v23 = vpop.f32.mrf.mxu1  ;;  %v4492_v58 = vadd.f32 %v4491_v52, %v4490_v21 }
 0x14e   : > { %v4529_v29 = vadd.f32 %v4528_v23, %v4527_v54 }
 0x14f   : > { %v4530_v50 = vpop.f32.mrf.mxu1  ;;  %v1954_v8 = vadd.f32 %v4492_v58, %v5736_v40 }
 0x150   : > { %v2016_v57 = vadd.f32 %v4529_v29, %v1951_v44 }
 0x151   : > { %v4531_v10 = vpop.f32.mrf.mxu1 }
 0x152   : > { %v2034_v14 = vpack.c.bf16 %v2016_v57, %v2016_v57  ;;  %v4532_v30 = vadd.f32 %v4531_v10, %v4530_v50 }
 0x154   : > { %2042 = vst [vmem:[%s5762_s13 + $0x44] sm:$0xf] %v2034_v14  ;;  %v2019_v20 = vadd.f32 %v4532_v30, %v1954_v8 }
 0x156   : > { %v2035_v26 = vpack.c.bf16 %v2019_v20, %v2019_v20 }
 0x158   : > { %2043 = vst [vmem:[%s5762_s13 + $0x54] sm:$0xf] %v2035_v26  ;;  %v4493_v42 = vpop.f32.mrf.mxu0 }
 0x15a   : > { %v4494_v56 = vpop.f32.mrf.mxu0 }
 0x15b   : > { %v4495_v28 = vadd.f32 %v4494_v56, %v4493_v42 }
 0x15c   : > { %v4533_v43 = vpop.f32.mrf.mxu1  ;;  %v4496_v60 = vpop.f32.mrf.mxu0 }
 0x15d   : > { %v1959_v55 = vadd.f32 %v4495_v28, %v5736_v40 }
 0x15e   : > { %v4534_v61 = vpop.f32.mrf.mxu1  ;;  %v4497_v62 = vpop.f32.mrf.mxu0 }
 0x15f   : > { %v4535_v63 = vadd.f32 %v4534_v61, %v4533_v43  ;;  %v4498_v59 = vadd.f32 %v4497_v62, %v4496_v60 }
 0x160   : > { %v4536_v47 = vpop.f32.mrf.mxu1  ;;  %v4555_v3 = vpop.f32.mrf.mxu0 }
 0x161   : > { %v2024_v1 = vadd.f32 %v4535_v63, %v1959_v55  ;;  %v1962_v32 = vadd.f32 %v4498_v59, %v5736_v40 }
 0x162   : > { %v4537_v5 = vpop.f32.mrf.mxu1  ;;  %v4556_v39 = vpop.f32.mrf.mxu0 }
 0x163   : > { %v2036_v7 = vpack.c.bf16 %v2024_v1, %v2024_v1  ;;  %v4538_v11 = vadd.f32 %v4537_v5, %v4536_v47  ;;  %v4557_v6 = vadd.f32 %v4556_v39, %v4555_v3 }
 0x164   : > { %v4595_v0 = vpop.f32.mrf.mxu1  ;;  %v4558_v12 = vpop.f32.mrf.mxu0 }
 0x165   : > { %2044 = vst [vmem:[%s5762_s13 + $0x64] sm:$0xf] %v2036_v7  ;;  %v2027_v2 = vadd.f32 %v4538_v11, %v1962_v32  ;;  %v2611_v16 = vadd.f32 %v4557_v6, %v5736_v40 }
 0x166   : > { %v4596_v18 = vpop.f32.mrf.mxu1  ;;  %v4559_v35 = vpop.f32.mrf.mxu0 }
 0x167   : > { %v2037_v17 = vpack.c.bf16 %v2027_v2, %v2027_v2  ;;  %v4597_v25 = vadd.f32 %v4596_v18, %v4595_v0  ;;  %v4560_v27 = vadd.f32 %v4559_v35, %v4558_v12 }
 0x168   : > { %v4598_v9 = vpop.f32.mrf.mxu1  ;;  %v4561_v15 = vpop.f32.mrf.mxu0 }
 0x169   : > { %2045 = vst [vmem:[%s5762_s13 + $0x74] sm:$0xf] %v2037_v17  ;;  %v2676_v31 = vadd.f32 %v4597_v25, %v2611_v16  ;;  %v2614_v33 = vadd.f32 %v4560_v27, %v5736_v40 }
 0x16a   : > { %v4599_v34 = vpop.f32.mrf.mxu1  ;;  %v4562_v4 = vpop.f32.mrf.mxu0 }
 0x16b   : > { %v2706_v19 = vpack.c.bf16 %v2676_v31, %v2676_v31  ;;  %v4600_v37 = vadd.f32 %v4599_v34, %v4598_v9  ;;  %v4563_v24 = vadd.f32 %v4562_v4, %v4561_v15 }
 0x16c   : > { %v4601_v13 = vpop.f32.mrf.mxu1  ;;  %v4564_v41 = vpop.f32.mrf.mxu0 }
 0x16d   : > { %4183 = vst [vmem:[%s5762_s13 + $0x8] sm:$0xf] %v2706_v19  ;;  %v2679_v22 = vadd.f32 %v4600_v37, %v2614_v33  ;;  %v2619_v45 = vadd.f32 %v4563_v24, %v5736_v40 }
 0x16e   : > { %v4602_v46 = vpop.f32.mrf.mxu1  ;;  %v4565_v38 = vpop.f32.mrf.mxu0 }
 0x16f   : > { %v2707_v48 = vpack.c.bf16 %v2679_v22, %v2679_v22  ;;  %v4603_v51 = vadd.f32 %v4602_v46, %v4601_v13  ;;  %v4566_v53 = vadd.f32 %v4565_v38, %v4564_v41 }
 0x170   : > { %v4604_v36 = vpop.f32.mrf.mxu1  ;;  %v4567_v23 = vpop.f32.mrf.mxu0 }
 0x171   : > { %4184 = vst [vmem:[%s5762_s13 + $0x18] sm:$0xf] %v2707_v48  ;;  %v2684_v49 = vadd.f32 %v4603_v51, %v2619_v45  ;;  %v2622_v21 = vadd.f32 %v4566_v53, %v5736_v40 }
 0x172   : > { %v4605_v54 = vpop.f32.mrf.mxu1  ;;  %v4568_v50 = vpop.f32.mrf.mxu0 }
 0x173   : > { %v2708_v44 = vpack.c.bf16 %v2684_v49, %v2684_v49  ;;  %v4606_v52 = vadd.f32 %v4605_v54, %v4604_v36  ;;  %v4569_v57 = vadd.f32 %v4568_v50, %v4567_v23 }
 0x174   : > { %v4607_v58 = vpop.f32.mrf.mxu1  ;;  %v4570_v14 = vpop.f32.mrf.mxu0 }
 0x175   : > { %4185 = vst [vmem:[%s5762_s13 + $0x28] sm:$0xf] %v2708_v44  ;;  %v2687_v29 = vadd.f32 %v4606_v52, %v2622_v21  ;;  %v2627_v30 = vadd.f32 %v4569_v57, %v5736_v40 }
 0x176   : > { %v4608_v8 = vpop.f32.mrf.mxu1  ;;  %v4571_v42 = vpop.f32.mrf.mxu0 }
 0x177   : > { %v2709_v10 = vpack.c.bf16 %v2687_v29, %v2687_v29  ;;  %v4609_v20 = vadd.f32 %v4608_v8, %v4607_v58  ;;  %v4572_v28 = vadd.f32 %v4571_v42, %v4570_v14 }
 0x178   : > { %v4610_v26 = vpop.f32.mrf.mxu1  ;;  %v4573_v63 = vpop.f32.mrf.mxu0 }
 0x179   : > { %4186 = vst [vmem:[%s5762_s13 + $0x38] sm:$0xf] %v2709_v10  ;;  %v2692_v56 = vadd.f32 %v4609_v20, %v2627_v30  ;;  %v2630_v55 = vadd.f32 %v4572_v28, %v5736_v40 }
 0x17a   : > { %v4611_v43 = vpop.f32.mrf.mxu1  ;;  %v4574_v47 = vpop.f32.mrf.mxu0 }
 0x17b   : > { %v2710_v60 = vpack.c.bf16 %v2692_v56, %v2692_v56  ;;  %v4612_v61 = vadd.f32 %v4611_v43, %v4610_v26  ;;  %v4575_v1 = vadd.f32 %v4574_v47, %v4573_v63 }
 0x17c   : > { %v4613_v3 = vpop.f32.mrf.mxu1  ;;  %v4576_v32 = vpop.f32.mrf.mxu0 }
 0x17d   : > { %4187 = vst [vmem:[%s5762_s13 + $0x48] sm:$0xf] %v2710_v60  ;;  %v2695_v62 = vadd.f32 %v4612_v61, %v2630_v55  ;;  %v2635_v5 = vadd.f32 %v4575_v1, %v5736_v40 }
 0x17e   : > { %v4614_v39 = vpop.f32.mrf.mxu1  ;;  %v4577_v11 = vpop.f32.mrf.mxu0 }
 0x17f   : > { %v2711_v59 = vpack.c.bf16 %v2695_v62, %v2695_v62  ;;  %v4615_v7 = vadd.f32 %v4614_v39, %v4613_v3  ;;  %v4578_v0 = vadd.f32 %v4577_v11, %v4576_v32 }
 0x180   : > { %v4616_v6 = vpop.f32.mrf.mxu1 }
 0x181   : > { %4188 = vst [vmem:[%s5762_s13 + $0x58] sm:$0xf] %v2711_v59  ;;  %v2700_v12 = vadd.f32 %v4615_v7, %v2635_v5  ;;  %v2638_v2 = vadd.f32 %v4578_v0, %v5736_v40 }
 0x182   : > { %v4617_v16 = vpop.f32.mrf.mxu1 }
 0x183   : > { %v2712_v18 = vpack.c.bf16 %v2700_v12, %v2700_v12  ;;  %v4618_v35 = vadd.f32 %v4617_v16, %v4616_v6 }
 0x185   : > { %4189 = vst [vmem:[%s5762_s13 + $0x68] sm:$0xf] %v2712_v18  ;;  %v2703_v17 = vadd.f32 %v4618_v35, %v2638_v2 }
 0x187   : > { %v2713_v25 = vpack.c.bf16 %v2703_v17, %v2703_v17 }
 0x189   : > { %4190 = vst [vmem:[%s5762_s13 + $0x78] sm:$0xf] %v2713_v25  ;;  %v4635_v27 = vpop.f32.mrf.mxu0 }
 0x18b   : > { %v4636_v9 = vpop.f32.mrf.mxu0 }
 0x18c   : > { %v4637_v15 = vadd.f32 %v4636_v9, %v4635_v27 }
 0x18d   : > { %v4638_v31 = vpop.f32.mrf.mxu0  ;;  %v4675_v33 = vpop.f32.mrf.mxu1 }
 0x18e   : > { %v3639_v34 = vadd.f32 %v4637_v15, %v5736_v40 }
 0x18f   : > { %v4639_v4 = vpop.f32.mrf.mxu0  ;;  %v4676_v19 = vpop.f32.mrf.mxu1 }
 0x190   : > { %v4640_v37 = vadd.f32 %v4639_v4, %v4638_v31  ;;  %v4677_v24 = vadd.f32 %v4676_v19, %v4675_v33 }
 0x191   : > { %v4678_v13 = vpop.f32.mrf.mxu1 }
 0x192   : > { %v3704_v41 = vadd.f32 %v4677_v24, %v3639_v34  ;;  %v3642_v22 = vadd.f32 %v4640_v37, %v5736_v40 }
 0x193   : > { %v4679_v45 = vpop.f32.mrf.mxu1 }
 0x194   : > { %v3734_v46 = vpack.c.bf16 %v3704_v41, %v3704_v41  ;;  %v4680_v38 = vadd.f32 %v4679_v45, %v4678_v13 }
 0x196   : > { %4367 = vst [vmem:[%s5762_s13 + $0xc] sm:$0xf] %v3734_v46  ;;  %v3707_v48 = vadd.f32 %v4680_v38, %v3642_v22 }
 0x197   : > { %v4641_v53 = vpop.f32.mrf.mxu0 }
 0x198   : > { %v3735_v51 = vpack.c.bf16 %v3707_v48, %v3707_v48 }
 0x199   : > { %v4642_v36 = vpop.f32.mrf.mxu0 }
 0x19a   : > { %4368 = vst [vmem:[%s5762_s13 + $0x1c] sm:$0xf] %v3735_v51  ;;  %v4643_v21 = vadd.f32 %v4642_v36, %v4641_v53 }
 0x19b   : > { %v4644_v49 = vpop.f32.mrf.mxu0 }
 0x19c   : > { %v3647_v52 = vadd.f32 %v4643_v21, %v5736_v40 }
 0x19d   : > { %v4645_v54 = vpop.f32.mrf.mxu0 }
 0x19e   : > { %v4646_v23 = vadd.f32 %v4645_v54, %v4644_v49 }
 0x19f   : > { %v4681_v44 = vpop.f32.mrf.mxu1 }
 0x1a0   : > { %v3650_v8 = vadd.f32 %v4646_v23, %v5736_v40 }
 0x1a1   : > { %v4682_v58 = vpop.f32.mrf.mxu1 }
 0x1a2   : > { %v4683_v29 = vadd.f32 %v4682_v58, %v4681_v44 }
 0x1a3   : > { %v4684_v50 = vpop.f32.mrf.mxu1 }
 0x1a4   : > { %v3712_v57 = vadd.f32 %v4683_v29, %v3647_v52 }
 0x1a5   : > { %v4685_v10 = vpop.f32.mrf.mxu1 }
 0x1a6   : > { %v3736_v14 = vpack.c.bf16 %v3712_v57, %v3712_v57  ;;  %v4686_v30 = vadd.f32 %v4685_v10, %v4684_v50  ;;  %v4647_v20 = vpop.f32.mrf.mxu0 }
 0x1a8   : > { %4369 = vst [vmem:[%s5762_s13 + $0x2c] sm:$0xf] %v3736_v14  ;;  %v3715_v26 = vadd.f32 %v4686_v30, %v3650_v8  ;;  %v4648_v42 = vpop.f32.mrf.mxu0 }
 0x1a9   : > { %v4649_v43 = vadd.f32 %v4648_v42, %v4647_v20 }
 0x1aa   : > { %v3737_v56 = vpack.c.bf16 %v3715_v26, %v3715_v26  ;;  %v4650_v28 = vpop.f32.mrf.mxu0 }
 0x1ab   : > { %v3655_v61 = vadd.f32 %v4649_v43, %v5736_v40 }
 0x1ac   : > { %4370 = vst [vmem:[%s5762_s13 + $0x3c] sm:$0xf] %v3737_v56  ;;  %v4651_v60 = vpop.f32.mrf.mxu0 }
 0x1ad   : > { %v4652_v62 = vadd.f32 %v4651_v60, %v4650_v28 }
 0x1af   : > { %v3658_v1 = vadd.f32 %v4652_v62, %v5736_v40 }
 0x1b1   : > { %v4687_v55 = vpop.f32.mrf.mxu1 }
 0x1b3   : > { %v4688_v63 = vpop.f32.mrf.mxu1 }
 0x1b4   : > { %v4689_v59 = vadd.f32 %v4688_v63, %v4687_v55 }
 0x1b5   : > { %v4690_v47 = vpop.f32.mrf.mxu1 }
 0x1b6   : > { %v3720_v3 = vadd.f32 %v4689_v59, %v3655_v61 }
 0x1b7   : > { %v4691_v5 = vpop.f32.mrf.mxu1 }
 0x1b8   : > { %v3738_v39 = vpack.c.bf16 %v3720_v3, %v3720_v3  ;;  %v4692_v7 = vadd.f32 %v4691_v5, %v4690_v47 }
 0x1ba   : > { %4371 = vst [vmem:[%s5762_s13 + $0x4c] sm:$0xf] %v3738_v39  ;;  %v3723_v6 = vadd.f32 %v4692_v7, %v3658_v1 }
 0x1bc   : > { %v3739_v0 = vpack.c.bf16 %v3723_v6, %v3723_v6 }
 0x1be   : > { %4372 = vst [vmem:[%s5762_s13 + $0x5c] sm:$0xf] %v3739_v0 }
 0x1c1   : > { %v4653_v32 = vpop.f32.mrf.mxu0 }
 0x1c3   : > { %v4654_v11 = vpop.f32.mrf.mxu0 }
 0x1c4   : > { %v4655_v2 = vadd.f32 %v4654_v11, %v4653_v32 }
 0x1c5   : > { %v4656_v12 = vpop.f32.mrf.mxu0 }
 0x1c6   : > { %v3663_v35 = vadd.f32 %v4655_v2, %v5736_v40 }
 0x1c7   : > { %v4657_v16 = vpop.f32.mrf.mxu0 }
 0x1c8   : > { %v4658_v17 = vadd.f32 %v4657_v16, %v4656_v12 }
 0x1ca   : > { %v3666_v31 = vadd.f32 %v4658_v17, %v5736_v40 }
 0x1cb   : > { %v4693_v18 = vpop.f32.mrf.mxu1 }
 0x1cd   : > { %v4694_v25 = vpop.f32.mrf.mxu1 }
 0x1ce   : > { %v4695_v27 = vadd.f32 %v4694_v25, %v4693_v18 }
 0x1cf   : > { %v4696_v9 = vpop.f32.mrf.mxu1 }
 0x1d0   : > { %v3728_v15 = vadd.f32 %v4695_v27, %v3663_v35 }
 0x1d1   : > { %v4697_v33 = vpop.f32.mrf.mxu1 }
 0x1d2   : > { %v3740_v34 = vpack.c.bf16 %v3728_v15, %v3728_v15  ;;  %v4698_v4 = vadd.f32 %v4697_v33, %v4696_v9 }
 0x1d4   : > { %4373 = vst [vmem:[%s5762_s13 + $0x6c] sm:$0xf] %v3740_v34  ;;  %v3731_v19 = vadd.f32 %v4698_v4, %v3666_v31 }
 0x1d6   : > { %v3741_v37 = vpack.c.bf16 %v3731_v19, %v3731_v19 }
 0x1d8   : > { %4374 = vst [vmem:[%s5762_s13 + $0x7c] sm:$0xf] %v3741_v37 }
 0x1d9 PF: > { %s13_s12 = sadd.s32 1, %s4922_s12  }
 0x1da   : > { %p10_p4 = scmp.ge.s32.totalorder %s13_s12, 4  }
 0x1dc   :  { %12 = sbr.rel (!%p10_p4) target bundleno = 1 (0x1), region = 68 }

// kernel: decoder_block_forward.3
= control target key start
LH: loop header
LB: loop body
LE: loop exit
PB: predicated region body
PF: predicated region fallthrough
CT: control target
= control target key end

     0   :  { %s6654_s18 = smov 0   ;;  %s8870_s0 = inlined_call_operand.vmem [shape: bf16[2,16,16,128], index: 0, kind: input, shape index: {}]   ;;  %s8871_s1 = inlined_call_operand.vmem [shape: bf16[2,16,16,128], index: 1, kind: input, shape index: {}]   ;;  %s8872_s2 = inlined_call_operand.vmem [shape: bf16[3,3,256,128], index: 2, kind: input, shape index: {}]   ;;  %s8873_s3 = inlined_call_operand.vmem [shape: f32[1,128], index: 3, kind: input, shape index: {}]   ;;  %s8874_s4 = inlined_call_operand.vmem [shape: f32[1,128], index: 4, kind: input, shape index: {}]   ;;  %s8875_s5 = inlined_call_operand.vmem [shape: f32[2,16,16,128], index: 5, kind: output, shape index: {}]  }
   0x1 LB: > { %s5130_s19 = sadd.s32 4294967295, %s6617_s18   ;;  %p5134_p0 = scmp.ge.s32.totalorder %s6617_s18, 1  ;;  %s6617_s18 = sphi %s6654_s18, %s15_s18  }
   0x2   : > { %p197_p1 = scmp.lt.s32.totalorder %s6617_s18, 3 }
   0x4   : > { %p198_p2 = pnand %p5134_p0, %p197_p1 }
   0x5   : > { %p6674_p3 = scmp.lt.s32.totalorder (!%p198_p2), %s5130_s19, 1  ;;  %s6978_s11 = smov (!%p198_p2), 0  }
   0x6   : > { %201 = sbr.rel (%p198_p2) target bundleno = 685 (0x2ad), region = 40 }
   0xb   : > { %v6665_v0 = vld [vmem:[%s8873_s3] ss:$0 sm:$0xff]  ;;  %v6623_v2 = vmov 0   ;;  %s8960_s19 = smov (!%p6674_p3, %s5130_s19), 1  ;;  %vm657_vm0 = vsmask.f32 7938 }
   0xc   : > { %v6670_v1 = vld [vmem:[%s8874_s4] ss:$0 sm:$0xff]  ;;  %249 = vst [vmem:[#allocation2 + $0x18] sm:$0xff] %v6623_v2  ;;  %246 = vst [vmem:[#allocation2] sm:$0xff] %v6623_v2  ;;  %s5817_s25 = sshll.u32 %s8960_s19, 7  ;;  %s5819_s26 = sshll.u32 %s8960_s19, 8 }
   0xd   : > { %247 = vst [vmem:[#allocation2 + $0x8] sm:$0xff] %v6623_v2  ;;  %248 = vst [vmem:[#allocation2 + $0x10] sm:$0x11] %v6623_v2  ;;  %s6691_s29 = scalar_lea.vmem %s8870_s0, %s5817_s25  ;;  %s6696_s7 = scalar_lea.vmem %s8875_s5, %s5819_s26  ;;  %vm656_vm1 = vcmask 1043456   ;;  %vm332_vm2 = vsmask.f32 256 }
   0xe   : > { %250 = vst [vmem:[#allocation2 + $0x20] sm:$0xff] %v6623_v2  ;;  %251 = vst [vmem:[#allocation2 + $0x28] sm:$0x11] %v6623_v2  ;;  %vm333_vm3 = vsmask.f32 4368  ;;  %vm663_vm4 = vcmask 1040384   ;;  %s6830_s10 = scalar_lea.vmem %s8871_s1, %s5817_s25 }
   0xf   : > { %252 = vst [vmem:[#allocation2 + $0x30] sm:$0xff] %v6623_v2  ;;  %253 = vst [vmem:[#allocation2 + $0x38] sm:$0xff] %v6623_v2  ;;  %v300_v3 = vld [vmem:[%s6691_s29] sm:$0xf]  ;;  %v301_v4 = vld [vmem:[%s6691_s29 + $0x4] sm:$0xf] }
  0x10   : > { %254 = vst [vmem:[#allocation2 + $0x40] sm:$0x11] %v6623_v2  ;;  %255 = vst [vmem:[#allocation2 + $0x48] sm:$0xff] %v6623_v2  ;;  %v302_v5 = vld [vmem:[%s6691_s29 + $0x8] sm:$0xf]  ;;  %v336_v6 = vshrl.u32 %v300_v3, 16 }
  0x11   : > { %256 = vst [vmem:[#allocation2 + $0x50] sm:$0xff] %v6623_v2  ;;  %257 = vst [vmem:[#allocation2 + $0x58] sm:$0x11] %v6623_v2  ;;  %v339_v7 = vshll.u32 %v300_v3, 16  ;;  %v344_v8 = vshrl.u32 %v301_v4, 16  ;;  %v347_v9 = vshll.u32 %v301_v4, 16 }
  0x12   : > { %258 = vst [vmem:[#allocation2 + $0x60] sm:$0xff] %v6623_v2  ;;  %259 = vst [vmem:[#allocation2 + $0x68] sm:$0xff] %v6623_v2  ;;  %v303_v10 = vld [vmem:[%s6691_s29 + $0xc] sm:$0xf]  ;;  %v353_v12 = vshrl.u32 %v302_v5, 16  ;;  %v356_v13 = vshll.u32 %v302_v5, 16 }
  0x13   : > { %260 = vst [vmem:[#allocation2 + $0x70] sm:$0x11] %v6623_v2  ;;  %261 = vst [vmem:[#allocation2 + $0x78] sm:$0xff] %v6623_v2  ;;  %v338_v14 = vrot.slane %v336_v6, 7  ;;  %v659_v15 = vld [vmem:[#allocation2 + $0x18] sm:$0xf] }
  0x14   : > { %262 = vst [vmem:[#allocation2 + $0x80] sm:$0xff] %v6623_v2  ;;  %263 = vst [vmem:[#allocation2 + $0x88] sm:$0x11] %v6623_v2  ;;  %v346_v17 = vrot.slane %v344_v8, 7  ;;  %v361_v18 = vshrl.u32 %v303_v10, 16  ;;  %v355_v21 = vrot.slane %v353_v12, 7 }
  0x15   : > { %264 = vst [vmem:[#allocation2 + $0x90] sm:$0xff] %v6623_v2  ;;  %265 = vst [vmem:[#allocation2 + $0x98] sm:$0xff] %v6623_v2  ;;  %v665_v20 = vld [vmem:[#allocation2 + $0x28] sm:$0x1]  ;;  %v364_v22 = vshll.u32 %v303_v10, 16  ;;  %v341_v24 = vor.u32 %v339_v7, %v338_v14  ;;  %v342_v25 = vrot.slane %v338_v14, 4 }
  0x16   : > { %266 = vst [vmem:[#allocation2 + $0xa0] sm:$0x11] %v6623_v2  ;;  %267 = vst [vmem:[#allocation2 + $0xa8] sm:$0xff] %v6623_v2  ;;  %v304_v23 = vld [vmem:[%s6691_s29 + $0x10] sm:$0xf]  ;;  %v349_v26 = vor.u32 %v347_v9, %v346_v17  ;;  %v351_v27 = vrot.slane %v346_v17, 4  ;;  %v358_v29 = vor.u32 %v356_v13, %v355_v21 }
  0x17   : > { %268 = vst [vmem:[#allocation2 + $0xb0] sm:$0xff] %v6623_v2  ;;  %269 = vst [vmem:[#allocation2 + $0xb8] sm:$0x11] %v6623_v2  ;;  %v668_v28 = vld [vmem:[#allocation2 + $0x30] sm:$0xf]  ;;  %v359_v30 = vrot.slane %v355_v21, 4 }
  0x18   : > { %270 = vst [vmem:[#allocation2 + $0xc0] sm:$0xff] %v6623_v2  ;;  %271 = vst [vmem:[#allocation2 + $0xc8] sm:$0xff] %v6623_v2  ;;  %v363_v31 = vrot.slane %v361_v18, 7  ;;  %v370_v32 = vshrl.u32 %v304_v23, 16  ;;  %v305_v33 = vld [vmem:[%s6691_s29 + $0x14] sm:$0xf] }
  0x19   : > { %272 = vst [vmem:[#allocation2 + $0xd0] sm:$0x11] %v6623_v2  ;;  %273 = vst [vmem:[#allocation2 + $0xd8] sm:$0xff] %v6623_v2  ;;  %v672_v37 = vld [vmem:[#allocation2 + $0x40] sm:$0x1]  ;;  %v373_v38 = vshll.u32 %v304_v23, 16 }
  0x1a   : > { %274 = vst [vmem:[#allocation2 + $0xe0] sm:$0xff] %v6623_v2  ;;  %275 = vst [vmem:[#allocation2 + $0xe8] sm:$0x11] %v6623_v2  ;;  %v306_v39 = vld [vmem:[%s6691_s29 + $0x18] sm:$0xf]  ;;  %v366_v41 = vor.u32 %v364_v22, %v363_v31  ;;  %v368_v42 = vrot.slane %v363_v31, 4 }
  0x1b   : > { %276 = vst [vmem:[#allocation2 + $0xf0] sm:$0xff] %v6623_v2  ;;  %277 = vst [vmem:[#allocation2 + $0xf8] sm:$0xff] %v6623_v2  ;;  %v372_v43 = vrot.slane %v370_v32, 7  ;;  %v675_v44 = vld [vmem:[#allocation2 + $0x48] sm:$0xf]  ;;  %v378_v46 = vshrl.u32 %v305_v33, 16 }
  0x1c   : > { %278 = vst [vmem:[#allocation2 + $0x100] sm:$0x11] %v6623_v2  ;;  %279 = vst [vmem:[#allocation2 + $0x108] sm:$0xff] %v6623_v2  ;;  %v307_v45 = vld [vmem:[%s6691_s29 + $0x1c] sm:$0xf]  ;;  %v381_v47 = vshll.u32 %v305_v33, 16 }
  0x1d   : > { %280 = vst [vmem:[#allocation2 + $0x110] sm:$0xff] %v6623_v2  ;;  %281 = vst [vmem:[#allocation2 + $0x118] sm:$0x11] %v6623_v2  ;;  %v387_v48 = vshrl.u32 %v306_v39, 16  ;;  %v390_v49 = vshll.u32 %v306_v39, 16  ;;  %v375_v53 = vor.u32 %v373_v38, %v372_v43  ;;  %v376_v54 = vrot.slane %v372_v43, 4 }
  0x1e   : > { %282 = vst [vmem:[#allocation2 + $0x120] sm:$0xff] %v6623_v2  ;;  %283 = vst [vmem:[#allocation2 + $0x128] sm:$0xff] %v6623_v2  ;;  %v308_v50 = vld [vmem:[%s6691_s29 + $0x20] sm:$0xf]  ;;  %v679_v55 = vld [vmem:[#allocation2 + $0x58] sm:$0x1] }
  0x1f   : > { %284 = vst [vmem:[#allocation2 + $0x130] sm:$0x11] %v6623_v2  ;;  %285 = vst [vmem:[#allocation2 + $0x138] sm:$0xff] %v6623_v2  ;;  %v309_v56 = vld [vmem:[%s6691_s29 + $0x24] sm:$0xf]  ;;  %v380_v57 = vrot.slane %v378_v46, 7 }
  0x20   : > { %286 = vst [vmem:[#allocation2 + $0x140] sm:$0xff] %v6623_v2  ;;  %287 = vst [vmem:[#allocation2 + $0x148] sm:$0x11] %v6623_v2  ;;  %v389_v58 = vrot.slane %v387_v48, 7  ;;  %v682_v59 = vld [vmem:[#allocation2 + $0x60] sm:$0xf] }
  0x21   : > { %288 = vst [vmem:[#allocation2 + $0x150] sm:$0xff] %v6623_v2  ;;  %289 = vst [vmem:[#allocation2 + $0x158] sm:$0xff] %v6623_v2  ;;  %v395_v60 = vshrl.u32 %v307_v45, 16  ;;  %v398_v61 = vshll.u32 %v307_v45, 16  ;;  %v404_v63 = vshrl.u32 %v308_v50, 16  ;;  %v412_v3 = vshrl.u32 %v309_v56, 16 }
  0x22   : > { %290 = vst [vmem:[#allocation2 + $0x160] sm:$0x11] %v6623_v2  ;;  %291 = vst [vmem:[#allocation2 + $0x168] sm:$0xff] %v6623_v2  ;;  %v310_v4 = vld [vmem:[%s6691_s29 + $0x28] sm:$0xf]  ;;  %v383_v5 = vor.u32 %v381_v47, %v380_v57  ;;  %v385_v6 = vrot.slane %v380_v57, 4  ;;  %v392_v7 = vor.u32 %v390_v49, %v389_v58 }
  0x23   : > { %292 = vst [vmem:[#allocation2 + $0x170] sm:$0xff] %v6623_v2  ;;  %293 = vst [vmem:[#allocation2 + $0x178] sm:$0x11] %v6623_v2  ;;  %v393_v8 = vrot.slane %v389_v58, 4  ;;  %v397_v9 = vrot.slane %v395_v60, 7  ;;  %v406_v12 = vrot.slane %v404_v63, 7 }
  0x24   : > { %294 = vst [vmem:[#allocation2 + $0x180] sm:$0xff] %v6623_v2  ;;  %295 = vst [vmem:[#allocation2 + $0x188] sm:$0xff] %v6623_v2  ;;  %v686_v10 = vld [vmem:[#allocation2 + $0x70] sm:$0x1]  ;;  %v414_v13 = vrot.slane %v412_v3, 7  ;;  %v415_v14 = vshll.u32 %v309_v56, 16 }
  0x25   : > { %296 = vst [vmem:[#allocation2 + $0x190] sm:$0x11] %v6623_v2  ;;  %297 = vst [vmem:[#allocation2 + $0x198] sm:$0xff] %v6623_v2  ;;  %v421_v21 = vshrl.u32 %v310_v4, 16  ;;  %v311_v22 = vld [vmem:[%s6691_s29 + $0x2c] sm:$0xf]  ;;  %v400_v23 = vor.u32 %v398_v61, %v397_v9 }
  0x26   : > { %298 = vst [vmem:[#allocation2 + $0x1a0] sm:$0xff] %v6623_v2  ;;  %299 = vst [vmem:[#allocation2 + $0x1a8] sm:$0x11] %v6623_v2  ;;  %v407_v2 = vshll.u32 %v308_v50, 16  ;;  %v424_v32 = vshll.u32 %v310_v4, 16  ;;  %v432_v46 = vshll.u32 %v311_v22, 16 }
  0x27   : > { %vm6703_vm5 = vmand %vm656_vm1, %vm657_vm0  ;;  %v423_v31 = vrot.slane %v421_v21, 7  ;;  %v312_v33 = vld [vmem:[%s6691_s29 + $0x30] sm:$0xf]  ;;  %v313_v38 = vld [vmem:[%s6691_s29 + $0x34] sm:$0xf] }
  0x28   : > { %vm6709_vm6 = vmor %vm332_vm2, %vm333_vm3  ;;  %v660_v34 = vsel %vm6703_vm5, %v341_v24, %v659_v15  ;;  %v669_v40 = vsel %vm6703_vm5, %v358_v29, %v668_v28  ;;  %v676_v62 = vsel %vm6703_vm5, %v375_v53, %v675_v44  ;;  %v683_v18 = vsel %vm6703_vm5, %v392_v7, %v682_v59  ;;  %v696_v28 = vld [vmem:[#allocation2 + $0x90] sm:$0xf]  ;;  %v314_v39 = vld [vmem:[%s6691_s29 + $0x38] sm:$0xf] }
  0x29   : > { %vm6715_vm7 = vmand %vm663_vm4, %vm332_vm2  ;;  %v350_v35 = vsel %vm6709_vm6, %v342_v25, %v349_v26  ;;  %661 = vst [vmem:[#allocation2 + $0x18] sm:$0xf] %v660_v34  ;;  %v367_v51 = vsel %vm6709_vm6, %v359_v30, %v366_v41  ;;  %v384_v15 = vsel %vm6709_vm6, %v376_v54, %v383_v5  ;;  %v402_v24 = vrot.slane %v397_v9, 4  ;;  %v700_v44 = vld [vmem:[#allocation2 + $0xa0] sm:$0x1] }
  0x2a   : > { %v666_v36 = vsel %vm6715_vm7, %v351_v27, %v665_v20  ;;  %662 = vst [vmem:[#allocation2 + $0x20] sm:$0xf] %v350_v35  ;;  %670 = vst [vmem:[#allocation2 + $0x30] sm:$0xf] %v669_v40  ;;  %v673_v52 = vsel %vm6715_vm7, %v368_v42, %v672_v37  ;;  %v680_v17 = vsel %vm6715_vm7, %v385_v6, %v679_v55  ;;  %v689_v20 = vld [vmem:[#allocation2 + $0x78] sm:$0xf] }
  0x2b   : > { %667 = vst [vmem:[#allocation2 + $0x28] sm:$0x1] %v666_v36  ;;  %671 = vst [vmem:[#allocation2 + $0x38] sm:$0xf] %v367_v51  ;;  %v409_v25 = vor.u32 %v407_v2, %v406_v12  ;;  %v410_v26 = vrot.slane %v406_v12, 4  ;;  %v417_v29 = vor.u32 %v415_v14, %v414_v13  ;;  %v419_v30 = vrot.slane %v414_v13, 4 }
  0x2c   : > { %674 = vst [vmem:[#allocation2 + $0x40] sm:$0x1] %v673_v52  ;;  %677 = vst [vmem:[#allocation2 + $0x48] sm:$0xf] %v676_v62  ;;  %v693_v27 = vld [vmem:[#allocation2 + $0x88] sm:$0x1]  ;;  %v401_v34 = vsel %vm6709_vm6, %v393_v8, %v400_v23  ;;  %v687_v35 = vsel %vm6715_vm7, %v402_v24, %v686_v10  ;;  %v426_v42 = vor.u32 %v424_v32, %v423_v31 }
  0x2d   : > { %678 = vst [vmem:[#allocation2 + $0x50] sm:$0xf] %v384_v15  ;;  %681 = vst [vmem:[#allocation2 + $0x58] sm:$0x1] %v680_v17  ;;  %v690_v36 = vsel %vm6703_vm5, %v409_v25, %v689_v20  ;;  %v429_v37 = vshrl.u32 %v311_v22, 16  ;;  %v418_v40 = vsel %vm6709_vm6, %v410_v26, %v417_v29  ;;  %v694_v41 = vsel %vm6715_vm7, %v419_v30, %v693_v27 }
  0x2e   : > { %684 = vst [vmem:[#allocation2 + $0x60] sm:$0xf] %v683_v18  ;;  %685 = vst [vmem:[#allocation2 + $0x68] sm:$0xf] %v401_v34  ;;  %v427_v43 = vrot.slane %v423_v31, 4  ;;  %v438_v47 = vshrl.u32 %v312_v33, 16  ;;  %v697_v50 = vsel %vm6703_vm5, %v426_v42, %v696_v28 }
  0x2f   : > { %688 = vst [vmem:[#allocation2 + $0x70] sm:$0x1] %v687_v35  ;;  %691 = vst [vmem:[#allocation2 + $0x78] sm:$0xf] %v690_v36  ;;  %v431_v45 = vrot.slane %v429_v37, 7  ;;  %v441_v48 = vshll.u32 %v312_v33, 16 }
  0x30   : > { %692 = vst [vmem:[#allocation2 + $0x80] sm:$0xf] %v418_v40  ;;  %695 = vst [vmem:[#allocation2 + $0x88] sm:$0x1] %v694_v41  ;;  %v315_v49 = vld [vmem:[%s6691_s29 + $0x3c] sm:$0xf] }
  0x31   : > { %v703_v51 = vld [vmem:[#allocation2 + $0xa8] sm:$0xf]  ;;  %v446_v52 = vshrl.u32 %v313_v38, 16  ;;  %v449_v53 = vshll.u32 %v313_v38, 16  ;;  %v455_v54 = vshrl.u32 %v314_v39, 16  ;;  %v434_v55 = vor.u32 %v432_v46, %v431_v45 }
  0x32   : > { %698 = vst [vmem:[#allocation2 + $0x90] sm:$0xf] %v697_v50  ;;  %v436_v56 = vrot.slane %v431_v45, 4  ;;  %v440_v57 = vrot.slane %v438_v47, 7  ;;  %v707_v58 = vld [vmem:[#allocation2 + $0xb8] sm:$0x1] }
  0x33   : > { %v458_v59 = vshll.u32 %v314_v39, 16  ;;  %v448_v60 = vrot.slane %v446_v52, 7  ;;  %v457_v61 = vrot.slane %v455_v54, 7  ;;  %v463_v62 = vshrl.u32 %v315_v49, 16  ;;  %v316_v2 = vld [vmem:[%s6691_s29 + $0x40] sm:$0xf] }
  0x34   : > { %v466_v63 = vshll.u32 %v315_v49, 16  ;;  %v435_v3 = vsel %vm6709_vm6, %v427_v43, %v434_v55  ;;  %v701_v4 = vsel %vm6715_vm7, %v436_v56, %v700_v44  ;;  %v443_v5 = vor.u32 %v441_v48, %v440_v57  ;;  %v710_v7 = vld [vmem:[#allocation2 + $0xc0] sm:$0xf]  ;;  %v317_v8 = vld [vmem:[%s6691_s29 + $0x44] sm:$0xf] }
  0x35   : > { %v444_v6 = vrot.slane %v440_v57, 4  ;;  %699 = vst [vmem:[#allocation2 + $0x98] sm:$0xf] %v435_v3  ;;  %702 = vst [vmem:[#allocation2 + $0xa0] sm:$0x1] %v701_v4  ;;  %v451_v9 = vor.u32 %v449_v53, %v448_v60  ;;  %v453_v10 = vrot.slane %v448_v60, 4  ;;  %v460_v12 = vor.u32 %v458_v59, %v457_v61 }
  0x36   : > { %v461_v13 = vrot.slane %v457_v61, 4  ;;  %v318_v14 = vld [vmem:[%s6691_s29 + $0x48] sm:$0xf]  ;;  %v704_v15 = vsel %vm6703_vm5, %v443_v5, %v703_v51  ;;  %v465_v17 = vrot.slane %v463_v62, 7  ;;  %v472_v18 = vshrl.u32 %v316_v2, 16 }
  0x37   : > { %v475_v20 = vshll.u32 %v316_v2, 16  ;;  %v319_v21 = vld [vmem:[%s6691_s29 + $0x4c] sm:$0xf]  ;;  %705 = vst [vmem:[#allocation2 + $0xa8] sm:$0xf] %v704_v15  ;;  %v452_v22 = vsel %vm6709_vm6, %v444_v6, %v451_v9  ;;  %v708_v23 = vsel %vm6715_vm7, %v453_v10, %v707_v58  ;;  %v711_v24 = vsel %vm6703_vm5, %v460_v12, %v710_v7 }
  0x38   : > { %v714_v25 = vld [vmem:[#allocation2 + $0xd0] sm:$0x1]  ;;  %v480_v26 = vshrl.u32 %v317_v8, 16  ;;  %706 = vst [vmem:[#allocation2 + $0xb0] sm:$0xf] %v452_v22  ;;  %v468_v27 = vor.u32 %v466_v63, %v465_v17  ;;  %v470_v28 = vrot.slane %v465_v17, 4 }
  0x39   : > { %709 = vst [vmem:[#allocation2 + $0xb8] sm:$0x1] %v708_v23  ;;  %712 = vst [vmem:[#allocation2 + $0xc0] sm:$0xf] %v711_v24  ;;  %v474_v29 = vrot.slane %v472_v18, 7  ;;  %v483_v31 = vshll.u32 %v317_v8, 16 }
  0x3a   : > { %v717_v30 = vld [vmem:[#allocation2 + $0xd8] sm:$0xf]  ;;  %v482_v32 = vrot.slane %v480_v26, 7  ;;  %v489_v33 = vshrl.u32 %v318_v14, 16  ;;  %v492_v34 = vshll.u32 %v318_v14, 16  ;;  %v497_v35 = vshrl.u32 %v319_v21, 16 }
  0x3b   : > { %v320_v36 = vld [vmem:[%s6691_s29 + $0x50] sm:$0xf]  ;;  %v469_v37 = vsel %vm6709_vm6, %v461_v13, %v468_v27  ;;  %v715_v38 = vsel %vm6715_vm7, %v470_v28, %v714_v25  ;;  %v477_v39 = vor.u32 %v475_v20, %v474_v29  ;;  %v478_v40 = vrot.slane %v474_v29, 4  ;;  %v721_v41 = vld [vmem:[#allocation2 + $0xe8] sm:$0x1] }
  0x3c   : > { %v724_v42 = vld [vmem:[#allocation2 + $0xf0] sm:$0xf]  ;;  %713 = vst [vmem:[#allocation2 + $0xc8] sm:$0xf] %v469_v37  ;;  %716 = vst [vmem:[#allocation2 + $0xd0] sm:$0x1] %v715_v38  ;;  %v485_v43 = vor.u32 %v483_v31, %v482_v32 }
  0x3d   : > { %v487_v44 = vrot.slane %v482_v32, 4  ;;  %v491_v45 = vrot.slane %v489_v33, 7  ;;  %v499_v46 = vrot.slane %v497_v35, 7  ;;  %v728_v47 = vld [vmem:[#allocation2 + $0x100] sm:$0x1]  ;;  %v718_v49 = vsel %vm6703_vm5, %v477_v39, %v717_v30 }
  0x3e   : > { %v321_v48 = vld [vmem:[%s6691_s29 + $0x54] sm:$0xf]  ;;  %v500_v50 = vshll.u32 %v319_v21, 16  ;;  %v506_v51 = vshrl.u32 %v320_v36, 16  ;;  %v509_v52 = vshll.u32 %v320_v36, 16  ;;  %v486_v54 = vsel %vm6709_vm6, %v478_v40, %v485_v43 }
  0x3f   : > { %v322_v53 = vld [vmem:[%s6691_s29 + $0x58] sm:$0xf]  ;;  %719 = vst [vmem:[#allocation2 + $0xd8] sm:$0xf] %v718_v49  ;;  %v722_v55 = vsel %vm6715_vm7, %v487_v44, %v721_v41  ;;  %v494_v56 = vor.u32 %v492_v34, %v491_v45  ;;  %v495_v57 = vrot.slane %v491_v45, 4  ;;  %v504_v61 = vrot.slane %v499_v46, 4 }
  0x40   : > { %v731_v58 = vld [vmem:[#allocation2 + $0x108] sm:$0xf]  ;;  %v323_v59 = vld [vmem:[%s6691_s29 + $0x5c] sm:$0xf]  ;;  %720 = vst [vmem:[#allocation2 + $0xe0] sm:$0xf] %v486_v54  ;;  %v502_v60 = vor.u32 %v500_v50, %v499_v46 }
  0x41   : > { %723 = vst [vmem:[#allocation2 + $0xe8] sm:$0x1] %v722_v55  ;;  %v508_v62 = vrot.slane %v506_v51, 7  ;;  %v514_v63 = vshrl.u32 %v321_v48, 16  ;;  %v324_v2 = vld [vmem:[%s6691_s29 + $0x60] sm:$0xf]  ;;  %v725_v3 = vsel %vm6703_vm5, %v494_v56, %v724_v42  ;;  %v729_v9 = vsel %vm6715_vm7, %v504_v61, %v728_v47 }
  0x42   : > { %v517_v4 = vshll.u32 %v321_v48, 16  ;;  %v523_v5 = vshrl.u32 %v322_v53, 16  ;;  %v526_v6 = vshll.u32 %v322_v53, 16  ;;  %v325_v7 = vld [vmem:[%s6691_s29 + $0x64] sm:$0xf]  ;;  %v503_v8 = vsel %vm6709_vm6, %v495_v57, %v502_v60 }
  0x43   : > { %726 = vst [vmem:[#allocation2 + $0xf0] sm:$0xf] %v725_v3  ;;  %v511_v10 = vor.u32 %v509_v52, %v508_v62  ;;  %v512_v12 = vrot.slane %v508_v62, 4  ;;  %v735_v13 = vld [vmem:[#allocation2 + $0x118] sm:$0x1]  ;;  %v516_v14 = vrot.slane %v514_v63, 7 }
  0x44   : > { %727 = vst [vmem:[#allocation2 + $0xf8] sm:$0xf] %v503_v8  ;;  %730 = vst [vmem:[#allocation2 + $0x100] sm:$0x1] %v729_v9  ;;  %v525_v15 = vrot.slane %v523_v5, 7  ;;  %v531_v18 = vshrl.u32 %v323_v59, 16 }
  0x45   : > { %v738_v17 = vld [vmem:[#allocation2 + $0x120] sm:$0xf]  ;;  %v534_v20 = vshll.u32 %v323_v59, 16  ;;  %v732_v21 = vsel %vm6703_vm5, %v511_v10, %v731_v58  ;;  %v540_v22 = vshrl.u32 %v324_v2, 16  ;;  %v543_v23 = vshll.u32 %v324_v2, 16 }
  0x46   : > { %v548_v24 = vshrl.u32 %v325_v7, 16  ;;  %v326_v25 = vld [vmem:[%s6691_s29 + $0x68] sm:$0xf]  ;;  %733 = vst [vmem:[#allocation2 + $0x108] sm:$0xf] %v732_v21  ;;  %v519_v26 = vor.u32 %v517_v4, %v516_v14  ;;  %v521_v27 = vrot.slane %v516_v14, 4  ;;  %v528_v28 = vor.u32 %v526_v6, %v525_v15 }
  0x47   : > { %v529_v29 = vrot.slane %v525_v15, 4  ;;  %v533_v30 = vrot.slane %v531_v18, 7  ;;  %v742_v31 = vld [vmem:[#allocation2 + $0x130] sm:$0x1]  ;;  %v542_v32 = vrot.slane %v540_v22, 7  ;;  %v551_v34 = vshll.u32 %v325_v7, 16 }
  0x48   : > { %v550_v33 = vrot.slane %v548_v24, 7  ;;  %v520_v35 = vsel %vm6709_vm6, %v512_v12, %v519_v26  ;;  %v736_v36 = vsel %vm6715_vm7, %v521_v27, %v735_v13  ;;  %v739_v37 = vsel %vm6703_vm5, %v528_v28, %v738_v17  ;;  %v745_v38 = vld [vmem:[#allocation2 + $0x138] sm:$0xf]  ;;  %v327_v40 = vld [vmem:[%s6691_s29 + $0x6c] sm:$0xf] }
  0x49   : > { %v557_v39 = vshrl.u32 %v326_v25, 16  ;;  %734 = vst [vmem:[#allocation2 + $0x110] sm:$0xf] %v520_v35  ;;  %737 = vst [vmem:[#allocation2 + $0x118] sm:$0x1] %v736_v36  ;;  %v536_v41 = vor.u32 %v534_v20, %v533_v30  ;;  %v538_v42 = vrot.slane %v533_v30, 4  ;;  %v545_v43 = vor.u32 %v543_v23, %v542_v32 }
  0x4a   : > { %740 = vst [vmem:[#allocation2 + $0x120] sm:$0xf] %v739_v37  ;;  %v546_v44 = vrot.slane %v542_v32, 4  ;;  %v749_v45 = vld [vmem:[#allocation2 + $0x148] sm:$0x1]  ;;  %v553_v47 = vor.u32 %v551_v34, %v550_v33  ;;  %v555_v48 = vrot.slane %v550_v33, 4 }
  0x4b   : > { %v752_v46 = vld [vmem:[#allocation2 + $0x150] sm:$0xf]  ;;  %v559_v49 = vrot.slane %v557_v39, 7  ;;  %v560_v50 = vshll.u32 %v326_v25, 16  ;;  %v537_v52 = vsel %vm6709_vm6, %v529_v29, %v536_v41  ;;  %v743_v53 = vsel %vm6715_vm7, %v538_v42, %v742_v31  ;;  %v329_v56 = vld [vmem:[%s6691_s29 + $0x74] sm:$0xf] }
  0x4c   : > { %v328_v51 = vld [vmem:[%s6691_s29 + $0x70] sm:$0xf]  ;;  %v746_v54 = vsel %vm6703_vm5, %v545_v43, %v745_v38  ;;  %v565_v55 = vshrl.u32 %v327_v40, 16  ;;  %v330_v57 = vld [vmem:[%s6691_s29 + $0x78] sm:$0xf]  ;;  %v554_v58 = vsel %vm6709_vm6, %v546_v44, %v553_v47  ;;  %v750_v59 = vsel %vm6715_vm7, %v555_v48, %v749_v45 }
  0x4d   : > { %741 = vst [vmem:[#allocation2 + $0x128] sm:$0xf] %v537_v52  ;;  %744 = vst [vmem:[#allocation2 + $0x130] sm:$0x1] %v743_v53  ;;  %v562_v60 = vor.u32 %v560_v50, %v559_v49  ;;  %v563_v61 = vrot.slane %v559_v49, 4  ;;  %v568_v2 = vshll.u32 %v327_v40, 16 }
  0x4e   : > { %747 = vst [vmem:[#allocation2 + $0x138] sm:$0xf] %v746_v54  ;;  %v756_v62 = vld [vmem:[#allocation2 + $0x160] sm:$0x1]  ;;  %748 = vst [vmem:[#allocation2 + $0x140] sm:$0xf] %v554_v58 }
  0x4f   : > { %751 = vst [vmem:[#allocation2 + $0x148] sm:$0x1] %v750_v59  ;;  %v567_v63 = vrot.slane %v565_v55, 7  ;;  %v574_v3 = vshrl.u32 %v328_v51, 16  ;;  %v577_v4 = vshll.u32 %v328_v51, 16  ;;  %v753_v6 = vsel %vm6703_vm5, %v562_v60, %v752_v46 }
  0x50   : > { %v331_v5 = vld [vmem:[%s6691_s29 + $0x7c] sm:$0xf]  ;;  %v759_v7 = vld [vmem:[#allocation2 + $0x168] sm:$0xf]  ;;  %v582_v8 = vshrl.u32 %v329_v56, 16  ;;  %v585_v9 = vshll.u32 %v329_v56, 16 }
  0x51   : > { %v591_v10 = vshrl.u32 %v330_v57, 16  ;;  %754 = vst [vmem:[#allocation2 + $0x150] sm:$0xf] %v753_v6  ;;  %v570_v12 = vor.u32 %v568_v2, %v567_v63  ;;  %v572_v13 = vrot.slane %v567_v63, 4  ;;  %v576_v14 = vrot.slane %v574_v3, 7 }
  0x52   : > { %v763_v15 = vld [vmem:[#allocation2 + $0x178] sm:$0x1]  ;;  %v594_v17 = vshll.u32 %v330_v57, 16  ;;  %v584_v18 = vrot.slane %v582_v8, 7  ;;  %v599_v21 = vshrl.u32 %v331_v5, 16  ;;  %v602_v22 = vshll.u32 %v331_v5, 16 }
  0x53   : > { %v593_v20 = vrot.slane %v591_v10, 7  ;;  %v773_v23 = vld [vmem:[%s6830_s10] sm:$0xf]  ;;  %v571_v24 = vsel %vm6709_vm6, %v563_v61, %v570_v12  ;;  %v757_v25 = vsel %vm6715_vm7, %v572_v13, %v756_v62  ;;  %v579_v26 = vor.u32 %v577_v4, %v576_v14  ;;  %v774_v29 = vld [vmem:[%s6830_s10 + $0x4] sm:$0xf] }
  0x54   : > { %v580_v27 = vrot.slane %v576_v14, 4  ;;  %v766_v28 = vld [vmem:[#allocation2 + $0x180] sm:$0xf]  ;;  %755 = vst [vmem:[#allocation2 + $0x158] sm:$0xf] %v571_v24  ;;  %v587_v30 = vor.u32 %v585_v9, %v584_v18  ;;  %v589_v31 = vrot.slane %v584_v18, 4 }
  0x55   : > { %758 = vst [vmem:[#allocation2 + $0x160] sm:$0x1] %v757_v25  ;;  %v596_v32 = vor.u32 %v594_v17, %v593_v20  ;;  %v597_v33 = vrot.slane %v593_v20, 4  ;;  %v775_v34 = vld [vmem:[%s6830_s10 + $0x8] sm:$0xf]  ;;  %v760_v35 = vsel %vm6703_vm5, %v579_v26, %v759_v7  ;;  %v601_v36 = vrot.slane %v599_v21, 7 }
  0x56   : > { %v806_v37 = vshrl.u32 %v773_v23, 16  ;;  %v809_v38 = vshll.u32 %v773_v23, 16  ;;  %v776_v39 = vld [vmem:[%s6830_s10 + $0xc] sm:$0xf]  ;;  %761 = vst [vmem:[#allocation2 + $0x168] sm:$0xf] %v760_v35  ;;  %v588_v40 = vsel %vm6709_vm6, %v580_v27, %v587_v30  ;;  %v764_v41 = vsel %vm6715_vm7, %v589_v31, %v763_v15 }
  0x57   : > { %v767_v42 = vsel %vm6703_vm5, %v596_v32, %v766_v28  ;;  %v770_v43 = vld [vmem:[#allocation2 + $0x190] sm:$0x1]  ;;  %v814_v44 = vshrl.u32 %v774_v29, 16  ;;  %762 = vst [vmem:[#allocation2 + $0x170] sm:$0xf] %v588_v40  ;;  %v604_v45 = vor.u32 %v602_v22, %v601_v36  ;;  %v606_v46 = vrot.slane %v601_v36, 4 }
  0x58   : > { %765 = vst [vmem:[#allocation2 + $0x178] sm:$0x1] %v764_v41  ;;  %768 = vst [vmem:[#allocation2 + $0x180] sm:$0xf] %v767_v42  ;;  %v808_v47 = vrot.slane %v806_v37, 7  ;;  %v817_v49 = vshll.u32 %v774_v29, 16 }
  0x59   : > { %v1125_v48 = vld [vmem:[#allocation2 + $0x1c] sm:$0xf]  ;;  %v816_v50 = vrot.slane %v814_v44, 7  ;;  %v823_v51 = vshrl.u32 %v775_v34, 16  ;;  %v826_v52 = vshll.u32 %v775_v34, 16  ;;  %v831_v53 = vshrl.u32 %v776_v39, 16 }
  0x5a   : > { %v777_v54 = vld [vmem:[%s6830_s10 + $0x10] sm:$0xf]  ;;  %v605_v55 = vsel %vm6709_vm6, %v597_v33, %v604_v45  ;;  %v771_v56 = vsel %vm6715_vm7, %v606_v46, %v770_v43  ;;  %v811_v57 = vor.u32 %v809_v38, %v808_v47  ;;  %v812_v58 = vrot.slane %v808_v47, 4  ;;  %v1129_v59 = vld [vmem:[#allocation2 + $0x2c] sm:$0x1] }
  0x5b   : > { %v1132_v60 = vld [vmem:[#allocation2 + $0x34] sm:$0xf]  ;;  %769 = vst [vmem:[#allocation2 + $0x188] sm:$0xf] %v605_v55  ;;  %772 = vst [vmem:[#allocation2 + $0x190] sm:$0x1] %v771_v56  ;;  %v819_v61 = vor.u32 %v817_v49, %v816_v50 }
  0x5c   : > { %v821_v62 = vrot.slane %v816_v50, 4  ;;  %v825_v63 = vrot.slane %v823_v51, 7  ;;  %v833_v2 = vrot.slane %v831_v53, 7  ;;  %v1136_v3 = vld [vmem:[#allocation2 + $0x44] sm:$0x1]  ;;  %v1126_v5 = vsel %vm6703_vm5, %v811_v57, %v1125_v48 }
  0x5d   : > { %v778_v4 = vld [vmem:[%s6830_s10 + $0x14] sm:$0xf]  ;;  %v834_v6 = vshll.u32 %v776_v39, 16  ;;  %v840_v7 = vshrl.u32 %v777_v54, 16  ;;  %v843_v8 = vshll.u32 %v777_v54, 16  ;;  %v820_v10 = vsel %vm6709_vm6, %v812_v58, %v819_v61 }
  0x5e   : > { %v779_v9 = vld [vmem:[%s6830_s10 + $0x18] sm:$0xf]  ;;  %1127 = vst [vmem:[#allocation2 + $0x1c] sm:$0xf] %v1126_v5  ;;  %v1130_v12 = vsel %vm6715_vm7, %v821_v62, %v1129_v59  ;;  %v828_v13 = vor.u32 %v826_v52, %v825_v63  ;;  %v829_v14 = vrot.slane %v825_v63, 4  ;;  %v838_v20 = vrot.slane %v833_v2, 4 }
  0x5f   : > { %v1139_v15 = vld [vmem:[#allocation2 + $0x4c] sm:$0xf]  ;;  %v780_v17 = vld [vmem:[%s6830_s10 + $0x1c] sm:$0xf]  ;;  %1128 = vst [vmem:[#allocation2 + $0x24] sm:$0xf] %v820_v10  ;;  %v836_v18 = vor.u32 %v834_v6, %v833_v2 }
  0x60   : > { %1131 = vst [vmem:[#allocation2 + $0x2c] sm:$0x1] %v1130_v12  ;;  %v842_v21 = vrot.slane %v840_v7, 7  ;;  %v848_v22 = vshrl.u32 %v778_v4, 16  ;;  %v781_v23 = vld [vmem:[%s6830_s10 + $0x20] sm:$0xf]  ;;  %v1133_v24 = vsel %vm6703_vm5, %v828_v13, %v1132_v60  ;;  %v1137_v30 = vsel %vm6715_vm7, %v838_v20, %v1136_v3 }
  0x61   : > { %v851_v25 = vshll.u32 %v778_v4, 16  ;;  %v857_v26 = vshrl.u32 %v779_v9, 16  ;;  %v860_v27 = vshll.u32 %v779_v9, 16  ;;  %v782_v28 = vld [vmem:[%s6830_s10 + $0x24] sm:$0xf]  ;;  %v837_v29 = vsel %vm6709_vm6, %v829_v14, %v836_v18 }
  0x62   : > { %1134 = vst [vmem:[#allocation2 + $0x34] sm:$0xf] %v1133_v24  ;;  %v845_v31 = vor.u32 %v843_v8, %v842_v21  ;;  %v846_v32 = vrot.slane %v842_v21, 4  ;;  %v1143_v33 = vld [vmem:[#allocation2 + $0x5c] sm:$0x1]  ;;  %v850_v34 = vrot.slane %v848_v22, 7 }
  0x63   : > { %1135 = vst [vmem:[#allocation2 + $0x3c] sm:$0xf] %v837_v29  ;;  %1138 = vst [vmem:[#allocation2 + $0x44] sm:$0x1] %v1137_v30  ;;  %v859_v35 = vrot.slane %v857_v26, 7  ;;  %v865_v37 = vshrl.u32 %v780_v17, 16 }
  0x64   : > { %v1146_v36 = vld [vmem:[#allocation2 + $0x64] sm:$0xf]  ;;  %v868_v38 = vshll.u32 %v780_v17, 16  ;;  %v1140_v39 = vsel %vm6703_vm5, %v845_v31, %v1139_v15  ;;  %v874_v40 = vshrl.u32 %v781_v23, 16  ;;  %v877_v41 = vshll.u32 %v781_v23, 16 }
  0x65   : > { %v882_v42 = vshrl.u32 %v782_v28, 16  ;;  %v783_v43 = vld [vmem:[%s6830_s10 + $0x28] sm:$0xf]  ;;  %1141 = vst [vmem:[#allocation2 + $0x4c] sm:$0xf] %v1140_v39  ;;  %v853_v44 = vor.u32 %v851_v25, %v850_v34  ;;  %v855_v45 = vrot.slane %v850_v34, 4  ;;  %v862_v46 = vor.u32 %v860_v27, %v859_v35 }
  0x66   : > { %v863_v47 = vrot.slane %v859_v35, 4  ;;  %v867_v48 = vrot.slane %v865_v37, 7  ;;  %v1150_v49 = vld [vmem:[#allocation2 + $0x74] sm:$0x1]  ;;  %v876_v50 = vrot.slane %v874_v40, 7  ;;  %v885_v52 = vshll.u32 %v782_v28, 16 }
  0x67   : > { %v884_v51 = vrot.slane %v882_v42, 7  ;;  %v854_v53 = vsel %vm6709_vm6, %v846_v32, %v853_v44  ;;  %v1144_v54 = vsel %vm6715_vm7, %v855_v45, %v1143_v33  ;;  %v1147_v55 = vsel %vm6703_vm5, %v862_v46, %v1146_v36  ;;  %v1153_v56 = vld [vmem:[#allocation2 + $0x7c] sm:$0xf]  ;;  %v784_v58 = vld [vmem:[%s6830_s10 + $0x2c] sm:$0xf] }
  0x68   : > { %v891_v57 = vshrl.u32 %v783_v43, 16  ;;  %1142 = vst [vmem:[#allocation2 + $0x54] sm:$0xf] %v854_v53  ;;  %1145 = vst [vmem:[#allocation2 + $0x5c] sm:$0x1] %v1144_v54  ;;  %v870_v59 = vor.u32 %v868_v38, %v867_v48  ;;  %v872_v60 = vrot.slane %v867_v48, 4  ;;  %v879_v61 = vor.u32 %v877_v41, %v876_v50 }
  0x69   : > { %1148 = vst [vmem:[#allocation2 + $0x64] sm:$0xf] %v1147_v55  ;;  %v880_v62 = vrot.slane %v876_v50, 4  ;;  %v1157_v63 = vld [vmem:[#allocation2 + $0x8c] sm:$0x1]  ;;  %v887_v3 = vor.u32 %v885_v52, %v884_v51  ;;  %v889_v4 = vrot.slane %v884_v51, 4 }
  0x6a   : > { %v1160_v2 = vld [vmem:[#allocation2 + $0x94] sm:$0xf]  ;;  %v893_v5 = vrot.slane %v891_v57, 7  ;;  %v894_v6 = vshll.u32 %v783_v43, 16  ;;  %v785_v7 = vld [vmem:[%s6830_s10 + $0x30] sm:$0xf]  ;;  %v871_v8 = vsel %vm6709_vm6, %v863_v47, %v870_v59  ;;  %v1151_v9 = vsel %vm6715_vm7, %v872_v60, %v1150_v49 }
  0x6b   : > { %v1154_v10 = vsel %vm6703_vm5, %v879_v61, %v1153_v56  ;;  %v899_v12 = vshrl.u32 %v784_v58, 16  ;;  %v786_v13 = vld [vmem:[%s6830_s10 + $0x34] sm:$0xf]  ;;  %v787_v14 = vld [vmem:[%s6830_s10 + $0x38] sm:$0xf]  ;;  %v888_v15 = vsel %vm6709_vm6, %v880_v62, %v887_v3  ;;  %v1158_v17 = vsel %vm6715_vm7, %v889_v4, %v1157_v63 }
  0x6c   : > { %1149 = vst [vmem:[#allocation2 + $0x6c] sm:$0xf] %v871_v8  ;;  %1152 = vst [vmem:[#allocation2 + $0x74] sm:$0x1] %v1151_v9  ;;  %v896_v18 = vor.u32 %v894_v6, %v893_v5  ;;  %v897_v20 = vrot.slane %v893_v5, 4  ;;  %v902_v23 = vshll.u32 %v784_v58, 16 }
  0x6d   : > { %1155 = vst [vmem:[#allocation2 + $0x7c] sm:$0xf] %v1154_v10  ;;  %v1164_v21 = vld [vmem:[#allocation2 + $0xa4] sm:$0x1]  ;;  %1156 = vst [vmem:[#allocation2 + $0x84] sm:$0xf] %v888_v15 }
  0x6e   : > { %1159 = vst [vmem:[#allocation2 + $0x8c] sm:$0x1] %v1158_v17  ;;  %v901_v22 = vrot.slane %v899_v12, 7  ;;  %v908_v24 = vshrl.u32 %v785_v7, 16  ;;  %v911_v25 = vshll.u32 %v785_v7, 16  ;;  %v1161_v27 = vsel %vm6703_vm5, %v896_v18, %v1160_v2 }
  0x6f   : > { %v788_v26 = vld [vmem:[%s6830_s10 + $0x3c] sm:$0xf]  ;;  %v1167_v28 = vld [vmem:[#allocation2 + $0xac] sm:$0xf]  ;;  %v916_v29 = vshrl.u32 %v786_v13, 16  ;;  %v919_v30 = vshll.u32 %v786_v13, 16 }
  0x70   : > { %v925_v31 = vshrl.u32 %v787_v14, 16  ;;  %1162 = vst [vmem:[#allocation2 + $0x94] sm:$0xf] %v1161_v27  ;;  %v904_v32 = vor.u32 %v902_v23, %v901_v22  ;;  %v906_v33 = vrot.slane %v901_v22, 4  ;;  %v910_v34 = vrot.slane %v908_v24, 7 }
  0x71   : > { %v1171_v35 = vld [vmem:[#allocation2 + $0xbc] sm:$0x1]  ;;  %v928_v36 = vshll.u32 %v787_v14, 16  ;;  %v918_v37 = vrot.slane %v916_v29, 7  ;;  %v933_v39 = vshrl.u32 %v788_v26, 16  ;;  %v936_v40 = vshll.u32 %v788_v26, 16 }
  0x72   : > { %v927_v38 = vrot.slane %v925_v31, 7  ;;  %v789_v41 = vld [vmem:[%s6830_s10 + $0x40] sm:$0xf]  ;;  %v905_v42 = vsel %vm6709_vm6, %v897_v20, %v904_v32  ;;  %v1165_v43 = vsel %vm6715_vm7, %v906_v33, %v1164_v21  ;;  %v913_v44 = vor.u32 %v911_v25, %v910_v34  ;;  %v1174_v46 = vld [vmem:[#allocation2 + $0xc4] sm:$0xf] }
  0x73   : > { %v914_v45 = vrot.slane %v910_v34, 4  ;;  %v790_v47 = vld [vmem:[%s6830_s10 + $0x44] sm:$0xf]  ;;  %1163 = vst [vmem:[#allocation2 + $0x9c] sm:$0xf] %v905_v42  ;;  %v921_v48 = vor.u32 %v919_v30, %v918_v37  ;;  %v923_v49 = vrot.slane %v918_v37, 4 }
  0x74   : > { %1166 = vst [vmem:[#allocation2 + $0xa4] sm:$0x1] %v1165_v43  ;;  %v930_v50 = vor.u32 %v928_v36, %v927_v38  ;;  %v931_v51 = vrot.slane %v927_v38, 4  ;;  %v791_v52 = vld [vmem:[%s6830_s10 + $0x48] sm:$0xf]  ;;  %v1168_v53 = vsel %vm6703_vm5, %v913_v44, %v1167_v28  ;;  %v935_v54 = vrot.slane %v933_v39, 7 }
  0x75   : > { %v942_v55 = vshrl.u32 %v789_v41, 16  ;;  %v945_v56 = vshll.u32 %v789_v41, 16  ;;  %v792_v57 = vld [vmem:[%s6830_s10 + $0x4c] sm:$0xf]  ;;  %1169 = vst [vmem:[#allocation2 + $0xac] sm:$0xf] %v1168_v53  ;;  %v922_v58 = vsel %vm6709_vm6, %v914_v45, %v921_v48  ;;  %v1172_v59 = vsel %vm6715_vm7, %v923_v49, %v1171_v35 }
  0x76   : > { %v1175_v60 = vsel %vm6703_vm5, %v930_v50, %v1174_v46  ;;  %v1178_v61 = vld [vmem:[#allocation2 + $0xd4] sm:$0x1]  ;;  %v950_v62 = vshrl.u32 %v790_v47, 16  ;;  %1170 = vst [vmem:[#allocation2 + $0xb4] sm:$0xf] %v922_v58  ;;  %v938_v63 = vor.u32 %v936_v40, %v935_v54  ;;  %v940_v2 = vrot.slane %v935_v54, 4 }
  0x77   : > { %1173 = vst [vmem:[#allocation2 + $0xbc] sm:$0x1] %v1172_v59  ;;  %1176 = vst [vmem:[#allocation2 + $0xc4] sm:$0xf] %v1175_v60  ;;  %v944_v3 = vrot.slane %v942_v55, 7  ;;  %v953_v5 = vshll.u32 %v790_v47, 16 }
  0x78   : > { %v1181_v4 = vld [vmem:[#allocation2 + $0xdc] sm:$0xf]  ;;  %v952_v6 = vrot.slane %v950_v62, 7  ;;  %v959_v7 = vshrl.u32 %v791_v52, 16  ;;  %v962_v8 = vshll.u32 %v791_v52, 16  ;;  %v967_v9 = vshrl.u32 %v792_v57, 16 }
  0x79   : > { %v793_v10 = vld [vmem:[%s6830_s10 + $0x50] sm:$0xf]  ;;  %v939_v12 = vsel %vm6709_vm6, %v931_v51, %v938_v63  ;;  %v1179_v13 = vsel %vm6715_vm7, %v940_v2, %v1178_v61  ;;  %v947_v14 = vor.u32 %v945_v56, %v944_v3  ;;  %v948_v15 = vrot.slane %v944_v3, 4  ;;  %v1185_v17 = vld [vmem:[#allocation2 + $0xec] sm:$0x1] }
  0x7a   : > { %v1188_v18 = vld [vmem:[#allocation2 + $0xf4] sm:$0xf]  ;;  %1177 = vst [vmem:[#allocation2 + $0xcc] sm:$0xf] %v939_v12  ;;  %1180 = vst [vmem:[#allocation2 + $0xd4] sm:$0x1] %v1179_v13  ;;  %v955_v20 = vor.u32 %v953_v5, %v952_v6 }
  0x7b   : > { %v957_v21 = vrot.slane %v952_v6, 4  ;;  %v961_v22 = vrot.slane %v959_v7, 7  ;;  %v969_v23 = vrot.slane %v967_v9, 7  ;;  %v1192_v24 = vld [vmem:[#allocation2 + $0x104] sm:$0x1]  ;;  %v1182_v26 = vsel %vm6703_vm5, %v947_v14, %v1181_v4 }
  0x7c   : > { %v794_v25 = vld [vmem:[%s6830_s10 + $0x54] sm:$0xf]  ;;  %v970_v27 = vshll.u32 %v792_v57, 16  ;;  %v976_v28 = vshrl.u32 %v793_v10, 16  ;;  %v979_v29 = vshll.u32 %v793_v10, 16  ;;  %v956_v31 = vsel %vm6709_vm6, %v948_v15, %v955_v20 }
  0x7d   : > { %v795_v30 = vld [vmem:[%s6830_s10 + $0x58] sm:$0xf]  ;;  %1183 = vst [vmem:[#allocation2 + $0xdc] sm:$0xf] %v1182_v26  ;;  %v1186_v32 = vsel %vm6715_vm7, %v957_v21, %v1185_v17  ;;  %v964_v33 = vor.u32 %v962_v8, %v961_v22  ;;  %v965_v34 = vrot.slane %v961_v22, 4  ;;  %v974_v38 = vrot.slane %v969_v23, 4 }
  0x7e   : > { %v1195_v35 = vld [vmem:[#allocation2 + $0x10c] sm:$0xf]  ;;  %v796_v36 = vld [vmem:[%s6830_s10 + $0x5c] sm:$0xf]  ;;  %1184 = vst [vmem:[#allocation2 + $0xe4] sm:$0xf] %v956_v31  ;;  %v972_v37 = vor.u32 %v970_v27, %v969_v23 }
  0x7f   : > { %1187 = vst [vmem:[#allocation2 + $0xec] sm:$0x1] %v1186_v32  ;;  %v978_v39 = vrot.slane %v976_v28, 7  ;;  %v984_v40 = vshrl.u32 %v794_v25, 16  ;;  %v797_v41 = vld [vmem:[%s6830_s10 + $0x60] sm:$0xf]  ;;  %v1189_v42 = vsel %vm6703_vm5, %v964_v33, %v1188_v18  ;;  %v1193_v48 = vsel %vm6715_vm7, %v974_v38, %v1192_v24 }
  0x80   : > { %v987_v43 = vshll.u32 %v794_v25, 16  ;;  %v993_v44 = vshrl.u32 %v795_v30, 16  ;;  %v996_v45 = vshll.u32 %v795_v30, 16  ;;  %v798_v46 = vld [vmem:[%s6830_s10 + $0x64] sm:$0xf]  ;;  %v973_v47 = vsel %vm6709_vm6, %v965_v34, %v972_v37 }
  0x81   : > { %1190 = vst [vmem:[#allocation2 + $0xf4] sm:$0xf] %v1189_v42  ;;  %v981_v49 = vor.u32 %v979_v29, %v978_v39  ;;  %v982_v50 = vrot.slane %v978_v39, 4  ;;  %v1199_v51 = vld [vmem:[#allocation2 + $0x11c] sm:$0x1]  ;;  %v986_v52 = vrot.slane %v984_v40, 7 }
  0x82   : > { %1191 = vst [vmem:[#allocation2 + $0xfc] sm:$0xf] %v973_v47  ;;  %1194 = vst [vmem:[#allocation2 + $0x104] sm:$0x1] %v1193_v48  ;;  %v995_v53 = vrot.slane %v993_v44, 7  ;;  %v1001_v55 = vshrl.u32 %v796_v36, 16 }
  0x83   : > { %v1202_v54 = vld [vmem:[#allocation2 + $0x124] sm:$0xf]  ;;  %v1004_v56 = vshll.u32 %v796_v36, 16  ;;  %v1196_v57 = vsel %vm6703_vm5, %v981_v49, %v1195_v35  ;;  %v1010_v58 = vshrl.u32 %v797_v41, 16  ;;  %v1013_v59 = vshll.u32 %v797_v41, 16 }
  0x84   : > { %v1018_v60 = vshrl.u32 %v798_v46, 16  ;;  %v799_v61 = vld [vmem:[%s6830_s10 + $0x68] sm:$0xf]  ;;  %1197 = vst [vmem:[#allocation2 + $0x10c] sm:$0xf] %v1196_v57  ;;  %v989_v62 = vor.u32 %v987_v43, %v986_v52  ;;  %v991_v63 = vrot.slane %v986_v52, 4  ;;  %v998_v2 = vor.u32 %v996_v45, %v995_v53 }
  0x85   : > { %v999_v3 = vrot.slane %v995_v53, 4  ;;  %v1003_v4 = vrot.slane %v1001_v55, 7  ;;  %v1206_v5 = vld [vmem:[#allocation2 + $0x134] sm:$0x1]  ;;  %v1012_v6 = vrot.slane %v1010_v58, 7  ;;  %v1021_v8 = vshll.u32 %v798_v46, 16 }
  0x86   : > { %v1020_v7 = vrot.slane %v1018_v60, 7  ;;  %v990_v9 = vsel %vm6709_vm6, %v982_v50, %v989_v62  ;;  %v1200_v10 = vsel %vm6715_vm7, %v991_v63, %v1199_v51  ;;  %v1203_v12 = vsel %vm6703_vm5, %v998_v2, %v1202_v54  ;;  %v1209_v13 = vld [vmem:[#allocation2 + $0x13c] sm:$0xf]  ;;  %v800_v15 = vld [vmem:[%s6830_s10 + $0x6c] sm:$0xf] }
  0x87   : > { %v1027_v14 = vshrl.u32 %v799_v61, 16  ;;  %1198 = vst [vmem:[#allocation2 + $0x114] sm:$0xf] %v990_v9  ;;  %1201 = vst [vmem:[#allocation2 + $0x11c] sm:$0x1] %v1200_v10  ;;  %v1006_v17 = vor.u32 %v1004_v56, %v1003_v4  ;;  %v1008_v18 = vrot.slane %v1003_v4, 4  ;;  %v1015_v20 = vor.u32 %v1013_v59, %v1012_v6 }
  0x88   : > { %1204 = vst [vmem:[#allocation2 + $0x124] sm:$0xf] %v1203_v12  ;;  %v1016_v21 = vrot.slane %v1012_v6, 4  ;;  %v1213_v22 = vld [vmem:[#allocation2 + $0x14c] sm:$0x1]  ;;  %v1023_v24 = vor.u32 %v1021_v8, %v1020_v7  ;;  %v1025_v25 = vrot.slane %v1020_v7, 4 }
  0x89   : > { %v1216_v23 = vld [vmem:[#allocation2 + $0x154] sm:$0xf]  ;;  %v1029_v26 = vrot.slane %v1027_v14, 7  ;;  %v1030_v27 = vshll.u32 %v799_v61, 16  ;;  %v801_v28 = vld [vmem:[%s6830_s10 + $0x70] sm:$0xf]  ;;  %v1007_v29 = vsel %vm6709_vm6, %v999_v3, %v1006_v17  ;;  %v1207_v30 = vsel %vm6715_vm7, %v1008_v18, %v1206_v5 }
  0x8a   : > { %v1210_v31 = vsel %vm6703_vm5, %v1015_v20, %v1209_v13  ;;  %v1035_v32 = vshrl.u32 %v800_v15, 16  ;;  %v802_v33 = vld [vmem:[%s6830_s10 + $0x74] sm:$0xf]  ;;  %v803_v34 = vld [vmem:[%s6830_s10 + $0x78] sm:$0xf]  ;;  %v1024_v35 = vsel %vm6709_vm6, %v1016_v21, %v1023_v24  ;;  %v1214_v36 = vsel %vm6715_vm7, %v1025_v25, %v1213_v22 }
  0x8b   : > { %1205 = vst [vmem:[#allocation2 + $0x12c] sm:$0xf] %v1007_v29  ;;  %1208 = vst [vmem:[#allocation2 + $0x134] sm:$0x1] %v1207_v30  ;;  %v1032_v37 = vor.u32 %v1030_v27, %v1029_v26  ;;  %v1033_v38 = vrot.slane %v1029_v26, 4  ;;  %v1038_v40 = vshll.u32 %v800_v15, 16 }
  0x8c   : > { %1211 = vst [vmem:[#allocation2 + $0x13c] sm:$0xf] %v1210_v31  ;;  %1212 = vst [vmem:[#allocation2 + $0x144] sm:$0xf] %v1024_v35  ;;  %v1037_v39 = vrot.slane %v1035_v32, 7  ;;  %v1044_v41 = vshrl.u32 %v801_v28, 16 }
  0x8d   : > { %1215 = vst [vmem:[#allocation2 + $0x14c] sm:$0x1] %v1214_v36  ;;  %v1047_v42 = vshll.u32 %v801_v28, 16  ;;  %v804_v43 = vld [vmem:[%s6830_s10 + $0x7c] sm:$0xf]  ;;  %v1217_v44 = vsel %vm6703_vm5, %v1032_v37, %v1216_v23  ;;  %v1052_v46 = vshrl.u32 %v802_v33, 16 }
  0x8e   : > { %v1220_v45 = vld [vmem:[#allocation2 + $0x164] sm:$0x1]  ;;  %v1055_v47 = vshll.u32 %v802_v33, 16  ;;  %v1061_v48 = vshrl.u32 %v803_v34, 16  ;;  %1218 = vst [vmem:[#allocation2 + $0x154] sm:$0xf] %v1217_v44  ;;  %v1040_v49 = vor.u32 %v1038_v40, %v1037_v39 }
  0x8f   : > { %v1042_v50 = vrot.slane %v1037_v39, 4  ;;  %v1046_v51 = vrot.slane %v1044_v41, 7  ;;  %v1064_v52 = vshll.u32 %v803_v34, 16  ;;  %v1223_v53 = vld [vmem:[#allocation2 + $0x16c] sm:$0xf]  ;;  %v1054_v54 = vrot.slane %v1052_v46, 7 }
  0x90   : > { %v1063_v55 = vrot.slane %v1061_v48, 7  ;;  %v1069_v56 = vshrl.u32 %v804_v43, 16  ;;  %v1072_v57 = vshll.u32 %v804_v43, 16  ;;  %v1041_v58 = vsel %vm6709_vm6, %v1033_v38, %v1040_v49  ;;  %v1227_v62 = vld [vmem:[#allocation2 + $0x17c] sm:$0x1] }
  0x91   : > { %v1221_v59 = vsel %vm6715_vm7, %v1042_v50, %v1220_v45  ;;  %v1049_v60 = vor.u32 %v1047_v42, %v1046_v51  ;;  %v1050_v61 = vrot.slane %v1046_v51, 4  ;;  %v1230_v63 = vld [vmem:[#allocation2 + $0x184] sm:$0xf]  ;;  %1219 = vst [vmem:[#allocation2 + $0x15c] sm:$0xf] %v1041_v58  ;;  %v1057_v2 = vor.u32 %v1055_v47, %v1054_v54 }
  0x92   : > { %1222 = vst [vmem:[#allocation2 + $0x164] sm:$0x1] %v1221_v59  ;;  %v1059_v3 = vrot.slane %v1054_v54, 4  ;;  %v1066_v4 = vor.u32 %v1064_v52, %v1063_v55  ;;  %v1067_v6 = vrot.slane %v1063_v55, 4  ;;  %v1071_v7 = vrot.slane %v1069_v56, 7 }
  0x93   : > { %v1224_v5 = vsel %vm6703_vm5, %v1049_v60, %v1223_v53  ;;  %v1058_v8 = vsel %vm6709_vm6, %v1050_v61, %v1057_v2  ;;  %v1234_v12 = vld [vmem:[#allocation2 + $0x194] sm:$0x1] }
  0x94   : > { %1225 = vst [vmem:[#allocation2 + $0x16c] sm:$0xf] %v1224_v5  ;;  %v1228_v9 = vsel %vm6715_vm7, %v1059_v3, %v1227_v62  ;;  %v1231_v10 = vsel %vm6703_vm5, %v1066_v4, %v1230_v63  ;;  %1226 = vst [vmem:[#allocation2 + $0x174] sm:$0xf] %v1058_v8  ;;  %v1074_v13 = vor.u32 %v1072_v57, %v1071_v7  ;;  %v1076_v14 = vrot.slane %v1071_v7, 4 }
  0x95   : > { %1229 = vst [vmem:[#allocation2 + $0x17c] sm:$0x1] %v1228_v9  ;;  %1232 = vst [vmem:[#allocation2 + $0x184] sm:$0xf] %v1231_v10 }
  0x96   : > { %v1075_v15 = vsel %vm6709_vm6, %v1067_v6, %v1074_v13  ;;  %v1235_v17 = vsel %vm6715_vm7, %v1076_v14, %v1234_v12 }
  0x97   : > { %1233 = vst [vmem:[#allocation2 + $0x18c] sm:$0xf] %v1075_v15  ;;  %1236 = vst [vmem:[#allocation2 + $0x194] sm:$0x1] %v1235_v17 }
  0x98 LB: >> { %v6431_v11 = vld [vmem:[%s8872_s2 + $0xf8] sm:$0xff]   ;;  %v6433_v19 = vld [vmem:[%s8872_s2 + $0xf0] sm:$0xff]   ;;  %v6435_v20 = vld [vmem:[%s8872_s2 + $0xe8] sm:$0xff]   ;;  %s5820_s27 = smul.u32 192, %s6621_s11  ;;  %vm1305_vm8 = vsmask.f32 3328  ;;  %s6621_s11 = sphi %s6978_s11, %s1244_s11  }
  0x99   : >> { %v6432_v16 = vld [vmem:[%s8872_s2 + $0xb8] sm:$0xff]   ;;  %5822 = vmatprep.subr.bf16.mxu0 %v6431_v11  ;;  %6398 = vmatprep.subr.bf16.mxu1 %v6431_v11  ;;  %v6434_v18 = vld [vmem:[%s8872_s2 + $0xb0] sm:$0xff]   ;;  %v6436_v21 = vld [vmem:[%s8872_s2 + $0xa8] sm:$0xff]   ;;  %vm1306_vm9 = vsmask.f32 7440  ;;  %vm2087_vm11 = vcmask 1042432  }
  0x9a   : >> { %5823 = vmatpush3.bf16.msra.mxu0 %v6432_v16  ;;  %6406 = vmatpush3.bf16.msra.mxu1 %v6432_v16  ;;  %v6437_v22 = vld [vmem:[%s8872_s2 + $0xe0] sm:$0xff]   ;;  %v6439_v24 = vld [vmem:[%s8872_s2 + $0xd8] sm:$0xff]   ;;  %v6441_v26 = vld [vmem:[%s8872_s2 + $0xd0] sm:$0xff]   ;;  %s7017_s13 = scalar_lea.vmem [#allocation2], %s5820_s27  ;;  %vm2088_vm12 = vcmask 1046532  }
  0x9b   : >> { %5824 = vmatprep.subr.bf16.mxu0 %v6433_v19  ;;  %6399 = vmatprep.subr.bf16.mxu1 %v6433_v19  ;;  %v6438_v23 = vld [vmem:[%s8872_s2 + $0xa0] sm:$0xff]   ;;  %v6440_v25 = vld [vmem:[%s8872_s2 + $0x98] sm:$0xff]   ;;  %v6442_v34 = vld [vmem:[%s8872_s2 + $0x90] sm:$0xff]  }
  0x9c   : >> { %v6443_v43 = vld [vmem:[%s8872_s2 + $0xc8] sm:$0xff]   ;;  %vm7055_vm10 = vmor %vm1305_vm8, %vm1306_vm9  ;;  %v6445_v60 = vld [vmem:[%s8872_s2 + $0xc0] sm:$0xff]  }
  0x9d   : >> { %v6444_v56 = vld [vmem:[%s8872_s2 + $0x88] sm:$0xff]   ;;  %v6446_v5 = vld [vmem:[%s8872_s2 + $0x80] sm:$0xff]   ;;  %v6447_v10 = vld [vmem:[%s8872_s2 + $0x78] sm:$0xff]  }
  0x9e   : >> { %5825 = vmatpush3.bf16.msra.mxu0 %v6434_v18  ;;  %6407 = vmatpush3.bf16.msra.mxu1 %v6434_v18  ;;  %v7020_v27 = vld [vmem:[%s7017_s13] sm:$0xff]  ;;  %v7023_v28 = vld [vmem:[%s7017_s13 + $0x8] sm:$0xff]  ;;  %v7026_v29 = vld [vmem:[%s7017_s13 + $0x10] sm:$0x11] }
  0x9f   : >> { %5826 = vmatprep.subr.bf16.mxu0 %v6435_v20  ;;  %6400 = vmatprep.subr.bf16.mxu1 %v6435_v20  ;;  %v1309_v30 = vshrl.u32 %v7020_v27, 16  ;;  %v1312_v31 = vshll.u32 %v7020_v27, 16  ;;  %v1318_v32 = vshll.u32 %v7023_v28, 16  ;;  %v7032_v33 = vld [vmem:[%s7017_s13 + $0x60] sm:$0xff]  ;;  %v1322_v35 = vshrl.u32 %v7023_v28, 16  ;;  %v7040_v37 = vld [vmem:[%s7017_s13 + $0x68] sm:$0xff]  ;;  %vm7218_vm13 = vmor %vm2087_vm11, %vm2088_vm12 }
  0xa0   : >> { %v1328_v36 = vshll.u32 %v7026_v29, 16  ;;  %v7043_v38 = vld [vmem:[%s7017_s13 + $0x70] sm:$0x11]  ;;  %v1405_v42 = vshrl.u32 %v7032_v33, 16  ;;  %v1408_v45 = vshll.u32 %v7032_v33, 16  ;;  %v1414_v46 = vshll.u32 %v7040_v37, 16 }
  0xa1   : >> { %v1311_v39 = vrot.slane %v1309_v30, 4  ;;  %v1314_v40 = vrot.slane %v1312_v31, 5  ;;  %v1320_v41 = vrot.slane %v1318_v32, 5  ;;  %v1324_v44 = vrot.slane %v1322_v35, 4  ;;  %v6448_v13 = vld [vmem:[%s8872_s2 + $0x178] sm:$0xff]   ;;  %v7096_v19 = vld [vmem:[%s7017_s13 + $0x20] sm:$0xff] }
  0xa2   : >> { %5827 = vmatpush3.bf16.msra.mxu0 %v6436_v21  ;;  %6408 = vmatpush3.bf16.msra.mxu1 %v6436_v21  ;;  %v1407_v48 = vrot.slane %v1405_v42, 4  ;;  %v1418_v49 = vshrl.u32 %v7040_v37, 16  ;;  %v1424_v50 = vshll.u32 %v7043_v38, 16  ;;  %v1330_v53 = vrot.slane %v1328_v36, 5  ;;  %v6449_v17 = vld [vmem:[%s8872_s2 + $0x38] sm:$0xff]   ;;  %v6451_v21 = vld [vmem:[%s8872_s2 + $0x70] sm:$0xff]  }
  0xa3   : >> { %5828 = vmatprep.subr.bf16.mxu0 %v6437_v22  ;;  %6401 = vmatprep.subr.bf16.mxu1 %v6437_v22  ;;  %v1315_v47 = vor.u32 %v1314_v40, %v1311_v39  ;;  %v1325_v52 = vor.u32 %v1324_v44, %v1320_v41  ;;  %v1410_v54 = vrot.slane %v1408_v45, 5  ;;  %v1416_v55 = vrot.slane %v1414_v46, 5  ;;  %v6450_v11 = vld [vmem:[%s8872_s2 + $0x138] sm:$0xff]   ;;  %v6452_v22 = vld [vmem:[%s8872_s2 + $0x170] sm:$0xff]   ;;  %v7113_v30 = vld [vmem:[%s7017_s13 + $0x80] sm:$0xff] }
  0xa4   : >> { %v1420_v58 = vrot.slane %v1418_v49, 4  ;;  %v1426_v59 = vrot.slane %v1424_v50, 5  ;;  %v5217_v63 = vcombine.high %v7032_v33, %v7040_v37  ;;  %v5216_v2 = vcombine.low %v7032_v33, %v7040_v37  ;;  %v7093_v16 = vld [vmem:[%s7017_s13 + $0x18] sm:$0xff]  ;;  %v7119_v35 = vld [vmem:[%s7017_s13 + $0x88] sm:$0x11] }
  0xa5   : >> { %v1316_v57 = vrot.slane %v1315_v47, 4  ;;  %v1326_v61 = vrot.slane %v1325_v52, 4  ;;  %v1411_v62 = vor.u32 %v1410_v54, %v1407_v48  ;;  %v1342_v31 = vshll.u32 %v7096_v19, 16  ;;  %v6454_v48 = vld [vmem:[%s8872_s2 + $0x130] sm:$0xff]  }
  0xa6   : >> { %5829 = vmatpush3.bf16.msra.mxu0 %v6438_v23  ;;  %6409 = vmatpush3.bf16.msra.mxu1 %v6438_v23  ;;  %v1421_v4 = vor.u32 %v1420_v58, %v1416_v55  ;;  %v7105_v23 = vld [vmem:[%s7017_s13 + $0x28] sm:$0x11]  ;;  %v1346_v32 = vshrl.u32 %v7096_v19, 16  ;;  %v1438_v42 = vshll.u32 %v7113_v30, 16  ;;  %v2120_v47 = vrot.slane %v7040_v37, 5 }
  0xa7   : >> { %5830 = vmatprep.subr.bf16.mxu0 %v6439_v24  ;;  %6402 = vmatprep.subr.bf16.mxu1 %v6439_v24  ;;  %v1321_v3 = vsel %vm7055_vm10, %v1316_v57, %v1320_v41  ;;  %v1331_v6 = vsel %vm7055_vm10, %v1326_v61, %v1330_v53  ;;  %v1412_v7 = vrot.slane %v1411_v62, 4  ;;  %v1333_v24 = vshrl.u32 %v7093_v16, 16  ;;  %v6456_v61 = vld [vmem:[%s8872_s2 + $0x168] sm:$0xff]  }
  0xa8   : >> { %v5177_v8 = vcombine.high %v1321_v3, %v1331_v6  ;;  %v1422_v9 = vrot.slane %v1421_v4, 4  ;;  %v5176_v14 = vcombine.low %v1321_v3, %v1331_v6  ;;  %v1344_v44 = vrot.slane %v1342_v31, 5  ;;  %v6457_v4 = vld [vmem:[%s8872_s2 + $0x28] sm:$0xff]   ;;  %v7181_v31 = vld [vmem:[%s7017_s13 + $0x38] sm:$0xff] }
  0xa9   : >> { %v1417_v12 = vsel %vm7055_vm10, %v1412_v7, %v1416_v55  ;;  %v1335_v39 = vrot.slane %v1333_v24, 4  ;;  %v1348_v45 = vrot.slane %v1346_v32, 4  ;;  %v1440_v52 = vrot.slane %v1438_v42, 5  ;;  %v6462_v24 = vld [vmem:[%s8872_s2 + $0x120] sm:$0xff]   ;;  %v7192_v42 = vld [vmem:[%s7017_s13 + $0x90] sm:$0xff] }
  0xaa   : >> { %5831 = vmatpush3.bf16.msra.mxu0 %v6440_v25  ;;  %6410 = vmatpush3.bf16.msra.mxu1 %v6440_v25  ;;  %v1427_v15 = vsel %vm7055_vm10, %v1422_v9, %v1426_v59  ;;  %v1336_v25 = vshll.u32 %v7093_v16, 16  ;;  %v1442_v53 = vshrl.u32 %v7113_v30, 16  ;;  %v2092_v32 = vrot.slane %v7023_v28, 5 }
  0xab   : >> { %5832 = vmatprep.subr.bf16.mxu0 %v6441_v26  ;;  %6403 = vmatprep.subr.bf16.mxu1 %v6441_v26  ;;  %v5184_v18 = vcombine.low %v1417_v12, %v1427_v15  ;;  %v5185_v20 = vcombine.high %v1417_v12, %v1427_v15  ;;  %v7110_v26 = vld [vmem:[%s7017_s13 + $0x78] sm:$0xff]  ;;  %v1349_v54 = vor.u32 %v1348_v45, %v1344_v44  ;;  %v1366_v45 = vshll.u32 %v7181_v31, 16 }
  0xac   : >> { %1725 = vmatprep.mubr.bf16.mxu0 %v5177_v8  ;;  %v1429_v36 = vshrl.u32 %v7110_v26, 16  ;;  %v1338_v40 = vrot.slane %v1336_v25, 5  ;;  %v1432_v41 = vshll.u32 %v7110_v26, 16  ;;  %v1444_v59 = vrot.slane %v1442_v53, 4  ;;  %v7178_v25 = vld [vmem:[%s7017_s13 + $0x30] sm:$0xff] }
  0xad   : >> { %1757 = vmatprep.mubr.bf16.mxu1 %v5185_v20  ;;  %v5219_v62 = vcombine.high %v7110_v26, %v7113_v30  ;;  %v7141_v3 = vrot.slane %v1349_v54, 4  ;;  %v2123_v20 = vrot.slane %v7043_v38, 5  ;;  %v7184_v38 = vld [vmem:[%s7017_s13 + $0x40] sm:$0x11]  ;;  %v1456_v53 = vshll.u32 %v7192_v42, 16 }
  0xae   : >> { %5833 = vmatpush3.bf16.msra.mxu0 %v6442_v34  ;;  %6411 = vmatpush3.bf16.msra.mxu1 %v6442_v34  ;;  %v1352_v34 = vshll.u32 %v7105_v23, 16  ;;  %v1431_v46 = vrot.slane %v1429_v36, 4  ;;  %v1339_v49 = vor.u32 %v1338_v40, %v1335_v39  ;;  %v1434_v50 = vrot.slane %v1432_v41, 5 }
  0xaf   : >> { %5834 = vmatprep.subr.bf16.mxu0 %v6443_v43  ;;  %6404 = vmatprep.subr.bf16.mxu1 %v6443_v43  ;;  %v6453_v43 = vld [vmem:[%s8872_s2 + $0x30] sm:$0xff]   ;;  %v1445_v8 = vor.u32 %v1444_v59, %v1440_v52  ;;  %v1357_v40 = vshrl.u32 %v7178_v25, 16  ;;  %v1360_v41 = vshll.u32 %v7178_v25, 16  ;;  %v6463_v59 = vld [vmem:[%s8872_s2 + $0x58] sm:$0xff]  }
  0xb0   : >> { %v1354_v55 = vrot.slane %v1352_v34, 5  ;;  %v1340_v57 = vrot.slane %v1339_v49, 4  ;;  %v1435_v58 = vor.u32 %v1434_v50, %v1431_v46  ;;  %v2122_v34 = vrot.slane %v2120_v47, 4 }
  0xb1   : >> { %v1370_v46 = vshrl.u32 %v7181_v31, 16  ;;  %v1453_v49 = vshrl.u32 %v7192_v42, 16  ;;  %v1359_v50 = vrot.slane %v1357_v40, 4 }
  0xb2   : >> { %5835 = vmatpush3.bf16.msra.mxu0 %v6444_v56  ;;  %6412 = vmatpush3.bf16.msra.mxu1 %v6444_v56  ;;  %v1448_v56 = vshll.u32 %v7119_v35, 16  ;;  %v7150_v6 = vsel %vm7055_vm10, %v1340_v57, %v1344_v44  ;;  %v1436_v7 = vrot.slane %v1435_v58, 4  ;;  %v1355_v12 = vsel %vm7055_vm10, %v7141_v3, %v1354_v55  ;;  %v7198_v44 = vld [vmem:[%s7017_s13 + $0xa0] sm:$0x11] }
  0xb3   : >> { %5836 = vmatprep.subr.bf16.mxu0 %v6445_v60  ;;  %6405 = vmatprep.subr.bf16.mxu1 %v6445_v60  ;;  %v6455_v60 = vld [vmem:[%s8872_s2 + $0x68] sm:$0xff]   ;;  %v1368_v55 = vrot.slane %v1366_v45, 5  ;;  %v1455_v58 = vrot.slane %v1453_v49, 4  ;;  %v6468_v45 = vld [vmem:[%s8872_s2 + $0x150] sm:$0xff]  }
  0xb4   : >> { %v1450_v9 = vrot.slane %v1448_v56, 5  ;;  %v1441_v15 = vsel %vm7055_vm10, %v1436_v7, %v1440_v52  ;;  %v1362_v52 = vrot.slane %v1360_v41, 5  ;;  %v1372_v56 = vrot.slane %v1370_v46, 4 }
  0xb6   : >> { %5837 = vmatpush3.bf16.msra.mxu0 %v6446_v5  ;;  %6413 = vmatpush3.bf16.msra.mxu1 %v6446_v5  ;;  %v5218_v5 = vcombine.low %v7110_v26, %v7113_v30 }
  0xb7   : >> { %5886 = vmatprep.subr.bf16.mxu1 %v6447_v10  ;;  %5950 = vmatprep.subr.bf16.mxu0 %v6448_v13  ;;  %v6458_v10 = vld [vmem:[%s8872_s2 + $0x128] sm:$0xff]   ;;  %v6459_v13 = vld [vmem:[%s8872_s2 + $0x60] sm:$0xff]  }
  0xb9   : >> { %1726 = vmatmul.mubr.bf16.vlgmr.msra.gmra.mxu0 %v5176_v14  ;;  %1758 = vmatmul.mubr.bf16.vlgmr.msra.gmra.mxu1 %v5184_v18  ;;  %v5179_v14 = vcombine.high %v7150_v6, %v1355_v12  ;;  %v6460_v18 = vld [vmem:[%s8872_s2 + $0x160] sm:$0xff]  }
  0xba   : >> { %5887 = vmatpush3.bf16.msra.mxu1 %v6449_v17  ;;  %5951 = vmatpush3.bf16.msra.mxu0 %v6450_v11  ;;  %v1446_v17 = vrot.slane %v1445_v8, 4  ;;  %v5178_v11 = vcombine.low %v7150_v6, %v1355_v12  ;;  %v1373_v12 = vor.u32 %v1372_v56, %v1368_v55  ;;  %v7265_v56 = vrot.slane %v2092_v32, 4 }
  0xbb   : >> { %5888 = vmatprep.subr.bf16.mxu1 %v6451_v21  ;;  %5952 = vmatprep.subr.bf16.mxu0 %v6452_v22  ;;  %v6461_v21 = vld [vmem:[%s8872_s2 + $0x20] sm:$0xff]  }
  0xbc   : >> { %1733 = vmatprep.mubr.bf16.mxu0 %v5179_v14  ;;  %v1451_v22 = vsel %vm7055_vm10, %v1446_v17, %v1450_v9  ;;  %v6465_v9 = vld [vmem:[%s8872_s2 + $0x18] sm:$0xff]  }
  0xbd   : >> { %v5187_v36 = vcombine.high %v1441_v15, %v1451_v22  ;;  %v5186_v39 = vcombine.low %v1441_v15, %v1451_v22  ;;  %v6466_v14 = vld [vmem:[%s8872_s2 + $0x118] sm:$0xff]  }
  0xbe   : >> { %5889 = vmatpush3.bf16.msra.mxu1 %v6453_v43  ;;  %5953 = vmatpush3.bf16.msra.mxu0 %v6454_v48  ;;  %v7195_v43 = vld [vmem:[%s7017_s13 + $0x98] sm:$0xff]  ;;  %v1376_v48 = vshll.u32 %v7184_v38, 16 }
  0xbf   : >> { %5890 = vmatprep.subr.bf16.mxu1 %v6455_v60  ;;  %5954 = vmatprep.subr.bf16.mxu0 %v6456_v61  ;;  %v1462_v54 = vshll.u32 %v7195_v43, 16  ;;  %v6464_v60 = vld [vmem:[%s8872_s2 + $0x158] sm:$0xff]   ;;  %v1363_v61 = vor.u32 %v1362_v52, %v1359_v50  ;;  %v1466_v8 = vshrl.u32 %v7195_v43, 16  ;;  %v6469_v52 = vld [vmem:[%s8872_s2 + $0x10] sm:$0xff]  }
  0xc0   : >> { %1765 = vmatprep.mubr.bf16.mxu1 %v5187_v36  ;;  %v1378_v57 = vrot.slane %v1376_v48, 5  ;;  %v5220_v36 = vcombine.low %v7192_v42, %v7195_v43 }
  0xc1   : >> { %1734 = vmatmul.mubr.bf16.gmra.mxu0 %v5178_v11  ;;  %1766 = vmatmul.mubr.bf16.gmra.mxu1 %v5186_v39  ;;  %v1464_v7 = vrot.slane %v1462_v54, 5  ;;  %v1364_v15 = vrot.slane %v1363_v61, 4  ;;  %v1468_v11 = vrot.slane %v1466_v8, 4  ;;  %v6470_v54 = vld [vmem:[%s8872_s2 + $0x110] sm:$0xff]  }
  0xc2   : >> { %5891 = vmatpush3.bf16.msra.mxu1 %v6457_v4  ;;  %5955 = vmatpush3.bf16.msra.mxu0 %v6458_v10  ;;  %v1458_v4 = vrot.slane %v1456_v53, 5  ;;  %v2095_v53 = vrot.slane %v7026_v29, 5  ;;  %v6483_v29 = vld [vmem:[%s8872_s2 + $0x278] sm:$0xff]  }
  0xc3   : >> { %5892 = vmatprep.subr.bf16.mxu1 %v6459_v13  ;;  %5956 = vmatprep.subr.bf16.mxu0 %v6460_v18  ;;  %v1472_v13 = vshll.u32 %v7198_v44, 16  ;;  %v7228_v18 = vsel %vm7218_vm13, %v2122_v34, %v2123_v20  ;;  %v7238_v39 = vsel %vm7055_vm10, %v1364_v15, %v1368_v55  ;;  %v1469_v41 = vor.u32 %v1468_v11, %v1464_v7  ;;  %v6467_v20 = vld [vmem:[%s8872_s2 + $0x50] sm:$0xff]   ;;  %v7261_v55 = vld [vmem:[%s7017_s13 + $0x48] sm:$0xff] }
  0xc4   : >> { %v1459_v17 = vor.u32 %v1458_v4, %v1455_v58  ;;  %v7270_v58 = vld [vmem:[%s7017_s13 + $0x50] sm:$0xff]  ;;  %v1384_v61 = vshll.u32 %v7261_v55, 16  ;;  %v7278_v4 = vld [vmem:[%s7017_s13 + $0xa8] sm:$0xff] }
  0xc5   : >> { %v1474_v22 = vrot.slane %v1472_v13, 5  ;;  %v1470_v49 = vrot.slane %v1469_v41, 4  ;;  %v7283_v13 = vld [vmem:[%s7017_s13 + $0xb0] sm:$0xff]  ;;  %v6471_v15 = vld [vmem:[%s8872_s2 + $0x48] sm:$0xff]  }
  0xc6   : >> { %5893 = vmatpush3.bf16.msra.mxu1 %v6461_v21  ;;  %5957 = vmatpush3.bf16.msra.mxu0 %v6462_v24  ;;  %v7230_v21 = vrot.slane %v1373_v12, 4  ;;  %v5221_v24 = vcombine.high %v7192_v42, %v7195_v43  ;;  %v1460_v40 = vrot.slane %v1459_v17, 4  ;;  %v1394_v12 = vshrl.u32 %v7270_v58, 16 }
  0xc7   : >> { %5894 = vmatprep.subr.bf16.mxu1 %v6463_v59  ;;  %5958 = vmatprep.subr.bf16.mxu0 %v6464_v60  ;;  %v7273_v59 = vld [vmem:[%s7017_s13 + $0x58] sm:$0x11]  ;;  %v1381_v60 = vshrl.u32 %v7261_v55, 16  ;;  %v1386_v11 = vrot.slane %v1384_v61, 5 }
  0xc8   : >> { %v1379_v34 = vsel %vm7055_vm10, %v7230_v21, %v1378_v57  ;;  %v1465_v48 = vsel %vm7055_vm10, %v1460_v40, %v1464_v7  ;;  %v1475_v57 = vsel %vm7055_vm10, %v1470_v49, %v1474_v22  ;;  %v1400_v22 = vshll.u32 %v7273_v59, 16 }
  0xc9   : >> { %v5181_v46 = vcombine.high %v7238_v39, %v1379_v34  ;;  %v5180_v50 = vcombine.low %v7238_v39, %v1379_v34  ;;  %v5189_v7 = vcombine.high %v1465_v48, %v1475_v57  ;;  %v5188_v8 = vcombine.low %v1465_v48, %v1475_v57 }
  0xca   : >> { %5895 = vmatpush3.bf16.msra.mxu1 %v6465_v9  ;;  %5959 = vmatpush3.bf16.msra.mxu0 %v6466_v14  ;;  %v1390_v9 = vshll.u32 %v7270_v58, 16  ;;  %v7286_v14 = vld [vmem:[%s7017_s13 + $0xb8] sm:$0x11]  ;;  %v1383_v17 = vrot.slane %v1381_v60, 4  ;;  %v1477_v40 = vshrl.u32 %v7278_v4, 16  ;;  %v1480_v34 = vshll.u32 %v7278_v4, 16 }
  0xcb   : >> { %5896 = vmatprep.subr.bf16.mxu1 %v6467_v20  ;;  %5960 = vmatprep.subr.bf16.mxu0 %v6468_v45  ;;  %v1396_v20 = vrot.slane %v1394_v12, 4  ;;  %v1486_v45 = vshll.u32 %v7283_v13, 16  ;;  %v1402_v48 = vrot.slane %v1400_v22, 5  ;;  %v1496_v61 = vshll.u32 %v7286_v14, 16 }
  0xcc   : >> { %1741 = vmatprep.mubr.bf16.mxu0 %v5181_v46  ;;  %1773 = vmatprep.mubr.bf16.mxu1 %v5189_v7  ;;  %v1392_v41 = vrot.slane %v1390_v9, 5  ;;  %v1387_v46 = vor.u32 %v1386_v11, %v1383_v17  ;;  %v1479_v49 = vrot.slane %v1477_v40, 4  ;;  %v1482_v57 = vrot.slane %v1480_v34, 5  ;;  %v6473_v7 = vld [vmem:[%s8872_s2 + $0x8] sm:$0xff]  }
  0xcd   : >> { %1742 = vmatmul.mubr.bf16.gmra.mxu0 %v5180_v50  ;;  %1774 = vmatmul.mubr.bf16.gmra.mxu1 %v5188_v8  ;;  %v1490_v50 = vshrl.u32 %v7283_v13, 16  ;;  %v1488_v60 = vrot.slane %v1486_v45, 5  ;;  %v7306_v17 = vrot.slane %v7096_v19, 5  ;;  %v5223_v11 = vcombine.high %v7278_v4, %v7283_v13  ;;  %v6474_v34 = vld [vmem:[%s8872_s2 + $0x108] sm:$0xff]  }
  0xce   : >> { %5897 = vmatpush3.bf16.msra.mxu1 %v6469_v52  ;;  %5961 = vmatpush3.bf16.msra.mxu0 %v6470_v54  ;;  %v6472_v52 = vld [vmem:[%s8872_s2 + $0x148] sm:$0xff]   ;;  %v1397_v54 = vor.u32 %v1396_v20, %v1392_v41  ;;  %v1388_v9 = vrot.slane %v1387_v46, 4  ;;  %v1498_v20 = vrot.slane %v1496_v61, 5  ;;  %v5222_v45 = vcombine.low %v7278_v4, %v7283_v13 }
  0xcf   : >> { %5898 = vmatprep.subr.bf16.mxu1 %v6471_v15  ;;  %v1492_v8 = vrot.slane %v1490_v50, 4  ;;  %5962 = vmatprep.subr.bf16.mxu0 %v6472_v52  ;;  %v1483_v15 = vor.u32 %v1482_v57, %v1479_v49  ;;  %v6476_v57 = vld [vmem:[%s8872_s2 + $0x140] sm:$0xff]   ;;  %v2144_v33 = vrot.slane %v7286_v14, 5 }
  0xd0   : >> { %v7303_v12 = vrot.slane %v1397_v54, 4  ;;  %v7312_v22 = vsel %vm7055_vm10, %v1388_v9, %v1392_v41  ;;  %v6475_v41 = vld [vmem:[%s8872_s2 + $0x40] sm:$0xff]  }
  0xd1   : >> { %v1493_v40 = vor.u32 %v1492_v8, %v1488_v60  ;;  %v1484_v49 = vrot.slane %v1483_v15, 4  ;;  %v6478_v8 = vld [vmem:[%s8872_s2 + $0x100] sm:$0xff]   ;;  %v5209_v15 = vcombine.high %v7020_v27, %v7023_v28 }
  0xd2   : >> { %5899 = vmatpush3.bf16.msra.mxu1 %v6473_v7  ;;  %v1403_v46 = vsel %vm7055_vm10, %v7303_v12, %v1402_v48  ;;  %5963 = vmatpush3.bf16.msra.mxu0 %v6474_v34  ;;  %v6477_v48 = vld [vmem:[%s8872_s2] sm:$0xff]   ;;  %v2102_v7 = vrot.slane %v7105_v23, 5 }
  0xd3   : >> { %v5183_v50 = vcombine.high %v7312_v22, %v1403_v46  ;;  %v1494_v52 = vrot.slane %v1493_v40, 4  ;;  %v5182_v54 = vcombine.low %v7312_v22, %v1403_v46  ;;  %v1489_v61 = vsel %vm7055_vm10, %v1484_v49, %v1488_v60  ;;  %5900 = vmatprep.subr.bf16.mxu1 %v6475_v41  ;;  %5964 = vmatprep.subr.bf16.mxu0 %v6476_v57  ;;  %v2063_v60 = vld [vmem:[%s7017_s13] sm:$0xee]  ;;  %v6481_v49 = vld [vmem:[%s8872_s2 + $0x1f8] sm:$0xff]  }
  0xd4   : >> { %v2101_v40 = vrot.slane %v7306_v17, 4  ;;  %v5240_v23 = vrot.slane %v2063_v60, 9  ;;  %v7354_v41 = vrot.slane %v7181_v31, 5  ;;  %v5208_v60 = vcombine.low %v7020_v27, %v7023_v28  ;;  %v6490_v27 = vld [vmem:[%s8872_s2 + $0x230] sm:$0xff]  }
  0xd5   : >> { %1749 = vmatprep.mubr.bf16.mxu0 %v5183_v50  ;;  %v1499_v9 = vsel %vm7055_vm10, %v1494_v52, %v1498_v20  ;;  %v2096_v20 = vsel %vm7218_vm13, %v7265_v56, %v2095_v53  ;;  %v2127_v53 = vrot.slane %v7113_v30, 5  ;;  %v2064_v52 = vld [vmem:[%s7017_s13 + $0x18] sm:$0xee] }
  0xd6   : >> { %v5191_v34 = vcombine.high %v1489_v61, %v1499_v9  ;;  %1750 = vmatmul.mubr.bf16.gmra.mxu0 %v5182_v54  ;;  %v5190_v46 = vcombine.low %v1489_v61, %v1499_v9  ;;  %5901 = vmatpush3.bf16.msra.mxu1 %v6477_v48  ;;  %v2093_v50 = vsel %vm7218_vm13, %v5240_v23, %v2092_v32  ;;  %v2130_v54 = vrot.slane %v7119_v35, 5  ;;  %v6484_v9 = vld [vmem:[%s8872_s2 + $0x238] sm:$0xff]  }
  0xd7   : >> { %5965 = vmatpush3.bf16.msra.mxu0 %v6478_v8  ;;  %6014 = vmatprep.subr.bf16.mxu1 %v6481_v49  ;;  %v5281_v56 = vcombine.high %v2093_v50, %v2096_v20  ;;  %v5280_v57 = vcombine.low %v2093_v50, %v2096_v20  ;;  %v5241_v61 = vrot.slane %v2064_v52, 9  ;;  %v2103_v32 = vsel %vm7218_vm13, %v2101_v40, %v2102_v7  ;;  %v6482_v8 = vld [vmem:[%s8872_s2 + $0x1b8] sm:$0xff]   ;;  %v2065_v50 = vld [vmem:[%s7017_s13 + $0x30] sm:$0xee]  ;;  %v6495_v52 = vld [vmem:[%s8872_s2 + $0x268] sm:$0xff]  }
  0xd8   : >> { %1781 = vmatprep.mubr.bf16.mxu1 %v5191_v34  ;;  %6078 = vmatprep.subr.bf16.mxu0 %v6483_v29  ;;  %v2109_v48 = vrot.slane %v7184_v38, 5  ;;  %v2129_v35 = vrot.slane %v2127_v53, 4  ;;  %v6489_v38 = vld [vmem:[%s8872_s2 + $0x270] sm:$0xff]   ;;  %v2108_v7 = vrot.slane %v7354_v41, 4  ;;  %v7392_v23 = vrot.slane %v7270_v58, 5  ;;  %v7638_v30 = vld [vmem:[%s7017_s13 + $0x78] sm:$0xff] }
  0xd9   : >> { %1782 = vmatmul.mubr.bf16.gmra.mxu1 %v5190_v46  ;;  %2371 = vmatprep.mubr.bf16.mxu0 %v5281_v56  ;;  %v6487_v46 = vld [vmem:[%s8872_s2 + $0x1f0] sm:$0xff]   ;;  %v7400_v49 = vcombine.high %v7093_v16, %v7096_v19  ;;  %v5242_v28 = vrot.slane %v2065_v50, 9 }
  0xda   : >> { %1998 = vmatprep.mubr.bf16.mxu1 %v5209_v15  ;;  %v2100_v15 = vsel %vm7218_vm13, %v5241_v61, %v7306_v17  ;;  %v7396_v20 = vsel %vm7218_vm13, %v2129_v35, %v2130_v54  ;;  %v2110_v29 = vsel %vm7218_vm13, %v2108_v7, %v2109_v48  ;;  %v2066_v61 = vld [vmem:[%s7017_s13 + $0x48] sm:$0xee]  ;;  %v2116_v48 = vrot.slane %v7273_v59, 5  ;;  %v6501_v59 = vld [vmem:[%s8872_s2 + $0x260] sm:$0xff]  }
  0xdb   : >> { %v5283_v34 = vcombine.high %v2100_v15, %v2103_v32  ;;  %v2107_v56 = vsel %vm7218_vm13, %v5242_v28, %v7354_v41  ;;  %v5282_v54 = vcombine.low %v2100_v15, %v2103_v32  ;;  %v6493_v35 = vld [vmem:[%s8872_s2 + $0x1e8] sm:$0xff]   ;;  %v5243_v15 = vrot.slane %v2066_v61, 9  ;;  %v6500_v28 = vld [vmem:[%s8872_s2 + $0x1a0] sm:$0xff]  }
  0xdc   : >> { %v6496_v32 = vld [vmem:[%s8872_s2 + $0x228] sm:$0xff]   ;;  %v5284_v61 = vcombine.low %v2107_v56, %v2110_v29 }
  0xdd   : >> { %v2114_v50 = vsel %vm7218_vm13, %v5243_v15, %v7392_v23  ;;  %v6508_v15 = vld [vmem:[%s8872_s2 + $0x218] sm:$0xff]  }
  0xde   : >> { %2372 = vmatmul.mubr.bf16.vlgmr.msra.gmra.mxu0 %v5280_v57  ;;  %v6488_v57 = vld [vmem:[%s8872_s2 + $0x1b0] sm:$0xff]  }
  0xdf   : >> { %6079 = vmatpush3.bf16.msra.mxu0 %v6484_v9  ;;  %2379 = vmatprep.mubr.bf16.mxu0 %v5283_v34  ;;  %v5285_v9 = vcombine.high %v2107_v56, %v2110_v29  ;;  %v6494_v34 = vld [vmem:[%s8872_s2 + $0x1a8] sm:$0xff]   ;;  %v7484_v56 = vcombine.low %v7178_v25, %v7181_v31 }
  0xe0   : >> { %6080 = vmatprep.subr.bf16.mxu0 %v6489_v38  ;;  %v7431_v38 = vcombine.low %v7093_v16, %v7096_v19  ;;  %v6499_v16 = vld [vmem:[%s8872_s2 + $0x1e0] sm:$0xff]  }
  0xe1   : >> { %1999 = vmatmul.mubr.bf16.vlgmr.msra.gmra.mxu1 %v5208_v60  ;;  %v7438_v60 = vcombine.high %v7178_v25, %v7181_v31  ;;  %v6513_v25 = vld [vmem:[%s8872_s2 + $0x250] sm:$0xff]  }
  0xe2   : >> { %6015 = vmatpush3.bf16.msra.mxu1 %v6482_v8  ;;  %2006 = vmatprep.mubr.bf16.mxu1 %v7400_v49  ;;  %v2115_v8 = vrot.slane %v7392_v23, 4 }
  0xe3   : >> { %6016 = vmatprep.subr.bf16.mxu1 %v6487_v46  ;;  %6081 = vmatpush3.bf16.msra.mxu0 %v6490_v27  ;;  %v2067_v46 = vld [vmem:[%s7017_s13 + $0x60] sm:$0xee] }
  0xe4   : >> { %6082 = vmatprep.subr.bf16.mxu0 %v6495_v52  ;;  %v5244_v19 = vrot.slane %v2067_v46, 9  ;;  %v2117_v27 = vsel %vm7218_vm13, %v2115_v8, %v2116_v48  ;;  %v6502_v52 = vld [vmem:[%s8872_s2 + $0x220] sm:$0xff]  }
  0xe6   : >> { %2380 = vmatmul.mubr.bf16.gmra.mxu0 %v5282_v54  ;;  %6017 = vmatpush3.bf16.msra.mxu1 %v6488_v57  ;;  %v7465_v54 = vsel %vm7218_vm13, %v5244_v19, %v2120_v47  ;;  %v6507_v57 = vld [vmem:[%s8872_s2 + $0x258] sm:$0xff]   ;;  %v5287_v47 = vcombine.high %v2114_v50, %v2117_v27  ;;  %v6511_v19 = vld [vmem:[%s8872_s2 + $0x1d0] sm:$0xff]  }
  0xe7   : >> { %2387 = vmatprep.mubr.bf16.mxu0 %v5285_v9  ;;  %6018 = vmatprep.subr.bf16.mxu1 %v6493_v35  ;;  %v5289_v48 = vcombine.high %v7465_v54, %v7228_v18  ;;  %v5288_v9 = vcombine.low %v7465_v54, %v7228_v18  ;;  %v6505_v35 = vld [vmem:[%s8872_s2 + $0x1d8] sm:$0xff]  }
  0xe8   : >> { %6083 = vmatpush3.bf16.msra.mxu0 %v6496_v32  ;;  %v2068_v32 = vld [vmem:[%s7017_s13 + $0x78] sm:$0xee] }
  0xe9   : >> { %2007 = vmatmul.mubr.bf16.gmra.mxu1 %v7431_v38  ;;  %6084 = vmatprep.subr.bf16.mxu0 %v6501_v59  ;;  %v5245_v29 = vrot.slane %v2068_v32, 9  ;;  %v6506_v59 = vld [vmem:[%s8872_s2 + $0x198] sm:$0xff]   ;;  %v6518_v32 = vld [vmem:[%s8872_s2 + $0x188] sm:$0xff]  }
  0xea   : >> { %2014 = vmatprep.mubr.bf16.mxu1 %v7438_v60  ;;  %6019 = vmatpush3.bf16.msra.mxu1 %v6494_v34  ;;  %v7491_v34 = vcombine.high %v7261_v55, %v7270_v58 }
  0xeb   : >> { %6020 = vmatprep.subr.bf16.mxu1 %v6499_v16  ;;  %v7497_v46 = vsel %vm7218_vm13, %v5245_v29, %v2127_v53  ;;  %v6514_v53 = vld [vmem:[%s8872_s2 + $0x210] sm:$0xff]   ;;  %v6525_v29 = vld [vmem:[%s8872_s2 + $0x240] sm:$0xff]  }
  0xec   : >> { %6085 = vmatpush3.bf16.msra.mxu0 %v6502_v52  ;;  %v5291_v31 = vcombine.high %v7497_v46, %v7396_v20  ;;  %v5290_v16 = vcombine.low %v7497_v46, %v7396_v20  ;;  %v5286_v52 = vcombine.low %v2114_v50, %v2117_v27  ;;  %v7529_v50 = vcombine.low %v7261_v55, %v7270_v58  ;;  %v6524_v55 = vld [vmem:[%s8872_s2 + $0x180] sm:$0xff]  }
  0xed   : >> { %6086 = vmatprep.subr.bf16.mxu0 %v6507_v57  ;;  %v2134_v57 = vrot.slane %v7195_v43, 5  ;;  %v2137_v27 = vrot.slane %v7198_v44, 5  ;;  %v6523_v44 = vld [vmem:[%s8872_s2 + $0x1c0] sm:$0xff]  }
  0xee   : >> { %2388 = vmatmul.mubr.bf16.gmra.mxu0 %v5284_v61  ;;  %6021 = vmatpush3.bf16.msra.mxu1 %v6500_v28  ;;  %v6512_v28 = vld [vmem:[%s8872_s2 + $0x190] sm:$0xff]   ;;  %v6519_v61 = vld [vmem:[%s8872_s2 + $0x248] sm:$0xff]   ;;  %v6526_v58 = vld [vmem:[%s8872_s2 + $0x200] sm:$0xff]  }
  0xef   : >> { %2395 = vmatprep.mubr.bf16.mxu0 %v5287_v47  ;;  %6022 = vmatprep.subr.bf16.mxu1 %v6505_v35  ;;  %v6517_v35 = vld [vmem:[%s8872_s2 + $0x1c8] sm:$0xff]  }
  0xf0   : >> { %6087 = vmatpush3.bf16.msra.mxu0 %v6508_v15  ;;  %v6520_v47 = vld [vmem:[%s8872_s2 + $0x208] sm:$0xff]   ;;  %v2136_v15 = vrot.slane %v2134_v57, 4 }
  0xf1   : >> { %2015 = vmatmul.mubr.bf16.gmra.mxu1 %v7484_v56  ;;  %6088 = vmatprep.subr.bf16.mxu0 %v6513_v25  ;;  %v6527_v25 = vld [vmem:[%s8872_s2 + $0x2f8] sm:$0xff]  }
  0xf2   : >> { %2022 = vmatprep.mubr.bf16.mxu1 %v7491_v34  ;;  %6023 = vmatpush3.bf16.msra.mxu1 %v6506_v59  ;;  %v2069_v59 = vld [vmem:[%s7017_s13 + $0x90] sm:$0xee] }
  0xf3   : >> { %6024 = vmatprep.subr.bf16.mxu1 %v6511_v19 }
  0xf4   : >> { %6089 = vmatpush3.bf16.msra.mxu0 %v6514_v53  ;;  %v6529_v53 = vld [vmem:[%s8872_s2 + $0x378] sm:$0xff]  }
  0xf5   : >> { %6090 = vmatprep.subr.bf16.mxu0 %v6519_v61 }
  0xf6   : >> { %2396 = vmatmul.mubr.bf16.gmra.mxu0 %v5286_v52  ;;  %6025 = vmatpush3.bf16.msra.mxu1 %v6512_v28  ;;  %v5246_v28 = vrot.slane %v2069_v59, 9  ;;  %v5399_v52 = vld [vmem:[%s7017_s13 + $0x40] sm:$0x11]  ;;  %v2070_v59 = vld [vmem:[%s7017_s13 + $0xa8] sm:$0xee] }
  0xf7   : >> { %2403 = vmatprep.mubr.bf16.mxu0 %v5289_v48  ;;  %6026 = vmatprep.subr.bf16.mxu1 %v6517_v35  ;;  %v5396_v48 = vld [vmem:[%s7017_s13 + $0x28] sm:$0x11]  ;;  %v2862_v61 = vshll.u32 %v5399_v52, 16  ;;  %v2141_v35 = vrot.slane %v7283_v13, 5 }
  0xf8   : >> { %6091 = vmatpush3.bf16.msra.mxu0 %v6520_v47  ;;  %v3353_v19 = vrot.slane %v5396_v48, 5  ;;  %v3360_v47 = vrot.slane %v5399_v52, 5 }
  0xf9   : >> { %2023 = vmatmul.mubr.bf16.gmra.mxu1 %v7529_v50  ;;  %6092 = vmatprep.subr.bf16.mxu0 %v6525_v29  ;;  %v2135_v29 = vsel %vm7218_vm13, %v5246_v28, %v2134_v57 }
  0xfa   : >> { %2030 = vmatprep.mubr.bf16.mxu1 %v5217_v63  ;;  %6027 = vmatpush3.bf16.msra.mxu1 %v6518_v32  ;;  %v7564_v63 = vsel %vm7218_vm13, %v2101_v40, %v3353_v19  ;;  %v2864_v32 = vrot.slane %v2862_v61, 5  ;;  %v2138_v40 = vsel %vm7218_vm13, %v2136_v15, %v2137_v27  ;;  %v7580_v18 = vsel %vm7218_vm13, %v2108_v7, %v3360_v47 }
  0xfb   : >> { %6028 = vmatprep.subr.bf16.mxu1 %v6523_v44  ;;  %v5402_v44 = vld [vmem:[%s7017_s13 + $0x58] sm:$0x11]  ;;  %v5293_v27 = vcombine.high %v2135_v29, %v2138_v40  ;;  %v5292_v20 = vcombine.low %v2135_v29, %v2138_v40 }
  0xfc   : >> { %6093 = vmatpush3.bf16.msra.mxu0 %v6526_v58  ;;  %v7588_v54 = vsel %vm7055_vm10, %v7230_v21, %v2864_v32  ;;  %v3367_v57 = vrot.slane %v5402_v44, 5  ;;  %v2143_v21 = vrot.slane %v2141_v35, 4  ;;  %v2838_v58 = vshll.u32 %v5396_v48, 16  ;;  %v7632_v48 = vld [vmem:[%s7017_s13 + $0x60] sm:$0xff] }
  0xfd   : >> { %6206 = vmatprep.subr.bf16.mxu0 %v6529_v53  ;;  %v5452_v7 = vcombine.low %v7238_v39, %v7588_v54  ;;  %v5405_v53 = vld [vmem:[%s7017_s13 + $0x70] sm:$0x11]  ;;  %v2891_v61 = vshrl.u32 %v7632_v48, 16 }
  0xfe   : >> { %2404 = vmatmul.mubr.bf16.gmra.mxu0 %v5288_v9  ;;  %6029 = vmatpush3.bf16.msra.mxu1 %v6524_v55  ;;  %v2886_v9 = vshll.u32 %v5402_v44, 16  ;;  %v7602_v15 = vsel %vm7218_vm13, %v2115_v8, %v3367_v57  ;;  %v3374_v28 = vrot.slane %v5405_v53, 5 }
  0xff   : >> { %2411 = vmatprep.mubr.bf16.mxu0 %v5291_v31  ;;  %6142 = vmatprep.subr.bf16.mxu1 %v6527_v25  ;;  %v5453_v31 = vcombine.high %v7238_v39, %v7588_v54  ;;  %v2840_v25 = vrot.slane %v2838_v58, 5  ;;  %v6549_v39 = vld [vmem:[%s8872_s2 + $0x358] sm:$0xff]   ;;  %v7794_v54 = vld [vmem:[%s7017_s13 + $0xd0] sm:$0x11] }
 0x100   : >> { %v2888_v37 = vrot.slane %v2886_v9, 5 }
 0x101   : >> { %2031 = vmatmul.mubr.bf16.gmra.mxu1 %v5216_v2  ;;  %v5247_v2 = vrot.slane %v2070_v59, 9  ;;  %v2841_v26 = vsel %vm7055_vm10, %v7141_v3, %v2840_v25  ;;  %v2894_v3 = vshll.u32 %v7632_v48, 16  ;;  %v2893_v59 = vrot.slane %v2891_v61, 4 }
 0x102   : >> { %2038 = vmatprep.mubr.bf16.mxu1 %v5219_v62  ;;  %v7607_v62 = vsel %vm7055_vm10, %v7303_v12, %v2888_v37  ;;  %v2145_v12 = vsel %vm7218_vm13, %v2143_v21, %v2144_v33  ;;  %v5451_v47 = vcombine.high %v7150_v6, %v2841_v26  ;;  %v5408_v33 = vld [vmem:[%s7017_s13 + $0x88] sm:$0x11] }
 0x103   : >> { %v5455_v14 = vcombine.high %v7312_v22, %v7607_v62  ;;  %v5454_v55 = vcombine.low %v7312_v22, %v7607_v62  ;;  %v2142_v8 = vsel %vm7218_vm13, %v5247_v2, %v2141_v35  ;;  %v2896_v44 = vrot.slane %v2894_v3, 5  ;;  %v7701_v3 = vld [vmem:[%s7017_s13 + $0xa0] sm:$0x11] }
 0x104   : >> { %v5295_v46 = vcombine.high %v2142_v8, %v2145_v12  ;;  %v5294_v52 = vcombine.low %v2142_v8, %v2145_v12  ;;  %v3381_v58 = vrot.slane %v5408_v33, 5  ;;  %v2934_v13 = vshll.u32 %v5408_v33, 16 }
 0x105   : >> { %v2897_v25 = vor.u32 %v2896_v44, %v2893_v59 }
 0x106   : >> { %2412 = vmatmul.mubr.bf16.gmra.mxu0 %v5290_v16  ;;  %v7627_v16 = vld [vmem:[%s7017_s13 + $0x68] sm:$0xff] }
 0x107   : >> { %2419 = vmatprep.mubr.bf16.mxu0 %v5293_v27  ;;  %v3371_v19 = vrot.slane %v7627_v16, 5  ;;  %v2900_v42 = vshll.u32 %v7627_v16, 16  ;;  %v2904_v43 = vshrl.u32 %v7627_v16, 16  ;;  %v2910_v27 = vshll.u32 %v5405_v53, 16  ;;  %v7681_v53 = vld [vmem:[%s7017_s13 + $0x90] sm:$0xff] }
 0x108   : >> { %v2942_v59 = vshll.u32 %v7681_v53, 16 }
 0x109   : >> { %2039 = vmatmul.mubr.bf16.gmra.mxu1 %v5218_v5  ;;  %v3373_v5 = vrot.slane %v3371_v19, 4  ;;  %v7665_v9 = vrot.slane %v2900_v42, 5  ;;  %v2906_v57 = vrot.slane %v2904_v43, 4  ;;  %v2898_v42 = vrot.slane %v2897_v25, 4  ;;  %v7748_v25 = vld [vmem:[%s7017_s13 + $0xa8] sm:$0xff] }
 0x10a   : >> { %2046 = vmatprep.mubr.bf16.mxu1 %v5221_v24  ;;  %v7646_v24 = vld [vmem:[%s7017_s13 + $0x80] sm:$0xff]  ;;  %v2939_v43 = vshrl.u32 %v7681_v53, 16 }
 0x10b   : >> { %v7655_v35 = vsel %vm7218_vm13, %v3373_v5, %v3374_v28  ;;  %v2924_v32 = vshll.u32 %v7646_v24, 16  ;;  %v2928_v29 = vshrl.u32 %v7646_v24, 16  ;;  %v8877_v40 = vrot.slane %v7646_v24, 5  ;;  %v6528_v28 = vld [vmem:[%s8872_s2 + $0x2b8] sm:$0xff]  }
 0x10c   : >> { %v2907_v4 = vor.u32 %v2906_v57, %v7665_v9  ;;  %v6532_v57 = vld [vmem:[%s8872_s2 + $0x2b0] sm:$0xff]  }
 0x10d   : >> { %v7671_v21 = vrot.slane %v2924_v32, 5  ;;  %v2930_v8 = vrot.slane %v2928_v29, 4  ;;  %v3380_v12 = vrot.slane %v8877_v40, 4  ;;  %v7717_v29 = vrot.slane %v2934_v13, 5 }
 0x10e   : >> { %2420 = vmatmul.mubr.bf16.gmra.mxu0 %v5292_v20  ;;  %v5450_v20 = vcombine.low %v7150_v6, %v2841_v26  ;;  %v6533_v6 = vld [vmem:[%s8872_s2 + $0x370] sm:$0xff]   ;;  %v2908_v32 = vrot.slane %v2907_v4, 4  ;;  %v6543_v4 = vld [vmem:[%s8872_s2 + $0x360] sm:$0xff]   ;;  %v7753_v13 = vrot.slane %v2942_v59, 5 }
 0x10f   : >> { %2427 = vmatprep.mubr.bf16.mxu0 %v5295_v46  ;;  %v6530_v46 = vld [vmem:[%s8872_s2 + $0x338] sm:$0xff]   ;;  %v2931_v61 = vor.u32 %v2930_v8, %v7671_v21 }
 0x111   : >> { %2047 = vmatmul.mubr.bf16.gmra.mxu1 %v5220_v36  ;;  %v2915_v36 = vshrl.u32 %v7638_v30, 16  ;;  %v7736_v8 = vrot.slane %v2931_v61, 4  ;;  %v2963_v61 = vshrl.u32 %v7748_v25, 16 }
 0x112   : >> { %2054 = vmatprep.mubr.bf16.mxu1 %v5223_v11  ;;  %v2918_v11 = vshll.u32 %v7638_v30, 16 }
 0x113   : >> { %v2917_v37 = vrot.slane %v2915_v36, 4  ;;  %v6534_v36 = vld [vmem:[%s8872_s2 + $0x330] sm:$0xff]   ;;  %v7884_v22 = vsel %vm7055_vm10, %v7736_v8, %v7717_v29  ;;  %v6561_v29 = vld [vmem:[%s8872_s2 + $0x348] sm:$0xff]  }
 0x114   : >> { %v2920_v2 = vrot.slane %v2918_v11, 5  ;;  %v6537_v11 = vld [vmem:[%s8872_s2 + $0x368] sm:$0xff]  }
 0x116   : >> { %2428 = vmatmul.mubr.bf16.gmra.mxu0 %v5294_v52  ;;  %v2921_v26 = vor.u32 %v2920_v2, %v2917_v37  ;;  %v6531_v52 = vld [vmem:[%s8872_s2 + $0x2f0] sm:$0xff]   ;;  %v3388_v37 = vrot.slane %v7701_v3, 5  ;;  %v6535_v2 = vld [vmem:[%s8872_s2 + $0x2e8] sm:$0xff]  }
 0x117   : >> { %3235 = vmatprep.mubr.bf16.mxu0 %v5451_v47  ;;  %v7705_v47 = vsel %vm7218_vm13, %v3380_v12, %v3381_v58  ;;  %v2958_v58 = vshll.u32 %v7701_v3, 16 }
 0x119   : >> { %2055 = vmatmul.mubr.bf16.gmra.mxu1 %v5222_v45  ;;  %v7685_v45 = vld [vmem:[%s7017_s13 + $0x98] sm:$0xff] }
 0x11a   : >> { %2713 = vmatprep.mubr.bf16.mxu1 %v7400_v49  ;;  %v7693_v49 = vrot.slane %v2910_v27, 5  ;;  %v8876_v5 = vrot.slane %v7685_v45, 5  ;;  %v2948_v44 = vshll.u32 %v7685_v45, 16  ;;  %v7727_v27 = vld [vmem:[%s7017_s13 + $0xb0] sm:$0xff]  ;;  %v2952_v12 = vshrl.u32 %v7685_v45, 16 }
 0x11c   : >> { %v3387_v33 = vrot.slane %v8876_v5, 4  ;;  %v7785_v5 = vld [vmem:[%s7017_s13 + $0xc8] sm:$0xff] }
 0x11e   : >> { %3236 = vmatmul.mubr.bf16.vlgmr.msra.gmra.mxu0 %v5450_v20  ;;  %v3392_v20 = vrot.slane %v7727_v27, 5 }
 0x11f   : >> { %6207 = vmatpush3.bf16.msra.mxu0 %v6530_v46  ;;  %3243 = vmatprep.mubr.bf16.mxu0 %v5453_v31  ;;  %v7724_v31 = vrot.slane %v2921_v26, 4  ;;  %v7745_v46 = vrot.slane %v2939_v43, 4  ;;  %v7765_v26 = vsel %vm7218_vm13, %v3387_v33, %v3388_v37  ;;  %v2966_v43 = vshll.u32 %v7748_v25, 16 }
 0x120   : >> { %6208 = vmatprep.subr.bf16.mxu0 %v6533_v6  ;;  %v7761_v6 = vld [vmem:[%s7017_s13 + $0xb8] sm:$0x11]  ;;  %v3394_v59 = vrot.slane %v3392_v20, 4  ;;  %v2972_v33 = vshll.u32 %v7727_v27, 16  ;;  %v2976_v37 = vshrl.u32 %v7727_v27, 16 }
 0x121   : >> { %2714 = vmatmul.mubr.bf16.vlgmr.msra.gmra.mxu1 %v7431_v38  ;;  %v6538_v38 = vld [vmem:[%s8872_s2 + $0x328] sm:$0xff]   ;;  %v2982_v3 = vshll.u32 %v7761_v6, 16 }
 0x122   : >> { %6143 = vmatpush3.bf16.msra.mxu1 %v6528_v28  ;;  %2721 = vmatprep.mubr.bf16.mxu1 %v7438_v60  ;;  %v7755_v28 = vrot.slane %v2948_v44, 5  ;;  %v6536_v60 = vld [vmem:[%s8872_s2 + $0x2a8] sm:$0xff]   ;;  %v6544_v44 = vld [vmem:[%s8872_s2 + $0x320] sm:$0xff]  }
 0x123   : >> { %6144 = vmatprep.subr.bf16.mxu1 %v6531_v52  ;;  %6209 = vmatpush3.bf16.msra.mxu0 %v6534_v36  ;;  %v6541_v52 = vld [vmem:[%s8872_s2 + $0x2e0] sm:$0xff]   ;;  %v5482_v36 = vld [vmem:[%s7017_s13 + $0x18] sm:$0xee] }
 0x124   : >> { %6210 = vmatprep.subr.bf16.mxu0 %v6537_v11  ;;  %v3395_v11 = vrot.slane %v7761_v6, 5  ;;  %v5490_v40 = vrot.slane %v5482_v36, 9 }
 0x126   : >> { %3244 = vmatmul.mubr.bf16.gmra.mxu0 %v5452_v7  ;;  %6145 = vmatpush3.bf16.msra.mxu1 %v6532_v57  ;;  %v7798_v7 = vsel %vm7218_vm13, %v3394_v59, %v3395_v11  ;;  %v7803_v57 = vsel %vm7055_vm10, %v2898_v42, %v7665_v9  ;;  %v7816_v36 = vsel %vm7218_vm13, %v5490_v40, %v7306_v17  ;;  %v6547_v9 = vld [vmem:[%s8872_s2 + $0x2d8] sm:$0xff]   ;;  %v2954_v42 = vrot.slane %v2952_v12, 4 }
 0x127   : >> { %3251 = vmatprep.mubr.bf16.mxu0 %v5455_v14  ;;  %6146 = vmatprep.subr.bf16.mxu1 %v6535_v2  ;;  %v7808_v14 = vsel %vm7055_vm10, %v2908_v32, %v7693_v49  ;;  %v6542_v2 = vld [vmem:[%s8872_s2 + $0x2a0] sm:$0xff]   ;;  %v2965_v17 = vrot.slane %v2963_v61, 4  ;;  %v2968_v40 = vrot.slane %v2966_v43, 5  ;;  %v3402_v59 = vrot.slane %v7794_v54, 5  ;;  %v6550_v61 = vld [vmem:[%s8872_s2 + $0x318] sm:$0xff]  }
 0x128   : >> { %6211 = vmatpush3.bf16.msra.mxu0 %v6538_v38  ;;  %v3399_v38 = vrot.slane %v7785_v5, 5  ;;  %v5457_v12 = vcombine.high %v7803_v57, %v7808_v14  ;;  %v2945_v11 = vor.u32 %v7753_v13, %v7745_v46  ;;  %v2978_v49 = vrot.slane %v2976_v37, 4 }
 0x129   : >> { %2722 = vmatmul.mubr.bf16.gmra.mxu1 %v7484_v56  ;;  %6212 = vmatprep.subr.bf16.mxu0 %v6543_v4  ;;  %v7828_v56 = vrot.slane %v2972_v33, 5  ;;  %v5483_v4 = vld [vmem:[%s7017_s13 + $0x30] sm:$0xee]  ;;  %v7852_v46 = vsel %vm7055_vm10, %v7724_v31, %v7671_v21  ;;  %v2955_v13 = vor.u32 %v2954_v42, %v7755_v28  ;;  %v2960_v43 = vrot.slane %v2958_v58, 5  ;;  %v6559_v42 = vld [vmem:[%s8872_s2 + $0x2c8] sm:$0xff]  }
 0x12a   : >> { %2729 = vmatprep.mubr.bf16.mxu1 %v7491_v34  ;;  %6147 = vmatpush3.bf16.msra.mxu1 %v6536_v60  ;;  %v5491_v32 = vrot.slane %v5483_v4, 9  ;;  %v7838_v34 = vcombine.high %v7632_v48, %v7627_v16  ;;  %v6548_v60 = vld [vmem:[%s8872_s2 + $0x298] sm:$0xff]   ;;  %v6553_v21 = vld [vmem:[%s8872_s2 + $0x2d0] sm:$0xff]   ;;  %v2946_v62 = vrot.slane %v2945_v11, 4  ;;  %v2969_v6 = vor.u32 %v2968_v40, %v2965_v17  ;;  %v5485_v11 = vld [vmem:[%s7017_s13 + $0x60] sm:$0xee] }
 0x12b   : >> { %6148 = vmatprep.subr.bf16.mxu1 %v6541_v52  ;;  %v3401_v52 = vrot.slane %v3399_v38, 4  ;;  %v2979_v37 = vor.u32 %v2978_v49, %v7828_v56  ;;  %v7902_v49 = vld [vmem:[%s7017_s13 + $0xc0] sm:$0xff]  ;;  %v5459_v17 = vcombine.high %v7852_v46, %v7884_v22  ;;  %v2984_v40 = vrot.slane %v2982_v3, 5 }
 0x12c   : >> { %6213 = vmatpush3.bf16.msra.mxu0 %v6544_v44  ;;  %v6555_v44 = vld [vmem:[%s8872_s2 + $0x350] sm:$0xff]   ;;  %v7863_v33 = vsel %vm7218_vm13, %v5491_v32, %v7354_v41  ;;  %v5456_v32 = vcombine.low %v7803_v57, %v7808_v14  ;;  %v2996_v3 = vshll.u32 %v7785_v5, 16 }
 0x12d   : >> { %6214 = vmatprep.subr.bf16.mxu0 %v6549_v39  ;;  %v5533_v31 = vcombine.high %v7863_v33, %v7580_v18  ;;  %v5532_v58 = vcombine.low %v7863_v33, %v7580_v18  ;;  %v7878_v41 = vsel %vm7218_vm13, %v3401_v52, %v3402_v59  ;;  %v5484_v39 = vld [vmem:[%s7017_s13 + $0x48] sm:$0xee]  ;;  %v2970_v59 = vrot.slane %v2969_v6, 4  ;;  %v6589_v18 = vld [vmem:[%s8872_s2 + $0x3d8] sm:$0xff]  }
 0x12e   : >> { %3252 = vmatmul.mubr.bf16.gmra.mxu0 %v5454_v55  ;;  %6149 = vmatpush3.bf16.msra.mxu1 %v6542_v2  ;;  %v6556_v55 = vld [vmem:[%s8872_s2 + $0x310] sm:$0xff]   ;;  %v5492_v8 = vrot.slane %v5484_v39, 9  ;;  %v5493_v52 = vrot.slane %v5485_v11, 9  ;;  %v3000_v6 = vshrl.u32 %v7785_v5, 16  ;;  %v6592_v33 = vld [vmem:[%s8872_s2 + $0x418] sm:$0xff]  }
 0x12f   : >> { %3259 = vmatprep.mubr.bf16.mxu0 %v5457_v12  ;;  %6150 = vmatprep.subr.bf16.mxu1 %v6547_v9  ;;  %v6554_v2 = vld [vmem:[%s8872_s2 + $0x290] sm:$0xff]   ;;  %v2956_v9 = vrot.slane %v2955_v13, 4  ;;  %v2980_v12 = vrot.slane %v2979_v37, 4  ;;  %v2990_v13 = vshll.u32 %v7902_v49, 16  ;;  %v6568_v37 = vld [vmem:[%s8872_s2 + $0x300] sm:$0xff]  }
 0x130   : >> { %6215 = vmatpush3.bf16.msra.mxu0 %v6550_v61  ;;  %v7915_v4 = vsel %vm7218_vm13, %v5492_v8, %v7392_v23  ;;  %v2987_v61 = vshrl.u32 %v7902_v49, 16  ;;  %v7928_v23 = vcombine.low %v7632_v48, %v7627_v16  ;;  %v6565_v48 = vld [vmem:[%s8872_s2 + $0x2c0] sm:$0xff]   ;;  %v2951_v16 = vsel %vm7055_vm10, %v2946_v62, %v7755_v28  ;;  %v6573_v8 = vld [vmem:[%s8872_s2 + $0x478] sm:$0xff]  }
 0x131   : >> { %2730 = vmatmul.mubr.bf16.gmra.mxu1 %v7529_v50  ;;  %6216 = vmatprep.subr.bf16.mxu0 %v6555_v44  ;;  %v6562_v50 = vld [vmem:[%s8872_s2 + $0x308] sm:$0xff]   ;;  %v5535_v57 = vcombine.high %v7915_v4, %v7602_v15  ;;  %v5534_v14 = vcombine.low %v7915_v4, %v7602_v15  ;;  %v6567_v44 = vld [vmem:[%s8872_s2 + $0x340] sm:$0xff]  }
 0x132   : >> { %2737 = vmatprep.mubr.bf16.mxu1 %v7838_v34  ;;  %6151 = vmatpush3.bf16.msra.mxu1 %v6548_v60  ;;  %v6560_v60 = vld [vmem:[%s8872_s2 + $0x288] sm:$0xff]   ;;  %v2989_v28 = vrot.slane %v2987_v61, 4 }
 0x133   : >> { %6152 = vmatprep.subr.bf16.mxu1 %v6553_v21  ;;  %v7936_v21 = vcombine.high %v7638_v30, %v7646_v24  ;;  %v6597_v15 = vld [vmem:[%s8872_s2 + $0x3c8] sm:$0xff]  }
 0x134   : >> { %6217 = vmatpush3.bf16.msra.mxu0 %v6556_v55  ;;  %v7946_v55 = vsel %vm7218_vm13, %v5493_v52, %v3371_v19  ;;  %v2961_v19 = vsel %vm7055_vm10, %v2956_v9, %v2960_v43  ;;  %v6566_v43 = vld [vmem:[%s8872_s2 + $0x280] sm:$0xff]   ;;  %v2992_v9 = vrot.slane %v2990_v13, 5  ;;  %v5487_v52 = vld [vmem:[%s7017_s13 + $0x90] sm:$0xee]  ;;  %v7988_v13 = vcombine.low %v7638_v30, %v7646_v24 }
 0x135   : >> { %6218 = vmatprep.subr.bf16.mxu0 %v6561_v29  ;;  %v5537_v39 = vcombine.high %v7946_v55, %v7655_v35  ;;  %v5486_v29 = vld [vmem:[%s7017_s13 + $0x78] sm:$0xee]  ;;  %v5461_v62 = vcombine.high %v2951_v16, %v2961_v19  ;;  %v3006_v30 = vshll.u32 %v7794_v54, 16 }
 0x136   : >> { %3260 = vmatmul.mubr.bf16.gmra.mxu0 %v5456_v32  ;;  %6153 = vmatpush3.bf16.msra.mxu1 %v6554_v2  ;;  %v5536_v2 = vcombine.low %v7946_v55, %v7655_v35  ;;  %v5458_v32 = vcombine.low %v7852_v46, %v7884_v22  ;;  %v2998_v46 = vrot.slane %v2996_v3, 5  ;;  %v3002_v22 = vrot.slane %v3000_v6, 4 }
 0x137   : >> { %3267 = vmatprep.mubr.bf16.mxu0 %v5459_v17  ;;  %6154 = vmatprep.subr.bf16.mxu1 %v6559_v42  ;;  %v5494_v42 = vrot.slane %v5486_v29, 9  ;;  %v6571_v17 = vld [vmem:[%s8872_s2 + $0x3f8] sm:$0xff]   ;;  %v7992_v3 = vcombine.high %v7681_v53, %v7685_v45  ;;  %v2985_v6 = vsel %vm7055_vm10, %v2980_v12, %v2984_v40  ;;  %v2993_v29 = vor.u32 %v2992_v9, %v2989_v28 }
 0x138   : >> { %6219 = vmatpush3.bf16.msra.mxu0 %v6562_v50  ;;  %v8889_v50 = vrot.slane %v7646_v24, 5  ;;  %v8890_v24 = vrot.slane %v7685_v45, 5  ;;  %v5460_v40 = vcombine.low %v2951_v16, %v2961_v19  ;;  %v5489_v16 = vld [vmem:[%s7017_s13 + $0xc0] sm:$0xee]  ;;  %v8030_v19 = vcombine.high %v7748_v25, %v7727_v27 }
 0x139   : >> { %2738 = vmatmul.mubr.bf16.gmra.mxu1 %v7928_v23  ;;  %6220 = vmatprep.subr.bf16.mxu0 %v6567_v44  ;;  %v5495_v44 = vrot.slane %v5487_v52, 9 }
 0x13a   : >> { %2745 = vmatprep.mubr.bf16.mxu1 %v7936_v21  ;;  %6155 = vmatpush3.bf16.msra.mxu1 %v6560_v60  ;;  %v7979_v11 = vsel %vm7218_vm13, %v5494_v42, %v8889_v50  ;;  %v8025_v50 = vcombine.low %v7681_v53, %v7685_v45 }
 0x13b   : >> { %6156 = vmatprep.subr.bf16.mxu1 %v6565_v48  ;;  %v5539_v60 = vcombine.high %v7979_v11, %v7705_v47  ;;  %v5538_v61 = vcombine.low %v7979_v11, %v7705_v47  ;;  %v2975_v48 = vsel %vm7055_vm10, %v2970_v59, %v7828_v56  ;;  %v5488_v59 = vld [vmem:[%s7017_s13 + $0xa8] sm:$0xee] }
 0x13c   : >> { %6221 = vmatpush3.bf16.msra.mxu0 %v6568_v37  ;;  %v8004_v37 = vsel %vm7218_vm13, %v5495_v44, %v8890_v24  ;;  %v5496_v54 = vrot.slane %v5488_v59, 9  ;;  %v5463_v12 = vcombine.high %v2975_v48, %v2985_v6  ;;  %v8050_v24 = vcombine.low %v7748_v25, %v7727_v27  ;;  %v8071_v25 = vld [vmem:[%s7017_s13 + $0x48] sm:$0xff]  ;;  %v8074_v59 = vld [vmem:[%s7017_s13 + $0x50] sm:$0xff] }
 0x13d   : >> { %6334 = vmatprep.subr.bf16.mxu0 %v6573_v8  ;;  %v3003_v8 = vor.u32 %v3002_v22, %v2998_v46  ;;  %v5541_v42 = vcombine.high %v8004_v37, %v7765_v26  ;;  %v5540_v56 = vcombine.low %v8004_v37, %v7765_v26  ;;  %v8068_v27 = vcombine.low %v7902_v49, %v7785_v5 }
 0x13e   : >> { %3268 = vmatmul.mubr.bf16.gmra.mxu0 %v5458_v32  ;;  %6157 = vmatpush3.bf16.msra.mxu1 %v6566_v43  ;;  %v3008_v32 = vrot.slane %v3006_v30, 5  ;;  %v8017_v28 = vsel %vm7218_vm13, %v5496_v54, %v3392_v20  ;;  %v2994_v43 = vrot.slane %v2993_v29, 4  ;;  %v5497_v20 = vrot.slane %v5489_v16, 9  ;;  %v8057_v29 = vld [vmem:[%s7017_s13 + $0x30] sm:$0xff]  ;;  %v6583_v16 = vld [vmem:[%s8872_s2 + $0x468] sm:$0xff]  }
 0x13f   : >> { %3275 = vmatprep.mubr.bf16.mxu0 %v5461_v62  ;;  %6270 = vmatprep.subr.bf16.mxu1 %v6571_v17  ;;  %v3004_v62 = vrot.slane %v3003_v8, 4  ;;  %v5543_v9 = vcombine.high %v8017_v28, %v7798_v7  ;;  %v5542_v17 = vcombine.low %v8017_v28, %v7798_v7  ;;  %v8060_v8 = vld [vmem:[%s7017_s13 + $0x38] sm:$0xff]  ;;  %v8891_v54 = vcombine.high %v7816_v36, %v7564_v63 }
 0x140   : >> { %v2999_v22 = vsel %vm7055_vm10, %v2994_v43, %v2998_v46  ;;  %v8040_v53 = vsel %vm7218_vm13, %v5497_v20, %v3399_v38  ;;  %v5462_v46 = vcombine.low %v2975_v48, %v2985_v6  ;;  %v8054_v38 = vcombine.high %v7902_v49, %v7785_v5  ;;  %v6574_v5 = vld [vmem:[%s8872_s2 + $0x438] sm:$0xff]   ;;  %v6577_v43 = vld [vmem:[%s8872_s2 + $0x3f0] sm:$0xff]  }
 0x141   : >> { %2746 = vmatmul.mubr.bf16.gmra.mxu1 %v7988_v13  ;;  %v3009_v52 = vsel %vm7055_vm10, %v3004_v62, %v3008_v32  ;;  %v5545_v45 = vcombine.high %v8040_v53, %v7878_v41  ;;  %v5544_v44 = vcombine.low %v8040_v53, %v7878_v41  ;;  %v5613_v6 = vcombine.high %v8057_v29, %v8060_v8  ;;  %v6572_v32 = vld [vmem:[%s8872_s2 + $0x3b8] sm:$0xff]   ;;  %v6580_v62 = vld [vmem:[%s8872_s2 + $0x430] sm:$0xff]  }
 0x142   : >> { %2753 = vmatprep.mubr.bf16.mxu1 %v7992_v3  ;;  %v5465_v30 = vcombine.high %v2999_v22, %v3009_v52  ;;  %v5464_v48 = vcombine.low %v2999_v22, %v3009_v52  ;;  %v5615_v49 = vcombine.high %v8071_v25, %v8074_v59  ;;  %v8892_v20 = vcombine.low %v7816_v36, %v7564_v63  ;;  %v6578_v52 = vld [vmem:[%s8872_s2 + $0x3b0] sm:$0xff]   ;;  %v6584_v63 = vld [vmem:[%s8872_s2 + $0x428] sm:$0xff]   ;;  %v6587_v36 = vld [vmem:[%s8872_s2 + $0x460] sm:$0xff]  }
 0x143   : >> { %v5614_v22 = vcombine.low %v8071_v25, %v8074_v59 }
 0x146   : >> { %3276 = vmatmul.mubr.bf16.gmra.mxu0 %v5460_v40  ;;  %v5612_v40 = vcombine.low %v8057_v29, %v8060_v8 }
 0x147   : >> { %3283 = vmatprep.mubr.bf16.mxu0 %v5463_v12  ;;  %v6579_v12 = vld [vmem:[%s8872_s2 + $0x470] sm:$0xff]  }
 0x149   : >> { %2754 = vmatmul.mubr.bf16.gmra.mxu1 %v8025_v50 }
 0x14a   : >> { %2761 = vmatprep.mubr.bf16.mxu1 %v8030_v19 }
 0x14e   : >> { %3284 = vmatmul.mubr.bf16.gmra.mxu0 %v5462_v46  ;;  %v6581_v46 = vld [vmem:[%s8872_s2 + $0x3e8] sm:$0xff]  }
 0x14f   : >> { %3291 = vmatprep.mubr.bf16.mxu0 %v5465_v30  ;;  %v6585_v30 = vld [vmem:[%s8872_s2 + $0x3e0] sm:$0xff]  }
 0x151   : >> { %2762 = vmatmul.mubr.bf16.gmra.mxu1 %v8050_v24 }
 0x152   : >> { %2769 = vmatprep.mubr.bf16.mxu1 %v8054_v38 }
 0x156   : >> { %3292 = vmatmul.mubr.bf16.gmra.mxu0 %v5464_v48  ;;  %v6588_v48 = vld [vmem:[%s8872_s2 + $0x420] sm:$0xff]  }
 0x157   : >> { %3971 = vmatprep.mubr.bf16.mxu0 %v5613_v6  ;;  %v6591_v6 = vld [vmem:[%s8872_s2 + $0x458] sm:$0xff]  }
 0x159   : >> { %2770 = vmatmul.mubr.bf16.gmra.mxu1 %v8068_v27 }
 0x15a   : >> { %3629 = vmatprep.mubr.bf16.mxu1 %v8891_v54  ;;  %v6593_v54 = vld [vmem:[%s8872_s2 + $0x3d0] sm:$0xff]  }
 0x15e   : >> { %3972 = vmatmul.mubr.bf16.vlgmr.msra.gmra.mxu0 %v5612_v40  ;;  %v6596_v40 = vld [vmem:[%s8872_s2 + $0x410] sm:$0xff]  }
 0x15f   : >> { %6335 = vmatpush3.bf16.msra.mxu0 %v6574_v5  ;;  %3979 = vmatprep.mubr.bf16.mxu0 %v5615_v49  ;;  %v6600_v5 = vld [vmem:[%s8872_s2 + $0x408] sm:$0xff]  }
 0x160   : >> { %6336 = vmatprep.subr.bf16.mxu0 %v6579_v12 }
 0x161   : >> { %3630 = vmatmul.mubr.bf16.vlgmr.msra.gmra.mxu1 %v8892_v20 }
 0x162   : >> { %6271 = vmatpush3.bf16.msra.mxu1 %v6572_v32  ;;  %3637 = vmatprep.mubr.bf16.mxu1 %v5533_v31  ;;  %v6582_v31 = vld [vmem:[%s8872_s2 + $0x3a8] sm:$0xff]  }
 0x163   : >> { %6272 = vmatprep.subr.bf16.mxu1 %v6577_v43  ;;  %6337 = vmatpush3.bf16.msra.mxu0 %v6580_v62  ;;  %v6598_v32 = vld [vmem:[%s8872_s2 + $0x388] sm:$0xff]  }
 0x164   : >> { %6338 = vmatprep.subr.bf16.mxu0 %v6583_v16  ;;  %v6603_v16 = vld [vmem:[%s8872_s2 + $0x3c0] sm:$0xff]  }
 0x166   : >> { %3980 = vmatmul.mubr.bf16.gmra.mxu0 %v5614_v22  ;;  %6273 = vmatpush3.bf16.msra.mxu1 %v6578_v52  ;;  %v6606_v22 = vld [vmem:[%s8872_s2 + $0x400] sm:$0xff]  }
 0x167   : >> { %3987 = vmatprep.mubr.bf16.mxu0 %v7838_v34  ;;  %6274 = vmatprep.subr.bf16.mxu1 %v6581_v46  ;;  %v6586_v34 = vld [vmem:[%s8872_s2 + $0x3a0] sm:$0xff]  }
 0x168   : >> { %6339 = vmatpush3.bf16.msra.mxu0 %v6584_v63  ;;  %v6604_v46 = vld [vmem:[%s8872_s2 + $0x380] sm:$0xff]  }
 0x169   : >> { %3638 = vmatmul.mubr.bf16.gmra.mxu1 %v5532_v58  ;;  %6340 = vmatprep.subr.bf16.mxu0 %v6587_v36  ;;  %v6595_v58 = vld [vmem:[%s8872_s2 + $0x450] sm:$0xff]  }
 0x16a   : >> { %3645 = vmatprep.mubr.bf16.mxu1 %v5535_v57  ;;  %6275 = vmatpush3.bf16.msra.mxu1 %v6582_v31  ;;  %v6590_v57 = vld [vmem:[%s8872_s2 + $0x398] sm:$0xff]  }
 0x16b   : >> { %6276 = vmatprep.subr.bf16.mxu1 %v6585_v30  ;;  %v4077_v30 = vshrl.u32 %v8057_v29, 16 }
 0x16c   : >> { %6341 = vmatpush3.bf16.msra.mxu0 %v6588_v48  ;;  %v4080_v48 = vshll.u32 %v8057_v29, 16 }
 0x16d   : >> { %6342 = vmatprep.subr.bf16.mxu0 %v6591_v6  ;;  %v4086_v6 = vshll.u32 %v8060_v8, 16 }
 0x16e   : >> { %3988 = vmatmul.mubr.bf16.gmra.mxu0 %v7928_v23  ;;  %6277 = vmatpush3.bf16.msra.mxu1 %v6586_v34  ;;  %v6599_v23 = vld [vmem:[%s8872_s2 + $0x448] sm:$0xff]   ;;  %v4082_v29 = vrot.slane %v4080_v48, 5 }
 0x16f   : >> { %3995 = vmatprep.mubr.bf16.mxu0 %v7936_v21  ;;  %6278 = vmatprep.subr.bf16.mxu1 %v6589_v18  ;;  %v6594_v21 = vld [vmem:[%s8872_s2 + $0x390] sm:$0xff]  }
 0x170   : >> { %6343 = vmatpush3.bf16.msra.mxu0 %v6592_v33  ;;  %v4088_v33 = vrot.slane %v4086_v6, 5 }
 0x171   : >> { %3646 = vmatmul.mubr.bf16.gmra.mxu1 %v5534_v14  ;;  %6344 = vmatprep.subr.bf16.mxu0 %v6595_v58 }
 0x172   : >> { %3653 = vmatprep.mubr.bf16.mxu1 %v5537_v39  ;;  %6279 = vmatpush3.bf16.msra.mxu1 %v6590_v57  ;;  %v6605_v39 = vld [vmem:[%s8872_s2 + $0x440] sm:$0xff]   ;;  %v4101_v57 = vshrl.u32 %v8071_v25, 16 }
 0x173   : >> { %6280 = vmatprep.subr.bf16.mxu1 %v6593_v54  ;;  %v4104_v54 = vshll.u32 %v8071_v25, 16 }
 0x174   : >> { %6345 = vmatpush3.bf16.msra.mxu0 %v6596_v40  ;;  %v4110_v40 = vshll.u32 %v8074_v59, 16 }
 0x175   : >> { %6346 = vmatprep.subr.bf16.mxu0 %v6599_v23 }
 0x176   : >> { %3996 = vmatmul.mubr.bf16.gmra.mxu0 %v7988_v13  ;;  %6281 = vmatpush3.bf16.msra.mxu1 %v6594_v21  ;;  %v8239_v21 = vld [vmem:[%s7017_s13 + $0xd8] sm:$0xff] }
 0x177   : >> { %4003 = vmatprep.mubr.bf16.mxu0 %v7992_v3  ;;  %6282 = vmatprep.subr.bf16.mxu1 %v6597_v15  ;;  %v4114_v15 = vshrl.u32 %v8074_v59, 16 }
 0x178   : >> { %6347 = vmatpush3.bf16.msra.mxu0 %v6600_v5  ;;  %v4608_v5 = vrot.slane %v8060_v8, 5 }
 0x179   : >> { %v5838_v4 = vpop.f32.mrf.mxu0  ;;  %v5862_v14 = vpop.f32.mrf.mxu1  ;;  %3654 = vmatmul.mubr.bf16.gmra.mxu1 %v5536_v2  ;;  %6348 = vmatprep.subr.bf16.mxu0 %v6605_v39  ;;  %v4116_v37 = vrot.slane %v4114_v15, 4 }
 0x17a   : >> { %3661 = vmatprep.mubr.bf16.mxu1 %v5539_v60  ;;  %6283 = vmatpush3.bf16.msra.mxu1 %v6598_v32  ;;  %v8254_v32 = vrot.slane %v4110_v40, 5 }
 0x17b   : >> { %v5839_v49 = vpop.f32.mrf.mxu0  ;;  %v5863_v12 = vpop.f32.mrf.mxu1  ;;  %6284 = vmatprep.subr.bf16.mxu1 %v6603_v16 }
 0x17c   : >> { %v8190_v43 = vadd.f32 %v5839_v49, %v5838_v4  ;;  %v8192_v62 = vadd.f32 %v5863_v12, %v5862_v14  ;;  %6349 = vmatpush3.bf16.msra.mxu0 %v6606_v22  ;;  %v8243_v4 = vld [vmem:[%s7017_s13 + $0xe0] sm:$0xff]  ;;  %v4103_v49 = vrot.slane %v4101_v57, 4  ;;  %v4106_v12 = vrot.slane %v4104_v54, 5 }
 0x17d   : >> { %v5841_v20 = vpop.f32.mrf.mxu0  ;;  %v5865_v13 = vpop.f32.mrf.mxu1  ;;  %v5646_v14 = vld [vmem:[%s7017_s13 + $0x40] sm:$0x11]  ;;  %v5626_v15 = vcombine.low %v8239_v21, %v8243_v4 }
 0x17e   : >> { %4004 = vmatmul.mubr.bf16.gmra.mxu0 %v8025_v50  ;;  %6285 = vmatpush3.bf16.msra.mxu1 %v6604_v46  ;;  %v4096_v16 = vshll.u32 %v5646_v14, 16 }
 0x17f   : >> { %v5842_v3 = vpop.f32.mrf.mxu0  ;;  %v5866_v52 = vpop.f32.mrf.mxu1  ;;  %4011 = vmatprep.mubr.bf16.mxu0 %v8030_v19  ;;  %v4090_v19 = vshrl.u32 %v8060_v8, 16  ;;  %v5627_v8 = vcombine.high %v8239_v21, %v8243_v4 }
 0x180   : >> { %v8209_v63 = vadd.f32 %v5842_v3, %v5841_v20  ;;  %v8211_v36 = vadd.f32 %v5866_v52, %v5865_v13  ;;  %v4610_v20 = vrot.slane %v4608_v5, 4  ;;  %v4611_v13 = vrot.slane %v5646_v14, 5  ;;  %v5650_v3 = vld [vmem:[%s7017_s13 + $0x60] sm:$0xff] }
 0x181   : >> { %v5844_v35 = vpop.f32.mrf.mxu0  ;;  %v5868_v2 = vpop.f32.mrf.mxu1  ;;  %3662 = vmatmul.mubr.bf16.gmra.mxu1 %v5538_v61  ;;  %v4079_v61 = vrot.slane %v4077_v30, 4  ;;  %v4098_v48 = vrot.slane %v4096_v16, 5 }
 0x182   : >> { %3669 = vmatprep.mubr.bf16.mxu1 %v5541_v42  ;;  %v4092_v42 = vrot.slane %v4090_v19, 4  ;;  %v5733_v19 = vld [vmem:[%s7017_s13 + $0x48] sm:$0xee] }
 0x183   : >> { %v5845_v55 = vpop.f32.mrf.mxu0  ;;  %v5869_v50 = vpop.f32.mrf.mxu1  ;;  %v4083_v25 = vor.u32 %v4082_v29, %v4079_v61  ;;  %v8277_v61 = vsel %vm7218_vm13, %v4610_v20, %v4611_v13  ;;  %v4125_v29 = vshrl.u32 %v5650_v3, 16  ;;  %v5741_v28 = vrot.slane %v5733_v19, 9  ;;  %v5652_v13 = vld [vmem:[%s7017_s13 + $0x70] sm:$0x11] }
 0x184   : >> { %v8215_v60 = vadd.f32 %v5845_v55, %v5844_v35  ;;  %v8227_v34 = vadd.f32 %v5869_v50, %v5868_v2  ;;  %v4093_v39 = vor.u32 %v4092_v42, %v4088_v33  ;;  %v5649_v55 = vld [vmem:[%s7017_s13 + $0x58] sm:$0x11]  ;;  %v4107_v2 = vor.u32 %v4106_v12, %v4103_v49 }
 0x185   : >> { %v5847_v31 = vpop.f32.mrf.mxu0  ;;  %v5871_v47 = vpop.f32.mrf.mxu1  ;;  %v4084_v46 = vrot.slane %v4083_v25, 4  ;;  %v4117_v50 = vor.u32 %v4116_v37, %v8254_v32  ;;  %v4120_v54 = vshll.u32 %v5649_v55, 16  ;;  %v4618_v25 = vrot.slane %v5649_v55, 5  ;;  %v5653_v49 = vld [vmem:[%s7017_s13 + $0x78] sm:$0xff] }
 0x186   : >> { %4012 = vmatmul.mubr.bf16.gmra.mxu0 %v8050_v24  ;;  %v5732_v24 = vld [vmem:[%s7017_s13 + $0x30] sm:$0xee]  ;;  %v4094_v35 = vrot.slane %v4093_v39, 4  ;;  %v4127_v39 = vrot.slane %v4125_v29, 4  ;;  %v4152_v55 = vshll.u32 %v5653_v49, 16 }
 0x187   : >> { %v5848_v18 = vpop.f32.mrf.mxu0  ;;  %v5872_v58 = vpop.f32.mrf.mxu1  ;;  %4019 = vmatprep.mubr.bf16.mxu0 %v8054_v38  ;;  %v5740_v26 = vrot.slane %v5732_v24, 9  ;;  %v8293_v7 = vsel %vm7055_vm10, %v4084_v46, %v4088_v33  ;;  %v4118_v12 = vrot.slane %v4117_v50, 4  ;;  %v8320_v46 = vld [vmem:[%s7017_s13 + $0x80] sm:$0xff] }
 0x188   : >> { %v8229_v11 = vadd.f32 %v5848_v18, %v5847_v31  ;;  %v8235_v23 = vadd.f32 %v5872_v58, %v5871_v47  ;;  %v8264_v31 = vld [vmem:[%s7017_s13 + $0x68] sm:$0xff]  ;;  %v4615_v18 = vrot.slane %v8074_v59, 5  ;;  %v4128_v58 = vshll.u32 %v5650_v3, 16  ;;  %v5734_v3 = vld [vmem:[%s7017_s13 + $0x60] sm:$0xee] }
 0x189   : >> { %3670 = vmatmul.mubr.bf16.gmra.mxu1 %v5540_v56  ;;  %v8268_v6 = vsel %vm7218_vm13, %v5740_v26, %v4608_v5  ;;  %v4134_v59 = vshll.u32 %v8264_v31, 16  ;;  %v4138_v40 = vshrl.u32 %v8264_v31, 16  ;;  %v8297_v14 = vsel %vm7055_vm10, %v4094_v35, %v4098_v48 }
 0x18a   : >> { %3677 = vmatprep.mubr.bf16.mxu1 %v5543_v9  ;;  %v5781_v24 = vcombine.high %v8268_v6, %v8277_v61  ;;  %v4617_v5 = vrot.slane %v4615_v18, 4  ;;  %v4130_v33 = vrot.slane %v4128_v58, 5  ;;  %v8310_v20 = vsel %vm7218_vm13, %v5741_v28, %v4615_v18 }
 0x18b   : >> { %v8304_v16 = vrot.slane %v4134_v59, 5  ;;  %v4140_v26 = vrot.slane %v4138_v40, 4  ;;  %v4149_v35 = vshrl.u32 %v5653_v49, 16  ;;  %v5742_v29 = vrot.slane %v5734_v3, 9  ;;  %v5735_v3 = vld [vmem:[%s7017_s13 + $0x78] sm:$0xee] }
 0x18c   : >> { %v4131_v50 = vor.u32 %v4130_v33, %v4127_v39  ;;  %v4158_v58 = vshll.u32 %v8320_v46, 16  ;;  %v4162_v41 = vshrl.u32 %v8320_v46, 16  ;;  %v4154_v59 = vrot.slane %v4152_v55, 5 }
 0x18d   : >> { %v5850_v38 = vpop.f32.mrf.mxu0  ;;  %v5874_v22 = vpop.f32.mrf.mxu1  ;;  %v5700_v28 = vcombine.low %v8293_v7, %v8297_v14 }
 0x18e   : >> { %4020 = vmatmul.mubr.bf16.gmra.mxu0 %v8068_v27 }
 0x18f   : >> { %v5851_v56 = vpop.f32.mrf.mxu0  ;;  %v5875_v30 = vpop.f32.mrf.mxu1  ;;  %4027 = vmatprep.mubr.bf16.mxu0 %v5627_v8  ;;  %v4122_v8 = vrot.slane %v4120_v54, 5  ;;  %v4151_v54 = vrot.slane %v4149_v35, 4 }
 0x190   : >> { %v8258_v9 = vadd.f32 %v5851_v56, %v5850_v38  ;;  %v8273_v27 = vadd.f32 %v5875_v30, %v5874_v22  ;;  %v4108_v38 = vrot.slane %v4107_v2, 4  ;;  %v5701_v56 = vcombine.high %v8293_v7, %v8297_v14 }
 0x191   : >> { %v5853_v52 = vpop.f32.mrf.mxu0  ;;  %3678 = vmatmul.mubr.bf16.gmra.mxu1 %v5542_v17  ;;  %v5877_v42 = vpop.f32.mrf.mxu1  ;;  %v8315_v22 = vsel %vm7218_vm13, %v4617_v5, %v4618_v25  ;;  %v5780_v30 = vcombine.low %v8268_v6, %v8277_v61  ;;  %v8336_v18 = vsel %vm7055_vm10, %v4118_v12, %v4122_v8  ;;  %v4144_v6 = vshll.u32 %v5652_v13, 16  ;;  %v5656_v5 = vld [vmem:[%s7017_s13 + $0x90] sm:$0xff]  ;;  %v5655_v12 = vld [vmem:[%s7017_s13 + $0x88] sm:$0x11] }
 0x192   : >> { %3685 = vmatprep.mubr.bf16.mxu1 %v5545_v45  ;;  %v8327_v48 = vsel %vm7055_vm10, %v4108_v38, %v8254_v32  ;;  %v5783_v32 = vcombine.high %v8310_v20, %v8315_v22  ;;  %v4160_v14 = vrot.slane %v4158_v58, 5  ;;  %v4173_v35 = vshrl.u32 %v5656_v5, 16 }
 0x193   : >> { %v5854_v47 = vpop.f32.mrf.mxu0  ;;  %v5878_v17 = vpop.f32.mrf.mxu1  ;;  %v5703_v39 = vcombine.high %v8327_v48, %v8336_v18  ;;  %v4146_v49 = vrot.slane %v4144_v6, 5  ;;  %v4176_v55 = vshll.u32 %v5656_v5, 16 }
 0x194   : >> { %v8282_v57 = vadd.f32 %v5854_v47, %v5853_v52  ;;  %v8301_v45 = vadd.f32 %v5878_v17, %v5877_v42  ;;  %v4622_v52 = vrot.slane %v8264_v31, 5  ;;  %v4141_v47 = vor.u32 %v4140_v26, %v8304_v16 }
 0x195   : >> { %v4625_v42 = vrot.slane %v5652_v13, 5  ;;  %v5782_v17 = vcombine.low %v8310_v20, %v8315_v22  ;;  %v4164_v26 = vrot.slane %v4162_v41, 4  ;;  %v4155_v22 = vor.u32 %v4154_v59, %v4151_v54 }
 0x196   : >> { %v5856_v37 = vpop.f32.mrf.mxu0  ;;  %4028 = vmatmul.mubr.bf16.gmra.mxu0 %v5626_v15  ;;  %v4142_v33 = vrot.slane %v4141_v47, 4  ;;  %v8357_v7 = vsel %vm7218_vm13, %v5742_v29, %v4622_v52  ;;  %v4178_v54 = vrot.slane %v4176_v55, 5 }
 0x197   : >> { %4887 = vmatprep.mubr.bf16.mxu0 %v5781_v24  ;;  %v4132_v24 = vrot.slane %v4131_v50, 4  ;;  %v4168_v50 = vshll.u32 %v5655_v12, 16 }
 0x198   : >> { %v5857_v2 = vpop.f32.mrf.mxu0  ;;  %v8379_v6 = vsel %vm7055_vm10, %v4142_v33, %v4146_v49 }
 0x199   : >> { %v5880_v19 = vpop.f32.mrf.mxu1  ;;  %3686 = vmatmul.mubr.bf16.gmra.mxu1 %v5544_v44  ;;  %v8332_v31 = vadd.f32 %v5857_v2, %v5856_v37  ;;  %v4624_v44 = vrot.slane %v4622_v52, 4  ;;  %v4629_v37 = vrot.slane %v8320_v46, 5  ;;  %v8375_v46 = vsel %vm7055_vm10, %v4132_v24, %v8304_v16 }
 0x19a   : >> { %v5859_v61 = vpop.f32.mrf.mxu0  ;;  %4493 = vmatprep.mubr.bf16.mxu1 %v5701_v56  ;;  %v8361_v56 = vld [vmem:[%s7017_s13 + $0x98] sm:$0xff]  ;;  %v4165_v16 = vor.u32 %v4164_v26, %v4160_v14  ;;  %v4170_v5 = vrot.slane %v4168_v50, 5  ;;  %v5705_v49 = vcombine.high %v8375_v46, %v8379_v6  ;;  %v5659_v26 = vld [vmem:[%s7017_s13 + $0xa8] sm:$0xff] }
 0x19b   : >> { %v5881_v53 = vpop.f32.mrf.mxu1  ;;  %v8365_v13 = vsel %vm7218_vm13, %v4624_v44, %v4625_v42  ;;  %v4631_v58 = vrot.slane %v4629_v37, 4  ;;  %v4632_v44 = vrot.slane %v5655_v12, 5  ;;  %v4175_v42 = vrot.slane %v4173_v35, 4  ;;  %v8402_v35 = vld [vmem:[%s7017_s13 + $0xb0] sm:$0xff] }
 0x19c   : >> { %v8343_v40 = vadd.f32 %v5881_v53, %v5880_v19  ;;  %v5860_v15 = vpop.f32.mrf.mxu0  ;;  %v4156_v53 = vrot.slane %v4155_v22, 4  ;;  %v5784_v24 = vcombine.low %v8357_v7, %v8365_v13 }
 0x19d   : >> { %v5883_v25 = vpop.f32.mrf.mxu1  ;;  %v8350_v38 = vadd.f32 %v5860_v15, %v5859_v61  ;;  %v4182_v61 = vshll.u32 %v8361_v56, 16 }
 0x19e   : >> { %v5966_v8 = vpop.f32.mrf.mxu0  ;;  %4888 = vmatmul.mubr.bf16.vlgmr.msra.gmra.mxu0 %v5780_v30  ;;  %v5702_v30 = vcombine.low %v8327_v48, %v8336_v18  ;;  %v5785_v48 = vcombine.high %v8357_v7, %v8365_v13  ;;  %v5743_v18 = vrot.slane %v5735_v3, 9  ;;  %v4166_v3 = vrot.slane %v4165_v16, 4 }
 0x19f   : >> { %v5884_v20 = vpop.f32.mrf.mxu1  ;;  %4895 = vmatprep.mubr.bf16.mxu0 %v5783_v32  ;;  %v4186_v32 = vshrl.u32 %v8361_v56, 16  ;;  %v4636_v13 = vrot.slane %v8361_v56, 5  ;;  %v4197_v56 = vshrl.u32 %v5659_v26, 16 }
 0x1a0   : >> { %v8368_v2 = vadd.f32 %v5884_v20, %v5883_v25  ;;  %v5967_v52 = vpop.f32.mrf.mxu0  ;;  %v5658_v25 = vld [vmem:[%s7017_s13 + $0xa0] sm:$0x11]  ;;  %v8398_v7 = vsel %vm7218_vm13, %v5743_v18, %v4629_v37 }
 0x1a1   : >> { %v5902_v19 = vpop.f32.mrf.mxu1  ;;  %4494 = vmatmul.mubr.bf16.vlgmr.msra.gmra.mxu1 %v5700_v28  ;;  %v5968_v47 = vadd.f32 %v5967_v52, %v5966_v8  ;;  %v5704_v28 = vcombine.low %v8375_v46, %v8379_v6  ;;  %v8392_v8 = vrot.slane %v4182_v61, 5  ;;  %v4188_v12 = vrot.slane %v4186_v32, 4 }
 0x1a2   : >> { %v5969_v29 = vpop.f32.mrf.mxu0  ;;  %4501 = vmatprep.mubr.bf16.mxu1 %v5703_v39  ;;  %v8406_v52 = vsel %vm7055_vm10, %v4156_v53, %v4160_v14  ;;  %v4192_v50 = vshll.u32 %v5658_v25, 16  ;;  %v4206_v14 = vshll.u32 %v8402_v35, 16 }
 0x1a3   : >> { %v5903_v41 = vpop.f32.mrf.mxu1  ;;  %v4189_v18 = vor.u32 %v4188_v12, %v8392_v8 }
 0x1a4   : >> { %v5904_v59 = vadd.f32 %v5903_v41, %v5902_v19  ;;  %v5970_v15 = vpop.f32.mrf.mxu0  ;;  %v5736_v19 = vld [vmem:[%s7017_s13 + $0x90] sm:$0xee] }
 0x1a5   : >> { %v5905_v39 = vpop.f32.mrf.mxu1  ;;  %v5971_v33 = vadd.f32 %v5970_v15, %v5969_v29  ;;  %v4200_v29 = vshll.u32 %v5659_v26, 16 }
 0x1a6   : >> { %v2001_v20 = vadd.f32 %v5904_v59, %v8190_v43  ;;  %v5972_v22 = vpop.f32.mrf.mxu0  ;;  %4896 = vmatmul.mubr.bf16.gmra.mxu0 %v5782_v17  ;;  %v8410_v43 = vsel %vm7218_vm13, %v4631_v58, %v4632_v44  ;;  %v4179_v17 = vor.u32 %v4178_v54, %v4175_v42  ;;  %v4210_v58 = vshrl.u32 %v8402_v35, 16 }
 0x1a7   : >> { %v5906_v55 = vpop.f32.mrf.mxu1  ;;  %4903 = vmatprep.mubr.bf16.mxu0 %v5785_v48  ;;  %v4638_v44 = vrot.slane %v4636_v13, 4  ;;  %v4639_v42 = vrot.slane %v5658_v25, 5  ;;  %v8421_v59 = vsel %vm7055_vm10, %v4166_v3, %v4170_v5  ;;  %v8430_v5 = vrot.slane %v4206_v14, 5 }
 0x1a8   : >> { %v8413_v61 = vadd.f32 %v5968_v47, %v2001_v20  ;;  %v5907_v37 = vadd.f32 %v5906_v55, %v5905_v39  ;;  %v5973_v32 = vpop.f32.mrf.mxu0  ;;  %v5744_v47 = vrot.slane %v5736_v19, 9  ;;  %v4180_v15 = vrot.slane %v4179_v17, 4 }
 0x1a9   : >> { %v5908_v16 = vpop.f32.mrf.mxu1  ;;  %4502 = vmatmul.mubr.bf16.gmra.mxu1 %v5702_v30  ;;  %v5974_v48 = vadd.f32 %v5973_v32, %v5972_v22  ;;  %v5787_v30 = vcombine.high %v8398_v7, %v8410_v43  ;;  %v4194_v39 = vrot.slane %v4192_v50, 5  ;;  %v4202_v22 = vrot.slane %v4200_v29, 5 }
 0x1aa   : >> { %v2004_v41 = vadd.f32 %v5907_v37, %v8209_v63  ;;  %v5975_v53 = vpop.f32.mrf.mxu0  ;;  %4509 = vmatprep.mubr.bf16.mxu1 %v5705_v49  ;;  %v8428_v63 = vld [vmem:[%s7017_s13 + $0xb8] sm:$0x11]  ;;  %v4199_v49 = vrot.slane %v4197_v56, 4  ;;  %v4190_v19 = vrot.slane %v4189_v18, 4  ;;  %v4212_v3 = vrot.slane %v4210_v58, 4  ;;  %v5662_v18 = vld [vmem:[%s7017_s13 + $0xc0] sm:$0xff] }
 0x1ab   : >> { %v5909_v54 = vpop.f32.mrf.mxu1  ;;  %v8437_v50 = vsel %vm7218_vm13, %v5744_v47, %v4636_v13  ;;  %v8441_v32 = vsel %vm7218_vm13, %v4638_v44, %v4639_v42  ;;  %v5786_v29 = vcombine.low %v8398_v7, %v8410_v43  ;;  %v8457_v47 = vld [vmem:[%s7017_s13 + $0xc8] sm:$0xff]  ;;  %v4646_v6 = vrot.slane %v8428_v63, 5 }
 0x1ac   : >> { %v8425_v12 = vadd.f32 %v5971_v33, %v2004_v41  ;;  %v5910_v26 = vadd.f32 %v5909_v54, %v5908_v16  ;;  %v5976_v20 = vpop.f32.mrf.mxu0  ;;  %v5707_v33 = vcombine.high %v8406_v52, %v8421_v59  ;;  %v4643_v16 = vrot.slane %v8402_v35, 5 }
 0x1ad   : >> { %v5911_v25 = vpop.f32.mrf.mxu1  ;;  %v5977_v55 = vadd.f32 %v5976_v20, %v5975_v53  ;;  %v8454_v41 = vsel %vm7055_vm10, %v4180_v15, %v8392_v8  ;;  %v4203_v53 = vor.u32 %v4202_v22, %v4199_v49  ;;  %v8464_v35 = vsel %vm7055_vm10, %v4190_v19, %v4194_v39 }
 0x1ae   : >> { %v2009_v37 = vadd.f32 %v5910_v26, %v8215_v60  ;;  %v5978_v17 = vpop.f32.mrf.mxu0  ;;  %4904 = vmatmul.mubr.bf16.gmra.mxu0 %v5784_v24  ;;  %v4216_v60 = vshll.u32 %v8428_v63, 16  ;;  %v5737_v24 = vld [vmem:[%s7017_s13 + $0xa8] sm:$0xee]  ;;  %v4213_v44 = vor.u32 %v4212_v3, %v8430_v5  ;;  %v4224_v15 = vshll.u32 %v5662_v18, 16 }
 0x1af   : >> { %v5912_v56 = vpop.f32.mrf.mxu1  ;;  %4911 = vmatprep.mubr.bf16.mxu0 %v5787_v30  ;;  %v5745_v54 = vrot.slane %v5737_v24, 9  ;;  %v4221_v30 = vshrl.u32 %v5662_v18, 16  ;;  %v4645_v46 = vrot.slane %v4643_v16, 4  ;;  %v4234_v39 = vshrl.u32 %v8457_v47, 16  ;;  %v5664_v24 = vld [vmem:[%s7017_s13 + $0xd0] sm:$0x11] }
 0x1b0   : >> { %v8449_v14 = vadd.f32 %v5974_v48, %v2009_v37  ;;  %v5913_v58 = vadd.f32 %v5912_v56, %v5911_v25  ;;  %v5979_v13 = vpop.f32.mrf.mxu0  ;;  %v5789_v48 = vcombine.high %v8437_v50, %v8441_v32  ;;  %v4204_v25 = vrot.slane %v4203_v53, 4 }
 0x1b1   : >> { %v5914_v7 = vpop.f32.mrf.mxu1  ;;  %4510 = vmatmul.mubr.bf16.gmra.mxu1 %v5704_v28  ;;  %v5980_v43 = vadd.f32 %v5979_v13, %v5978_v17  ;;  %v4230_v28 = vshll.u32 %v8457_v47, 16  ;;  %v5788_v37 = vcombine.low %v8437_v50, %v8441_v32  ;;  %v4214_v63 = vrot.slane %v4213_v44, 4  ;;  %v5738_v13 = vld [vmem:[%s7017_s13 + $0xc0] sm:$0xee] }
 0x1b2   : >> { %v2012_v8 = vadd.f32 %v5913_v58, %v8229_v11  ;;  %v5981_v42 = vpop.f32.mrf.mxu0  ;;  %4517 = vmatprep.mubr.bf16.mxu1 %v5707_v33  ;;  %v5706_v11 = vcombine.low %v8406_v52, %v8421_v59  ;;  %v4218_v17 = vrot.slane %v4216_v60, 5  ;;  %v4223_v18 = vrot.slane %v4221_v30, 4 }
 0x1b3   : >> { %v5915_v26 = vpop.f32.mrf.mxu1  ;;  %v4226_v58 = vrot.slane %v4224_v15, 5  ;;  %v8486_v59 = vsel %vm7218_vm13, %v5745_v54, %v4643_v16  ;;  %v8490_v50 = vsel %vm7218_vm13, %v4645_v46, %v4646_v6  ;;  %v4236_v32 = vrot.slane %v4234_v39, 4 }
 0x1b4   : >> { %v8473_v20 = vadd.f32 %v5977_v55, %v2012_v8  ;;  %v5916_v49 = vadd.f32 %v5915_v26, %v5914_v7  ;;  %v5982_v22 = vpop.f32.mrf.mxu0  ;;  %v5709_v55 = vcombine.high %v8454_v41, %v8464_v35  ;;  %v8497_v7 = vsel %vm7055_vm10, %v4204_v25, %v8430_v5 }
 0x1b5   : >> { %v5917_v19 = vpop.f32.mrf.mxu1  ;;  %v5983_v3 = vadd.f32 %v5982_v22, %v5981_v42  ;;  %v8502_v8 = vsel %vm7055_vm10, %v4214_v63, %v4218_v17  ;;  %v4240_v42 = vshll.u32 %v5664_v24, 16  ;;  %v5746_v54 = vrot.slane %v5738_v13, 9 }
 0x1b6   : >> { %v2017_v33 = vadd.f32 %v5916_v49, %v8258_v9  ;;  %v5984_v56 = vpop.f32.mrf.mxu0  ;;  %4912 = vmatmul.mubr.bf16.gmra.mxu0 %v5786_v29  ;;  %v4232_v9 = vrot.slane %v4230_v28, 5  ;;  %v5791_v15 = vcombine.high %v8486_v59, %v8490_v50  ;;  %v4227_v5 = vor.u32 %v4226_v58, %v4223_v18 }
 0x1b7   : >> { %v5918_v52 = vpop.f32.mrf.mxu1  ;;  %4919 = vmatprep.mubr.bf16.mxu0 %v5789_v48  ;;  %v4650_v48 = vrot.slane %v8457_v47, 5  ;;  %v4245_v26 = vshrl.u32 %v8239_v21, 16  ;;  %v4248_v6 = vshll.u32 %v8239_v21, 16  ;;  %v4254_v28 = vshll.u32 %v8243_v4, 16 }
 0x1b8   : >> { %v8492_v29 = vadd.f32 %v5980_v43, %v2017_v33  ;;  %v5919_v60 = vadd.f32 %v5918_v52, %v5917_v19  ;;  %v5985_v53 = vpop.f32.mrf.mxu0  ;;  %v4237_v46 = vor.u32 %v4236_v32, %v4232_v9  ;;  %v4258_v39 = vshrl.u32 %v8243_v4, 16 }
 0x1b9   : >> { %v5920_v44 = vpop.f32.mrf.mxu1  ;;  %4518 = vmatmul.mubr.bf16.gmra.mxu1 %v5706_v11  ;;  %v5986_v16 = vadd.f32 %v5985_v53, %v5984_v56  ;;  %v4652_v11 = vrot.slane %v4650_v48, 4  ;;  %v4653_v25 = vrot.slane %v5664_v24, 5  ;;  %v5708_v17 = vcombine.low %v8454_v41, %v8464_v35  ;;  %v5667_v24 = vld [vmem:[%s7017_s13 + $0xe8] sm:$0x11] }
 0x1ba   : >> { %v2020_v43 = vadd.f32 %v5919_v60, %v8282_v57  ;;  %v5987_v30 = vpop.f32.mrf.mxu0  ;;  %4525 = vmatprep.mubr.bf16.mxu1 %v5709_v55  ;;  %v5711_v21 = vcombine.high %v8497_v7, %v8502_v8  ;;  %v4242_v33 = vrot.slane %v4240_v42, 5  ;;  %v8520_v18 = vsel %vm7218_vm13, %v5746_v54, %v4650_v48  ;;  %v5739_v60 = vld [vmem:[%s7017_s13 + $0xd8] sm:$0xee]  ;;  %s5821_s13 = sshll.u32 %s6621_s11, 7  ;;  %s1244_s11 = sadd.s32 1, %s6621_s11  }
 0x1bb   : >> { %v5921_v47 = vpop.f32.mrf.mxu1  ;;  %v4247_v58 = vrot.slane %v4245_v26, 4  ;;  %v4238_v52 = vrot.slane %v4237_v46, 4  ;;  %v4250_v41 = vrot.slane %v4248_v6, 5  ;;  %v4256_v35 = vrot.slane %v4254_v28, 5  ;;  %s8758_s29 = scalar_lea.vmem %s6696_s7, %s5821_s13  ;;  %p1241_p4 = scmp.ge.s32.totalorder %s1244_s11, 2  }
 0x1bc   : >> { %v8511_v49 = vadd.f32 %v5983_v3, %v2020_v43  ;;  %v5922_v57 = vadd.f32 %v5921_v47, %v5920_v44  ;;  %v5988_v22 = vpop.f32.mrf.mxu0  ;;  %v4228_v3 = vrot.slane %v4227_v5, 4  ;;  %v4260_v32 = vrot.slane %v4258_v39, 4 }
 0x1bd   : >> { %v5923_v19 = vpop.f32.mrf.mxu1  ;;  %v5989_v63 = vadd.f32 %v5988_v22, %v5987_v30  ;;  %v4657_v42 = vrot.slane %v8243_v4, 5  ;;  %v5790_v43 = vcombine.low %v8486_v59, %v8490_v50  ;;  %v4264_v5 = vshll.u32 %v5667_v24, 16 }
 0x1be   : >> { %v2025_v56 = vadd.f32 %v5922_v57, %v8332_v31  ;;  %v5990_v55 = vpop.f32.mrf.mxu0  ;;  %4920 = vmatmul.mubr.bf16.gmra.mxu0 %v5788_v37  ;;  %v4654_v37 = vsel %vm7218_vm13, %v4652_v11, %v4653_v25  ;;  %v5747_v26 = vrot.slane %v5739_v60, 9  ;;  %v4243_v46 = vsel %vm7055_vm10, %v4238_v52, %v4242_v33 }
 0x1bf   : >> { %v5924_v13 = vpop.f32.mrf.mxu1  ;;  %4927 = vmatprep.mubr.bf16.mxu0 %v5791_v15  ;;  %v5793_v4 = vcombine.high %v8520_v18, %v4654_v37  ;;  %v4251_v6 = vor.u32 %v4250_v41, %v4247_v58  ;;  %v4261_v28 = vor.u32 %v4260_v32, %v4256_v35  ;;  %v4660_v57 = vrot.slane %v5667_v24, 5 }
 0x1c0   : >> { %v8524_v53 = vadd.f32 %v5986_v16, %v2025_v56  ;;  %v5925_v44 = vadd.f32 %v5924_v13, %v5923_v19  ;;  %v5991_v31 = vpop.f32.mrf.mxu0  ;;  %v4233_v16 = vsel %vm7055_vm10, %v4228_v3, %v4232_v9  ;;  %v5710_v9 = vcombine.low %v8497_v7, %v8502_v8 }
 0x1c1   : >> { %v5926_v48 = vpop.f32.mrf.mxu1  ;;  %4526 = vmatmul.mubr.bf16.gmra.mxu1 %v5708_v17  ;;  %v5992_v54 = vadd.f32 %v5991_v31, %v5990_v55  ;;  %v5713_v17 = vcombine.high %v4233_v16, %v4243_v46  ;;  %v4252_v33 = vrot.slane %v4251_v6, 4  ;;  %v4262_v56 = vrot.slane %v4261_v28, 4 }
 0x1c2   : >> { %v2028_v30 = vadd.f32 %v5925_v44, %v8350_v38  ;;  %v5993_v15 = vpop.f32.mrf.mxu0  ;;  %4533 = vmatprep.mubr.bf16.mxu1 %v5711_v21  ;;  %v4659_v38 = vrot.slane %v4657_v42, 4  ;;  %v4658_v24 = vsel %vm7218_vm13, %v5747_v26, %v4657_v42  ;;  %v5792_v41 = vcombine.low %v8520_v18, %v4654_v37 }
 0x1c3   : >> { %v5927_v47 = vpop.f32.mrf.mxu1  ;;  %v4257_v60 = vsel %vm7055_vm10, %v4252_v33, %v4256_v35 }
 0x1c4   : >> { %v8537_v39 = vadd.f32 %v5989_v63, %v2028_v30  ;;  %v5928_v59 = vadd.f32 %v5927_v47, %v5926_v48  ;;  %v5994_v50 = vpop.f32.mrf.mxu0  ;;  %v4266_v63 = vrot.slane %v4264_v5, 5  ;;  %v4661_v7 = vsel %vm7218_vm13, %v4659_v38, %v4660_v57 }
 0x1c5   : >> { %v5929_v22 = vpop.f32.mrf.mxu1  ;;  %v5995_v11 = vadd.f32 %v5994_v50, %v5993_v15  ;;  %v5795_v31 = vcombine.high %v4658_v24, %v4661_v7  ;;  %v5712_v30 = vcombine.low %v4233_v16, %v4243_v46  ;;  %v5794_v28 = vcombine.low %v4658_v24, %v4661_v7 }
 0x1c6   : >> { %v2033_v25 = vadd.f32 %v5928_v59, %v8192_v62  ;;  %v5996_v19 = vpop.f32.mrf.mxu0  ;;  %4928 = vmatmul.mubr.bf16.gmra.mxu0 %v5790_v43  ;;  %v4267_v44 = vsel %vm7055_vm10, %v4262_v56, %v4266_v63 }
 0x1c7   : >> { %v5930_v21 = vpop.f32.mrf.mxu1  ;;  %4935 = vmatprep.mubr.bf16.mxu0 %v5793_v4  ;;  %v5715_v18 = vcombine.high %v4257_v60, %v4267_v44  ;;  %v5714_v57 = vcombine.low %v4257_v60, %v4267_v44 }
 0x1c8   : >> { %v8542_v55 = vadd.f32 %v5992_v54, %v2033_v25  ;;  %v5931_v3 = vadd.f32 %v5930_v21, %v5929_v22  ;;  %v5997_v58 = vpop.f32.mrf.mxu0 }
 0x1c9   : >> { %v5932_v8 = vpop.f32.mrf.mxu1  ;;  %4534 = vmatmul.mubr.bf16.gmra.mxu1 %v5710_v9  ;;  %v5998_v62 = vadd.f32 %v5997_v58, %v5996_v19 }
 0x1ca   : >> { %v2036_v13 = vadd.f32 %v5931_v3, %v8211_v36  ;;  %v5999_v52 = vpop.f32.mrf.mxu0  ;;  %4541 = vmatprep.mubr.bf16.mxu1 %v5713_v17 }
 0x1cb   : >> { %v5933_v32 = vpop.f32.mrf.mxu1 }
 0x1cc   : >> { %v8554_v42 = vadd.f32 %v5995_v11, %v2036_v13  ;;  %v5934_v10 = vadd.f32 %v5933_v32, %v5932_v8  ;;  %v6000_v48 = vpop.f32.mrf.mxu0 }
 0x1cd   : >> { %v5935_v54 = vpop.f32.mrf.mxu1  ;;  %v6001_v43 = vadd.f32 %v6000_v48, %v5999_v52 }
 0x1ce   : >> { %v2041_v36 = vadd.f32 %v5934_v10, %v8227_v34  ;;  %v6002_v15 = vpop.f32.mrf.mxu0  ;;  %4936 = vmatmul.mubr.bf16.gmra.mxu0 %v5792_v41 }
 0x1cf   : >> { %v5936_v37 = vpop.f32.mrf.mxu1  ;;  %4943 = vmatprep.mubr.bf16.mxu0 %v5795_v31 }
 0x1d0   : >> { %v8557_v5 = vadd.f32 %v5998_v62, %v2041_v36  ;;  %v5937_v35 = vadd.f32 %v5936_v37, %v5935_v54  ;;  %v6003_v51 = vpop.f32.mrf.mxu0 }
 0x1d1   : >> { %v5938_v26 = vpop.f32.mrf.mxu1  ;;  %4542 = vmatmul.mubr.bf16.gmra.mxu1 %v5712_v30  ;;  %v6004_v47 = vadd.f32 %v6003_v51, %v6002_v15 }
 0x1d2   : >> { %v2044_v4 = vadd.f32 %v5937_v35, %v8235_v23  ;;  %v6005_v6 = vpop.f32.mrf.mxu0  ;;  %4549 = vmatprep.mubr.bf16.mxu1 %v5715_v18 }
 0x1d3   : >> { %v5939_v16 = vpop.f32.mrf.mxu1 }
 0x1d4   : >> { %v8560_v46 = vadd.f32 %v6001_v43, %v2044_v4  ;;  %v5940_v34 = vadd.f32 %v5939_v16, %v5938_v26  ;;  %v6006_v59 = vpop.f32.mrf.mxu0 }
 0x1d5   : >> { %v5941_v50 = vpop.f32.mrf.mxu1  ;;  %v6007_v38 = vadd.f32 %v6006_v59, %v6005_v6 }
 0x1d6   : >> { %v2049_v22 = vadd.f32 %v5940_v34, %v8273_v27  ;;  %v6008_v11 = vpop.f32.mrf.mxu0  ;;  %4944 = vmatmul.mubr.bf16.gmra.mxu0 %v5794_v28 }
 0x1d7   : >> { %v5942_v9 = vpop.f32.mrf.mxu1 }
 0x1d8   : >> { %v8563_v25 = vadd.f32 %v6004_v47, %v2049_v22  ;;  %v5943_v19 = vadd.f32 %v5942_v9, %v5941_v50  ;;  %v6009_v23 = vpop.f32.mrf.mxu0 }
 0x1d9   : >> { %v5944_v17 = vpop.f32.mrf.mxu1  ;;  %4550 = vmatmul.mubr.bf16.gmra.mxu1 %v5714_v57  ;;  %v6010_v21 = vadd.f32 %v6009_v23, %v6008_v11 }
 0x1da   : >> { %v2052_v33 = vadd.f32 %v5943_v19, %v8301_v45  ;;  %v6011_v56 = vpop.f32.mrf.mxu0 }
 0x1db   : >> { %v5945_v63 = vpop.f32.mrf.mxu1 }
 0x1dc   : >> { %v8566_v3 = vadd.f32 %v6007_v38, %v2052_v33  ;;  %v5946_v58 = vadd.f32 %v5945_v63, %v5944_v17  ;;  %v6012_v24 = vpop.f32.mrf.mxu0 }
 0x1dd   : >> { %v5947_v7 = vpop.f32.mrf.mxu1  ;;  %v6013_v27 = vadd.f32 %v6012_v24, %v6011_v56 }
 0x1de   : >> { %v2057_v8 = vadd.f32 %v5946_v58, %v8343_v40  ;;  %v6094_v62 = vpop.f32.mrf.mxu0 }
 0x1df   : >> { %v5948_v13 = vpop.f32.mrf.mxu1 }
 0x1e0   : >> { %v8569_v52 = vadd.f32 %v6010_v21, %v2057_v8  ;;  %v5949_v41 = vadd.f32 %v5948_v13, %v5947_v7  ;;  %v6095_v32 = vpop.f32.mrf.mxu0 }
 0x1e1   : >> { %v6030_v60 = vpop.f32.mrf.mxu1  ;;  %v6096_v44 = vadd.f32 %v6095_v32, %v6094_v62 }
 0x1e2   : >> { %v2060_v45 = vadd.f32 %v5949_v41, %v8368_v2  ;;  %v6097_v31 = vpop.f32.mrf.mxu0 }
 0x1e3   : >> { %v6031_v10 = vpop.f32.mrf.mxu1 }
 0x1e4   : >> { %v8572_v48 = vadd.f32 %v6013_v27, %v2060_v45  ;;  %v6032_v54 = vadd.f32 %v6031_v10, %v6030_v60  ;;  %v6098_v43 = vpop.f32.mrf.mxu0 }
 0x1e5   : >> { %v6033_v30 = vpop.f32.mrf.mxu1  ;;  %v6099_v36 = vadd.f32 %v6098_v43, %v6097_v31 }
 0x1e6   : >> { %v2778_v40 = vadd.f32 %v6032_v54, %v8413_v61  ;;  %v6100_v15 = vpop.f32.mrf.mxu0 }
 0x1e7   : >> { %v6034_v18 = vpop.f32.mrf.mxu1 }
 0x1e8   : >> { %v8575_v37 = vadd.f32 %v6096_v44, %v2778_v40  ;;  %v6035_v35 = vadd.f32 %v6034_v18, %v6033_v30  ;;  %v6101_v51 = vpop.f32.mrf.mxu0 }
 0x1e9   : >> { %v6036_v26 = vpop.f32.mrf.mxu1  ;;  %v6102_v47 = vadd.f32 %v6101_v51, %v6100_v15 }
 0x1ea   : >> { %v2779_v2 = vadd.f32 %v6035_v35, %v8425_v12  ;;  %v6103_v4 = vpop.f32.mrf.mxu0 }
 0x1eb   : >> { %v6037_v6 = vpop.f32.mrf.mxu1 }
 0x1ec   : >> { %v8578_v28 = vadd.f32 %v6099_v36, %v2779_v2  ;;  %v6038_v16 = vadd.f32 %v6037_v6, %v6036_v26  ;;  %v6104_v34 = vpop.f32.mrf.mxu0 }
 0x1ed   : >> { %v6039_v59 = vpop.f32.mrf.mxu1  ;;  %v6105_v50 = vadd.f32 %v6104_v34, %v6103_v4 }
 0x1ee   : >> { %v2780_v61 = vadd.f32 %v6038_v16, %v8449_v14  ;;  %v6106_v38 = vpop.f32.mrf.mxu0 }
 0x1ef   : >> { %v6040_v57 = vpop.f32.mrf.mxu1 }
 0x1f0   : >> { %v8581_v22 = vadd.f32 %v6102_v47, %v2780_v61  ;;  %v6041_v11 = vadd.f32 %v6040_v57, %v6039_v59  ;;  %v6107_v9 = vpop.f32.mrf.mxu0 }
 0x1f1   : >> { %v6042_v19 = vpop.f32.mrf.mxu1  ;;  %v6108_v23 = vadd.f32 %v6107_v9, %v6106_v38 }
 0x1f2   : >> { %v2781_v12 = vadd.f32 %v6041_v11, %v8473_v20  ;;  %v6109_v17 = vpop.f32.mrf.mxu0 }
 0x1f3   : >> { %v6043_v21 = vpop.f32.mrf.mxu1 }
 0x1f4   : >> { %v8584_v33 = vadd.f32 %v6105_v50, %v2781_v12  ;;  %v6044_v56 = vadd.f32 %v6043_v21, %v6042_v19  ;;  %v6110_v63 = vpop.f32.mrf.mxu0 }
 0x1f5   : >> { %v6045_v58 = vpop.f32.mrf.mxu1  ;;  %v6111_v24 = vadd.f32 %v6110_v63, %v6109_v17 }
 0x1f6   : >> { %v2782_v14 = vadd.f32 %v6044_v56, %v8492_v29  ;;  %v6112_v7 = vpop.f32.mrf.mxu0 }
 0x1f7   : >> { %v6046_v27 = vpop.f32.mrf.mxu1 }
 0x1f8   : >> { %v8587_v8 = vadd.f32 %v6108_v23, %v2782_v14  ;;  %v6047_v62 = vadd.f32 %v6046_v27, %v6045_v58  ;;  %v6113_v13 = vpop.f32.mrf.mxu0 }
 0x1f9   : >> { %v6048_v41 = vpop.f32.mrf.mxu1  ;;  %v6114_v32 = vadd.f32 %v6113_v13, %v6112_v7 }
 0x1fa   : >> { %v2783_v20 = vadd.f32 %v6047_v62, %v8511_v49  ;;  %v6115_v60 = vpop.f32.mrf.mxu0 }
 0x1fb   : >> { %v6049_v44 = vpop.f32.mrf.mxu1 }
 0x1fc   : >> { %v8590_v45 = vadd.f32 %v6111_v24, %v2783_v20  ;;  %v6050_v31 = vadd.f32 %v6049_v44, %v6048_v41  ;;  %v6116_v10 = vpop.f32.mrf.mxu0 }
 0x1fd   : >> { %v6051_v54 = vpop.f32.mrf.mxu1  ;;  %v6117_v43 = vadd.f32 %v6116_v10, %v6115_v60 }
 0x1fe   : >> { %v2784_v29 = vadd.f32 %v6050_v31, %v8524_v53  ;;  %v6118_v30 = vpop.f32.mrf.mxu0 }
 0x1ff   : >> { %v6052_v36 = vpop.f32.mrf.mxu1 }
 0x200   : >> { %v8593_v40 = vadd.f32 %v6114_v32, %v2784_v29  ;;  %v6053_v15 = vadd.f32 %v6052_v36, %v6051_v54  ;;  %v6119_v18 = vpop.f32.mrf.mxu0 }
 0x201   : >> { %v6054_v35 = vpop.f32.mrf.mxu1  ;;  %v6120_v51 = vadd.f32 %v6119_v18, %v6118_v30 }
 0x202   : >> { %v2785_v49 = vadd.f32 %v6053_v15, %v8537_v39  ;;  %v6121_v26 = vpop.f32.mrf.mxu0 }
 0x203   : >> { %v6055_v47 = vpop.f32.mrf.mxu1 }
 0x204   : >> { %v8596_v2 = vadd.f32 %v6117_v43, %v2785_v49  ;;  %v6056_v4 = vadd.f32 %v6055_v47, %v6054_v35  ;;  %v6122_v6 = vpop.f32.mrf.mxu0 }
 0x205   : >> { %v6057_v16 = vpop.f32.mrf.mxu1  ;;  %v6123_v34 = vadd.f32 %v6122_v6, %v6121_v26 }
 0x206   : >> { %v2786_v53 = vadd.f32 %v6056_v4, %v8542_v55  ;;  %v6124_v59 = vpop.f32.mrf.mxu0 }
 0x207   : >> { %v6058_v50 = vpop.f32.mrf.mxu1 }
 0x208   : >> { %v8599_v61 = vadd.f32 %v6120_v51, %v2786_v53  ;;  %v6059_v38 = vadd.f32 %v6058_v50, %v6057_v16  ;;  %v6125_v57 = vpop.f32.mrf.mxu0 }
 0x209   : >> { %v6060_v11 = vpop.f32.mrf.mxu1  ;;  %v6126_v9 = vadd.f32 %v6125_v57, %v6124_v59 }
 0x20a   : >> { %v2787_v39 = vadd.f32 %v6059_v38, %v8554_v42  ;;  %v6127_v19 = vpop.f32.mrf.mxu0 }
 0x20b   : >> { %v6061_v23 = vpop.f32.mrf.mxu1 }
 0x20c   : >> { %v8602_v12 = vadd.f32 %v6123_v34, %v2787_v39  ;;  %v6062_v17 = vadd.f32 %v6061_v23, %v6060_v11  ;;  %v6128_v21 = vpop.f32.mrf.mxu0 }
 0x20d   : >> { %v6063_v56 = vpop.f32.mrf.mxu1  ;;  %v6129_v63 = vadd.f32 %v6128_v21, %v6127_v19 }
 0x20e   : >> { %8893 = vst [vmem:[#allocation3_spill] sm:$0xff] %v8602_v12  ;;  %v2788_v55 = vadd.f32 %v6062_v17, %v8557_v5  ;;  %v6130_v58 = vpop.f32.mrf.mxu0 }
 0x20f   : >> { %v6064_v24 = vpop.f32.mrf.mxu1 }
 0x210   : >> { %v8605_v14 = vadd.f32 %v6126_v9, %v2788_v55  ;;  %v6065_v7 = vadd.f32 %v6064_v24, %v6063_v56  ;;  %v6131_v27 = vpop.f32.mrf.mxu0 }
 0x211   : >> { %v6066_v62 = vpop.f32.mrf.mxu1  ;;  %v6132_v13 = vadd.f32 %v6131_v27, %v6130_v58 }
 0x212   : >> { %8894 = vst [vmem:[#allocation4_spill] sm:$0xff] %v8605_v14  ;;  %v2789_v42 = vadd.f32 %v6065_v7, %v8560_v46  ;;  %v6133_v41 = vpop.f32.mrf.mxu0 }
 0x213   : >> { %v6067_v32 = vpop.f32.mrf.mxu1 }
 0x214   : >> { %v8608_v20 = vadd.f32 %v6129_v63, %v2789_v42  ;;  %v6068_v60 = vadd.f32 %v6067_v32, %v6066_v62  ;;  %v6134_v44 = vpop.f32.mrf.mxu0 }
 0x215   : >> { %v6069_v31 = vpop.f32.mrf.mxu1  ;;  %v6135_v10 = vadd.f32 %v6134_v44, %v6133_v41 }
 0x216   : >> { %8895 = vst [vmem:[#allocation5_spill] sm:$0xff] %v8608_v20  ;;  %v2790_v5 = vadd.f32 %v6068_v60, %v8563_v25  ;;  %v6136_v54 = vpop.f32.mrf.mxu0 }
 0x217   : >> { %v6070_v43 = vpop.f32.mrf.mxu1 }
 0x218   : >> { %v8611_v29 = vadd.f32 %v6132_v13, %v2790_v5  ;;  %v6071_v30 = vadd.f32 %v6070_v43, %v6069_v31  ;;  %v6137_v36 = vpop.f32.mrf.mxu0 }
 0x219   : >> { %v6072_v15 = vpop.f32.mrf.mxu1  ;;  %v6138_v18 = vadd.f32 %v6137_v36, %v6136_v54 }
 0x21a   : >> { %8896 = vst [vmem:[#allocation6_spill] sm:$0xff] %v8611_v29  ;;  %v2791_v46 = vadd.f32 %v6071_v30, %v8566_v3  ;;  %v6139_v35 = vpop.f32.mrf.mxu0 }
 0x21b   : >> { %v6073_v51 = vpop.f32.mrf.mxu1 }
 0x21c   : >> { %v8614_v49 = vadd.f32 %v6135_v10, %v2791_v46  ;;  %v6074_v26 = vadd.f32 %v6073_v51, %v6072_v15  ;;  %v6140_v47 = vpop.f32.mrf.mxu0 }
 0x21d   : >> { %v6075_v4 = vpop.f32.mrf.mxu1  ;;  %v6141_v6 = vadd.f32 %v6140_v47, %v6139_v35 }
 0x21e   : >> { %8897 = vst [vmem:[#allocation7_spill] sm:$0xff] %v8614_v49  ;;  %v2792_v25 = vadd.f32 %v6074_v26, %v8569_v52  ;;  %v8617_v16 = vpop.f32.mrf.mxu0 }
 0x21f   : >> { %v6076_v34 = vpop.f32.mrf.mxu1 }
 0x220   : >> { %v8619_v53 = vadd.f32 %v6138_v18, %v2792_v25  ;;  %v6077_v59 = vadd.f32 %v6076_v34, %v6075_v4  ;;  %v8621_v50 = vpop.f32.mrf.mxu0 }
 0x221   : >> { %v6158_v38 = vpop.f32.mrf.mxu1 }
 0x222   : >> { %8898 = vst [vmem:[#allocation8_spill] sm:$0xff] %v8619_v53  ;;  %v2793_v3 = vadd.f32 %v6077_v59, %v8572_v48  ;;  %v8624_v57 = vpop.f32.mrf.mxu0 }
 0x223   : >> { %v6159_v11 = vpop.f32.mrf.mxu1 }
 0x224   : >> { %v8626_v9 = vadd.f32 %v6141_v6, %v2793_v3  ;;  %v8628_v39 = vpop.f32.mrf.mxu0 }
 0x225   : >> { %v6161_v19 = vpop.f32.mrf.mxu1 }
 0x226   : >> { %8899 = vst [vmem:[#allocation9_spill] sm:$0xff] %v8626_v9  ;;  %v8630_v52 = vpop.f32.mrf.mxu0 }
 0x227   : >> { %v6162_v23 = vpop.f32.mrf.mxu1 }
 0x228   : >> { %v8632_v17 = vpop.f32.mrf.mxu0 }
 0x229   : >> { %v6164_v21 = vpop.f32.mrf.mxu1 }
 0x22a   : >> { %v8634_v56 = vpop.f32.mrf.mxu0 }
 0x22b   : >> { %v6165_v63 = vpop.f32.mrf.mxu1 }
 0x22c   : >> { %v8636_v55 = vpop.f32.mrf.mxu0 }
 0x22d   : >> { %v8638_v48 = vpop.f32.mrf.mxu1 }
 0x22e   : >> { %v8640_v58 = vpop.f32.mrf.mxu0 }
 0x22f   : >> { %v8642_v24 = vpop.f32.mrf.mxu1 }
 0x230   : >> { %v8644_v7 = vpop.f32.mrf.mxu0 }
 0x231   : >> { %v8646_v27 = vpop.f32.mrf.mxu1 }
 0x232   : >> { %v8648_v62 = vpop.f32.mrf.mxu0 }
 0x233   : >> { %v8650_v13 = vpop.f32.mrf.mxu1 }
 0x234   : >> { %v8652_v42 = vpop.f32.mrf.mxu0 }
 0x235   : >> { %v8654_v41 = vpop.f32.mrf.mxu1 }
 0x236   : >> { %v8656_v32 = vpop.f32.mrf.mxu0 }
 0x237   : >> { %v8658_v60 = vpop.f32.mrf.mxu1 }
 0x238   : >> { %v8660_v44 = vpop.f32.mrf.mxu0 }
 0x239   : >> { %v8662_v31 = vpop.f32.mrf.mxu1 }
 0x23a   : >> { %v8664_v10 = vpop.f32.mrf.mxu0 }
 0x23b   : >> { %v8666_v5 = vpop.f32.mrf.mxu1 }
 0x23c   : >> { %v8668_v54 = vpop.f32.mrf.mxu0 }
 0x23d   : >> { %v8670_v43 = vpop.f32.mrf.mxu1 }
 0x23e   : >> { %v8672_v30 = vpop.f32.mrf.mxu0 }
 0x23f   : >> { %v8674_v36 = vpop.f32.mrf.mxu1 }
 0x240   : >> { %v8676_v15 = vpop.f32.mrf.mxu0 }
 0x241   : >> { %v8678_v18 = vpop.f32.mrf.mxu1 }
 0x242   : >> { %v8680_v46 = vpop.f32.mrf.mxu0 }
 0x243   : >> { %8900 = vst [vmem:[#allocation10_spill] sm:$0xff] %v8680_v46  ;;  %v8682_v35 = vpop.f32.mrf.mxu1 }
 0x244   : >> { %v8684_v51 = vpop.f32.mrf.mxu0 }
 0x245   : >> { %8901 = vst [vmem:[#allocation11_spill] sm:$0xff] %v8684_v51  ;;  %v8686_v26 = vpop.f32.mrf.mxu1 }
 0x246   : >> { %v8688_v47 = vpop.f32.mrf.mxu0 }
 0x247   : >> { %8902 = vst [vmem:[#allocation12_spill] sm:$0xff] %v8688_v47  ;;  %v8690_v4 = vpop.f32.mrf.mxu1 }
 0x248   : >> { %v8692_v6 = vpop.f32.mrf.mxu0 }
 0x249   : >> { %8903 = vst [vmem:[#allocation13_spill] sm:$0xff] %v8692_v6  ;;  %v8694_v25 = vpop.f32.mrf.mxu1 }
 0x24a   : >> { %8904 = vst [vmem:[#allocation14_spill] sm:$0xff] %v8694_v25  ;;  %v8696_v34 = vpop.f32.mrf.mxu0 }
 0x24b   : >> { %8905 = vst [vmem:[#allocation15_spill] sm:$0xff] %v8696_v34  ;;  %v8698_v59 = vpop.f32.mrf.mxu1 }
 0x24c   : >> { %8906 = vst [vmem:[#allocation16_spill] sm:$0xff] %v8698_v59  ;;  %v8700_v3 = vpop.f32.mrf.mxu0 }
 0x24d   : >> { %8907 = vst [vmem:[#allocation17_spill] sm:$0xff] %v8700_v3  ;;  %v8702_v9 = vpop.f32.mrf.mxu1 }
 0x24e   : >> { %8908 = vst [vmem:[#allocation18_spill] sm:$0xff] %v8702_v9  ;;  %v8704_v53 = vpop.f32.mrf.mxu0 }
 0x24f   : >> { %8909 = vst [vmem:[#allocation19_spill] sm:$0xff] %v8704_v53  ;;  %v8706_v49 = vpop.f32.mrf.mxu1 }
 0x250   : >> { %8910 = vst [vmem:[#allocation20_spill] sm:$0xff] %v8706_v49  ;;  %v8708_v29 = vpop.f32.mrf.mxu0 }
 0x251   : >> { %8911 = vst [vmem:[#allocation21_spill] sm:$0xff] %v8708_v29  ;;  %v8710_v20 = vpop.f32.mrf.mxu1 }
 0x252   : >> { %8912 = vst [vmem:[#allocation22_spill] sm:$0xff] %v8710_v20  ;;  %v8712_v47 = vpop.f32.mrf.mxu0  ;;  %v6160_v20 = vadd.f32 %v6159_v11, %v6158_v38 }
 0x253   : >> { %8913 = vst [vmem:[#allocation23_spill] sm:$0xff] %v8712_v47  ;;  %v8714_v6 = vpop.f32.mrf.mxu1 }
 0x254   : >> { %8914 = vst [vmem:[#allocation24_spill] sm:$0xff] %v8714_v6  ;;  %v8716_v14 = vpop.f32.mrf.mxu0 }
 0x255   : >> { %8915 = vst [vmem:[#allocation25_spill] sm:$0xff] %v8716_v14  ;;  %v8718_v34 = vpop.f32.mrf.mxu1 }
 0x256   : >> { %8916 = vst [vmem:[#allocation26_spill] sm:$0xff] %v8718_v34  ;;  %v8720_v51 = vpop.f32.mrf.mxu0  ;;  %v6163_v34 = vadd.f32 %v6162_v23, %v6161_v19 }
 0x257   : >> { %8917 = vst [vmem:[#allocation27_spill] sm:$0xff] %v8720_v51  ;;  %v8722_v3 = vpop.f32.mrf.mxu1  ;;  %v3694_v51 = vadd.f32 %v6160_v20, %v8575_v37 }
 0x258   : >> { %8918 = vst [vmem:[#allocation28_spill] sm:$0xff] %v8722_v3  ;;  %v8724_v9 = vpop.f32.mrf.mxu0  ;;  %v3695_v38 = vadd.f32 %v6163_v34, %v8578_v28 }
 0x259   : >> { %8919 = vst [vmem:[#allocation29_spill] sm:$0xff] %v8724_v9  ;;  %v8726_v53 = vpop.f32.mrf.mxu1  ;;  %v6224_v9 = vadd.f32 %v8621_v50, %v8617_v16  ;;  %v6169_v50 = vadd.f32 %v8642_v24, %v8638_v48 }
 0x25a   : >> { %8920 = vst [vmem:[#allocation30_spill] sm:$0xff] %v8726_v53  ;;  %v8728_v49 = vpop.f32.mrf.mxu0 }
 0x25b   : >> { %8921 = vst [vmem:[#allocation31_spill] sm:$0xff] %v8728_v49  ;;  %v8730_v29 = vpop.f32.mrf.mxu1  ;;  %v6166_v49 = vadd.f32 %v6165_v63, %v6164_v21  ;;  %v3697_v48 = vadd.f32 %v6169_v50, %v8584_v33 }
 0x25c   : >> { %8922 = vst [vmem:[#allocation32_spill] sm:$0xff] %v8730_v29  ;;  %v8732_v47 = vpop.f32.mrf.mxu0  ;;  %v4036_v29 = vadd.f32 %v6224_v9, %v3694_v51 }
 0x25d   : >> { %8923 = vst [vmem:[#allocation33_spill] sm:$0xff] %v8732_v47  ;;  %v8734_v6 = vpop.f32.mrf.mxu1  ;;  %v3696_v23 = vadd.f32 %v6166_v49, %v8581_v22  ;;  %v6172_v49 = vadd.f32 %v8650_v13, %v8646_v27 }
 0x25e   : >> { %8924 = vst [vmem:[#allocation34_spill] sm:$0xff] %v8734_v6  ;;  %v6350_v14 = vpop.f32.mrf.mxu0 }
 0x25f   : >> { %v8736_v46 = vpop.f32.mrf.mxu1  ;;  %v3698_v33 = vadd.f32 %v6172_v49, %v8587_v8 }
 0x260   : >> { %8925 = vst [vmem:[#allocation35_spill] sm:$0xff] %v8736_v46  ;;  %v6351_v3 = vpop.f32.mrf.mxu0  ;;  %v6227_v46 = vadd.f32 %v8628_v39, %v8624_v57 }
 0x261   : >> { %v6286_v12 = vpop.f32.mrf.mxu1  ;;  %v6352_v20 = vadd.f32 %v6351_v3, %v6350_v14 }
 0x262   : >> { %v6353_v53 = vpop.f32.mrf.mxu0  ;;  %v4037_v16 = vadd.f32 %v6227_v46, %v3695_v38 }
 0x263   : >> { %v6287_v59 = vpop.f32.mrf.mxu1 }
 0x264   : >> { %v6288_v11 = vadd.f32 %v6287_v59, %v6286_v12  ;;  %v6354_v47 = vpop.f32.mrf.mxu0  ;;  %v6230_v12 = vadd.f32 %v8632_v17, %v8630_v52  ;;  %v6233_v17 = vadd.f32 %v8636_v55, %v8634_v56  ;;  %v6175_v59 = vadd.f32 %v8658_v60, %v8654_v41 }
 0x265   : >> { %v6289_v6 = vpop.f32.mrf.mxu1 }
 0x266   : >> { %v4558_v37 = vadd.f32 %v6288_v11, %v4036_v29  ;;  %v6356_v19 = vpop.f32.mrf.mxu0  ;;  %v6355_v29 = vadd.f32 %v6354_v47, %v6353_v53  ;;  %v4038_v22 = vadd.f32 %v6230_v12, %v3696_v23  ;;  %v4039_v38 = vadd.f32 %v6233_v17, %v3697_v48 }
 0x267   : >> { %v6290_v25 = vpop.f32.mrf.mxu1  ;;  %v3699_v60 = vadd.f32 %v6175_v59, %v8590_v45  ;;  %v6245_v59 = vadd.f32 %v8668_v54, %v8664_v10 }
 0x268   : >> { %v4952_v9 = vadd.f32 %v6352_v20, %v4558_v37  ;;  %v6291_v21 = vadd.f32 %v6290_v25, %v6289_v6  ;;  %v6357_v28 = vpop.f32.mrf.mxu0  ;;  %v6236_v20 = vadd.f32 %v8644_v7, %v8640_v58 }
 0x269   : >> { %v6292_v63 = vpop.f32.mrf.mxu1  ;;  %v6358_v27 = vadd.f32 %v6357_v28, %v6356_v19  ;;  %v6178_v28 = vadd.f32 %v8666_v5, %v8662_v31  ;;  %v6181_v31 = vadd.f32 %v8674_v36, %v8670_v43 }
 0x26a   : >> { %v4974_v57 = vmul.f32 %v6665_v0, %v4952_v9  ;;  %v4559_v14 = vadd.f32 %v6291_v21, %v4037_v16  ;;  %v6359_v39 = vpop.f32.mrf.mxu0  ;;  %v4040_v41 = vadd.f32 %v6236_v20, %v3698_v33  ;;  %v6187_v20 = vadd.f32 %v8690_v4, %v8686_v26  ;;  %v8927_v26 = vld [vmem:[#allocation16_spill] sm:$0xff] }
 0x26b   : >> { %v6293_v46 = vpop.f32.mrf.mxu1  ;;  %v3700_v48 = vadd.f32 %v6178_v28, %v8593_v40  ;;  %v3701_v36 = vadd.f32 %v6181_v31, %v8596_v2  ;;  %v6184_v40 = vadd.f32 %v8682_v35, %v8678_v18  ;;  %v8926_v28 = vld [vmem:[#allocation14_spill] sm:$0xff] }
 0x26c   : >> { %v4996_v24 = vadd.f32 %v6670_v1, %v4974_v57  ;;  %v4953_v51 = vadd.f32 %v6355_v29, %v4559_v14  ;;  %v6294_v6 = vadd.f32 %v6293_v46, %v6292_v63  ;;  %v6360_v52 = vpop.f32.mrf.mxu0  ;;  %v6239_v57 = vadd.f32 %v8652_v42, %v8648_v62 }
 0x26d   : >> { %v6295_v53 = vpop.f32.mrf.mxu1  ;;  %v6361_v50 = vadd.f32 %v6360_v52, %v6359_v39  ;;  %v4043_v18 = vadd.f32 %v6245_v59, %v3701_v36  ;;  %v3702_v35 = vadd.f32 %v6184_v40, %v8599_v61  ;;  %v6190_v4 = vadd.f32 %v8927_v26, %v8926_v28  ;;  %v8935_v36 = vld [vmem:[#allocation13_spill] sm:$0xff] }
 0x26e   : >> { %v5012_v47 = vmax.f32 %v4996_v24, 0.0  ;;  %v4975_v25 = vmul.f32 %v6665_v0, %v4953_v51  ;;  %v4560_v34 = vadd.f32 %v6294_v6, %v4038_v22  ;;  %v6362_v13 = vpop.f32.mrf.mxu0  ;;  %v4041_v46 = vadd.f32 %v6239_v57, %v3699_v60 }
 0x26f   : >> { %v6296_v3 = vpop.f32.mrf.mxu1  ;;  %v6242_v6 = vadd.f32 %v8660_v44, %v8656_v32 }
 0x270   : >> { %5030 = vst [vmem:[%s8758_s29] sm:$0xff] %v5012_v47  ;;  %v4997_v56 = vadd.f32 %v6670_v1, %v4975_v25  ;;  %v4954_v55 = vadd.f32 %v6358_v27, %v4560_v34  ;;  %v6297_v11 = vadd.f32 %v6296_v3, %v6295_v53  ;;  %v6363_v37 = vpop.f32.mrf.mxu0 }
 0x271   : >> { %v6298_v23 = vpop.f32.mrf.mxu1  ;;  %v6364_v45 = vadd.f32 %v6363_v37, %v6362_v13  ;;  %v4042_v27 = vadd.f32 %v6242_v6, %v3700_v48  ;;  %v8931_v48 = vld [vmem:[#allocation4_spill] sm:$0xff] }
 0x272   : >> { %v5013_v19 = vmax.f32 %v4997_v56, 0.0  ;;  %v4976_v16 = vmul.f32 %v6665_v0, %v4954_v55  ;;  %v4561_v8 = vadd.f32 %v6297_v11, %v4039_v38  ;;  %v6365_v9 = vpop.f32.mrf.mxu0 }
 0x273   : >> { %v6299_v21 = vpop.f32.mrf.mxu1 }
 0x274   : >> { %5031 = vst [vmem:[%s8758_s29 + $0x8] sm:$0xff] %v5013_v19  ;;  %v4998_v12 = vadd.f32 %v6670_v1, %v4976_v16  ;;  %v4955_v63 = vadd.f32 %v6361_v50, %v4561_v8  ;;  %v6300_v58 = vadd.f32 %v6299_v21, %v6298_v23  ;;  %v6366_v7 = vpop.f32.mrf.mxu0  ;;  %v6248_v16 = vadd.f32 %v8676_v15, %v8672_v30 }
 0x275   : >> { %v6301_v14 = vpop.f32.mrf.mxu1  ;;  %v6367_v25 = vadd.f32 %v6366_v7, %v6365_v9 }
 0x276   : >> { %v5014_v29 = vmax.f32 %v4998_v12, 0.0  ;;  %v4977_v39 = vmul.f32 %v6665_v0, %v4955_v63  ;;  %v4562_v22 = vadd.f32 %v6300_v58, %v4040_v41  ;;  %v6368_v49 = vpop.f32.mrf.mxu0  ;;  %v4044_v21 = vadd.f32 %v6248_v16, %v3702_v35  ;;  %v8928_v63 = vld [vmem:[#allocation3_spill] sm:$0xff] }
 0x277   : >> { %v6302_v5 = vpop.f32.mrf.mxu1  ;;  %v3703_v58 = vadd.f32 %v6187_v20, %v8928_v63 }
 0x278   : >> { %5032 = vst [vmem:[%s8758_s29 + $0x10] sm:$0xff] %v5014_v29  ;;  %v4999_v24 = vadd.f32 %v6670_v1, %v4977_v39  ;;  %v4956_v51 = vadd.f32 %v6364_v45, %v4562_v22  ;;  %v6303_v62 = vadd.f32 %v6302_v5, %v6301_v14  ;;  %v6369_v42 = vpop.f32.mrf.mxu0  ;;  %v8929_v14 = vld [vmem:[#allocation10_spill] sm:$0xff]  ;;  %v8930_v29 = vld [vmem:[#allocation11_spill] sm:$0xff] }
 0x279   : >> { %v6304_v52 = vpop.f32.mrf.mxu1  ;;  %v6370_v55 = vadd.f32 %v6369_v42, %v6368_v49  ;;  %v6251_v39 = vadd.f32 %v8930_v29, %v8929_v14 }
 0x27a   : >> { %v5015_v17 = vmax.f32 %v4999_v24, 0.0  ;;  %v4978_v53 = vmul.f32 %v6665_v0, %v4956_v51  ;;  %v4563_v47 = vadd.f32 %v6303_v62, %v4041_v46  ;;  %v6371_v43 = vpop.f32.mrf.mxu0  ;;  %v3704_v24 = vadd.f32 %v6190_v4, %v8931_v48  ;;  %v8932_v51 = vld [vmem:[#allocation18_spill] sm:$0xff]  ;;  %v8933_v62 = vld [vmem:[#allocation20_spill] sm:$0xff] }
 0x27b   : >> { %v6305_v34 = vpop.f32.mrf.mxu1  ;;  %v6193_v42 = vadd.f32 %v8933_v62, %v8932_v51  ;;  %v8943_v4 = vld [vmem:[#allocation6_spill] sm:$0xff] }
 0x27c   : >> { %5033 = vst [vmem:[%s8758_s29 + $0x18] sm:$0xff] %v5015_v17  ;;  %v5000_v13 = vadd.f32 %v6670_v1, %v4978_v53  ;;  %v4957_v33 = vadd.f32 %v6367_v25, %v4563_v47  ;;  %v6306_v32 = vadd.f32 %v6305_v34, %v6304_v52  ;;  %v6372_v44 = vpop.f32.mrf.mxu0  ;;  %v4045_v52 = vadd.f32 %v6251_v39, %v3703_v58  ;;  %v8947_v48 = vld [vmem:[#allocation30_spill] sm:$0xff] }
 0x27d   : >> { %v6307_v3 = vpop.f32.mrf.mxu1  ;;  %v6373_v61 = vadd.f32 %v6372_v44, %v6371_v43  ;;  %v8934_v43 = vld [vmem:[#allocation12_spill] sm:$0xff] }
 0x27e   : >> { %v5016_v38 = vmax.f32 %v5000_v13, 0.0  ;;  %v4979_v56 = vmul.f32 %v6665_v0, %v4957_v33  ;;  %v4564_v2 = vadd.f32 %v6306_v32, %v4042_v27  ;;  %v6374_v11 = vpop.f32.mrf.mxu0  ;;  %v6254_v40 = vadd.f32 %v8935_v36, %v8934_v43 }
 0x27f   : >> { %v6308_v37 = vpop.f32.mrf.mxu1 }
 0x280   : >> { %5034 = vst [vmem:[%s8758_s29 + $0x20] sm:$0xff] %v5016_v38  ;;  %v5001_v23 = vadd.f32 %v6670_v1, %v4979_v56  ;;  %v4958_v19 = vadd.f32 %v6370_v55, %v4564_v2  ;;  %v6309_v10 = vadd.f32 %v6308_v37, %v6307_v3  ;;  %v6375_v54 = vpop.f32.mrf.mxu0  ;;  %v4046_v59 = vadd.f32 %v6254_v40, %v3704_v24  ;;  %v8936_v3 = vld [vmem:[#allocation5_spill] sm:$0xff]  ;;  %v8937_v2 = vld [vmem:[#allocation22_spill] sm:$0xff]  ;;  %v8938_v55 = vld [vmem:[#allocation24_spill] sm:$0xff] }
 0x281   : >> { %v6310_v8 = vpop.f32.mrf.mxu1  ;;  %v6376_v31 = vadd.f32 %v6375_v54, %v6374_v11  ;;  %v3705_v38 = vadd.f32 %v6193_v42, %v8936_v3  ;;  %v6196_v11 = vadd.f32 %v8938_v55, %v8937_v2  ;;  %v8948_v24 = vld [vmem:[#allocation32_spill] sm:$0xff] }
 0x282   : >> { %v5017_v50 = vmax.f32 %v5001_v23, 0.0  ;;  %v4980_v9 = vmul.f32 %v6665_v0, %v4958_v19  ;;  %v4565_v41 = vadd.f32 %v6309_v10, %v4043_v18  ;;  %v6377_v60 = vpop.f32.mrf.mxu0  ;;  %v8939_v23 = vld [vmem:[#allocation15_spill] sm:$0xff]  ;;  %v8940_v19 = vld [vmem:[#allocation17_spill] sm:$0xff]  ;;  %v6202_v51 = vadd.f32 %v8948_v24, %v8947_v48 }
 0x283   : >> { %v6311_v12 = vpop.f32.mrf.mxu1  ;;  %v6257_v10 = vadd.f32 %v8940_v19, %v8939_v23 }
 0x284   : >> { %5035 = vst [vmem:[%s8758_s29 + $0x28] sm:$0xff] %v5017_v50  ;;  %v5002_v7 = vadd.f32 %v6670_v1, %v4980_v9  ;;  %v4959_v57 = vadd.f32 %v6373_v61, %v4565_v41  ;;  %v6312_v30 = vadd.f32 %v6311_v12, %v6310_v8  ;;  %v6378_v15 = vpop.f32.mrf.mxu0  ;;  %v3706_v12 = vadd.f32 %v6196_v11, %v8943_v4  ;;  %v8957_v4 = vld [vmem:[#allocation31_spill] sm:$0xff] }
 0x285   : >> { %v6313_v22 = vpop.f32.mrf.mxu1  ;;  %v6379_v32 = vadd.f32 %v6378_v15, %v6377_v60  ;;  %v4047_v61 = vadd.f32 %v6257_v10, %v3705_v38  ;;  %v8941_v60 = vld [vmem:[#allocation26_spill] sm:$0xff]  ;;  %v8945_v15 = vld [vmem:[#allocation21_spill] sm:$0xff] }
 0x286   : >> { %v5018_v45 = vmax.f32 %v5002_v7, 0.0  ;;  %v4981_v49 = vmul.f32 %v6665_v0, %v4959_v57  ;;  %v4566_v46 = vadd.f32 %v6312_v30, %v4044_v21  ;;  %v6380_v5 = vpop.f32.mrf.mxu0  ;;  %v8942_v21 = vld [vmem:[#allocation28_spill] sm:$0xff]  ;;  %v8944_v30 = vld [vmem:[#allocation19_spill] sm:$0xff]  ;;  %v8952_v38 = vld [vmem:[#allocation34_spill] sm:$0xff] }
 0x287   : >> { %v6314_v6 = vpop.f32.mrf.mxu1  ;;  %v6199_v28 = vadd.f32 %v8942_v21, %v8941_v60  ;;  %v6260_v14 = vadd.f32 %v8945_v15, %v8944_v30 }
 0x288   : >> { %5036 = vst [vmem:[%s8758_s29 + $0x30] sm:$0xff] %v5018_v45  ;;  %v5003_v17 = vadd.f32 %v6670_v1, %v4981_v49  ;;  %v4960_v53 = vadd.f32 %v6376_v31, %v4566_v46  ;;  %v6315_v47 = vadd.f32 %v6314_v6, %v6313_v22  ;;  %v6381_v25 = vpop.f32.mrf.mxu0  ;;  %v8946_v31 = vld [vmem:[#allocation7_spill] sm:$0xff] }
 0x289   : >> { %v6316_v34 = vpop.f32.mrf.mxu1  ;;  %v6382_v9 = vadd.f32 %v6381_v25, %v6380_v5  ;;  %v3707_v5 = vadd.f32 %v6199_v28, %v8946_v31  ;;  %v4048_v42 = vadd.f32 %v6260_v14, %v3706_v12  ;;  %v8950_v25 = vld [vmem:[#allocation25_spill] sm:$0xff] }
 0x28a   : >> { %v5019_v27 = vmax.f32 %v5003_v17, 0.0  ;;  %v4982_v13 = vmul.f32 %v6665_v0, %v4960_v53  ;;  %v4567_v33 = vadd.f32 %v6315_v47, %v4045_v52  ;;  %v6383_v44 = vpop.f32.mrf.mxu0  ;;  %v8949_v47 = vld [vmem:[#allocation23_spill] sm:$0xff]  ;;  %v8958_v12 = vld [vmem:[#allocation33_spill] sm:$0xff] }
 0x28b   : >> { %v6317_v56 = vpop.f32.mrf.mxu1  ;;  %v6263_v43 = vadd.f32 %v8950_v25, %v8949_v47 }
 0x28c   : >> { %5037 = vst [vmem:[%s8758_s29 + $0x38] sm:$0xff] %v5019_v27  ;;  %v5004_v18 = vadd.f32 %v6670_v1, %v4982_v13  ;;  %v4961_v35 = vadd.f32 %v6379_v32, %v4567_v33  ;;  %v6318_v37 = vadd.f32 %v6317_v56, %v6316_v34  ;;  %v6384_v20 = vpop.f32.mrf.mxu0  ;;  %v8953_v56 = vld [vmem:[#allocation35_spill] sm:$0xff] }
 0x28d   : >> { %v6319_v54 = vpop.f32.mrf.mxu1  ;;  %v6385_v49 = vadd.f32 %v6384_v20, %v6383_v44  ;;  %v4049_v32 = vadd.f32 %v6263_v43, %v3707_v5  ;;  %v8951_v44 = vld [vmem:[#allocation8_spill] sm:$0xff]  ;;  %v6205_v2 = vadd.f32 %v8953_v56, %v8952_v38  ;;  %v8955_v20 = vld [vmem:[#allocation29_spill] sm:$0xff] }
 0x28e   : >> { %v5020_v16 = vmax.f32 %v5004_v18, 0.0  ;;  %v4983_v8 = vmul.f32 %v6665_v0, %v4961_v35  ;;  %v4568_v50 = vadd.f32 %v6318_v37, %v4046_v59  ;;  %v6386_v41 = vpop.f32.mrf.mxu0  ;;  %v3708_v59 = vadd.f32 %v6202_v51, %v8951_v44  ;;  %v8954_v37 = vld [vmem:[#allocation27_spill] sm:$0xff] }
 0x28f   : >> { %v6320_v26 = vpop.f32.mrf.mxu1  ;;  %v6266_v23 = vadd.f32 %v8955_v20, %v8954_v37 }
 0x290   : >> { %5038 = vst [vmem:[%s8758_s29 + $0x40] sm:$0xff] %v5020_v16  ;;  %v5005_v63 = vadd.f32 %v6670_v1, %v4983_v8  ;;  %v4962_v58 = vadd.f32 %v6382_v9, %v4568_v50  ;;  %v6321_v7 = vadd.f32 %v6320_v26, %v6319_v54  ;;  %v6387_v57 = vpop.f32.mrf.mxu0 }
 0x291   : >> { %v6322_v29 = vpop.f32.mrf.mxu1  ;;  %v6388_v13 = vadd.f32 %v6387_v57, %v6386_v41  ;;  %v4050_v50 = vadd.f32 %v6266_v23, %v3708_v59 }
 0x292   : >> { %v5021_v39 = vmax.f32 %v5005_v63, 0.0  ;;  %v4984_v22 = vmul.f32 %v6665_v0, %v4962_v58  ;;  %v4569_v45 = vadd.f32 %v6321_v7, %v4047_v61  ;;  %v6389_v46 = vpop.f32.mrf.mxu0  ;;  %v8956_v61 = vld [vmem:[#allocation9_spill] sm:$0xff]  ;;  %v6269_v63 = vadd.f32 %v8958_v12, %v8957_v4 }
 0x293   : >> { %v6323_v62 = vpop.f32.mrf.mxu1  ;;  %v3709_v60 = vadd.f32 %v6205_v2, %v8956_v61 }
 0x294   : >> { %5039 = vst [vmem:[%s8758_s29 + $0x48] sm:$0xff] %v5021_v39  ;;  %v5006_v6 = vadd.f32 %v6670_v1, %v4984_v22  ;;  %v4963_v52 = vadd.f32 %v6385_v49, %v4569_v45  ;;  %v6324_v17 = vadd.f32 %v6323_v62, %v6322_v29  ;;  %v6390_v53 = vpop.f32.mrf.mxu0 }
 0x295   : >> { %v6325_v36 = vpop.f32.mrf.mxu1  ;;  %v6391_v8 = vadd.f32 %v6390_v53, %v6389_v46  ;;  %v4051_v39 = vadd.f32 %v6269_v63, %v3709_v60 }
 0x296   : >> { %v5022_v40 = vmax.f32 %v5006_v6, 0.0  ;;  %v4985_v34 = vmul.f32 %v6665_v0, %v4963_v52  ;;  %v4570_v27 = vadd.f32 %v6324_v17, %v4048_v42  ;;  %v6392_v33 = vpop.f32.mrf.mxu0 }
 0x297   : >> { %v6326_v3 = vpop.f32.mrf.mxu1 }
 0x298   : >> { %5040 = vst [vmem:[%s8758_s29 + $0x50] sm:$0xff] %v5022_v40  ;;  %v5007_v55 = vadd.f32 %v6670_v1, %v4985_v34  ;;  %v4964_v11 = vadd.f32 %v6388_v13, %v4570_v27  ;;  %v6327_v18 = vadd.f32 %v6326_v3, %v6325_v36  ;;  %v6393_v35 = vpop.f32.mrf.mxu0 }
 0x299   : >> { %v6328_v19 = vpop.f32.mrf.mxu1  ;;  %v6394_v15 = vadd.f32 %v6393_v35, %v6392_v33 }
 0x29a   : >> { %v5023_v10 = vmax.f32 %v5007_v55, 0.0  ;;  %v4986_v54 = vmul.f32 %v6665_v0, %v4964_v11  ;;  %v4571_v16 = vadd.f32 %v6327_v18, %v4049_v32  ;;  %v6395_v41 = vpop.f32.mrf.mxu0 }
 0x29b   : >> { %v6329_v9 = vpop.f32.mrf.mxu1 }
 0x29c   : >> { %5041 = vst [vmem:[%s8758_s29 + $0x58] sm:$0xff] %v5023_v10  ;;  %v5008_v21 = vadd.f32 %v6670_v1, %v4986_v54  ;;  %v4965_v28 = vadd.f32 %v6391_v8, %v4571_v16  ;;  %v6330_v26 = vadd.f32 %v6329_v9, %v6328_v19  ;;  %v6396_v29 = vpop.f32.mrf.mxu0 }
 0x29d   : >> { %v6331_v58 = vpop.f32.mrf.mxu1  ;;  %v6397_v48 = vadd.f32 %v6396_v29, %v6395_v41 }
 0x29e   : >> { %v5024_v7 = vmax.f32 %v5008_v21, 0.0  ;;  %v4987_v57 = vmul.f32 %v6665_v0, %v4965_v28  ;;  %v4572_v30 = vadd.f32 %v6330_v26, %v4050_v50 }
 0x29f   : >> { %v6332_v14 = vpop.f32.mrf.mxu1 }
 0x2a0   : >> { %5042 = vst [vmem:[%s8758_s29 + $0x60] sm:$0xff] %v5024_v7  ;;  %v5009_v22 = vadd.f32 %v6670_v1, %v4987_v57  ;;  %v4966_v45 = vadd.f32 %v6394_v15, %v4572_v30  ;;  %v6333_v49 = vadd.f32 %v6332_v14, %v6331_v58 }
 0x2a2   : >> { %v5025_v46 = vmax.f32 %v5009_v22, 0.0  ;;  %v4988_v31 = vmul.f32 %v6665_v0, %v4966_v45  ;;  %v4573_v5 = vadd.f32 %v6333_v49, %v4051_v39 }
 0x2a4   : >> { %5043 = vst [vmem:[%s8758_s29 + $0x68] sm:$0xff] %v5025_v46  ;;  %v5010_v24 = vadd.f32 %v6670_v1, %v4988_v31  ;;  %v4967_v51 = vadd.f32 %v6397_v48, %v4573_v5 }
 0x2a6   : >> { %v5026_v62 = vmax.f32 %v5010_v24, 0.0  ;;  %v4989_v42 = vmul.f32 %v6665_v0, %v4967_v51 }
 0x2a8   : >> { %5044 = vst [vmem:[%s8758_s29 + $0x70] sm:$0xff] %v5026_v62  ;;  %v5011_v6 = vadd.f32 %v6670_v1, %v4989_v42  ;;  %1243 = sbr.rel (!%p1241_p4) target bundleno = 152 (0x98), region = 93 }
 0x2aa   : >> { %v5027_v52 = vmax.f32 %v5011_v6, 0.0 }
 0x2ac   : >> { %5045 = vst [vmem:[%s8758_s29 + $0x78] sm:$0xff] %v5027_v52 }
 0x2ad PF: > { %s15_s18 = sadd.s32 1, %s6617_s18  }
 0x2ae   : > { %p12_p5 = scmp.ge.s32.totalorder %s15_s18, 4  }
 0x2b0   :  { %14 = sbr.rel (!%p12_p5) target bundleno = 1 (0x1), region = 104 }

</bundles_post_ra>
